<compile_context>
chip_gen: v7x
topology: tpu7x:2x2x1
jax: 0.10.0
libtpu: 0.0.40
codegen_flags: <defaults>
</compile_context>

<pallas_src>
import jax
import jax.numpy as jnp
from jax import lax
from jax.experimental import pallas as pl
from jax.experimental.pallas import tpu as pltpu


_VMEM_LIMIT = 32 * 1024 * 1024


# ----------------------------- Pallas kernels ------------------------------

def _conv12_kernel(x_ref, cop_ref, mop_ref, b_ref, o_ref):
    # Fused conv1 (Linear C->f) + conv2 (3x3, stride 2, valid), pre-composed.
    # x_ref is one image viewed as (C*H, W).  For each kw tap:
    #   y  = x2d @ C_kw        (column select, (W, W2))
    #   t  = M_kw @ y          (fused row-select + channel-mix, (f*H2, C*H))
    # so the whole stage is six 2-D MXU matmuls and x is read from HBM once.
    x2d = x_ref[...]                                                  # (C*H, W)
    acc = None
    for kw in range(3):
        y = jnp.dot(x2d, cop_ref[kw], preferred_element_type=jnp.float32)   # (C*H, W2)
        t = jnp.dot(mop_ref[kw], y, preferred_element_type=jnp.float32)     # (f*H2, W2)
        acc = t if acc is None else acc + t
    o_ref[...] = acc + b_ref[...]


def _gelu_exact(x):
    # Exact (erf) GELU.
    # TODO(synk): erf evaluated with Abramowitz-Stegun 7.1.26 (|err| < 1.5e-7,
    # below f32 resolution) because lax.erf has no Pallas/Mosaic TPU lowering.
    z = x * 0.7071067811865476
    a = jnp.abs(z)
    t = 1.0 / (1.0 + 0.3275911 * a)
    poly = t * (0.254829592 + t * (-0.284496736 + t * (1.421413741
               + t * (-1.453152027 + t * 1.061405429))))
    erf_a = 1.0 - poly * jnp.exp(-a * a)
    erf_z = jnp.where(z < 0, -erf_a, erf_a)
    return 0.5 * x * (1.0 + erf_z)


def _branch_kernel(v_ref, m1_ref, b1_ref, m2_ref, b2_ref, m3_ref, b3_ref, o_ref):
    # Fused conv_max -> GELU -> conv3 -> GELU -> conv3_ on the tiny pooled maps.
    # Pre-composed dense operators (built once at setup); batch on sublanes,
    # f*h*w features on lanes; all intermediates stay in VMEM.
    h = jnp.dot(v_ref[...], m1_ref[...], preferred_element_type=jnp.float32) + b1_ref[...]
    h = _gelu_exact(h)
    h = jnp.dot(h, m2_ref[...], preferred_element_type=jnp.float32) + b2_ref[...]
    h = _gelu_exact(h)
    o_ref[...] = jnp.dot(h, m3_ref[...], preferred_element_type=jnp.float32) + b3_ref[...]


def _tail_kernel(x_ref, up_ref, wcf_ref, bcf_ref, w4_ref, b4_ref, o_ref):
    # cf recomputed from x (pre-composed Wf@W1 — no cf HBM round trip), add the
    # upsampled c3, conv4 (Linear f->C), sigmoid, gating.  Lane-dense tiles.
    x = x_ref[...]                                                            # (C, tm)
    cf = jnp.dot(wcf_ref[...], x, preferred_element_type=jnp.float32) + bcf_ref[...]
    s = up_ref[...] + cf                                                      # (f, tm)
    c4 = jnp.dot(w4_ref[...], s, preferred_element_type=jnp.float32) + b4_ref[...]
    o_ref[...] = x * jax.nn.sigmoid(c4)


# ----------------------------- pallas_call wrappers -------------------------

def conv12(x_rows, c_ops, m_ops, bias_col):
    n, ch, w = x_rows.shape
    fh2 = m_ops.shape[1]
    w2 = c_ops.shape[2]
    return pl.pallas_call(
        _conv12_kernel,
        out_shape=jax.ShapeDtypeStruct((n, fh2, w2), jnp.float32),
        grid=(n,),
        in_specs=[pl.BlockSpec((None, ch, w), lambda i: (i, 0, 0)),
                  pl.BlockSpec((3, w, w2), lambda i: (0, 0, 0)),
                  pl.BlockSpec((3, fh2, ch), lambda i: (0, 0, 0)),
                  pl.BlockSpec((fh2, 1), lambda i: (0, 0))],
        out_specs=pl.BlockSpec((None, fh2, w2), lambda i: (i, 0, 0)),
        compiler_params=pltpu.CompilerParams(
            dimension_semantics=("parallel",),
            vmem_limit_bytes=_VMEM_LIMIT),
    )(x_rows, c_ops, m_ops, bias_col)


def branch_fused(v_flat, m1t, b1r, m2t, b2r, m3t, b3r):
    n, p_in = v_flat.shape
    p1, p2, p3 = m1t.shape[1], m2t.shape[1], m3t.shape[1]
    return pl.pallas_call(
        _branch_kernel,
        out_shape=jax.ShapeDtypeStruct((n, p3), jnp.float32),
        grid=(1,),
        in_specs=[pl.BlockSpec((n, p_in), lambda i: (0, 0)),
                  pl.BlockSpec(m1t.shape, lambda i: (0, 0)),
                  pl.BlockSpec((1, p1), lambda i: (0, 0)),
                  pl.BlockSpec(m2t.shape, lambda i: (0, 0)),
                  pl.BlockSpec((1, p2), lambda i: (0, 0)),
                  pl.BlockSpec(m3t.shape, lambda i: (0, 0)),
                  pl.BlockSpec((1, p3), lambda i: (0, 0))],
        out_specs=pl.BlockSpec((n, p3), lambda i: (0, 0)),
        compiler_params=pltpu.CompilerParams(
            dimension_semantics=("arbitrary",),
            vmem_limit_bytes=_VMEM_LIMIT),
    )(v_flat, m1t, b1r, m2t, b2r, m3t, b3r)


def tail_gate(x_pix, c3_up, wcf, bcf_col, w4, b4_col, tm):
    n, c, hw = x_pix.shape
    f = wcf.shape[0]
    return pl.pallas_call(
        _tail_kernel,
        out_shape=jax.ShapeDtypeStruct((n, c, hw), jnp.float32),
        grid=(n, hw // tm),
        in_specs=[pl.BlockSpec((None, c, tm), lambda i, j: (i, 0, j)),
                  pl.BlockSpec((None, f, tm), lambda i, j: (i, 0, j)),
                  pl.BlockSpec((f, c), lambda i, j: (0, 0)),
                  pl.BlockSpec((f, 1), lambda i, j: (0, 0)),
                  pl.BlockSpec((c, f), lambda i, j: (0, 0)),
                  pl.BlockSpec((c, 1), lambda i, j: (0, 0))],
        out_specs=pl.BlockSpec((None, c, tm), lambda i, j: (i, 0, j)),
        compiler_params=pltpu.CompilerParams(
            dimension_semantics=("parallel", "parallel"),
            vmem_limit_bytes=_VMEM_LIMIT),
    )(x_pix, c3_up, wcf, bcf_col, w4, b4_col)


# ------------------------- host-side operator builders ----------------------
# All of these run ONCE at setup time (outside the jitted forward).

def _pick_col_tile(hw, cap=8192):
    # Largest pixel tile <= cap that is a multiple of 128 and divides H*W.
    t = min(hw, cap)
    t -= t % 128
    while hw % t:
        t -= 128
    return t


def _conv_gather_mats(hi, wi, k=3):
    # 0/1 gather matrices G[t] (Pin, Pout): (x @ G[t])[:, p_out] = x[:, tap-shifted p_in]
    ho, wo = hi - k + 1, wi - k + 1
    oh = jnp.arange(ho)[:, None]
    ow = jnp.arange(wo)[None, :]
    mats = []
    for kh in range(k):
        for kw in range(k):
            idx = ((oh + kh) * wi + (ow + kw)).reshape(-1)
            mats.append(jax.nn.one_hot(idx, hi * wi, dtype=jnp.float32).T)
    return jnp.stack(mats, axis=0)                      # (k*k, Pin, Pout)


def _compose_conv_operator(w_hwio, hi, wi):
    # Dense operator M (f_out*Pout, f_in*Pin): flat_out = M @ flat_in for a 3x3 valid conv.
    k = w_hwio.shape[0]
    f_in, f_out = w_hwio.shape[2], w_hwio.shape[3]
    ho, wo = hi - k + 1, wi - k + 1
    g = _conv_gather_mats(hi, wi, k)                    # (k*k, Pin, Pout)
    w_t = jnp.transpose(w_hwio, (0, 1, 3, 2)).reshape(k * k, f_out, f_in)   # [t, o, i]
    m = jnp.einsum('toi,tpq->oqip', w_t, g).reshape(f_out * ho * wo, f_in * hi * wi)
    return m, ho, wo


def _interp_matrix(out_size, in_size):
    # PyTorch bilinear, align_corners=False (negative source indices clamped to 0)
    dst = jnp.arange(out_size, dtype=jnp.float32)
    src = (dst + 0.5) * (in_size / out_size) - 0.5
    src = jnp.maximum(src, 0.0)
    i0 = jnp.clip(jnp.floor(src).astype(jnp.int32), 0, in_size - 1)
    i1 = jnp.minimum(i0 + 1, in_size - 1)
    lam = src - i0.astype(jnp.float32)
    return ((1.0 - lam)[:, None] * jax.nn.one_hot(i0, in_size, dtype=jnp.float32)
            + lam[:, None] * jax.nn.one_hot(i1, in_size, dtype=jnp.float32))


def build_derived(params, h, w):
    """Pre-compose every per-(H, W, params) operator once, outside the hot path."""
    w1, b1 = params['W1'], params['b1']
    wf, bf = params['Wf'], params['bf']
    wc2, bc2 = params['Wc2'], params['bc2']
    f, c = w1.shape
    h2, w2 = (h - 3) // 2 + 1, (w - 3) // 2 + 1
    h3, w3 = (h2 - 7) // 3 + 1, (w2 - 7) // 3 + 1

    # conv1 o conv2 composed into a single 3x3 / stride-2 conv C -> f.
    wcomb = jnp.einsum('uvio,ic->uvco', wc2, w1)                       # (3,3,C,f)
    bcomb = bc2 + jnp.einsum('uvio,i->o', wc2, b1)                     # (f,)

    # Column-select (right) and fused row-select + channel-mix (left) operators.
    rsel = jax.nn.one_hot(
        2 * jnp.arange(h2)[None, :] + jnp.arange(3)[:, None], h,
        dtype=jnp.float32)                                             # (3, h2, H)
    m_ops = jnp.einsum('uvco,uyh->voych', wcomb, rsel).reshape(3, f * h2, c * h)
    csel = jax.nn.one_hot(
        2 * jnp.arange(w2)[None, :] + jnp.arange(3)[:, None], w,
        dtype=jnp.float32)                                             # (3, w2, W)
    c_ops = jnp.transpose(csel, (0, 2, 1))                             # (3, W, w2)
    b12 = jnp.repeat(bcomb, h2)[:, None]                               # (f*h2, 1)

    # conv_f o conv1 composed (cf is recomputed from x inside the tail kernel).
    wcf = wf @ w1                                                      # (f, C)
    bcf = (wf @ b1 + bf)[:, None]                                      # (f, 1)

    # Branch dense operators (conv_max / conv3 / conv3_), transposed for the
    # batch-on-sublanes / features-on-lanes layout.
    # TODO(synk): dense composition scales O((f*P)^2); switch to a separable
    # 9-tap form for large pooled maps.
    m1, h4, w4_ = _compose_conv_operator(params['Wcm'], h3, w3)
    m2, h5, w5 = _compose_conv_operator(params['Wc3'], h4, w4_)
    m3, h6, w6 = _compose_conv_operator(params['Wc3_'], h5, w5)
    assert h6 >= 1 and w6 >= 1, "spatial size too small for the valid conv/pool chain"
    b1r = jnp.repeat(params['bcm'], h4 * w4_)[None, :]
    b2r = jnp.repeat(params['bc3'], h5 * w5)[None, :]
    b3r = jnp.repeat(params['bc3_'], h6 * w6)[None, :]

    # Separable bilinear (align_corners=False) interpolation matrices.
    ah = _interp_matrix(h, h6)                                         # (H, h6)
    aw = _interp_matrix(w, w6)                                         # (W, w6)

    return dict(c_ops=c_ops, m_ops=m_ops, b12=b12,
                wcf=wcf, bcf=bcf,
                m1t=m1.T, b1r=b1r, m2t=m2.T, b2r=b2r, m3t=m3.T, b3r=b3r,
                ah=ah, aw=aw,
                w4=params['W4'], b4=params['b4'][:, None])


# ------------------------------- forward ------------------------------------

def esa_forward(ops, x_nchw):
    n, c, h, w = x_nchw.shape
    hw = h * w
    assert hw % 128 == 0, "H*W must be a multiple of 128 for lane-dense tiles"
    f = ops['wcf'].shape[0]
    h2 = ops['m_ops'].shape[1] // f
    w2 = ops['c_ops'].shape[2]
    h6 = ops['ah'].shape[1]
    w6 = ops['aw'].shape[1]

    x = x_nchw.astype(jnp.float32)

    # conv1 + conv2 fused (single composed 3x3/stride-2 conv), per-image grid.
    x_rows = x.reshape(n, c * h, w)                                    # free view
    c1d = conv12(x_rows, ops['c_ops'], ops['m_ops'], ops['b12'])
    c1d = c1d.reshape(n, f, h2, w2)

    # MaxPool2d(kernel=7, stride=3).
    # TODO(synk): tiny window reduction kept in plain JAX (lax.reduce_window).
    vmax = lax.reduce_window(c1d, -jnp.inf, lax.max,
                             (1, 1, 7, 7), (1, 1, 3, 3), 'VALID')      # (n,f,h3,w3)

    # conv_max -> GELU -> conv3 -> GELU -> conv3_ fused into ONE Pallas kernel.
    v_flat = vmax.reshape(n, -1)                                       # (n, f*h3*w3)
    c3_flat = branch_fused(v_flat, ops['m1t'], ops['b1r'],
                           ops['m2t'], ops['b2r'], ops['m3t'], ops['b3r'])
    c3 = c3_flat.reshape(n, f, h6, w6)

    # Bilinear upsample (align_corners=False), separable Ah (.) Aw form.
    # TODO(synk): tiny separable expansion kept in plain JAX; its (n,f,H,W)
    # output is the only intermediate of that size that touches HBM.
    c3_up = jnp.einsum('ha,nfab,wb->nfhw', ops['ah'], c3, ops['aw'])
    c3_up = c3_up.reshape(n, f, hw)

    # conv_f (recomputed from x), add, conv4, sigmoid, gate — lane-dense tiles.
    tm = _pick_col_tile(hw)
    x_pix = x.reshape(n, c, hw)                                        # free view
    out = tail_gate(x_pix, c3_up, ops['wcf'], ops['bcf'],
                    ops['w4'], ops['b4'], tm)
    return out.reshape(n, c, h, w)


def init_params(key, num_feat):
    f = num_feat // 4
    ks = jax.random.split(key, 14)

    def rnd(k, shape, scale=0.1):
        return scale * jax.random.normal(k, shape, dtype=jnp.float32)

    # Linear weights stored PyTorch-style (out, in); conv weights HWIO (kh, kw, in, out)
    return dict(
        W1=rnd(ks[0], (f, num_feat)), b1=rnd(ks[1], (f,)),            # conv1
        Wf=rnd(ks[2], (f, f)),        bf=rnd(ks[3], (f,)),            # conv_f
        Wc2=rnd(ks[4], (3, 3, f, f)), bc2=rnd(ks[5], (f,)),           # conv2
        Wcm=rnd(ks[6], (3, 3, f, f)), bcm=rnd(ks[7], (f,)),           # conv_max
        Wc3=rnd(ks[8], (3, 3, f, f)), bc3=rnd(ks[9], (f,)),           # conv3
        Wc3_=rnd(ks[10], (3, 3, f, f)), bc3_=rnd(ks[11], (f,)),       # conv3_
        W4=rnd(ks[12], (num_feat, f)), b4=rnd(ks[13], (num_feat,)),   # conv4
    )


if __name__ == "__main__":
    key = jax.random.PRNGKey(0)
    kx, kp = jax.random.split(key)
    # spatial must be >= 51 so the valid conv chain (stride-2 conv -> 7/3 maxpool
    # -> three 3x3 valid convs) stays non-empty; 64x64 is the smallest nice size.
    num_feat, batch, height, width = 16, 2, 64, 64
    x = jax.random.normal(kx, (batch, num_feat, height, width), dtype=jnp.float32)
    params = init_params(kp, num_feat)

    # Composed operators built once, outside the jitted hot path.
    ops = build_derived(params, height, width)

    out = jax.jit(esa_forward)(ops, x)
    jax.block_until_ready(out)
    assert out.shape == x.shape and out.dtype == jnp.float32
    print("KERNEL_OK")
</pallas_src>

<mosaic_0001>
module attributes {stable_mosaic.version = 11 : i64} {
  func.func @_conv12_kernel(%arg0: i32, %arg1: memref<1x1024x64xf32, #tpu.memory_space<vmem>>, %arg2: memref<3x64x31xf32, #tpu.memory_space<vmem>>, %arg3: memref<3x124x1024xf32, #tpu.memory_space<vmem>>, %arg4: memref<124x1xf32, #tpu.memory_space<vmem>>, %arg5: memref<1x124x31xf32, #tpu.memory_space<vmem>>) attributes {dimension_semantics = [#tpu.dimension_semantics<parallel>], iteration_bounds = array<i64: 2>, scalar_prefetch = 0 : i64, scratch_operands = 0 : i64, tpu.core_type = #tpu.core_type<tc>, window_params = [{transform_indices = @transform_0, window_bounds = array<i64: 1, 1024, 64>}, {pipeline_mode = #tpu.pipeline_mode<synchronous>, transform_indices = @transform_1, window_bounds = array<i64: 3, 64, 31>}, {pipeline_mode = #tpu.pipeline_mode<synchronous>, transform_indices = @transform_2, window_bounds = array<i64: 3, 124, 1024>}, {pipeline_mode = #tpu.pipeline_mode<synchronous>, transform_indices = @transform_3, window_bounds = array<i64: 124, 1>}, {transform_indices = @transform_4, window_bounds = array<i64: 1, 124, 31>}]} {
    %c0 = arith.constant 0 : index
    %c0_0 = arith.constant 0 : index
    %c0_1 = arith.constant 0 : index
    %0 = vector.load %arg1[%c0, %c0_0, %c0_1] : memref<1x1024x64xf32, #tpu.memory_space<vmem>>, vector<1x1024x64xf32>
    %1 = vector.shape_cast %0 : vector<1x1024x64xf32> to vector<1024x64xf32>
    %c0_2 = arith.constant 0 : index
    %c0_3 = arith.constant 0 : index
    %c0_4 = arith.constant 0 : index
    %2 = vector.load %arg2[%c0_2, %c0_3, %c0_4] : memref<3x64x31xf32, #tpu.memory_space<vmem>>, vector<1x64x31xf32>
    %3 = vector.shape_cast %2 : vector<1x64x31xf32> to vector<64x31xf32>
    %cst = arith.constant dense<0.000000e+00> : vector<1024x31xf32>
    %4 = tpu.matmul %1, %3, %cst {dimension_numbers = #tpu.dot_dimension_numbers<[1], [0], [0], [1], [0, 0, 1, 1], [], []>} : vector<1024x64xf32>, vector<64x31xf32>, vector<1024x31xf32> -> vector<1024x31xf32>
    %c0_5 = arith.constant 0 : index
    %c0_6 = arith.constant 0 : index
    %c0_7 = arith.constant 0 : index
    %5 = vector.load %arg3[%c0_5, %c0_6, %c0_7] : memref<3x124x1024xf32, #tpu.memory_space<vmem>>, vector<1x124x1024xf32>
    %6 = vector.shape_cast %5 : vector<1x124x1024xf32> to vector<124x1024xf32>
    %cst_8 = arith.constant dense<0.000000e+00> : vector<124x31xf32>
    %7 = tpu.matmul %6, %4, %cst_8 {dimension_numbers = #tpu.dot_dimension_numbers<[1], [0], [0], [1], [0, 0, 1, 1], [], []>} : vector<124x1024xf32>, vector<1024x31xf32>, vector<124x31xf32> -> vector<124x31xf32>
    %c1 = arith.constant 1 : index
    %c0_9 = arith.constant 0 : index
    %c0_10 = arith.constant 0 : index
    %8 = vector.load %arg2[%c1, %c0_9, %c0_10] : memref<3x64x31xf32, #tpu.memory_space<vmem>>, vector<1x64x31xf32>
    %9 = vector.shape_cast %8 : vector<1x64x31xf32> to vector<64x31xf32>
    %cst_11 = arith.constant dense<0.000000e+00> : vector<1024x31xf32>
    %10 = tpu.matmul %1, %9, %cst_11 {dimension_numbers = #tpu.dot_dimension_numbers<[1], [0], [0], [1], [0, 0, 1, 1], [], []>} : vector<1024x64xf32>, vector<64x31xf32>, vector<1024x31xf32> -> vector<1024x31xf32>
    %c1_12 = arith.constant 1 : index
    %c0_13 = arith.constant 0 : index
    %c0_14 = arith.constant 0 : index
    %11 = vector.load %arg3[%c1_12, %c0_13, %c0_14] : memref<3x124x1024xf32, #tpu.memory_space<vmem>>, vector<1x124x1024xf32>
    %12 = vector.shape_cast %11 : vector<1x124x1024xf32> to vector<124x1024xf32>
    %cst_15 = arith.constant dense<0.000000e+00> : vector<124x31xf32>
    %13 = tpu.matmul %12, %10, %cst_15 {dimension_numbers = #tpu.dot_dimension_numbers<[1], [0], [0], [1], [0, 0, 1, 1], [], []>} : vector<124x1024xf32>, vector<1024x31xf32>, vector<124x31xf32> -> vector<124x31xf32>
    %14 = arith.addf %7, %13 : vector<124x31xf32>
    %c2 = arith.constant 2 : index
    %c0_16 = arith.constant 0 : index
    %c0_17 = arith.constant 0 : index
    %15 = vector.load %arg2[%c2, %c0_16, %c0_17] : memref<3x64x31xf32, #tpu.memory_space<vmem>>, vector<1x64x31xf32>
    %16 = vector.shape_cast %15 : vector<1x64x31xf32> to vector<64x31xf32>
    %cst_18 = arith.constant dense<0.000000e+00> : vector<1024x31xf32>
    %17 = tpu.matmul %1, %16, %cst_18 {dimension_numbers = #tpu.dot_dimension_numbers<[1], [0], [0], [1], [0, 0, 1, 1], [], []>} : vector<1024x64xf32>, vector<64x31xf32>, vector<1024x31xf32> -> vector<1024x31xf32>
    %c2_19 = arith.constant 2 : index
    %c0_20 = arith.constant 0 : index
    %c0_21 = arith.constant 0 : index
    %18 = vector.load %arg3[%c2_19, %c0_20, %c0_21] : memref<3x124x1024xf32, #tpu.memory_space<vmem>>, vector<1x124x1024xf32>
    %19 = vector.shape_cast %18 : vector<1x124x1024xf32> to vector<124x1024xf32>
    %cst_22 = arith.constant dense<0.000000e+00> : vector<124x31xf32>
    %20 = tpu.matmul %19, %17, %cst_22 {dimension_numbers = #tpu.dot_dimension_numbers<[1], [0], [0], [1], [0, 0, 1, 1], [], []>} : vector<124x1024xf32>, vector<1024x31xf32>, vector<124x31xf32> -> vector<124x31xf32>
    %21 = arith.addf %14, %20 : vector<124x31xf32>
    %c0_23 = arith.constant 0 : index
    %c0_24 = arith.constant 0 : index
    %22 = vector.load %arg4[%c0_23, %c0_24] : memref<124x1xf32, #tpu.memory_space<vmem>>, vector<124x1xf32>
    %23 = vector.broadcast %22 : vector<124x1xf32> to vector<124x31xf32>
    %24 = arith.addf %21, %23 : vector<124x31xf32>
    %c0_25 = arith.constant 0 : index
    %c0_26 = arith.constant 0 : index
    %c0_27 = arith.constant 0 : index
    %25 = vector.load %arg5[%c0_25, %c0_26, %c0_27] : memref<1x124x31xf32, #tpu.memory_space<vmem>>, vector<1x124x31xf32>
    %26 = vector.shape_cast %25 : vector<1x124x31xf32> to vector<124x31xf32>
    %27 = vector.shape_cast %24 : vector<124x31xf32> to vector<1x124x31xf32>
    tpu.vector_store %arg5[%c0_25, %c0_26, %c0_27], %27 {strides = array<i32>} : memref<1x124x31xf32, #tpu.memory_space<vmem>>, vector<1x124x31xf32>,
    return
  }
  func.func @transform_0(%arg0: i32) -> (i32, i32, i32) {
    %c0_i32 = arith.constant 0 : i32
    %c0_i32_0 = arith.constant 0 : i32
    %c0_i32_1 = arith.constant 0 : i32
    return %arg0, %c0_i32, %c0_i32_0 : i32, i32, i32
  }
  func.func @transform_1(%arg0: i32) -> (i32, i32, i32) {
    %c0_i32 = arith.constant 0 : i32
    %c0_i32_0 = arith.constant 0 : i32
    %c0_i32_1 = arith.constant 0 : i32
    %c0_i32_2 = arith.constant 0 : i32
    return %c0_i32, %c0_i32_0, %c0_i32_1 : i32, i32, i32
  }
  func.func @transform_2(%arg0: i32) -> (i32, i32, i32) {
    %c0_i32 = arith.constant 0 : i32
    %c0_i32_0 = arith.constant 0 : i32
    %c0_i32_1 = arith.constant 0 : i32
    %c0_i32_2 = arith.constant 0 : i32
    return %c0_i32, %c0_i32_0, %c0_i32_1 : i32, i32, i32
  }
  func.func @transform_3(%arg0: i32) -> (i32, i32) {
    %c0_i32 = arith.constant 0 : i32
    %c0_i32_0 = arith.constant 0 : i32
    %c0_i32_1 = arith.constant 0 : i32
    return %c0_i32, %c0_i32_0 : i32, i32
  }
  func.func @transform_4(%arg0: i32) -> (i32, i32, i32) {
    %c0_i32 = arith.constant 0 : i32
    %c0_i32_0 = arith.constant 0 : i32
    %c0_i32_1 = arith.constant 0 : i32
    return %arg0, %c0_i32, %c0_i32_0 : i32, i32, i32
  }
}

module attributes {stable_mosaic.version = 11 : i64} {
  func.func @_branch_kernel(%arg0: i32, %arg1: memref<2x324xf32, #tpu.memory_space<vmem>>, %arg2: memref<324x196xf32, #tpu.memory_space<vmem>>, %arg3: memref<1x196xf32, #tpu.memory_space<vmem>>, %arg4: memref<196x100xf32, #tpu.memory_space<vmem>>, %arg5: memref<1x100xf32, #tpu.memory_space<vmem>>, %arg6: memref<100x36xf32, #tpu.memory_space<vmem>>, %arg7: memref<1x36xf32, #tpu.memory_space<vmem>>, %arg8: memref<2x36xf32, #tpu.memory_space<vmem>>) attributes {dimension_semantics = [#tpu.dimension_semantics<arbitrary>], iteration_bounds = array<i64: 1>, scalar_prefetch = 0 : i64, scratch_operands = 0 : i64, tpu.core_type = #tpu.core_type<tc>, window_params = [{pipeline_mode = #tpu.pipeline_mode<synchronous>, transform_indices = @transform_0, window_bounds = array<i64: 2, 324>}, {pipeline_mode = #tpu.pipeline_mode<synchronous>, transform_indices = @transform_1, window_bounds = array<i64: 324, 196>}, {pipeline_mode = #tpu.pipeline_mode<synchronous>, transform_indices = @transform_2, window_bounds = array<i64: 1, 196>}, {pipeline_mode = #tpu.pipeline_mode<synchronous>, transform_indices = @transform_3, window_bounds = array<i64: 196, 100>}, {pipeline_mode = #tpu.pipeline_mode<synchronous>, transform_indices = @transform_4, window_bounds = array<i64: 1, 100>}, {pipeline_mode = #tpu.pipeline_mode<synchronous>, transform_indices = @transform_5, window_bounds = array<i64: 100, 36>}, {pipeline_mode = #tpu.pipeline_mode<synchronous>, transform_indices = @transform_6, window_bounds = array<i64: 1, 36>}, {pipeline_mode = #tpu.pipeline_mode<synchronous>, transform_indices = @transform_7, window_bounds = array<i64: 2, 36>}]} {
    %c0 = arith.constant 0 : index
    %c0_0 = arith.constant 0 : index
    %0 = vector.load %arg1[%c0, %c0_0] : memref<2x324xf32, #tpu.memory_space<vmem>>, vector<2x324xf32>
    %c0_1 = arith.constant 0 : index
    %c0_2 = arith.constant 0 : index
    %1 = vector.load %arg2[%c0_1, %c0_2] : memref<324x196xf32, #tpu.memory_space<vmem>>, vector<324x196xf32>
    %cst = arith.constant dense<0.000000e+00> : vector<2x196xf32>
    %2 = tpu.matmul %0, %1, %cst {dimension_numbers = #tpu.dot_dimension_numbers<[1], [0], [0], [1], [0, 0, 1, 1], [], []>} : vector<2x324xf32>, vector<324x196xf32>, vector<2x196xf32> -> vector<2x196xf32>
    %c0_3 = arith.constant 0 : index
    %c0_4 = arith.constant 0 : index
    %3 = vector.load %arg3[%c0_3, %c0_4] : memref<1x196xf32, #tpu.memory_space<vmem>>, vector<1x196xf32>
    %4 = vector.broadcast %3 : vector<1x196xf32> to vector<2x196xf32>
    %5 = arith.addf %2, %4 : vector<2x196xf32>
    %cst_5 = arith.constant 0.707106769 : f32
    %6 = vector.broadcast %cst_5 : f32 to vector<2x196xf32>
    %7 = arith.mulf %5, %6 : vector<2x196xf32>
    %8 = math.absf %7 : vector<2x196xf32>
    %cst_6 = arith.constant 0.327591091 : f32
    %9 = vector.broadcast %cst_6 : f32 to vector<2x196xf32>
    %10 = arith.mulf %9, %8 : vector<2x196xf32>
    %cst_7 = arith.constant 1.000000e+00 : f32
    %11 = vector.broadcast %cst_7 : f32 to vector<2x196xf32>
    %12 = arith.addf %11, %10 : vector<2x196xf32>
    %cst_8 = arith.constant 1.000000e+00 : f32
    %13 = vector.broadcast %cst_8 : f32 to vector<2x196xf32>
    %14 = arith.divf %13, %12 : vector<2x196xf32>
    %cst_9 = arith.constant 1.06140542 : f32
    %15 = vector.broadcast %cst_9 : f32 to vector<2x196xf32>
    %16 = arith.mulf %14, %15 : vector<2x196xf32>
    %cst_10 = arith.constant -1.45315206 : f32
    %17 = vector.broadcast %cst_10 : f32 to vector<2x196xf32>
    %18 = arith.addf %17, %16 : vector<2x196xf32>
    %19 = arith.mulf %14, %18 : vector<2x196xf32>
    %cst_11 = arith.constant 1.42141378 : f32
    %20 = vector.broadcast %cst_11 : f32 to vector<2x196xf32>
    %21 = arith.addf %20, %19 : vector<2x196xf32>
    %22 = arith.mulf %14, %21 : vector<2x196xf32>
    %cst_12 = arith.constant -0.284496725 : f32
    %23 = vector.broadcast %cst_12 : f32 to vector<2x196xf32>
    %24 = arith.addf %23, %22 : vector<2x196xf32>
    %25 = arith.mulf %14, %24 : vector<2x196xf32>
    %cst_13 = arith.constant 0.254829586 : f32
    %26 = vector.broadcast %cst_13 : f32 to vector<2x196xf32>
    %27 = arith.addf %26, %25 : vector<2x196xf32>
    %28 = arith.mulf %14, %27 : vector<2x196xf32>
    %cst_14 = arith.constant 0.000000e+00 : f32
    %29 = vector.broadcast %cst_14 : f32 to vector<2x196xf32>
    %30 = arith.subf %29, %8 : vector<2x196xf32>
    %31 = arith.mulf %30, %8 : vector<2x196xf32>
    %32 = math.exp %31 : vector<2x196xf32>
    %33 = arith.mulf %28, %32 : vector<2x196xf32>
    %cst_15 = arith.constant 1.000000e+00 : f32
    %34 = vector.broadcast %cst_15 : f32 to vector<2x196xf32>
    %35 = arith.subf %34, %33 : vector<2x196xf32>
    %cst_16 = arith.constant 0.000000e+00 : f32
    %36 = vector.broadcast %cst_16 : f32 to vector<2x196xf32>
    %37 = arith.cmpf olt, %7, %36 : vector<2x196xf32>
    %cst_17 = arith.constant 0.000000e+00 : f32
    %38 = vector.broadcast %cst_17 : f32 to vector<2x196xf32>
    %39 = arith.subf %38, %35 : vector<2x196xf32>
    %40 = arith.select %37, %39, %35 : vector<2x196xi1>, vector<2x196xf32>
    %cst_18 = arith.constant 5.000000e-01 : f32
    %41 = vector.broadcast %cst_18 : f32 to vector<2x196xf32>
    %42 = arith.mulf %41, %5 : vector<2x196xf32>
    %cst_19 = arith.constant 1.000000e+00 : f32
    %43 = vector.broadcast %cst_19 : f32 to vector<2x196xf32>
    %44 = arith.addf %43, %40 : vector<2x196xf32>
    %45 = arith.mulf %42, %44 : vector<2x196xf32>
    %c0_20 = arith.constant 0 : index
    %c0_21 = arith.constant 0 : index
    %46 = vector.load %arg4[%c0_20, %c0_21] : memref<196x100xf32, #tpu.memory_space<vmem>>, vector<196x100xf32>
    %cst_22 = arith.constant dense<0.000000e+00> : vector<2x100xf32>
    %47 = tpu.matmul %45, %46, %cst_22 {dimension_numbers = #tpu.dot_dimension_numbers<[1], [0], [0], [1], [0, 0, 1, 1], [], []>} : vector<2x196xf32>, vector<196x100xf32>, vector<2x100xf32> -> vector<2x100xf32>
    %c0_23 = arith.constant 0 : index
    %c0_24 = arith.constant 0 : index
    %48 = vector.load %arg5[%c0_23, %c0_24] : memref<1x100xf32, #tpu.memory_space<vmem>>, vector<1x100xf32>
    %49 = vector.broadcast %48 : vector<1x100xf32> to vector<2x100xf32>
    %50 = arith.addf %47, %49 : vector<2x100xf32>
    %cst_25 = arith.constant 0.707106769 : f32
    %51 = vector.broadcast %cst_25 : f32 to vector<2x100xf32>
    %52 = arith.mulf %50, %51 : vector<2x100xf32>
    %53 = math.absf %52 : vector<2x100xf32>
    %cst_26 = arith.constant 0.327591091 : f32
    %54 = vector.broadcast %cst_26 : f32 to vector<2x100xf32>
    %55 = arith.mulf %54, %53 : vector<2x100xf32>
    %cst_27 = arith.constant 1.000000e+00 : f32
    %56 = vector.broadcast %cst_27 : f32 to vector<2x100xf32>
    %57 = arith.addf %56, %55 : vector<2x100xf32>
    %cst_28 = arith.constant 1.000000e+00 : f32
    %58 = vector.broadcast %cst_28 : f32 to vector<2x100xf32>
    %59 = arith.divf %58, %57 : vector<2x100xf32>
    %cst_29 = arith.constant 1.06140542 : f32
    %60 = vector.broadcast %cst_29 : f32 to vector<2x100xf32>
    %61 = arith.mulf %59, %60 : vector<2x100xf32>
    %cst_30 = arith.constant -1.45315206 : f32
    %62 = vector.broadcast %cst_30 : f32 to vector<2x100xf32>
    %63 = arith.addf %62, %61 : vector<2x100xf32>
    %64 = arith.mulf %59, %63 : vector<2x100xf32>
    %cst_31 = arith.constant 1.42141378 : f32
    %65 = vector.broadcast %cst_31 : f32 to vector<2x100xf32>
    %66 = arith.addf %65, %64 : vector<2x100xf32>
    %67 = arith.mulf %59, %66 : vector<2x100xf32>
    %cst_32 = arith.constant -0.284496725 : f32
    %68 = vector.broadcast %cst_32 : f32 to vector<2x100xf32>
    %69 = arith.addf %68, %67 : vector<2x100xf32>
    %70 = arith.mulf %59, %69 : vector<2x100xf32>
    %cst_33 = arith.constant 0.254829586 : f32
    %71 = vector.broadcast %cst_33 : f32 to vector<2x100xf32>
    %72 = arith.addf %71, %70 : vector<2x100xf32>
    %73 = arith.mulf %59, %72 : vector<2x100xf32>
    %cst_34 = arith.constant 0.000000e+00 : f32
    %74 = vector.broadcast %cst_34 : f32 to vector<2x100xf32>
    %75 = arith.subf %74, %53 : vector<2x100xf32>
    %76 = arith.mulf %75, %53 : vector<2x100xf32>
    %77 = math.exp %76 : vector<2x100xf32>
    %78 = arith.mulf %73, %77 : vector<2x100xf32>
    %cst_35 = arith.constant 1.000000e+00 : f32
    %79 = vector.broadcast %cst_35 : f32 to vector<2x100xf32>
    %80 = arith.subf %79, %78 : vector<2x100xf32>
    %cst_36 = arith.constant 0.000000e+00 : f32
    %81 = vector.broadcast %cst_36 : f32 to vector<2x100xf32>
    %82 = arith.cmpf olt, %52, %81 : vector<2x100xf32>
    %cst_37 = arith.constant 0.000000e+00 : f32
    %83 = vector.broadcast %cst_37 : f32 to vector<2x100xf32>
    %84 = arith.subf %83, %80 : vector<2x100xf32>
    %85 = arith.select %82, %84, %80 : vector<2x100xi1>, vector<2x100xf32>
    %cst_38 = arith.constant 5.000000e-01 : f32
    %86 = vector.broadcast %cst_38 : f32 to vector<2x100xf32>
    %87 = arith.mulf %86, %50 : vector<2x100xf32>
    %cst_39 = arith.constant 1.000000e+00 : f32
    %88 = vector.broadcast %cst_39 : f32 to vector<2x100xf32>
    %89 = arith.addf %88, %85 : vector<2x100xf32>
    %90 = arith.mulf %87, %89 : vector<2x100xf32>
    %c0_40 = arith.constant 0 : index
    %c0_41 = arith.constant 0 : index
    %91 = vector.load %arg6[%c0_40, %c0_41] : memref<100x36xf32, #tpu.memory_space<vmem>>, vector<100x36xf32>
    %cst_42 = arith.constant dense<0.000000e+00> : vector<2x36xf32>
    %92 = tpu.matmul %90, %91, %cst_42 {dimension_numbers = #tpu.dot_dimension_numbers<[1], [0], [0], [1], [0, 0, 1, 1], [], []>} : vector<2x100xf32>, vector<100x36xf32>, vector<2x36xf32> -> vector<2x36xf32>
    %c0_43 = arith.constant 0 : index
    %c0_44 = arith.constant 0 : index
    %93 = vector.load %arg7[%c0_43, %c0_44] : memref<1x36xf32, #tpu.memory_space<vmem>>, vector<1x36xf32>
    %94 = vector.broadcast %93 : vector<1x36xf32> to vector<2x36xf32>
    %95 = arith.addf %92, %94 : vector<2x36xf32>
    %c0_45 = arith.constant 0 : index
    %c0_46 = arith.constant 0 : index
    %96 = vector.load %arg8[%c0_45, %c0_46] : memref<2x36xf32, #tpu.memory_space<vmem>>, vector<2x36xf32>
    tpu.vector_store %arg8[%c0_45, %c0_46], %95 {strides = array<i32>} : memref<2x36xf32, #tpu.memory_space<vmem>>, vector<2x36xf32>,
    return
  }
  func.func @transform_0(%arg0: i32) -> (i32, i32) {
    %c0_i32 = arith.constant 0 : i32
    %c0_i32_0 = arith.constant 0 : i32
    %c0_i32_1 = arith.constant 0 : i32
    return %c0_i32, %c0_i32_0 : i32, i32
  }
  func.func @transform_1(%arg0: i32) -> (i32, i32) {
    %c0_i32 = arith.constant 0 : i32
    %c0_i32_0 = arith.constant 0 : i32
    %c0_i32_1 = arith.constant 0 : i32
    return %c0_i32, %c0_i32_0 : i32, i32
  }
  func.func @transform_2(%arg0: i32) -> (i32, i32) {
    %c0_i32 = arith.constant 0 : i32
    %c0_i32_0 = arith.constant 0 : i32
    %c0_i32_1 = arith.constant 0 : i32
    return %c0_i32, %c0_i32_0 : i32, i32
  }
  func.func @transform_3(%arg0: i32) -> (i32, i32) {
    %c0_i32 = arith.constant 0 : i32
    %c0_i32_0 = arith.constant 0 : i32
    %c0_i32_1 = arith.constant 0 : i32
    return %c0_i32, %c0_i32_0 : i32, i32
  }
  func.func @transform_4(%arg0: i32) -> (i32, i32) {
    %c0_i32 = arith.constant 0 : i32
    %c0_i32_0 = arith.constant 0 : i32
    %c0_i32_1 = arith.constant 0 : i32
    return %c0_i32, %c0_i32_0 : i32, i32
  }
  func.func @transform_5(%arg0: i32) -> (i32, i32) {
    %c0_i32 = arith.constant 0 : i32
    %c0_i32_0 = arith.constant 0 : i32
    %c0_i32_1 = arith.constant 0 : i32
    return %c0_i32, %c0_i32_0 : i32, i32
  }
  func.func @transform_6(%arg0: i32) -> (i32, i32) {
    %c0_i32 = arith.constant 0 : i32
    %c0_i32_0 = arith.constant 0 : i32
    %c0_i32_1 = arith.constant 0 : i32
    return %c0_i32, %c0_i32_0 : i32, i32
  }
  func.func @transform_7(%arg0: i32) -> (i32, i32) {
    %c0_i32 = arith.constant 0 : i32
    %c0_i32_0 = arith.constant 0 : i32
    %c0_i32_1 = arith.constant 0 : i32
    return %c0_i32, %c0_i32_0 : i32, i32
  }
}

module attributes {stable_mosaic.version = 11 : i64} {
  func.func @_tail_kernel(%arg0: i32, %arg1: i32, %arg2: memref<1x16x4096xf32, #tpu.memory_space<vmem>>, %arg3: memref<1x4x4096xf32, #tpu.memory_space<vmem>>, %arg4: memref<4x16xf32, #tpu.memory_space<vmem>>, %arg5: memref<4x1xf32, #tpu.memory_space<vmem>>, %arg6: memref<16x4xf32, #tpu.memory_space<vmem>>, %arg7: memref<16x1xf32, #tpu.memory_space<vmem>>, %arg8: memref<1x16x4096xf32, #tpu.memory_space<vmem>>) attributes {dimension_semantics = [#tpu.dimension_semantics<parallel>, #tpu.dimension_semantics<parallel>], iteration_bounds = array<i64: 2, 1>, scalar_prefetch = 0 : i64, scratch_operands = 0 : i64, tpu.core_type = #tpu.core_type<tc>, window_params = [{transform_indices = @transform_0, window_bounds = array<i64: 1, 16, 4096>}, {transform_indices = @transform_1, window_bounds = array<i64: 1, 4, 4096>}, {pipeline_mode = #tpu.pipeline_mode<synchronous>, transform_indices = @transform_2, window_bounds = array<i64: 4, 16>}, {pipeline_mode = #tpu.pipeline_mode<synchronous>, transform_indices = @transform_3, window_bounds = array<i64: 4, 1>}, {pipeline_mode = #tpu.pipeline_mode<synchronous>, transform_indices = @transform_4, window_bounds = array<i64: 16, 4>}, {pipeline_mode = #tpu.pipeline_mode<synchronous>, transform_indices = @transform_5, window_bounds = array<i64: 16, 1>}, {transform_indices = @transform_6, window_bounds = array<i64: 1, 16, 4096>}]} {
    %c0 = arith.constant 0 : index
    %c0_0 = arith.constant 0 : index
    %c0_1 = arith.constant 0 : index
    %0 = vector.load %arg2[%c0, %c0_0, %c0_1] : memref<1x16x4096xf32, #tpu.memory_space<vmem>>, vector<1x16x4096xf32>
    %1 = vector.shape_cast %0 : vector<1x16x4096xf32> to vector<16x4096xf32>
    %c0_2 = arith.constant 0 : index
    %c0_3 = arith.constant 0 : index
    %2 = vector.load %arg4[%c0_2, %c0_3] : memref<4x16xf32, #tpu.memory_space<vmem>>, vector<4x16xf32>
    %cst = arith.constant dense<0.000000e+00> : vector<4x4096xf32>
    %3 = tpu.matmul %2, %1, %cst {dimension_numbers = #tpu.dot_dimension_numbers<[1], [0], [0], [1], [0, 0, 1, 1], [], []>} : vector<4x16xf32>, vector<16x4096xf32>, vector<4x4096xf32> -> vector<4x4096xf32>
    %c0_4 = arith.constant 0 : index
    %c0_5 = arith.constant 0 : index
    %4 = vector.load %arg5[%c0_4, %c0_5] : memref<4x1xf32, #tpu.memory_space<vmem>>, vector<4x1xf32>
    %5 = vector.broadcast %4 : vector<4x1xf32> to vector<4x4096xf32>
    %6 = arith.addf %3, %5 : vector<4x4096xf32>
    %c0_6 = arith.constant 0 : index
    %c0_7 = arith.constant 0 : index
    %c0_8 = arith.constant 0 : index
    %7 = vector.load %arg3[%c0_6, %c0_7, %c0_8] : memref<1x4x4096xf32, #tpu.memory_space<vmem>>, vector<1x4x4096xf32>
    %8 = vector.shape_cast %7 : vector<1x4x4096xf32> to vector<4x4096xf32>
    %9 = arith.addf %8, %6 : vector<4x4096xf32>
    %c0_9 = arith.constant 0 : index
    %c0_10 = arith.constant 0 : index
    %10 = vector.load %arg6[%c0_9, %c0_10] : memref<16x4xf32, #tpu.memory_space<vmem>>, vector<16x4xf32>
    %cst_11 = arith.constant dense<0.000000e+00> : vector<16x4096xf32>
    %11 = tpu.matmul %10, %9, %cst_11 {dimension_numbers = #tpu.dot_dimension_numbers<[1], [0], [0], [1], [0, 0, 1, 1], [], []>} : vector<16x4xf32>, vector<4x4096xf32>, vector<16x4096xf32> -> vector<16x4096xf32>
    %c0_12 = arith.constant 0 : index
    %c0_13 = arith.constant 0 : index
    %12 = vector.load %arg7[%c0_12, %c0_13] : memref<16x1xf32, #tpu.memory_space<vmem>>, vector<16x1xf32>
    %13 = vector.broadcast %12 : vector<16x1xf32> to vector<16x4096xf32>
    %14 = arith.addf %11, %13 : vector<16x4096xf32>
    %15 = arith.negf %14 : vector<16x4096xf32>
    %16 = math.exp %15 : vector<16x4096xf32>
    %cst_14 = arith.constant 1.000000e+00 : f32
    %17 = vector.broadcast %cst_14 : f32 to vector<16x4096xf32>
    %18 = arith.addf %17, %16 : vector<16x4096xf32>
    %19 = arith.divf %17, %18 : vector<16x4096xf32>
    %20 = arith.mulf %1, %19 : vector<16x4096xf32>
    %c0_15 = arith.constant 0 : index
    %c0_16 = arith.constant 0 : index
    %c0_17 = arith.constant 0 : index
    %21 = vector.load %arg8[%c0_15, %c0_16, %c0_17] : memref<1x16x4096xf32, #tpu.memory_space<vmem>>, vector<1x16x4096xf32>
    %22 = vector.shape_cast %21 : vector<1x16x4096xf32> to vector<16x4096xf32>
    %23 = vector.shape_cast %20 : vector<16x4096xf32> to vector<1x16x4096xf32>
    tpu.vector_store %arg8[%c0_15, %c0_16, %c0_17], %23 {strides = array<i32>} : memref<1x16x4096xf32, #tpu.memory_space<vmem>>, vector<1x16x4096xf32>,
    return
  }
  func.func @transform_0(%arg0: i32, %arg1: i32) -> (i32, i32, i32) {
    %c0_i32 = arith.constant 0 : i32
    %c0_i32_0 = arith.constant 0 : i32
    return %arg0, %c0_i32, %arg1 : i32, i32, i32
  }
  func.func @transform_1(%arg0: i32, %arg1: i32) -> (i32, i32, i32) {
    %c0_i32 = arith.constant 0 : i32
    %c0_i32_0 = arith.constant 0 : i32
    return %arg0, %c0_i32, %arg1 : i32, i32, i32
  }
  func.func @transform_2(%arg0: i32, %arg1: i32) -> (i32, i32) {
    %c0_i32 = arith.constant 0 : i32
    %c0_i32_0 = arith.constant 0 : i32
    %c0_i32_1 = arith.constant 0 : i32
    return %c0_i32, %c0_i32_0 : i32, i32
  }
  func.func @transform_3(%arg0: i32, %arg1: i32) -> (i32, i32) {
    %c0_i32 = arith.constant 0 : i32
    %c0_i32_0 = arith.constant 0 : i32
    %c0_i32_1 = arith.constant 0 : i32
    return %c0_i32, %c0_i32_0 : i32, i32
  }
  func.func @transform_4(%arg0: i32, %arg1: i32) -> (i32, i32) {
    %c0_i32 = arith.constant 0 : i32
    %c0_i32_0 = arith.constant 0 : i32
    %c0_i32_1 = arith.constant 0 : i32
    return %c0_i32, %c0_i32_0 : i32, i32
  }
  func.func @transform_5(%arg0: i32, %arg1: i32) -> (i32, i32) {
    %c0_i32 = arith.constant 0 : i32
    %c0_i32_0 = arith.constant 0 : i32
    %c0_i32_1 = arith.constant 0 : i32
    return %c0_i32, %c0_i32_0 : i32, i32
  }
  func.func @transform_6(%arg0: i32, %arg1: i32) -> (i32, i32, i32) {
    %c0_i32 = arith.constant 0 : i32
    %c0_i32_0 = arith.constant 0 : i32
    return %arg0, %c0_i32, %arg1 : i32, i32, i32
  }
}

</mosaic_0001>

<bundles_post_ra>
// kernel: esa_forward.4
= control target key start
LH: loop header
LB: loop body
LE: loop exit
PB: predicated region body
PF: predicated region fallthrough
CT: control target
= control target key end

     0   :  { %v111_v25 = vlaneseq  ;;  %v791_v26 = vmov 1983009808   ;;  %vm143_vm0 = vcmask 1043456   ;;  %vm140_vm1 = vcmask 556032   ;;  %s1257_s1 = inlined_call_operand.vmem [shape: f32[324,196], index: 1, kind: input, shape index: {}]   ;;  %s1258_s0 = inlined_call_operand.vmem [shape: f32[2,324], index: 0, kind: input, shape index: {}]   ;;  %s1259_s3 = inlined_call_operand.vmem [shape: f32[196,100], index: 3, kind: input, shape index: {}]   ;;  %s1260_s2 = inlined_call_operand.vmem [shape: f32[1,196], index: 2, kind: input, shape index: {}]   ;;  %s1261_s5 = inlined_call_operand.vmem [shape: f32[100,36], index: 5, kind: input, shape index: {}]   ;;  %s1262_s4 = inlined_call_operand.vmem [shape: f32[1,100], index: 4, kind: input, shape index: {}]   ;;  %s1263_s6 = inlined_call_operand.vmem [shape: f32[1,36], index: 6, kind: input, shape index: {}]   ;;  %s1264_s7 = inlined_call_operand.vmem [shape: f32[2,36], index: 7, kind: output, shape index: {}]  }
   0x1   :  { %v28_v0 = vld [vmem:[%s1257_s1 + $0x8] sm:$0xff]  ;;  %v30_v1 = vld [vmem:[%s1257_s1 + $0x18] sm:$0xff]  ;;  %v27_v2 = vld [vmem:[%s1257_s1] sm:$0xff]  ;;  %v124_v27 = vunpack.c.l.s4 %v791_v26  ;;  %vm794_vm4 = vmmov 0   ;;  %vm501_vm6 = vcmask 818176   ;;  %vm578_vm7 = vcmask 287744  }
   0x2   :  { %v636_v3 = vpack.c.bf16 %v30_v1, %v28_v0  ;;  %v29_v4 = vld [vmem:[%s1257_s1 + $0x10] sm:$0xff]  ;;  %v32_v5 = vld [vmem:[%s1257_s1 + $0x28] sm:$0xff]  ;;  %v34_v6 = vld [vmem:[%s1257_s1 + $0x38] sm:$0xff]  ;;  %v901_v34 = vshrl.u32 %v111_v25, 7 }
   0x3   :  { %v638_v7 = vpack.c.bf16 %v29_v4, %v27_v2  ;;  %v640_v8 = vpack.c.bf16 %v34_v6, %v32_v5  ;;  %v31_v9 = vld [vmem:[%s1257_s1 + $0x20] sm:$0xff]  ;;  %v33_v10 = vld [vmem:[%s1257_s1 + $0x30] sm:$0xff]  ;;  %v36_v11 = vld [vmem:[%s1257_s1 + $0x48] sm:$0xff]  ;;  %v125_v35 = vunpack.c.0.s8 %v124_v27 }
   0x4   :  { %637 = vmatprep.subr.bf16.mxu0 %v636_v3  ;;  %v38_v12 = vld [vmem:[%s1257_s1 + $0x58] sm:$0xff]  ;;  %v642_v13 = vpack.c.bf16 %v33_v10, %v31_v9  ;;  %v35_v15 = vld [vmem:[%s1257_s1 + $0x40] sm:$0xff]  ;;  %v37_v16 = vld [vmem:[%s1257_s1 + $0x50] sm:$0xff] }
   0x5   :  { %639 = vmatpush1.bf16.msra.mxu0 %v638_v7  ;;  %v644_v14 = vpack.c.bf16 %v38_v12, %v36_v11  ;;  %v40_v17 = vld [vmem:[%s1257_s1 + $0x68] sm:$0xff]  ;;  %v42_v18 = vld [vmem:[%s1257_s1 + $0x78] sm:$0xff]  ;;  %v646_v19 = vpack.c.bf16 %v37_v16, %v35_v15  ;;  %v39_v21 = vld [vmem:[%s1257_s1 + $0x60] sm:$0xff]  ;;  %v916_v42 = vsub.s32 %v125_v35, %v901_v34 }
   0x6   :  { %641 = vmatprep.subr.bf16.mxu0 %v640_v8  ;;  %v648_v20 = vpack.c.bf16 %v42_v18, %v40_v17  ;;  %v41_v22 = vld [vmem:[%s1257_s1 + $0x70] sm:$0xff]  ;;  %v44_v23 = vld [vmem:[%s1257_s1 + $0x88] sm:$0xff]  ;;  %v46_v24 = vld [vmem:[%s1257_s1 + $0x98] sm:$0xff] }
   0x7   :  { %v650_v28 = vpack.c.bf16 %v41_v22, %v39_v21  ;;  %v652_v29 = vpack.c.bf16 %v46_v24, %v44_v23  ;;  %v43_v30 = vld [vmem:[%s1257_s1 + $0x80] sm:$0xff]  ;;  %v45_v31 = vld [vmem:[%s1257_s1 + $0x90] sm:$0xff]  ;;  %v48_v32 = vld [vmem:[%s1257_s1 + $0xa8] sm:$0xff] }
   0x8   :  { %v50_v33 = vld [vmem:[%s1257_s1 + $0xb8] sm:$0xff]  ;;  %v654_v36 = vpack.c.bf16 %v45_v31, %v43_v30  ;;  %v47_v38 = vld [vmem:[%s1257_s1 + $0xa0] sm:$0xff]  ;;  %v49_v39 = vld [vmem:[%s1257_s1 + $0xb0] sm:$0xff] }
   0x9   :  { %643 = vmatpush1.bf16.msra.mxu0 %v642_v13  ;;  %v656_v37 = vpack.c.bf16 %v50_v33, %v48_v32  ;;  %v52_v40 = vld [vmem:[%s1257_s1 + $0xc8] sm:$0xff]  ;;  %v54_v41 = vld [vmem:[%s1257_s1 + $0xd8] sm:$0xff]  ;;  %v658_v43 = vpack.c.bf16 %v49_v39, %v47_v38  ;;  %v51_v45 = vld [vmem:[%s1257_s1 + $0xc0] sm:$0xff] }
   0xa   :  { %645 = vmatprep.subr.bf16.mxu0 %v644_v14  ;;  %v660_v44 = vpack.c.bf16 %v54_v41, %v52_v40  ;;  %v53_v46 = vld [vmem:[%s1257_s1 + $0xd0] sm:$0xff]  ;;  %v927_v47 = vld [vmem:[%s1258_s0] sm:$0x3f]  ;;  %v56_v48 = vld [vmem:[%s1257_s1 + $0xe8] sm:$0xff] }
   0xb   :  { %v58_v49 = vld [vmem:[%s1257_s1 + $0xf8] sm:$0xff]  ;;  %v937_v50 = vrot.slane %v927_v47, %v916_v42  ;;  %v662_v51 = vpack.c.bf16 %v53_v46, %v51_v45  ;;  %v55_v54 = vld [vmem:[%s1257_s1 + $0xe0] sm:$0xff]  ;;  %v57_v55 = vld [vmem:[%s1257_s1 + $0xf0] sm:$0xff] }
   0xc   :  { %v664_v53 = vpack.c.bf16 %v58_v49, %v56_v48  ;;  %v60_v56 = vld [vmem:[%s1257_s1 + $0x108] sm:$0xff]  ;;  %v62_v57 = vld [vmem:[%s1257_s1 + $0x118] sm:$0xff]  ;;  %v666_v58 = vpack.c.bf16 %v57_v55, %v55_v54  ;;  %v59_v60 = vld [vmem:[%s1257_s1 + $0x100] sm:$0xff] }
   0xd   :  { %647 = vmatpush1.bf16.msra.mxu0 %v646_v19  ;;  %v137_v52 = vcombine.high %v937_v50, %v937_v50  ;;  %v668_v59 = vpack.c.bf16 %v62_v57, %v60_v56  ;;  %v61_v61 = vld [vmem:[%s1257_s1 + $0x110] sm:$0xff]  ;;  %v64_v62 = vld [vmem:[%s1257_s1 + $0x128] sm:$0xff]  ;;  %v66_v63 = vld [vmem:[%s1257_s1 + $0x138] sm:$0xff] }
   0xe   :  { %649 = vmatprep.subr.bf16.mxu0 %v648_v20  ;;  %v670_v0 = vpack.c.bf16 %v61_v61, %v59_v60  ;;  %v672_v1 = vpack.c.bf16 %v66_v63, %v64_v62  ;;  %v63_v2 = vld [vmem:[%s1257_s1 + $0x120] sm:$0xff]  ;;  %v65_v3 = vld [vmem:[%s1257_s1 + $0x130] sm:$0xff]  ;;  %v68_v4 = vld [vmem:[%s1257_s1 + $0x148] sm:$0xff] }
   0xf   :  { %214 = vmatprep.mubr.f32.mxu0 %v137_v52  ;;  %v70_v5 = vld [vmem:[%s1257_s1 + $0x158] sm:$0xff]  ;;  %v674_v6 = vpack.c.bf16 %v65_v3, %v63_v2  ;;  %v67_v8 = vld [vmem:[%s1257_s1 + $0x140] sm:$0xff]  ;;  %v69_v9 = vld [vmem:[%s1257_s1 + $0x150] sm:$0xff] }
  0x10   :  { %v676_v7 = vpack.c.bf16 %v70_v5, %v68_v4  ;;  %v72_v10 = vld [vmem:[%s1257_s1 + $0x168] sm:$0xff]  ;;  %v74_v11 = vld [vmem:[%s1257_s1 + $0x178] sm:$0xff]  ;;  %v678_v12 = vpack.c.bf16 %v69_v9, %v67_v8  ;;  %v71_v14 = vld [vmem:[%s1257_s1 + $0x160] sm:$0xff]  ;;  %v122_v5 = vcombine.high %v927_v47, %v927_v47 }
  0x11   :  { %651 = vmatpush1.bf16.msra.mxu0 %v650_v28  ;;  %v680_v13 = vpack.c.bf16 %v74_v11, %v72_v10  ;;  %v73_v15 = vld [vmem:[%s1257_s1 + $0x170] sm:$0xff]  ;;  %v76_v16 = vld [vmem:[%s1257_s1 + $0x188] sm:$0xff]  ;;  %v78_v17 = vld [vmem:[%s1257_s1 + $0x198] sm:$0xff]  ;;  %v793_v10 = vmov 0.0|0.0  }
  0x12   :  { %653 = vmatprep.subr.bf16.mxu0 %v652_v29  ;;  %v682_v18 = vpack.c.bf16 %v73_v15, %v71_v14  ;;  %v684_v19 = vpack.c.bf16 %v78_v17, %v76_v16  ;;  %v75_v20 = vld [vmem:[%s1257_s1 + $0x180] sm:$0xff]  ;;  %v77_v21 = vld [vmem:[%s1257_s1 + $0x190] sm:$0xff]  ;;  %v80_v22 = vld [vmem:[%s1257_s1 + $0x1a8] sm:$0xff]  ;;  %716 = vmatprep.subr.bf16.mxu1 %v793_v10 }
  0x13   :  { %v82_v23 = vld [vmem:[%s1257_s1 + $0x1b8] sm:$0xff]  ;;  %v686_v24 = vpack.c.bf16 %v77_v21, %v75_v20  ;;  %v79_v26 = vld [vmem:[%s1257_s1 + $0x1a0] sm:$0xff]  ;;  %v81_v27 = vld [vmem:[%s1257_s1 + $0x1b0] sm:$0xff] }
  0x14   :  { %v688_v25 = vpack.c.bf16 %v82_v23, %v80_v22  ;;  %v84_v28 = vld [vmem:[%s1257_s1 + $0x1c8] sm:$0xff]  ;;  %v86_v29 = vld [vmem:[%s1257_s1 + $0x1d8] sm:$0xff]  ;;  %v690_v30 = vpack.c.bf16 %v81_v27, %v79_v26  ;;  %v83_v32 = vld [vmem:[%s1257_s1 + $0x1c0] sm:$0xff] }
  0x15   :  { %655 = vmatpush1.bf16.msra.mxu0 %v654_v36  ;;  %v692_v31 = vpack.c.bf16 %v86_v29, %v84_v28  ;;  %v85_v33 = vld [vmem:[%s1257_s1 + $0x1d0] sm:$0xff]  ;;  %v88_v35 = vld [vmem:[%s1257_s1 + $0x1e8] sm:$0xff]  ;;  %v90_v36 = vld [vmem:[%s1257_s1 + $0x1f8] sm:$0xff] }
  0x16   :  { %657 = vmatprep.subr.bf16.mxu0 %v656_v37  ;;  %v694_v37 = vpack.c.bf16 %v85_v33, %v83_v32  ;;  %v696_v38 = vpack.c.bf16 %v90_v36, %v88_v35  ;;  %v87_v39 = vld [vmem:[%s1257_s1 + $0x1e0] sm:$0xff]  ;;  %v89_v40 = vld [vmem:[%s1257_s1 + $0x1f0] sm:$0xff]  ;;  %v92_v41 = vld [vmem:[%s1257_s1 + $0x208] sm:$0xff] }
  0x17   :  { %v91_v46 = vld [vmem:[%s1257_s1 + $0x200] sm:$0xff]  ;;  %v93_v48 = vld [vmem:[%s1257_s1 + $0x210] sm:$0xff]  ;;  %v96_v49 = vld [vmem:[%s1257_s1 + $0x228] sm:$0xff] }
  0x18   :  { %v702_v52 = vpack.c.bf16 %v93_v48, %v91_v46  ;;  %v95_v54 = vld [vmem:[%s1257_s1 + $0x220] sm:$0xff]  ;;  %v97_v55 = vld [vmem:[%s1257_s1 + $0x230] sm:$0xff]  ;;  %v100_v56 = vld [vmem:[%s1257_s1 + $0x248] sm:$0xff]  ;;  %v113_v48 = vsub.s32 0, %v901_v34 }
  0x19   :  { %659 = vmatpush1.bf16.msra.mxu0 %v658_v43  ;;  %v94_v43 = vld [vmem:[%s1257_s1 + $0x218] sm:$0xff]  ;;  %v99_v61 = vld [vmem:[%s1257_s1 + $0x240] sm:$0xff]  ;;  %v101_v62 = vld [vmem:[%s1257_s1 + $0x250] sm:$0xff] }
  0x1a   :  { %661 = vmatprep.subr.bf16.mxu0 %v660_v44  ;;  %v698_v44 = vpack.c.bf16 %v89_v40, %v87_v39  ;;  %v700_v45 = vpack.c.bf16 %v94_v43, %v92_v41  ;;  %v102_v57 = vld [vmem:[%s1257_s1 + $0x258] sm:$0xff]  ;;  %v104_v63 = vld [vmem:[%s1257_s1 + $0x268] sm:$0xff]  ;;  %v103_v2 = vld [vmem:[%s1257_s1 + $0x260] sm:$0xff] }
  0x1b   :  { %v708_v60 = vpack.c.bf16 %v102_v57, %v100_v56  ;;  %v105_v3 = vld [vmem:[%s1257_s1 + $0x270] sm:$0xff]  ;;  %v107_v8 = vld [vmem:[%s1257_s1 + $0x280] sm:$0xf]  ;;  %v347_v9 = vld [vmem:[%s1259_s3 + $0x8] sm:$0xff] }
  0x1c   :  { %v714_v4 = vpack.c.bf16 %v105_v3, %v103_v2  ;;  %v346_v47 = vld [vmem:[%s1259_s3] sm:$0xff]  ;;  %v348_v11 = vld [vmem:[%s1259_s3 + $0x10] sm:$0xff]  ;;  %v351_v15 = vld [vmem:[%s1259_s3 + $0x28] sm:$0xff] }
  0x1d   :  { %663 = vmatpush1.bf16.msra.mxu0 %v662_v51  ;;  %v98_v51 = vld [vmem:[%s1257_s1 + $0x238] sm:$0xff]  ;;  %v350_v14 = vld [vmem:[%s1259_s3 + $0x20] sm:$0xff]  ;;  %v352_v17 = vld [vmem:[%s1259_s3 + $0x30] sm:$0xff] }
  0x1e   :  { %665 = vmatprep.subr.bf16.mxu0 %v664_v53  ;;  %v704_v53 = vpack.c.bf16 %v98_v51, %v96_v49  ;;  %v723_v16 = vpack.c.bf16 %v351_v15, %v350_v14  ;;  %v354_v20 = vld [vmem:[%s1259_s3 + $0x40] sm:$0xff]  ;;  %v355_v21 = vld [vmem:[%s1259_s3 + $0x48] sm:$0xff]  ;;  %v356_v23 = vld [vmem:[%s1259_s3 + $0x50] sm:$0xff]  ;;  %v117_v51 = vsub.s32 1, %v901_v34 }
  0x1f   :  { %v729_v22 = vpack.c.bf16 %v355_v21, %v354_v20  ;;  %v358_v26 = vld [vmem:[%s1259_s3 + $0x60] sm:$0xff]  ;;  %v359_v27 = vld [vmem:[%s1259_s3 + $0x68] sm:$0xff]  ;;  %v360_v29 = vld [vmem:[%s1259_s3 + $0x70] sm:$0xff] }
  0x20   :  { %v735_v28 = vpack.c.bf16 %v359_v27, %v358_v26  ;;  %v362_v32 = vld [vmem:[%s1259_s3 + $0x80] sm:$0xff]  ;;  %v363_v33 = vld [vmem:[%s1259_s3 + $0x88] sm:$0xff]  ;;  %v364_v36 = vld [vmem:[%s1259_s3 + $0x90] sm:$0xff] }
  0x21   :  { %667 = vmatpush1.bf16.msra.mxu0 %v666_v58  ;;  %v706_v58 = vpack.c.bf16 %v97_v55, %v95_v54  ;;  %v741_v35 = vpack.c.bf16 %v363_v33, %v362_v32  ;;  %v366_v39 = vld [vmem:[%s1259_s3 + $0xa0] sm:$0xff]  ;;  %v367_v40 = vld [vmem:[%s1259_s3 + $0xa8] sm:$0xff]  ;;  %v368_v43 = vld [vmem:[%s1259_s3 + $0xb0] sm:$0xff] }
  0x22   :  { %669 = vmatprep.subr.bf16.mxu0 %v668_v59  ;;  %v792_v59 = vmov 0.0   ;;  %v747_v41 = vpack.c.bf16 %v367_v40, %v366_v39  ;;  %v370_v46 = vld [vmem:[%s1259_s3 + $0xc0] sm:$0xf] }
  0x23   :  { %v109_v49 = vld [vmem:[%s1260_s2] sm:$0x3] }
  0x25   :  { %671 = vmatpush1.bf16.msra.mxu0 %v670_v0  ;;  %v710_v0 = vpack.c.bf16 %v101_v62, %v99_v61 }
  0x26   :  { %673 = vmatprep.subr.bf16.mxu0 %v672_v1 }
  0x29   :  { %675 = vmatpush1.bf16.msra.mxu0 %v674_v6  ;;  %v108_v6 = vld [vmem:[%s1257_s1 + $0x288] sm:$0xf] }
  0x2a   :  { %677 = vmatprep.subr.bf16.mxu0 %v676_v7  ;;  %v136_v7 = vrot.slane %v122_v5, %v916_v42  ;;  %v717_v42 = vpack.c.bf16 %v347_v9, %v346_v47 }
  0x2c   :  { %718 = vmatpush1.bf16.msra.mxu1 %v717_v42 }
  0x2d   :  { %679 = vmatpush1.bf16.msra.mxu0 %v678_v12  ;;  %719 = vmatprep.subr.bf16.mxu1 %v793_v10  ;;  %v349_v12 = vld [vmem:[%s1259_s3 + $0x18] sm:$0xff] }
  0x2e   :  { %681 = vmatprep.subr.bf16.mxu0 %v680_v13  ;;  %v720_v13 = vpack.c.bf16 %v349_v12, %v348_v11 }
  0x30   :  { %721 = vmatpush1.bf16.msra.mxu1 %v720_v13 }
  0x31   :  { %683 = vmatpush1.bf16.msra.mxu0 %v682_v18  ;;  %722 = vmatprep.subr.bf16.mxu1 %v793_v10  ;;  %v353_v18 = vld [vmem:[%s1259_s3 + $0x38] sm:$0xff] }
  0x32   :  { %685 = vmatprep.subr.bf16.mxu0 %v684_v19  ;;  %v726_v19 = vpack.c.bf16 %v353_v18, %v352_v17 }
  0x34   :  { %724 = vmatpush1.bf16.msra.mxu1 %v723_v16 }
  0x35   :  { %687 = vmatpush1.bf16.msra.mxu0 %v686_v24  ;;  %725 = vmatprep.subr.bf16.mxu1 %v793_v10  ;;  %v357_v24 = vld [vmem:[%s1259_s3 + $0x58] sm:$0xff] }
  0x36   :  { %689 = vmatprep.subr.bf16.mxu0 %v688_v25  ;;  %v732_v25 = vpack.c.bf16 %v357_v24, %v356_v23 }
  0x38   :  { %727 = vmatpush1.bf16.msra.mxu1 %v726_v19 }
  0x39   :  { %691 = vmatpush1.bf16.msra.mxu0 %v690_v30  ;;  %728 = vmatprep.subr.bf16.mxu1 %v793_v10  ;;  %v361_v30 = vld [vmem:[%s1259_s3 + $0x78] sm:$0xff] }
  0x3a   :  { %693 = vmatprep.subr.bf16.mxu0 %v692_v31  ;;  %v738_v31 = vpack.c.bf16 %v361_v30, %v360_v29 }
  0x3c   :  { %730 = vmatpush1.bf16.msra.mxu1 %v729_v22 }
  0x3d   :  { %695 = vmatpush1.bf16.msra.mxu0 %v694_v37  ;;  %731 = vmatprep.subr.bf16.mxu1 %v793_v10  ;;  %v365_v37 = vld [vmem:[%s1259_s3 + $0x98] sm:$0xff] }
  0x3e   :  { %697 = vmatprep.subr.bf16.mxu0 %v696_v38  ;;  %v744_v38 = vpack.c.bf16 %v365_v37, %v364_v36 }
  0x40   :  { %733 = vmatpush1.bf16.msra.mxu1 %v732_v25 }
  0x41   :  { %699 = vmatpush1.bf16.msra.mxu0 %v698_v44  ;;  %734 = vmatprep.subr.bf16.mxu1 %v793_v10  ;;  %v369_v44 = vld [vmem:[%s1259_s3 + $0xb8] sm:$0xff] }
  0x42   :  { %701 = vmatprep.subr.bf16.mxu0 %v700_v45  ;;  %v750_v45 = vpack.c.bf16 %v369_v44, %v368_v43  ;;  %v481_v44 = vld [vmem:[%s1261_s5] sm:$0xff] }
  0x44   :  { %215 = vmatmul.mubr.f32.vlgmr.msra.gmra.mrb[0].mxu0 %v937_v50  ;;  %v106_v50 = vld [vmem:[%s1257_s1 + $0x278] sm:$0xff]  ;;  %736 = vmatpush1.bf16.msra.mxu1 %v735_v28 }
  0x45   :  { %703 = vmatpush1.bf16.msra.mxu0 %v702_v52  ;;  %285 = vmatprep.mubr.f32.mxu0 %v792_v59  ;;  %v712_v1 = vpack.c.bf16 %v106_v50, %v104_v63  ;;  %v114_v52 = vrot.slane %v109_v49, %v113_v48  ;;  %v483_v48 = vld [vmem:[%s1261_s5 + $0x10] sm:$0xff] }
  0x46   :  { %705 = vmatprep.subr.bf16.mxu0 %v704_v53  ;;  %737 = vmatprep.subr.bf16.mxu1 %v793_v10  ;;  %v118_v53 = vrot.slane %v109_v49, %v117_v51  ;;  %v484_v49 = vld [vmem:[%s1261_s5 + $0x18] sm:$0xff] }
  0x47   :  { %v756_v51 = vpack.c.bf16 %v484_v49, %v483_v48 }
  0x48   :  { %739 = vmatpush1.bf16.msra.mxu1 %v738_v31 }
  0x49   :  { %707 = vmatpush1.bf16.msra.mxu0 %v706_v58  ;;  %740 = vmatprep.subr.bf16.mxu1 %v793_v10 }
  0x4a   :  { %709 = vmatprep.subr.bf16.mxu0 %v708_v60 }
  0x4c   :  { %742 = vmatpush1.bf16.msra.mxu1 %v741_v35 }
  0x4d   :  { %711 = vmatpush1.bf16.msra.mxu0 %v710_v0  ;;  %743 = vmatprep.subr.bf16.mxu1 %v793_v10 }
  0x4e   :  { %713 = vmatprep.subr.bf16.mxu0 %v712_v1 }
  0x50   :  { %745 = vmatpush1.bf16.msra.mxu1 %v744_v38 }
  0x51   :  { %715 = vmatpush1.bf16.msra.mxu0 %v714_v4  ;;  %746 = vmatprep.subr.bf16.mxu1 %v793_v10 }
  0x52   :  { %584 = vmatprep.subr.msk.mxu0 %vm143_vm0, %v108_v6 }
  0x54   :  { %748 = vmatpush1.bf16.msra.mxu1 %v747_v41 }
  0x55   :  { %585 = vmatpush1.msk.msra.mxu0 %vm143_vm0, %v107_v8  ;;  %749 = vmatprep.subr.bf16.mxu1 %v793_v10 }
  0x56   :  { %586 = vmatmul.mubr.msk.f32.vlgmr.msra.gmra.mrb[0].mxu0 %vm140_vm1, %v136_v7 }
  0x58   :  { %751 = vmatpush1.bf16.msra.mxu1 %v750_v45  ;;  %v482_v45 = vld [vmem:[%s1261_s5 + $0x8] sm:$0xff] }
  0x59   :  { %432 = vmatprep.subr.mxu1 %v792_v59 }
  0x5c   :  { %588 = vmatpush1.msk.msra.mxu1 %vm143_vm0, %v370_v46  ;;  %v753_v46 = vpack.c.bf16 %v482_v45, %v481_v44 }
  0x5d   :  { %752 = vmatprep.subr.bf16.mxu1 %v793_v10 }
 0x129   :  { %v287_v54 = vpop.f32.mrb[0].mxu0 }
 0x12a   :  { %v770_v55 = vadd.f32 %v287_v54, %v114_v52  ;;  %v289_v56 = vpop.f32.mrb[1].mxu0  ;;  %v485_v52 = vld [vmem:[%s1261_s5 + $0x20] sm:$0xff] }
 0x12b   :  { %v771_v57 = vadd.f32 %v289_v56, %v118_v53  ;;  %v486_v53 = vld [vmem:[%s1261_s5 + $0x28] sm:$0xff]  ;;  %v488_v56 = vld [vmem:[%s1261_s5 + $0x38] sm:$0xff] }
 0x12c   :  { %v292_v58 = vmul.f32 0.70710677, %v770_v55  ;;  %v340_v40 = vmul.f32 0.5, %v770_v55  ;;  %v759_v54 = vpack.c.bf16 %v486_v53, %v485_v52  ;;  %v487_v55 = vld [vmem:[%s1261_s5 + $0x30] sm:$0xff] }
 0x12d   :  { %v293_v60 = vmul.f32 0.70710677, %v771_v57  ;;  %v341_v38 = vmul.f32 0.5, %v771_v57  ;;  %v762_v57 = vpack.c.bf16 %v488_v56, %v487_v55 }
 0x12e   :  { %v294_v61 = vand.u32 2147483647, %v292_v58  ;;  %vm334_vm2 = vcmp.lt.f32.partialorder %v292_v58, 0.0  ;;  %v489_v58 = vld [vmem:[%s1261_s5 + $0x40] sm:$0xff] }
 0x12f   :  { %v295_v62 = vand.u32 2147483647, %v293_v60  ;;  %vm335_vm3 = vcmp.lt.f32.partialorder %v293_v60, 0.0  ;;  %v490_v60 = vld [vmem:[%s1261_s5 + $0x48] sm:$0xff] }
 0x130   :  { %v296_v63 = vmul.f32 0.3275911, %v294_v61  ;;  %v322_v2 = vsub.f32 0.0, %v294_v61 }
 0x131   :  { %v297_v50 = vmul.f32 0.3275911, %v295_v62  ;;  %v323_v3 = vsub.f32 0.0, %v295_v62 }
 0x132   :  { %v298_v0 = vadd.f32 1.0, %v296_v63  ;;  %v324_v34 = vmul.f32 %v322_v2, %v294_v61  ;;  %v765_v61 = vpack.c.bf16 %v490_v60, %v489_v58  ;;  %v492_v63 = vld [vmem:[%s1261_s5 + $0x58] sm:$0xff] }
 0x133   :  { %v299_v1 = vadd.f32 1.0, %v297_v50  ;;  %v325_v6 = vmul.f32 %v323_v3, %v295_v62  ;;  %v491_v62 = vld [vmem:[%s1261_s5 + $0x50] sm:$0xff] }
 0x134   :  { %779 = vrcp.f32 %v298_v0  ;;  %v326_v9 = vmul.f32 1.442695, %v324_v34  ;;  %v768_v50 = vpack.c.bf16 %v492_v63, %v491_v62  ;;  %v493_v0 = vld [vmem:[%s1261_s5 + $0x60] sm:$0xf] }
 0x135   :  { %781 = vrcp.f32 %v299_v1  ;;  %v328_v11 = vmul.f32 1.442695, %v325_v6 }
 0x136   :  { %783 = vpow2.f32 %v326_v9 }
 0x137   :  { %785 = vpow2.f32 %v328_v11 }
 0x13e   :  { %v780_v4 = vpop.eup %779 }
 0x13f   :  { %v782_v5 = vpop.eup %781  ;;  %v304_v7 = vmul.f32 1.0614054, %v780_v4 }
 0x140   :  { %v305_v8 = vmul.f32 1.0614054, %v782_v5  ;;  %v784_v25 = vpop.eup %783 }
 0x141   :  { %v306_v47 = vadd.f32 -1.4531521, %v304_v7  ;;  %v786_v27 = vpop.eup %785 }
 0x142   :  { %v307_v42 = vadd.f32 -1.4531521, %v305_v8 }
 0x143   :  { %v308_v12 = vmul.f32 %v780_v4, %v306_v47 }
 0x144   :  { %v309_v13 = vmul.f32 %v782_v5, %v307_v42 }
 0x145   :  { %v310_v14 = vadd.f32 1.4214138, %v308_v12 }
 0x146   :  { %v311_v15 = vadd.f32 1.4214138, %v309_v13 }
 0x147   :  { %v312_v16 = vmul.f32 %v780_v4, %v310_v14 }
 0x148   :  { %v313_v17 = vmul.f32 %v782_v5, %v311_v15 }
 0x149   :  { %v314_v18 = vadd.f32 -0.28449672, %v312_v16 }
 0x14a   :  { %v315_v19 = vadd.f32 -0.28449672, %v313_v17 }
 0x14b   :  { %v316_v20 = vmul.f32 %v780_v4, %v314_v18 }
 0x14c   :  { %v317_v21 = vmul.f32 %v782_v5, %v315_v19 }
 0x14d   :  { %v318_v22 = vadd.f32 0.2548296, %v316_v20 }
 0x14e   :  { %v319_v23 = vadd.f32 0.2548296, %v317_v21 }
 0x14f   :  { %v320_v24 = vmul.f32 %v780_v4, %v318_v22 }
 0x150   :  { %v321_v26 = vmul.f32 %v782_v5, %v319_v23 }
 0x151   :  { %v330_v28 = vmul.f32 %v784_v25, %v320_v24 }
 0x152   :  { %v331_v29 = vmul.f32 %v786_v27, %v321_v26  ;;  %v590_v26 = vld [vmem:[%s1263_s6] ss:$0 sm:$0xff] }
 0x153   :  { %v332_v30 = vsub.f32 1.0, %v330_v28 }
 0x154   :  { %v333_v31 = vsub.f32 1.0, %v331_v29 }
 0x155   :  { %v336_v32 = vsub.f32 0.0, %v332_v30 }
 0x156   :  { %v337_v33 = vsub.f32 0.0, %v333_v31 }
 0x157   :  { %v338_v35 = vsel %vm334_vm2, %v336_v32, %v332_v30 }
 0x158   :  { %v339_v36 = vsel %vm335_vm3, %v337_v33, %v333_v31  ;;  %v342_v37 = vadd.f32 1.0, %v338_v35 }
 0x159   :  { %v343_v39 = vadd.f32 1.0, %v339_v36 }
 0x15a   :  { %v344_v43 = vmul.f32 %v342_v37, %v340_v40 }
 0x15b   :  { %v345_v41 = vmul.f32 %v343_v39, %v341_v38 }
 0x15d   :  { %589 = vmatprep.mubr.msk.f32.mxu1 %vm140_vm1, %v345_v41 }
 0x15e   :  { %449 = vmatmul.mubr.f32.vlgmr.msra.gmra.mrb[0].mxu1 %v344_v43 }
 0x15f   :  { %754 = vmatpush3.bf16.msra.mxu1 %v753_v46  ;;  %633 = vmatprep.mubr.msk.f32.mxu1 %vm794_vm4, %v792_v59 }
 0x160   :  { %755 = vmatprep.subr.bf16.mxu1 %v793_v10 }
 0x163   :  { %757 = vmatpush3.bf16.msra.mxu1 %v756_v51 }
 0x164   :  { %758 = vmatprep.subr.bf16.mxu1 %v793_v10 }
 0x167   :  { %760 = vmatpush3.bf16.msra.mxu1 %v759_v54 }
 0x168   :  { %761 = vmatprep.subr.bf16.mxu1 %v793_v10 }
 0x16b   :  { %763 = vmatpush3.bf16.msra.mxu1 %v762_v57 }
 0x16c   :  { %764 = vmatprep.subr.bf16.mxu1 %v793_v10 }
 0x16f   :  { %766 = vmatpush3.bf16.msra.mxu1 %v765_v61 }
 0x170   :  { %767 = vmatprep.subr.bf16.mxu1 %v793_v10  ;;  %v587_v10 = vld [vmem:[%s1262_s4] ss:$0 sm:$0xff] }
 0x173   :  { %769 = vmatpush3.bf16.msra.mxu1 %v768_v50 }
 0x174   :  { %631 = vmatprep.subr.mxu1 %v792_v59 }
 0x177   :  { %632 = vmatpush3.msk.msra.mxu1 %vm143_vm0, %v493_v0 }
 0x231   :  { %v450_v1 = vpop.f32.mrb[0].mxu1 }
 0x232   :  { %v451_v2 = vadd.f32 %v587_v10, %v450_v1  ;;  %v452_v3 = vpop.f32.mrb[1].mxu1 }
 0x234   :  { %v454_v4 = vmul.f32 0.70710677, %v451_v2  ;;  %v478_v23 = vmul.f32 0.5, %v451_v2 }
 0x236   :  { %v455_v34 = vand.u32 2147483647, %v454_v4  ;;  %vm475_vm5 = vcmp.lt.f32.partialorder %v454_v4, 0.0 }
 0x238   :  { %v456_v5 = vmul.f32 0.3275911, %v455_v34  ;;  %v469_v7 = vsub.f32 0.0, %v455_v34 }
 0x23a   :  { %v457_v6 = vadd.f32 1.0, %v456_v5  ;;  %v470_v47 = vmul.f32 %v469_v7, %v455_v34 }
 0x23c   :  { %787 = vrcp.f32 %v457_v6  ;;  %v471_v11 = vmul.f32 1.442695, %v470_v47 }
 0x23e   :  { %789 = vpow2.f32 %v471_v11 }
 0x246   :  { %v788_v8 = vpop.eup %787 }
 0x247   :  { %v460_v9 = vmul.f32 1.0614054, %v788_v8 }
 0x248   :  { %v790_v18 = vpop.eup %789 }
 0x249   :  { %v461_v42 = vadd.f32 -1.4531521, %v460_v9 }
 0x24b   :  { %v462_v12 = vmul.f32 %v788_v8, %v461_v42 }
 0x24d   :  { %v463_v59 = vadd.f32 1.4214138, %v462_v12 }
 0x24f   :  { %v464_v13 = vmul.f32 %v788_v8, %v463_v59 }
 0x251   :  { %v465_v14 = vadd.f32 -0.28449672, %v464_v13 }
 0x253   :  { %v466_v15 = vmul.f32 %v788_v8, %v465_v14 }
 0x255   :  { %v467_v16 = vadd.f32 0.2548296, %v466_v15 }
 0x257   :  { %v468_v17 = vmul.f32 %v788_v8, %v467_v16 }
 0x259   :  { %v473_v19 = vmul.f32 %v790_v18, %v468_v17 }
 0x25b   :  { %v474_v20 = vsub.f32 1.0, %v473_v19 }
 0x25d   :  { %v476_v21 = vsub.f32 0.0, %v474_v20 }
 0x25f   :  { %v477_v22 = vsel %vm475_vm5, %v476_v21, %v474_v20 }
 0x260   :  { %v479_v24 = vadd.f32 1.0, %v477_v22 }
 0x262   :  { %v480_v25 = vmul.f32 %v479_v24, %v478_v23 }
 0x264   :  { %634 = vmatmul.mubr.msk.f32.vlgmr.msra.gmra.mrb[2].mxu1 %vm501_vm6, %v480_v25 }
 0x337   :  { %v574_v27 = vpop.f32.mrb[2].mxu1 }
 0x338   :  { %v575_v28 = vadd.f32 %v590_v26, %v574_v27  ;;  %v635_v29 = vpop.f32.mrb[3].mxu1 }
 0x33a   :  { %579 = vst.msk [vmem:[%s1264_s7] sm:$0x3] %vm578_vm7, %v575_v28 }

// kernel: esa_forward.5
= control target key start
LH: loop header
LB: loop body
LE: loop exit
PB: predicated region body
PF: predicated region fallthrough
CT: control target
= control target key end

     0   :  { %s4232_s21 = smov 0   ;;  %s4234_s22 = smov 0   ;;  %s4945_s0 = inlined_call_operand.vmem [shape: f32[2,16,4096], index: 0, kind: input, shape index: {}]   ;;  %s4946_s1 = inlined_call_operand.vmem [shape: f32[2,4,4096], index: 1, kind: input, shape index: {}]   ;;  %s4947_s2 = inlined_call_operand.vmem [shape: f32[4,16], index: 2, kind: input, shape index: {}]   ;;  %s4948_s3 = inlined_call_operand.vmem [shape: f32[4,1], index: 3, kind: input, shape index: {}]   ;;  %s4949_s4 = inlined_call_operand.vmem [shape: f32[16,4], index: 4, kind: input, shape index: {}]   ;;  %s4950_s5 = inlined_call_operand.vmem [shape: f32[16,1], index: 5, kind: input, shape index: {}]   ;;  %s4951_s6 = inlined_call_operand.vmem [shape: f32[2,16,4096], index: 6, kind: output, shape index: {}]  }
   0x1   :  { %s4236_s23 = smov 0  }
   0x2 LB: > { %s28_s24 = sadd.s32 1, %s4189_s22  ;;  %p3605_p0 = scmp.ge.s32.totalorder %s4193_s23, 1  ;;  %s4193_s23 = sphi %s4236_s23, %s16_s23   ;;  %s4189_s22 = sphi %s4234_s22, %s4953_s22   ;;  %s4185_s21 = sphi %s4232_s21, %s4952_s21  }
   0x3   : > { %p30_p1 = scmp.ge.s32.totalorder %s28_s24, 2  ;;  %p250_p2 = scmp.lt.s32.totalorder %s4193_s23, 3 }
   0x5   : > { %s4955_s24 = smov (%p30_p1, %s28_s24), 0  ;;  %p251_p3 = pnand %p3605_p0, %p250_p2 }
   0x6   : > { %p298_p4 = scmp.lt.s32.totalorder (!%p251_p3), %s4185_s21, 1  ;;  %v4195_v0 = vmov (!%p251_p3), 0.0   ;;  %v392_v1 = vld [vmem:[%s4948_s3] sm:$0xf] (!%p251_p3)  ;;  %v4196_v2 = vmov (!%p251_p3), 0   ;;  %vm398_vm0 = vcmask (!%p251_p3), 130048  }
   0x7   : > { %254 = sbr.rel (%p251_p3) target bundleno = 606 (0x25e), region = 44  ;;  %466 = vmatprep.mubr.f32.mxu0 (!%p251_p3), %v4195_v0  ;;  %537 = vmatprep.mubr.f32.mxu1 (!%p251_p3), %v4195_v0  ;;  %v1636_v3 = vld [vmem:[%s4950_s5] sm:$0xff] (!%p251_p3)  ;;  %vm1687_vm1 = vcmask (!%p251_p3), 1043456   ;;  %vm1680_vm2 = vcmask (!%p251_p3), 31744  }
   0x8   : > { %3851 = vset.pattern.permute.xlu0 (!%p251_p3), %v4196_v2  ;;  %3852 = vset.pattern.permute.xlu1 (!%p251_p3), %v4196_v2  ;;  %v4284_v15 = vld [vmem:[%s4947_s2] sm:$0xf] (!%p251_p3) }
   0x9   : > { %395 = vperm.xlu0 (!%p251_p3), %3851, %v392_v1  }
   0xd   : > { %1640 = vperm.xlu0 (!%p251_p3), %3851, %v1636_v3  }
   0xe   : > { %s4957_s21 = smov (!%p298_p4, %s4185_s21), 1 }
   0xf   : > { %s3758_s27 = sshll.u32 %s4957_s21, 9  ;;  %s3759_s13 = sshll.u32 %s4957_s21, 7 }
  0x10   : > { %s4266_s8 = scalar_lea.vmem %s4945_s0, %s3758_s27  ;;  %s4400_s16 = scalar_lea.vmem %s4946_s1, %s3759_s13 }
  0x11   : > { %v328_v4 = vld [vmem:[%s4266_s8 + $0x8] sm:$0xff]  ;;  %v330_v6 = vld [vmem:[%s4266_s8 + $0x18] sm:$0xff]  ;;  %v4273_v9 = vld [vmem:[%s4266_s8] sm:$0xff]  ;;  %s4625_s28 = scalar_lea.vmem %s4951_s6, %s3758_s27 }
  0x12   : > { %v360_v5 = vld [vmem:[%s4266_s8 + $0x108] sm:$0xff]  ;;  %v362_v8 = vld [vmem:[%s4266_s8 + $0x118] sm:$0xff]  ;;  %v359_v10 = vld [vmem:[%s4266_s8 + $0x100] sm:$0xff] }
  0x13   : > { %v3761_v7 = vpack.c.bf16 %v360_v5, %v328_v4  ;;  %v3765_v11 = vpack.c.bf16 %v362_v8, %v330_v6  ;;  %v3763_v12 = vpack.c.bf16 %v359_v10, %v4273_v9  ;;  %v4278_v13 = vld [vmem:[%s4266_s8 + $0x10] sm:$0xff]  ;;  %v332_v16 = vld [vmem:[%s4266_s8 + $0x28] sm:$0xff]  ;;  %v334_v19 = vld [vmem:[%s4266_s8 + $0x38] sm:$0xff] }
  0x14   : > { %v361_v14 = vld [vmem:[%s4266_s8 + $0x110] sm:$0xff]  ;;  %v364_v18 = vld [vmem:[%s4266_s8 + $0x128] sm:$0xff]  ;;  %v366_v20 = vld [vmem:[%s4266_s8 + $0x138] sm:$0xff] }
  0x15   : > { %3762 = vmatprep.subr.bf16.mxu0 %v3761_v7  ;;  %v3767_v17 = vpack.c.bf16 %v361_v14, %v4278_v13  ;;  %3766 = vmatprep.subr.bf16.mxu1 %v3765_v11  ;;  %v3769_v21 = vpack.c.bf16 %v364_v18, %v332_v16  ;;  %v3773_v22 = vpack.c.bf16 %v366_v20, %v334_v19  ;;  %v331_v23 = vld [vmem:[%s4266_s8 + $0x20] sm:$0xff]  ;;  %v333_v25 = vld [vmem:[%s4266_s8 + $0x30] sm:$0xff]  ;;  %v336_v28 = vld [vmem:[%s4266_s8 + $0x48] sm:$0xff] }
  0x16   : > { %3764 = vmatpush1.bf16.msra.mxu0 %v3763_v12  ;;  %v363_v24 = vld [vmem:[%s4266_s8 + $0x120] sm:$0xff]  ;;  %v365_v27 = vld [vmem:[%s4266_s8 + $0x130] sm:$0xff]  ;;  %v368_v29 = vld [vmem:[%s4266_s8 + $0x148] sm:$0xff] }
  0x17   : > { %3768 = vmatpush1.bf16.msra.mxu1 %v3767_v17  ;;  %v3771_v26 = vpack.c.bf16 %v363_v24, %v331_v23  ;;  %3770 = vmatprep.subr.bf16.mxu0 %v3769_v21  ;;  %v3775_v30 = vpack.c.bf16 %v365_v27, %v333_v25  ;;  %v3777_v31 = vpack.c.bf16 %v368_v29, %v336_v28  ;;  %v338_v32 = vld [vmem:[%s4266_s8 + $0x58] sm:$0xff]  ;;  %v335_v34 = vld [vmem:[%s4266_s8 + $0x40] sm:$0xff]  ;;  %v337_v37 = vld [vmem:[%s4266_s8 + $0x50] sm:$0xff] }
  0x18   : > { %3774 = vmatprep.subr.bf16.mxu1 %v3773_v22  ;;  %v370_v33 = vld [vmem:[%s4266_s8 + $0x158] sm:$0xff]  ;;  %v367_v36 = vld [vmem:[%s4266_s8 + $0x140] sm:$0xff]  ;;  %v369_v38 = vld [vmem:[%s4266_s8 + $0x150] sm:$0xff] }
  0x19   : > { %3612 = vmatmul.mubr.msk.f32.vlgmr.msra.gmra.mrb[0].mxu0 %vm398_vm0, %v4284_v15  ;;  %v3781_v35 = vpack.c.bf16 %v370_v33, %v338_v32  ;;  %v3779_v39 = vpack.c.bf16 %v367_v36, %v335_v34  ;;  %v340_v40 = vld [vmem:[%s4266_s8 + $0x68] sm:$0xff]  ;;  %v342_v42 = vld [vmem:[%s4266_s8 + $0x78] sm:$0xff]  ;;  %v3783_v43 = vpack.c.bf16 %v369_v38, %v337_v37  ;;  %v339_v45 = vld [vmem:[%s4266_s8 + $0x60] sm:$0xff] }
  0x1a   : > { %3613 = vmatmul.mubr.msk.f32.vlgmr.msra.gmra.mrb[0].mxu1 %vm398_vm0, %v4284_v15  ;;  %3772 = vmatpush1.bf16.msra.mxu0 %v3771_v26  ;;  %v372_v41 = vld [vmem:[%s4266_s8 + $0x168] sm:$0xff]  ;;  %v374_v44 = vld [vmem:[%s4266_s8 + $0x178] sm:$0xff]  ;;  %v371_v46 = vld [vmem:[%s4266_s8 + $0x160] sm:$0xff] }
  0x1b   : > { %3776 = vmatpush1.bf16.msra.mxu1 %v3775_v30  ;;  %608 = vmatprep.mubr.f32.mxu0 %v4195_v0  ;;  %v3785_v47 = vpack.c.bf16 %v372_v41, %v340_v40  ;;  %v341_v48 = vld [vmem:[%s4266_s8 + $0x70] sm:$0xff]  ;;  %v3789_v50 = vpack.c.bf16 %v374_v44, %v342_v42  ;;  %v344_v51 = vld [vmem:[%s4266_s8 + $0x88] sm:$0xff]  ;;  %v3787_v53 = vpack.c.bf16 %v371_v46, %v339_v45  ;;  %v346_v54 = vld [vmem:[%s4266_s8 + $0x98] sm:$0xff] }
  0x1c   : > { %679 = vmatprep.mubr.f32.mxu1 %v4195_v0  ;;  %3778 = vmatprep.subr.bf16.mxu0 %v3777_v31  ;;  %v373_v49 = vld [vmem:[%s4266_s8 + $0x170] sm:$0xff]  ;;  %v376_v52 = vld [vmem:[%s4266_s8 + $0x188] sm:$0xff]  ;;  %v378_v55 = vld [vmem:[%s4266_s8 + $0x198] sm:$0xff] }
  0x1d   : > { %3614 = vmatmul.mubr.msk.f32.vlgmr.msra.gmra.mrb[2].mxu0 %vm398_vm0, %v4284_v15  ;;  %3782 = vmatprep.subr.bf16.mxu1 %v3781_v35  ;;  %v3791_v56 = vpack.c.bf16 %v373_v49, %v341_v48  ;;  %v343_v57 = vld [vmem:[%s4266_s8 + $0x80] sm:$0xff]  ;;  %v3793_v59 = vpack.c.bf16 %v376_v52, %v344_v51  ;;  %v345_v60 = vld [vmem:[%s4266_s8 + $0x90] sm:$0xff]  ;;  %v3797_v62 = vpack.c.bf16 %v378_v55, %v346_v54  ;;  %v348_v63 = vld [vmem:[%s4266_s8 + $0xa8] sm:$0xff] }
  0x1e   : > { %3615 = vmatmul.mubr.msk.f32.vlgmr.msra.gmra.mrb[2].mxu1 %vm398_vm0, %v4284_v15  ;;  %3780 = vmatpush1.bf16.msra.mxu0 %v3779_v39  ;;  %v375_v58 = vld [vmem:[%s4266_s8 + $0x180] sm:$0xff]  ;;  %v377_v61 = vld [vmem:[%s4266_s8 + $0x190] sm:$0xff]  ;;  %v380_v1 = vld [vmem:[%s4266_s8 + $0x1a8] sm:$0xff] }
  0x1f   : > { %3784 = vmatpush1.bf16.msra.mxu1 %v3783_v43  ;;  %750 = vmatprep.mubr.f32.mxu0 %v4195_v0  ;;  %v3795_v2 = vpack.c.bf16 %v375_v58, %v343_v57  ;;  %v350_v3 = vld [vmem:[%s4266_s8 + $0xb8] sm:$0xff]  ;;  %v3799_v5 = vpack.c.bf16 %v377_v61, %v345_v60  ;;  %v347_v6 = vld [vmem:[%s4266_s8 + $0xa0] sm:$0xff]  ;;  %v3801_v8 = vpack.c.bf16 %v380_v1, %v348_v63  ;;  %v349_v10 = vld [vmem:[%s4266_s8 + $0xb0] sm:$0xff] }
  0x20   : > { %821 = vmatprep.mubr.f32.mxu1 %v4195_v0  ;;  %3786 = vmatprep.subr.bf16.mxu0 %v3785_v47  ;;  %v382_v4 = vld [vmem:[%s4266_s8 + $0x1b8] sm:$0xff]  ;;  %v379_v7 = vld [vmem:[%s4266_s8 + $0x1a0] sm:$0xff]  ;;  %v381_v11 = vld [vmem:[%s4266_s8 + $0x1b0] sm:$0xff] }
  0x21   : > { %3616 = vmatmul.mubr.msk.f32.vlgmr.msra.gmra.mrb[4].mxu0 %vm398_vm0, %v4284_v15  ;;  %3790 = vmatprep.subr.bf16.mxu1 %v3789_v50  ;;  %v3805_v12 = vpack.c.bf16 %v382_v4, %v350_v3  ;;  %v352_v14 = vld [vmem:[%s4266_s8 + $0xc8] sm:$0xff]  ;;  %v3803_v17 = vpack.c.bf16 %v379_v7, %v347_v6  ;;  %v354_v18 = vld [vmem:[%s4266_s8 + $0xd8] sm:$0xff]  ;;  %v3807_v20 = vpack.c.bf16 %v381_v11, %v349_v10  ;;  %v351_v21 = vld [vmem:[%s4266_s8 + $0xc0] sm:$0xff] }
  0x22   : > { %3617 = vmatmul.mubr.msk.f32.vlgmr.msra.gmra.mrb[4].mxu1 %vm398_vm0, %v4284_v15  ;;  %3788 = vmatpush1.bf16.msra.mxu0 %v3787_v53  ;;  %v384_v16 = vld [vmem:[%s4266_s8 + $0x1c8] sm:$0xff]  ;;  %v386_v19 = vld [vmem:[%s4266_s8 + $0x1d8] sm:$0xff]  ;;  %v383_v22 = vld [vmem:[%s4266_s8 + $0x1c0] sm:$0xff] }
  0x23   : > { %3792 = vmatpush1.bf16.msra.mxu1 %v3791_v56  ;;  %892 = vmatprep.mubr.f32.mxu0 %v4195_v0  ;;  %v3809_v23 = vpack.c.bf16 %v384_v16, %v352_v14  ;;  %v353_v24 = vld [vmem:[%s4266_s8 + $0xd0] sm:$0xff]  ;;  %v3813_v26 = vpack.c.bf16 %v386_v19, %v354_v18  ;;  %v356_v27 = vld [vmem:[%s4266_s8 + $0xe8] sm:$0xff]  ;;  %v3811_v29 = vpack.c.bf16 %v383_v22, %v351_v21  ;;  %v358_v30 = vld [vmem:[%s4266_s8 + $0xf8] sm:$0xff] }
  0x24   : > { %963 = vmatprep.mubr.f32.mxu1 %v4195_v0  ;;  %3794 = vmatprep.subr.bf16.mxu0 %v3793_v59  ;;  %v385_v25 = vld [vmem:[%s4266_s8 + $0x1d0] sm:$0xff]  ;;  %v388_v28 = vld [vmem:[%s4266_s8 + $0x1e8] sm:$0xff]  ;;  %v390_v31 = vld [vmem:[%s4266_s8 + $0x1f8] sm:$0xff] }
  0x25   : > { %3618 = vmatmul.mubr.msk.f32.vlgmr.msra.gmra.mrb[6].mxu0 %vm398_vm0, %v4284_v15  ;;  %3798 = vmatprep.subr.bf16.mxu1 %v3797_v62  ;;  %v3815_v32 = vpack.c.bf16 %v385_v25, %v353_v24  ;;  %v355_v33 = vld [vmem:[%s4266_s8 + $0xe0] sm:$0xff]  ;;  %v3817_v35 = vpack.c.bf16 %v388_v28, %v356_v27  ;;  %v357_v36 = vld [vmem:[%s4266_s8 + $0xf0] sm:$0xff]  ;;  %v3821_v38 = vpack.c.bf16 %v390_v31, %v358_v30  ;;  %v1637_v41 = vld [vmem:[%s4950_s5 + $0x8] sm:$0xff] }
  0x26   : > { %3619 = vmatmul.mubr.msk.f32.vlgmr.msra.gmra.mrb[6].mxu1 %vm398_vm0, %v4284_v15  ;;  %3796 = vmatpush1.bf16.msra.mxu0 %v3795_v2  ;;  %v387_v34 = vld [vmem:[%s4266_s8 + $0x1e0] sm:$0xff]  ;;  %v389_v37 = vld [vmem:[%s4266_s8 + $0x1f0] sm:$0xff]  ;;  %v1539_v52 = vld [vmem:[%s4400_s16 + $0x8] sm:$0xff] }
  0x27   : > { %3800 = vmatpush1.bf16.msra.mxu1 %v3799_v5  ;;  %1034 = vmatprep.mubr.f32.mxu0 %v4195_v0  ;;  %v3819_v39 = vpack.c.bf16 %v387_v34, %v355_v33  ;;  %v3823_v40 = vpack.c.bf16 %v389_v37, %v357_v36  ;;  %v1538_v49 = vld [vmem:[%s4400_s16] sm:$0xff]  ;;  %v1540_v63 = vld [vmem:[%s4400_s16 + $0x10] sm:$0xff]  ;;  %v1541_v4 = vld [vmem:[%s4400_s16 + $0x18] sm:$0xff] }
  0x28   : > { %1105 = vmatprep.mubr.f32.mxu1 %v4195_v0  ;;  %3802 = vmatprep.subr.bf16.mxu0 %v3801_v8  ;;  %v1543_v24 = vld [vmem:[%s4400_s16 + $0x28] sm:$0xff]  ;;  %v1544_v37 = vld [vmem:[%s4400_s16 + $0x30] sm:$0xff] }
  0x29   : > { %3620 = vmatmul.mubr.msk.f32.vlgmr.msra.gmra.mrb[8].mxu0 %vm398_vm0, %v4284_v15  ;;  %3806 = vmatprep.subr.bf16.mxu1 %v3805_v12  ;;  %v4418_v12 = vld [vmem:[%s4949_s4] sm:$0xff]  ;;  %v4438_v31 = vld [vmem:[%s4949_s4 + $0x8] sm:$0xff] }
  0x2a   : > { %3621 = vmatmul.mubr.msk.f32.vlgmr.msra.gmra.mrb[8].mxu1 %vm398_vm0, %v4284_v15  ;;  %3804 = vmatpush1.bf16.msra.mxu0 %v3803_v17 }
  0x2b   : > { %3808 = vmatpush1.bf16.msra.mxu1 %v3807_v20  ;;  %1176 = vmatprep.mubr.f32.mxu0 %v4195_v0  ;;  %v1542_v20 = vld [vmem:[%s4400_s16 + $0x20] sm:$0xff] }
  0x2c   : > { %1247 = vmatprep.mubr.f32.mxu1 %v4195_v0  ;;  %3810 = vmatprep.subr.bf16.mxu0 %v3809_v23 }
  0x2d   : > { %3622 = vmatmul.mubr.msk.f32.vlgmr.msra.gmra.mrb[10].mxu0 %vm398_vm0, %v4284_v15  ;;  %3814 = vmatprep.subr.bf16.mxu1 %v3813_v26 }
  0x2e   : > { %3623 = vmatmul.mubr.msk.f32.vlgmr.msra.gmra.mrb[10].mxu1 %vm398_vm0, %v4284_v15  ;;  %3812 = vmatpush1.bf16.msra.mxu0 %v3811_v29 }
  0x2f   : > { %3816 = vmatpush1.bf16.msra.mxu1 %v3815_v32  ;;  %1318 = vmatprep.mubr.f32.mxu0 %v4195_v0 }
  0x30   : > { %1389 = vmatprep.mubr.f32.mxu1 %v4195_v0  ;;  %3818 = vmatprep.subr.bf16.mxu0 %v3817_v35 }
  0x31   : > { %3624 = vmatmul.mubr.msk.f32.vlgmr.msra.gmra.mrb[12].mxu0 %vm398_vm0, %v4284_v15  ;;  %3822 = vmatprep.subr.bf16.mxu1 %v3821_v38 }
  0x32   : > { %3625 = vmatmul.mubr.msk.f32.vlgmr.msra.gmra.mrb[12].mxu1 %vm398_vm0, %v4284_v15  ;;  %3820 = vmatpush1.bf16.msra.mxu0 %v3819_v39 }
  0x33   : > { %3824 = vmatpush1.bf16.msra.mxu1 %v3823_v40  ;;  %1460 = vmatprep.mubr.f32.mxu0 %v4195_v0 }
  0x34   : > { %1531 = vmatprep.mubr.f32.mxu1 %v4195_v0  ;;  %1645 = vperm.xlu1 %3852, %v1637_v41   ;;  %v1545_v41 = vld [vmem:[%s4400_s16 + $0x38] sm:$0xff] }
  0x35   : > { %3626 = vmatmul.mubr.msk.f32.vlgmr.msra.gmra.mrb[14].mxu0 %vm398_vm0, %v4284_v15 }
  0x36   : > { %3627 = vmatmul.mubr.msk.f32.vlgmr.msra.gmra.mrb[14].mxu1 %vm398_vm0, %v4284_v15  ;;  %1816 = vmatprep.mubr.f32.mxu0 %v4195_v0 }
  0x37   : > { %1893 = vmatprep.mubr.f32.mxu1 %v4195_v0 }
  0x88   : > { %v4395_v42 = vpop.permute.xlu0 %395 }
  0xec   : > { %v468_v43 = vpop.f32.mrb[0].mxu0 }
  0xed   : > { %v469_v15 = vadd.f32 %v468_v43, %v4395_v42  ;;  %v539_v44 = vpop.f32.mrb[0].mxu1  ;;  %v470_v45 = vpop.f32.mrb[1].mxu0 }
  0xee   : > { %v540_v46 = vadd.f32 %v539_v44, %v4395_v42  ;;  %v471_v47 = vadd.f32 %v470_v45, %v4395_v42  ;;  %v541_v48 = vpop.f32.mrb[1].mxu1 }
  0xef   : > { %v542_v50 = vadd.f32 %v541_v48, %v4395_v42 }
  0xf0   : > { %v1586_v51 = vcombine.low %v469_v15, %v471_v47  ;;  %v610_v53 = vpop.f32.mrb[2].mxu0 }
  0xf1   : > { %v1587_v54 = vcombine.low %v540_v46, %v542_v50  ;;  %v611_v55 = vadd.f32 %v610_v53, %v4395_v42  ;;  %v681_v56 = vpop.f32.mrb[2].mxu1  ;;  %v612_v57 = vpop.f32.mrb[3].mxu0 }
  0xf2   : > { %v1618_v58 = vadd.f32 %v1586_v51, %v1538_v49  ;;  %v682_v59 = vadd.f32 %v681_v56, %v4395_v42  ;;  %v613_v60 = vadd.f32 %v612_v57, %v4395_v42  ;;  %v683_v61 = vpop.f32.mrb[3].mxu1 }
  0xf3   : > { %v1619_v62 = vadd.f32 %v1587_v54, %v1539_v52  ;;  %v684_v1 = vadd.f32 %v683_v61, %v4395_v42 }
  0xf4   : > { %v1664_v2 = vcombine.high %v1618_v58, %v1618_v58  ;;  %v1588_v3 = vcombine.low %v611_v55, %v613_v60  ;;  %v752_v5 = vpop.f32.mrb[4].mxu0 }
  0xf5   : > { %v1665_v6 = vcombine.high %v1619_v62, %v1619_v62  ;;  %v1589_v7 = vcombine.low %v682_v59, %v684_v1  ;;  %v753_v8 = vadd.f32 %v752_v5, %v4395_v42  ;;  %v823_v10 = vpop.f32.mrb[4].mxu1  ;;  %v754_v11 = vpop.f32.mrb[5].mxu0 }
  0xf6   : > { %v1620_v14 = vadd.f32 %v1588_v3, %v1540_v63  ;;  %v824_v16 = vadd.f32 %v823_v10, %v4395_v42  ;;  %v755_v17 = vadd.f32 %v754_v11, %v4395_v42  ;;  %v825_v18 = vpop.f32.mrb[5].mxu1  ;;  %3628 = vmatprep.subr.msk.mxu0 %vm1687_vm1, %v1664_v2  ;;  %v1547_v63 = vld [vmem:[%s4400_s16 + $0x48] sm:$0xff] }
  0xf7   : > { %v1621_v19 = vadd.f32 %v1589_v7, %v1541_v4  ;;  %v826_v21 = vadd.f32 %v825_v18, %v4395_v42  ;;  %3632 = vmatprep.subr.msk.mxu1 %vm1687_vm1, %v1665_v6  ;;  %3629 = vmatpush1.msk.msra.mxu0 %vm1687_vm1, %v1618_v58  ;;  %v1546_v58 = vld [vmem:[%s4400_s16 + $0x40] sm:$0xff] }
  0xf8   : > { %v1666_v22 = vcombine.high %v1620_v14, %v1620_v14  ;;  %v1590_v23 = vcombine.low %v753_v8, %v755_v17  ;;  %3633 = vmatpush1.msk.msra.mxu1 %vm1687_vm1, %v1619_v62  ;;  %v894_v25 = vpop.f32.mrb[6].mxu0  ;;  %3630 = vmatmul.mubr.msk.f32.vlgmr.msra.gmra.mrb[16].mxu0 %vm1680_vm2, %v4418_v12 }
  0xf9   : > { %v1667_v26 = vcombine.high %v1621_v19, %v1621_v19  ;;  %v1591_v27 = vcombine.low %v824_v16, %v826_v21  ;;  %v895_v28 = vadd.f32 %v894_v25, %v4395_v42  ;;  %v965_v29 = vpop.f32.mrb[6].mxu1  ;;  %3634 = vmatmul.mubr.msk.f32.vlgmr.msra.gmra.mrb[16].mxu1 %vm1680_vm2, %v4418_v12  ;;  %v896_v30 = vpop.f32.mrb[7].mxu0  ;;  %1822 = vmatprep.mubr.f32.mxu0 %v4195_v0  ;;  %v1548_v25 = vld [vmem:[%s4400_s16 + $0x50] sm:$0xff] }
  0xfa   : > { %v1622_v32 = vadd.f32 %v1590_v23, %v1542_v20  ;;  %v966_v33 = vadd.f32 %v965_v29, %v4395_v42  ;;  %v897_v34 = vadd.f32 %v896_v30, %v4395_v42  ;;  %v967_v35 = vpop.f32.mrb[7].mxu1  ;;  %3636 = vmatprep.subr.msk.mxu0 %vm1687_vm1, %v1666_v22  ;;  %1899 = vmatprep.mubr.f32.mxu1 %v4195_v0  ;;  %v1549_v30 = vld [vmem:[%s4400_s16 + $0x58] sm:$0xff] }
  0xfb   : > { %v1623_v36 = vadd.f32 %v1591_v27, %v1543_v24  ;;  %v968_v38 = vadd.f32 %v967_v35, %v4395_v42  ;;  %3640 = vmatprep.subr.msk.mxu1 %vm1687_vm1, %v1667_v26  ;;  %3637 = vmatpush1.msk.msra.mxu0 %vm1687_vm1, %v1620_v14 }
  0xfc   : > { %v1668_v39 = vcombine.high %v1622_v32, %v1622_v32  ;;  %v1592_v40 = vcombine.low %v895_v28, %v897_v34  ;;  %3641 = vmatpush1.msk.msra.mxu1 %vm1687_vm1, %v1621_v19  ;;  %v1036_v43 = vpop.f32.mrb[8].mxu0  ;;  %3631 = vmatmul.mubr.msk.f32.gmra.mrb[18].mxu0 %vm1680_vm2, %v4438_v31 }
  0xfd   : > { %v1669_v15 = vcombine.high %v1623_v36, %v1623_v36  ;;  %v1593_v44 = vcombine.low %v966_v33, %v968_v38  ;;  %v1037_v45 = vadd.f32 %v1036_v43, %v4395_v42  ;;  %v1107_v46 = vpop.f32.mrb[8].mxu1  ;;  %3635 = vmatmul.mubr.msk.f32.gmra.mrb[18].mxu1 %vm1680_vm2, %v4438_v31  ;;  %v1038_v47 = vpop.f32.mrb[9].mxu0  ;;  %1970 = vmatprep.mubr.f32.mxu0 %v4195_v0  ;;  %v1551_v43 = vld [vmem:[%s4400_s16 + $0x68] sm:$0xff] }
  0xfe   : > { %v1624_v48 = vadd.f32 %v1592_v40, %v1544_v37  ;;  %v1108_v49 = vadd.f32 %v1107_v46, %v4395_v42  ;;  %v1039_v50 = vadd.f32 %v1038_v47, %v4395_v42  ;;  %v1109_v51 = vpop.f32.mrb[9].mxu1  ;;  %3644 = vmatprep.subr.msk.mxu0 %vm1687_vm1, %v1668_v39  ;;  %2047 = vmatprep.mubr.f32.mxu1 %v4195_v0  ;;  %v1552_v47 = vld [vmem:[%s4400_s16 + $0x70] sm:$0xff] }
  0xff   : > { %v1625_v52 = vadd.f32 %v1593_v44, %v1545_v41  ;;  %v1110_v53 = vadd.f32 %v1109_v51, %v4395_v42  ;;  %3648 = vmatprep.subr.msk.mxu1 %vm1687_vm1, %v1669_v15  ;;  %v1550_v41 = vld [vmem:[%s4400_s16 + $0x60] sm:$0xff] }
 0x100   : > { %v1670_v54 = vcombine.high %v1624_v48, %v1624_v48  ;;  %v1594_v55 = vcombine.low %v1037_v45, %v1039_v50  ;;  %v1178_v56 = vpop.f32.mrb[10].mxu0  ;;  %3638 = vmatmul.mubr.msk.f32.vlgmr.msra.gmra.mrb[20].mxu0 %vm1680_vm2, %v4418_v12 }
 0x101   : > { %v1671_v57 = vcombine.high %v1625_v52, %v1625_v52  ;;  %v1595_v59 = vcombine.low %v1108_v49, %v1110_v53  ;;  %v1179_v60 = vadd.f32 %v1178_v56, %v4395_v42  ;;  %v1249_v61 = vpop.f32.mrb[10].mxu1  ;;  %3642 = vmatmul.mubr.msk.f32.vlgmr.msra.gmra.mrb[20].mxu1 %vm1680_vm2, %v4418_v12  ;;  %3645 = vmatpush1.msk.msra.mxu0 %vm1687_vm1, %v1622_v32  ;;  %v1180_v62 = vpop.f32.mrb[11].mxu0 }
 0x102   : > { %v1250_v1 = vadd.f32 %v1249_v61, %v4395_v42  ;;  %3649 = vmatpush1.msk.msra.mxu1 %vm1687_vm1, %v1623_v36  ;;  %v1181_v2 = vadd.f32 %v1180_v62, %v4395_v42  ;;  %v1251_v3 = vpop.f32.mrb[11].mxu1  ;;  %3652 = vmatprep.subr.msk.mxu0 %vm1687_vm1, %v1670_v54  ;;  %v1626_v5 = vadd.f32 %v1594_v55, %v1546_v58  ;;  %v4586_v53 = vpop.permute.xlu0 %1640 }
 0x103   : > { %v1252_v4 = vadd.f32 %v1251_v3, %v4395_v42  ;;  %3656 = vmatprep.subr.msk.mxu1 %vm1687_vm1, %v1671_v57  ;;  %1976 = vmatprep.mubr.f32.mxu0 %v4195_v0  ;;  %v1627_v8 = vadd.f32 %v1595_v59, %v1547_v63 }
 0x104   : > { %v1596_v6 = vcombine.low %v1179_v60, %v1181_v2  ;;  %2053 = vmatprep.mubr.f32.mxu1 %v4195_v0  ;;  %v1320_v7 = vpop.f32.mrb[12].mxu0  ;;  %3639 = vmatmul.mubr.msk.f32.gmra.mrb[22].mxu0 %vm1680_vm2, %v4438_v31  ;;  %v1672_v21 = vcombine.high %v1626_v5, %v1626_v5  ;;  %v4591_v60 = vpop.permute.xlu1 %1645 }
 0x105   : > { %v1597_v10 = vcombine.low %v1250_v1, %v1252_v4  ;;  %v1321_v11 = vadd.f32 %v1320_v7, %v4395_v42  ;;  %v1391_v14 = vpop.f32.mrb[12].mxu1  ;;  %3643 = vmatmul.mubr.msk.f32.gmra.mrb[22].mxu1 %vm1680_vm2, %v4438_v31  ;;  %v1322_v16 = vpop.f32.mrb[13].mxu0  ;;  %2124 = vmatprep.mubr.f32.mxu0 %v4195_v0  ;;  %v1673_v24 = vcombine.high %v1627_v8, %v1627_v8 }
 0x106   : > { %v1392_v17 = vadd.f32 %v1391_v14, %v4395_v42  ;;  %v1323_v18 = vadd.f32 %v1322_v16, %v4395_v42  ;;  %v1393_v19 = vpop.f32.mrb[13].mxu1  ;;  %2201 = vmatprep.mubr.f32.mxu1 %v4195_v0  ;;  %v1628_v36 = vadd.f32 %v1596_v6, %v1548_v25 }
 0x107   : > { %v1394_v20 = vadd.f32 %v1393_v19, %v4395_v42  ;;  %v1629_v38 = vadd.f32 %v1597_v10, %v1549_v30 }
 0x108   : > { %v1598_v22 = vcombine.low %v1321_v11, %v1323_v18  ;;  %v1462_v23 = vpop.f32.mrb[14].mxu0  ;;  %3646 = vmatmul.mubr.msk.f32.vlgmr.msra.gmra.mrb[24].mxu0 %vm1680_vm2, %v4418_v12 }
 0x109   : > { %v1599_v26 = vcombine.low %v1392_v17, %v1394_v20  ;;  %v1463_v27 = vadd.f32 %v1462_v23, %v4395_v42  ;;  %v1533_v28 = vpop.f32.mrb[14].mxu1  ;;  %3650 = vmatmul.mubr.msk.f32.vlgmr.msra.gmra.mrb[24].mxu1 %vm1680_vm2, %v4418_v12  ;;  %3653 = vmatpush1.msk.msra.mxu0 %vm1687_vm1, %v1624_v48  ;;  %v1464_v29 = vpop.f32.mrb[15].mxu0  ;;  %v1675_v40 = vcombine.high %v1629_v38, %v1629_v38  ;;  %v1553_v48 = vld [vmem:[%s4400_s16 + $0x78] sm:$0xff] }
 0x10a   : > { %v1534_v32 = vadd.f32 %v1533_v28, %v4395_v42  ;;  %3657 = vmatpush1.msk.msra.mxu1 %vm1687_vm1, %v1625_v52  ;;  %v1465_v33 = vadd.f32 %v1464_v29, %v4395_v42  ;;  %v1535_v34 = vpop.f32.mrb[15].mxu1  ;;  %3660 = vmatprep.subr.msk.mxu0 %vm1687_vm1, %v1672_v21  ;;  %v1630_v15 = vadd.f32 %v1598_v22, %v1550_v41 }
 0x10b   : > { %v1536_v35 = vadd.f32 %v1535_v34, %v4395_v42  ;;  %3664 = vmatprep.subr.msk.mxu1 %vm1687_vm1, %v1673_v24  ;;  %2130 = vmatprep.mubr.f32.mxu0 %v4195_v0  ;;  %v1674_v42 = vcombine.high %v1628_v36, %v1628_v36  ;;  %v1631_v44 = vadd.f32 %v1599_v26, %v1551_v43 }
 0x10c   : > { %v1600_v37 = vcombine.low %v1463_v27, %v1465_v33  ;;  %2207 = vmatprep.mubr.f32.mxu1 %v4195_v0  ;;  %3647 = vmatmul.mubr.msk.f32.gmra.mrb[26].mxu0 %vm1680_vm2, %v4438_v31  ;;  %v1676_v45 = vcombine.high %v1630_v15, %v1630_v15 }
 0x10d   : > { %v1601_v39 = vcombine.low %v1534_v32, %v1536_v35  ;;  %3651 = vmatmul.mubr.msk.f32.gmra.mrb[26].mxu1 %vm1680_vm2, %v4438_v31  ;;  %2278 = vmatprep.mubr.f32.mxu0 %v4195_v0  ;;  %v1677_v46 = vcombine.high %v1631_v44, %v1631_v44 }
 0x10e   : > { %2355 = vmatprep.mubr.f32.mxu1 %v4195_v0  ;;  %v1632_v49 = vadd.f32 %v1600_v37, %v1552_v47 }
 0x10f   : > { %v1633_v50 = vadd.f32 %v1601_v39, %v1553_v48 }
 0x110   : > { %3654 = vmatmul.mubr.msk.f32.vlgmr.msra.gmra.mrb[28].mxu0 %vm1680_vm2, %v4418_v12  ;;  %v1678_v51 = vcombine.high %v1632_v49, %v1632_v49 }
 0x111   : > { %3658 = vmatmul.mubr.msk.f32.vlgmr.msra.gmra.mrb[28].mxu1 %vm1680_vm2, %v4418_v12  ;;  %3661 = vmatpush1.msk.msra.mxu0 %vm1687_vm1, %v1626_v5  ;;  %v1679_v52 = vcombine.high %v1633_v50, %v1633_v50 }
 0x112   : > { %3665 = vmatpush1.msk.msra.mxu1 %vm1687_vm1, %v1627_v8  ;;  %3668 = vmatprep.subr.msk.mxu0 %vm1687_vm1, %v1674_v42 }
 0x113   : > { %3672 = vmatprep.subr.msk.mxu1 %vm1687_vm1, %v1675_v40  ;;  %2284 = vmatprep.mubr.f32.mxu0 %v4195_v0 }
 0x114   : > { %2361 = vmatprep.mubr.f32.mxu1 %v4195_v0  ;;  %3655 = vmatmul.mubr.msk.f32.gmra.mrb[30].mxu0 %vm1680_vm2, %v4438_v31 }
 0x115   : > { %3659 = vmatmul.mubr.msk.f32.gmra.mrb[30].mxu1 %vm1680_vm2, %v4438_v31  ;;  %2432 = vmatprep.mubr.f32.mxu0 %v4195_v0 }
 0x116   : > { %2509 = vmatprep.mubr.f32.mxu1 %v4195_v0 }
 0x118   : > { %3662 = vmatmul.mubr.msk.f32.vlgmr.msra.gmra.mrb[32].mxu0 %vm1680_vm2, %v4418_v12 }
 0x119   : > { %3666 = vmatmul.mubr.msk.f32.vlgmr.msra.gmra.mrb[32].mxu1 %vm1680_vm2, %v4418_v12  ;;  %3669 = vmatpush1.msk.msra.mxu0 %vm1687_vm1, %v1628_v36 }
 0x11a   : > { %3673 = vmatpush1.msk.msra.mxu1 %vm1687_vm1, %v1629_v38  ;;  %3676 = vmatprep.subr.msk.mxu0 %vm1687_vm1, %v1676_v45 }
 0x11b   : > { %3680 = vmatprep.subr.msk.mxu1 %vm1687_vm1, %v1677_v46  ;;  %2438 = vmatprep.mubr.f32.mxu0 %v4195_v0 }
 0x11c   : > { %2515 = vmatprep.mubr.f32.mxu1 %v4195_v0  ;;  %3663 = vmatmul.mubr.msk.f32.gmra.mrb[34].mxu0 %vm1680_vm2, %v4438_v31 }
 0x11d   : > { %3667 = vmatmul.mubr.msk.f32.gmra.mrb[34].mxu1 %vm1680_vm2, %v4438_v31  ;;  %2586 = vmatprep.mubr.f32.mxu0 %v4195_v0 }
 0x11e   : > { %2663 = vmatprep.mubr.f32.mxu1 %v4195_v0 }
 0x120   : > { %3670 = vmatmul.mubr.msk.f32.vlgmr.msra.gmra.mrb[36].mxu0 %vm1680_vm2, %v4418_v12 }
 0x121   : > { %3674 = vmatmul.mubr.msk.f32.vlgmr.msra.gmra.mrb[36].mxu1 %vm1680_vm2, %v4418_v12  ;;  %3677 = vmatpush1.msk.msra.mxu0 %vm1687_vm1, %v1630_v15 }
 0x122   : > { %3681 = vmatpush1.msk.msra.mxu1 %vm1687_vm1, %v1631_v44  ;;  %3684 = vmatprep.subr.msk.mxu0 %vm1687_vm1, %v1678_v51 }
 0x123   : > { %3688 = vmatprep.subr.msk.mxu1 %vm1687_vm1, %v1679_v52  ;;  %2592 = vmatprep.mubr.f32.mxu0 %v4195_v0 }
 0x124   : > { %2669 = vmatprep.mubr.f32.mxu1 %v4195_v0  ;;  %3671 = vmatmul.mubr.msk.f32.gmra.mrb[38].mxu0 %vm1680_vm2, %v4438_v31 }
 0x125   : > { %3675 = vmatmul.mubr.msk.f32.gmra.mrb[38].mxu1 %vm1680_vm2, %v4438_v31  ;;  %2740 = vmatprep.mubr.f32.mxu0 %v4195_v0 }
 0x126   : > { %2817 = vmatprep.mubr.f32.mxu1 %v4195_v0 }
 0x128   : > { %3678 = vmatmul.mubr.msk.f32.vlgmr.msra.gmra.mrb[40].mxu0 %vm1680_vm2, %v4418_v12 }
 0x129   : > { %3682 = vmatmul.mubr.msk.f32.vlgmr.msra.gmra.mrb[40].mxu1 %vm1680_vm2, %v4418_v12  ;;  %3685 = vmatpush1.msk.msra.mxu0 %vm1687_vm1, %v1632_v49 }
 0x12a   : > { %3689 = vmatpush1.msk.msra.mxu1 %vm1687_vm1, %v1633_v50  ;;  %2746 = vmatprep.mubr.f32.mxu0 %v4195_v0 }
 0x12b   : > { %2823 = vmatprep.mubr.f32.mxu1 %v4195_v0 }
 0x12c   : > { %3679 = vmatmul.mubr.msk.f32.gmra.mrb[42].mxu0 %vm1680_vm2, %v4438_v31 }
 0x12d   : > { %3683 = vmatmul.mubr.msk.f32.gmra.mrb[42].mxu1 %vm1680_vm2, %v4438_v31  ;;  %2894 = vmatprep.mubr.f32.mxu0 %v4195_v0 }
 0x12e   : > { %2971 = vmatprep.mubr.f32.mxu1 %v4195_v0 }
 0x130   : > { %3686 = vmatmul.mubr.msk.f32.vlgmr.msra.gmra.mrb[44].mxu0 %vm1680_vm2, %v4418_v12 }
 0x131   : > { %3690 = vmatmul.mubr.msk.f32.vlgmr.msra.gmra.mrb[44].mxu1 %vm1680_vm2, %v4418_v12  ;;  %2900 = vmatprep.mubr.f32.mxu0 %v4195_v0 }
 0x132   : > { %2977 = vmatprep.mubr.f32.mxu1 %v4195_v0 }
 0x134   : > { %3687 = vmatmul.mubr.msk.f32.gmra.mrb[46].mxu0 %vm1680_vm2, %v4438_v31 }
 0x135   : > { %3691 = vmatmul.mubr.msk.f32.gmra.mrb[46].mxu1 %vm1680_vm2, %v4438_v31 }
 0x1cb   : > { %v1818_v54 = vpop.f32.mrb[16].mxu0 }
 0x1cc   : > { %v1819_v55 = vadd.f32 %v1818_v54, %v4586_v53  ;;  %v1895_v56 = vpop.f32.mrb[16].mxu1  ;;  %v1820_v57 = vpop.f32.mrb[17].mxu0 }
 0x1cd   : > { %v1896_v58 = vadd.f32 %v1895_v56, %v4586_v53  ;;  %v1821_v12 = vadd.f32 %v1820_v57, %v4586_v53  ;;  %v1897_v59 = vpop.f32.mrb[17].mxu1 }
 0x1ce   : > { %v3692_v0 = vmul.f32 -1.442695, %v1819_v55  ;;  %v1898_v61 = vadd.f32 %v1897_v59, %v4586_v53 }
 0x1cf   : > { %v3694_v62 = vmul.f32 -1.442695, %v1896_v58  ;;  %v3693_v63 = vmul.f32 -1.442695, %v1821_v12  ;;  %v1824_v31 = vpop.f32.mrb[18].mxu0 }
 0x1d0   : > { %3853 = vpow2.f32 %v3692_v0  ;;  %v3695_v1 = vmul.f32 -1.442695, %v1898_v61  ;;  %v1901_v2 = vpop.f32.mrb[18].mxu1  ;;  %v1825_v3 = vadd.f32 %v1824_v31, %v4591_v60  ;;  %v1826_v4 = vpop.f32.mrb[19].mxu0 }
 0x1d1   : > { %3855 = vpow2.f32 %v3694_v62  ;;  %v1902_v5 = vadd.f32 %v1901_v2, %v4591_v60  ;;  %v1827_v6 = vadd.f32 %v1826_v4, %v4591_v60  ;;  %v1903_v7 = vpop.f32.mrb[19].mxu1 }
 0x1d2   : > { %3857 = vpow2.f32 %v3693_v63  ;;  %v3724_v8 = vmul.f32 -1.442695, %v1825_v3  ;;  %v1904_v10 = vadd.f32 %v1903_v7, %v4591_v60 }
 0x1d3   : > { %3859 = vpow2.f32 %v3695_v1  ;;  %v3726_v11 = vmul.f32 -1.442695, %v1902_v5  ;;  %v3725_v14 = vmul.f32 -1.442695, %v1827_v6  ;;  %v1972_v16 = vpop.f32.mrb[20].mxu0 }
 0x1d4   : > { %3861 = vpow2.f32 %v3724_v8  ;;  %v3727_v17 = vmul.f32 -1.442695, %v1904_v10  ;;  %v1973_v18 = vadd.f32 %v1972_v16, %v4586_v53  ;;  %v2049_v19 = vpop.f32.mrb[20].mxu1  ;;  %v1974_v20 = vpop.f32.mrb[21].mxu0 }
 0x1d5   : > { %3863 = vpow2.f32 %v3726_v11  ;;  %v2050_v21 = vadd.f32 %v2049_v19, %v4586_v53  ;;  %v1975_v22 = vadd.f32 %v1974_v20, %v4586_v53  ;;  %v2051_v23 = vpop.f32.mrb[21].mxu1 }
 0x1d6   : > { %3865 = vpow2.f32 %v3725_v14  ;;  %v3696_v24 = vmul.f32 -1.442695, %v1973_v18  ;;  %v2052_v25 = vadd.f32 %v2051_v23, %v4586_v53 }
 0x1d7   : > { %3867 = vpow2.f32 %v3727_v17  ;;  %v3698_v26 = vmul.f32 -1.442695, %v2050_v21  ;;  %v3697_v27 = vmul.f32 -1.442695, %v1975_v22  ;;  %v1978_v28 = vpop.f32.mrb[22].mxu0 }
 0x1d8   : > { %3869 = vpow2.f32 %v3696_v24  ;;  %v3699_v29 = vmul.f32 -1.442695, %v2052_v25  ;;  %v1979_v30 = vadd.f32 %v1978_v28, %v4591_v60  ;;  %v2055_v32 = vpop.f32.mrb[22].mxu1  ;;  %v1980_v33 = vpop.f32.mrb[23].mxu0 }
 0x1d9   : > { %3871 = vpow2.f32 %v3698_v26  ;;  %v2057_v34 = vpop.f32.mrb[23].mxu1  ;;  %v2056_v0 = vadd.f32 %v2055_v32, %v4591_v60  ;;  %v1981_v63 = vadd.f32 %v1980_v33, %v4591_v60 }
 0x1da   : > { %v3854_v35 = vpop.eup %3853  ;;  %3873 = vpow2.f32 %v3697_v27  ;;  %v3728_v36 = vmul.f32 -1.442695, %v1979_v30  ;;  %v2058_v3 = vadd.f32 %v2057_v34, %v4591_v60 }
 0x1db   : > { %v3856_v37 = vpop.eup %3855  ;;  %v3176_v38 = vadd.f32 1.0, %v3854_v35  ;;  %3875 = vpow2.f32 %v3699_v29  ;;  %v2126_v39 = vpop.f32.mrb[24].mxu0  ;;  %v3730_v16 = vmul.f32 -1.442695, %v2056_v0  ;;  %v3729_v20 = vmul.f32 -1.442695, %v1981_v63 }
 0x1dc   : > { %v3858_v42 = vpop.eup %3857  ;;  %v3178_v40 = vadd.f32 1.0, %v3856_v37  ;;  %3877 = vpow2.f32 %v3728_v36  ;;  %v2203_v41 = vpop.f32.mrb[24].mxu1  ;;  %v2127_v8 = vadd.f32 %v2126_v39, %v4586_v53  ;;  %v3731_v25 = vmul.f32 -1.442695, %v2058_v3  ;;  %v4109_v35 = vld [vmem:[%s4266_s8 + $0x8] sm:$0xff]  ;;  %v4115_v3 = vld [vmem:[%s4266_s8 + $0x20] sm:$0xff] }
 0x1dd   : > { %v2128_v43 = vpop.f32.mrb[25].mxu0  ;;  %v3860_v15 = vpop.eup %3859  ;;  %3879 = vrcp.f32 %v3176_v38  ;;  %v3177_v44 = vadd.f32 1.0, %v3858_v42  ;;  %v2204_v17 = vadd.f32 %v2203_v41, %v4586_v53  ;;  %v4110_v42 = vld [vmem:[%s4266_s8 + $0x18] sm:$0xff] }
 0x1de   : > { %v2205_v45 = vpop.f32.mrb[25].mxu1  ;;  %v3862_v46 = vpop.eup %3861  ;;  %3881 = vrcp.f32 %v3178_v40  ;;  %v3179_v47 = vadd.f32 1.0, %v3860_v15  ;;  %v2129_v21 = vadd.f32 %v2128_v43, %v4586_v53  ;;  %v3700_v32 = vmul.f32 -1.442695, %v2127_v8 }
 0x1df   : > { %v3864_v48 = vpop.eup %3863  ;;  %3883 = vrcp.f32 %v3177_v44  ;;  %v3208_v49 = vadd.f32 1.0, %v3862_v46  ;;  %v2132_v50 = vpop.f32.mrb[26].mxu0  ;;  %v2206_v26 = vadd.f32 %v2205_v45, %v4586_v53  ;;  %v3702_v37 = vmul.f32 -1.442695, %v2204_v17  ;;  %v4111_v44 = vld [vmem:[%s4266_s8 + $0x100] sm:$0xff] }
 0x1e0   : > { %v3866_v51 = vpop.eup %3865  ;;  %3885 = vrcp.f32 %v3179_v47  ;;  %v3210_v52 = vadd.f32 1.0, %v3864_v48  ;;  %v2209_v54 = vpop.f32.mrb[26].mxu1  ;;  %v2133_v33 = vadd.f32 %v2132_v50, %v4591_v60  ;;  %v3701_v40 = vmul.f32 -1.442695, %v2129_v21  ;;  %v4117_v21 = vld [vmem:[%s4266_s8 + $0x28] sm:$0xff] }
 0x1e1   : > { %v4603_v55 = vpop.f32.mrb[27].mxu0  ;;  %v3868_v56 = vpop.eup %3867  ;;  %3887 = vrcp.f32 %v3208_v49  ;;  %v3209_v57 = vadd.f32 1.0, %v3866_v51  ;;  %v2210_v38 = vadd.f32 %v2209_v54, %v4591_v60  ;;  %v3703_v46 = vmul.f32 -1.442695, %v2206_v26  ;;  %v4112_v51 = vld [vmem:[%s4266_s8 + $0x110] sm:$0xff]  ;;  %v4118_v26 = vld [vmem:[%s4266_s8 + $0x38] sm:$0xff] }
 0x1e2   : > { %v4605_v58 = vpop.f32.mrb[27].mxu1  ;;  %v3870_v12 = vpop.eup %3869  ;;  %3889 = vrcp.f32 %v3210_v52  ;;  %v3211_v59 = vadd.f32 1.0, %v3868_v56  ;;  %v2135_v41 = vadd.f32 %v4603_v55, %v4591_v60  ;;  %v3732_v54 = vmul.f32 -1.442695, %v2133_v33 }
 0x1e3   : > { %v3872_v61 = vpop.eup %3871  ;;  %3891 = vrcp.f32 %v3209_v57  ;;  %v3180_v62 = vadd.f32 1.0, %v3870_v12  ;;  %v4609_v31 = vpop.f32.mrb[28].mxu0  ;;  %v2212_v47 = vadd.f32 %v4605_v58, %v4591_v60  ;;  %v4113_v58 = vld [vmem:[%s4266_s8 + $0x108] sm:$0xff] }
 0x1e4   : > { %v3874_v1 = vpop.eup %3873  ;;  %3893 = vrcp.f32 %v3211_v59  ;;  %v3182_v2 = vadd.f32 1.0, %v3872_v61  ;;  %v4612_v4 = vpop.f32.mrb[28].mxu1  ;;  %v2281_v55 = vadd.f32 %v4609_v31, %v4586_v53  ;;  %v3734_v59 = vmul.f32 -1.442695, %v2210_v38 }
 0x1e5   : > { %v4614_v5 = vpop.f32.mrb[29].mxu0  ;;  %v3876_v6 = vpop.eup %3875  ;;  %3895 = vrcp.f32 %v3180_v62  ;;  %v3181_v7 = vadd.f32 1.0, %v3874_v1  ;;  %v2358_v0 = vadd.f32 %v4612_v4, %v4586_v53  ;;  %v4114_v62 = vld [vmem:[%s4266_s8 + $0x118] sm:$0xff]  ;;  %v3733_v31 = vmul.f32 -1.442695, %v2135_v41 }
 0x1e6   : > { %v4617_v10 = vpop.f32.mrb[29].mxu1  ;;  %v3878_v11 = vpop.eup %3877  ;;  %3897 = vrcp.f32 %v3182_v2  ;;  %v3183_v14 = vadd.f32 1.0, %v3876_v6  ;;  %v2283_v4 = vadd.f32 %v4614_v5, %v4586_v53 }
 0x1e7   : > { %v3880_v18 = vpop.eup %3879  ;;  %3899 = vrcp.f32 %v3181_v7  ;;  %v3212_v19 = vadd.f32 1.0, %v3878_v11  ;;  %v4628_v22 = vpop.f32.mrb[30].mxu0  ;;  %v3735_v7 = vmul.f32 -1.442695, %v2212_v47  ;;  %v3706_v5 = vmul.f32 -1.442695, %v2358_v0 }
 0x1e8   : > { %v3882_v23 = vpop.eup %3881  ;;  %v3368_v24 = vmul.f32 %v3880_v18, %v4273_v9  ;;  %3901 = vrcp.f32 %v3183_v14  ;;  %v4632_v27 = vpop.f32.mrb[30].mxu1  ;;  %v3704_v18 = vmul.f32 -1.442695, %v2281_v55 }
 0x1e9   : > { %v4634_v28 = vpop.f32.mrb[31].mxu0  ;;  %v3884_v29 = vpop.eup %3883  ;;  %v3370_v30 = vmul.f32 %v3882_v23, %v4278_v13  ;;  %3903 = vrcp.f32 %v3212_v19 }
 0x1ea   : > { %v4638_v34 = vpop.f32.mrb[31].mxu1  ;;  %v3886_v9 = vpop.eup %3885  ;;  %3432 = vst [vmem:[%s4625_s28] sm:$0xff] %v3368_v24  ;;  %v3369_v36 = vmul.f32 %v4109_v35, %v3884_v29  ;;  %3905 = vpow2.f32 %v3730_v16  ;;  %v4116_v16 = vld [vmem:[%s4266_s8 + $0x30] sm:$0xff] }
 0x1eb   : > { %v3888_v39 = vpop.eup %3887  ;;  %3434 = vst [vmem:[%s4625_s28 + $0x10] sm:$0xff] %v3370_v30  ;;  %v3371_v13 = vmul.f32 %v4110_v42, %v3886_v9  ;;  %3907 = vpow2.f32 %v3729_v20  ;;  %v4647_v43 = vpop.f32.mrb[32].mxu0  ;;  %v2360_v30 = vadd.f32 %v4617_v10, %v4586_v53  ;;  %v4119_v9 = vld [vmem:[%s4266_s8 + $0x120] sm:$0xff] }
 0x1ec   : > { %v3890_v15 = vpop.eup %3889  ;;  %3433 = vst [vmem:[%s4625_s28 + $0x8] sm:$0xff] %v3369_v36  ;;  %v3400_v45 = vmul.f32 %v4111_v44, %v3888_v39  ;;  %3909 = vpow2.f32 %v3731_v25  ;;  %v4653_v48 = vpop.f32.mrb[32].mxu1  ;;  %v4692_v36 = vmul.f32 -1.442695, %v2283_v4 }
 0x1ed   : > { %v4655_v49 = vpop.f32.mrb[33].mxu0  ;;  %v3892_v50 = vpop.eup %3891  ;;  %3435 = vst [vmem:[%s4625_s28 + $0x18] sm:$0xff] %v3371_v13  ;;  %v3402_v52 = vmul.f32 %v4112_v51, %v3890_v15  ;;  %3911 = vpow2.f32 %v3700_v32  ;;  %v4710_v51 = vmul.f32 -1.442695, %v2360_v30 }
 0x1ee   : > { %v4661_v56 = vpop.f32.mrb[33].mxu1  ;;  %v3894_v57 = vpop.eup %3893  ;;  %3464 = vst [vmem:[%s4625_s28 + $0x100] sm:$0xff] %v3400_v45  ;;  %v3401_v12 = vmul.f32 %v4113_v58, %v3892_v50  ;;  %3913 = vpow2.f32 %v3702_v37  ;;  %v2287_v45 = vadd.f32 %v4628_v22, %v4591_v60  ;;  %v2289_v58 = vadd.f32 %v4634_v28, %v4591_v60 }
 0x1ef   : > { %v3896_v61 = vpop.eup %3895  ;;  %3466 = vst [vmem:[%s4625_s28 + $0x110] sm:$0xff] %v3402_v52  ;;  %v3403_v63 = vmul.f32 %v4114_v62, %v3894_v57  ;;  %3915 = vpow2.f32 %v3701_v40  ;;  %v4669_v1 = vpop.f32.mrb[34].mxu0  ;;  %v2364_v52 = vadd.f32 %v4632_v27, %v4591_v60 }
 0x1f0   : > { %v3898_v2 = vpop.eup %3897  ;;  %3465 = vst [vmem:[%s4625_s28 + $0x108] sm:$0xff] %v3401_v12  ;;  %v3372_v6 = vmul.f32 %v4115_v3, %v3896_v61  ;;  %3917 = vpow2.f32 %v3703_v46  ;;  %v4675_v8 = vpop.f32.mrb[34].mxu1  ;;  %v4725_v3 = vmul.f32 -1.442695, %v2287_v45 }
 0x1f1   : > { %v4677_v11 = vpop.f32.mrb[35].mxu0  ;;  %v3900_v14 = vpop.eup %3899  ;;  %3467 = vst [vmem:[%s4625_s28 + $0x118] sm:$0xff] %v3403_v63  ;;  %v3374_v17 = vmul.f32 %v4116_v16, %v3898_v2  ;;  %3919 = vpow2.f32 %v3732_v54  ;;  %v4730_v4 = vmul.f32 -1.442695, %v2364_v52 }
 0x1f2   : > { %v2519_v19 = vpop.f32.mrb[35].mxu1  ;;  %v3902_v20 = vpop.eup %3901  ;;  %3436 = vst [vmem:[%s4625_s28 + $0x20] sm:$0xff] %v3372_v6  ;;  %v3373_v23 = vmul.f32 %v4117_v21, %v3900_v14  ;;  %3921 = vpow2.f32 %v3734_v59  ;;  %v2366_v14 = vadd.f32 %v4638_v34, %v4591_v60 }
 0x1f3   : > { %v4684_v24 = vadd.f32 %v2519_v19, %v4591_v60  ;;  %v3904_v25 = vpop.eup %3903  ;;  %3438 = vst [vmem:[%s4625_s28 + $0x30] sm:$0xff] %v3374_v17  ;;  %v3375_v29 = vmul.f32 %v4118_v26, %v3902_v20  ;;  %3923 = vpow2.f32 %v3733_v31  ;;  %v2588_v32 = vpop.f32.mrb[36].mxu0  ;;  %v4734_v19 = vmul.f32 -1.442695, %v2289_v58 }
 0x1f4   : > { %v3906_v33 = vpop.eup %3905  ;;  %3437 = vst [vmem:[%s4625_s28 + $0x28] sm:$0xff] %v3373_v23  ;;  %v3404_v35 = vmul.f32 %v4119_v9, %v3904_v25  ;;  %3925 = vpow2.f32 %v3735_v7  ;;  %v4695_v37 = vadd.f32 %v2588_v32, %v4586_v53  ;;  %v2665_v38 = vpop.f32.mrb[36].mxu1 }
 0x1f5   : > { %v2590_v39 = vpop.f32.mrb[37].mxu0  ;;  %v3908_v42 = vpop.eup %3907  ;;  %3439 = vst [vmem:[%s4625_s28 + $0x38] sm:$0xff] %v3375_v29  ;;  %v3214_v13 = vadd.f32 1.0, %v3906_v33  ;;  %3927 = vpow2.f32 %v3704_v18  ;;  %v4699_v10 = vadd.f32 %v2665_v38, %v4586_v53  ;;  %v2435_v33 = vadd.f32 %v4647_v43, %v4586_v53 }
 0x1f6   : > { %v4702_v40 = vadd.f32 %v2590_v39, %v4586_v53  ;;  %v2667_v41 = vpop.f32.mrb[37].mxu1  ;;  %v3910_v15 = vpop.eup %3909  ;;  %3468 = vst [vmem:[%s4625_s28 + $0x120] sm:$0xff] %v3404_v35  ;;  %v3213_v44 = vadd.f32 1.0, %v3908_v42  ;;  %3929 = vpow2.f32 %v3706_v5  ;;  %v4750_v39 = vmul.f32 -1.442695, %v2366_v14  ;;  %v4122_v14 = vld [vmem:[%s4266_s8 + $0x138] sm:$0xff] }
 0x1f7   : > { %v4708_v46 = vadd.f32 %v2667_v41, %v4586_v53  ;;  %v3912_v47 = vpop.eup %3911  ;;  %3931 = vrcp.f32 %v3214_v13  ;;  %v3215_v50 = vadd.f32 1.0, %v3910_v15  ;;  %v2594_v54 = vpop.f32.mrb[38].mxu0  ;;  %v2512_v42 = vadd.f32 %v4653_v48, %v4586_v53 }
 0x1f8   : > { %v3914_v55 = vpop.eup %3913  ;;  %3933 = vrcp.f32 %v3213_v44  ;;  %v3184_v57 = vadd.f32 1.0, %v3912_v47  ;;  %v4717_v22 = vadd.f32 %v2594_v54, %v4591_v60  ;;  %v2671_v12 = vpop.f32.mrb[38].mxu1  ;;  %v2437_v44 = vadd.f32 %v4655_v49, %v4586_v53  ;;  %v4120_v49 = vld [vmem:[%s4266_s8 + $0x130] sm:$0xff] }
 0x1f9   : > { %v2596_v59 = vpop.f32.mrb[39].mxu0  ;;  %v3916_v0 = vpop.eup %3915  ;;  %3935 = vrcp.f32 %v3215_v50  ;;  %v3186_v61 = vadd.f32 1.0, %v3914_v55  ;;  %v4720_v62 = vadd.f32 %v2671_v12, %v4591_v60  ;;  %v3708_v12 = vmul.f32 -1.442695, %v2435_v33  ;;  %v4124_v33 = vld [vmem:[%s4266_s8 + $0x50] sm:$0xff] }
 0x1fa   : > { %v4723_v27 = vadd.f32 %v2596_v59, %v4591_v60  ;;  %v2673_v63 = vpop.f32.mrb[39].mxu1  ;;  %v3918_v31 = vpop.eup %3917  ;;  %3937 = vrcp.f32 %v3184_v57  ;;  %v3185_v2 = vadd.f32 1.0, %v3916_v0 }
 0x1fb   : > { %v4728_v28 = vadd.f32 %v2673_v63, %v4591_v60  ;;  %v3920_v6 = vpop.eup %3919  ;;  %3939 = vrcp.f32 %v3186_v61  ;;  %v3187_v7 = vadd.f32 1.0, %v3918_v31  ;;  %v2742_v16 = vpop.f32.mrb[40].mxu0  ;;  %v4121_v61 = vld [vmem:[%s4266_s8 + $0x128] sm:$0xff]  ;;  %v4770_v31 = vmul.f32 -1.442695, %v2512_v42 }
 0x1fc   : > { %v3922_v17 = vpop.eup %3921  ;;  %3941 = vrcp.f32 %v3185_v2  ;;  %v3216_v18 = vadd.f32 1.0, %v3920_v6  ;;  %v4737_v20 = vadd.f32 %v2742_v16, %v4586_v53  ;;  %v2819_v21 = vpop.f32.mrb[40].mxu1  ;;  %v2514_v2 = vadd.f32 %v4661_v56, %v4586_v53  ;;  %v4123_v56 = vld [vmem:[%s4266_s8 + $0x40] sm:$0xff] }
 0x1fd   : > { %v2744_v23 = vpop.f32.mrb[41].mxu0  ;;  %v3924_v5 = vpop.eup %3923  ;;  %3943 = vrcp.f32 %v3187_v7  ;;  %v3218_v25 = vadd.f32 1.0, %v3922_v17  ;;  %v4740_v26 = vadd.f32 %v2819_v21, %v4586_v53  ;;  %v3709_v17 = vmul.f32 -1.442695, %v2437_v44 }
 0x1fe   : > { %v4743_v29 = vadd.f32 %v2744_v23, %v4586_v53  ;;  %v2821_v34 = vpop.f32.mrb[41].mxu1  ;;  %v3926_v30 = vpop.eup %3925  ;;  %3945 = vrcp.f32 %v3216_v18  ;;  %v3217_v32 = vadd.f32 1.0, %v3924_v5  ;;  %v2518_v44 = vadd.f32 %v4675_v8, %v4591_v60  ;;  %v4127_v8 = vld [vmem:[%s4266_s8 + $0x140] sm:$0xff] }
 0x1ff   : > { %v4748_v9 = vadd.f32 %v2821_v34, %v4586_v53  ;;  %v3928_v35 = vpop.eup %3927  ;;  %3947 = vrcp.f32 %v3218_v25  ;;  %v3219_v38 = vadd.f32 1.0, %v3926_v30  ;;  %v2748_v13 = vpop.f32.mrb[42].mxu0 }
 0x200   : > { %v3930_v41 = vpop.eup %3929  ;;  %3949 = vrcp.f32 %v3217_v32  ;;  %v3188_v15 = vadd.f32 1.0, %v3928_v35  ;;  %v4757_v43 = vadd.f32 %v2748_v13, %v4591_v60  ;;  %v2825_v45 = vpop.f32.mrb[42].mxu1  ;;  %v4125_v13 = vld [vmem:[%s4266_s8 + $0x48] sm:$0xff] }
 0x201   : > { %v2750_v47 = vpop.f32.mrb[43].mxu0  ;;  %v3932_v50 = vpop.eup %3931  ;;  %3951 = vrcp.f32 %v3219_v38  ;;  %v3190_v52 = vadd.f32 1.0, %v3930_v41  ;;  %v4760_v54 = vadd.f32 %v2825_v45, %v4591_v60  ;;  %v2441_v38 = vadd.f32 %v4669_v1, %v4591_v60 }
 0x202   : > { %v4763_v48 = vadd.f32 %v2750_v47, %v4591_v60  ;;  %v2827_v55 = vpop.f32.mrb[43].mxu1  ;;  %v3934_v57 = vpop.eup %3933  ;;  %v3406_v58 = vmul.f32 %v4120_v49, %v3932_v50  ;;  %3953 = vrcp.f32 %v3188_v15  ;;  %v3711_v15 = vmul.f32 -1.442695, %v2514_v2  ;;  %v4126_v47 = vld [vmem:[%s4266_s8 + $0x58] sm:$0xff] }
 0x203   : > { %v4767_v59 = vadd.f32 %v2827_v55, %v4591_v60  ;;  %v3936_v0 = vpop.eup %3935  ;;  %v3405_v63 = vmul.f32 %v4121_v61, %v3934_v57  ;;  %3955 = vrcp.f32 %v3190_v52  ;;  %v2896_v6 = vpop.f32.mrb[44].mxu0 }
 0x204   : > { %v3938_v7 = vpop.eup %3937  ;;  %3470 = vst [vmem:[%s4625_s28 + $0x130] sm:$0xff] %v3406_v58  ;;  %v3407_v16 = vmul.f32 %v4122_v14, %v3936_v0  ;;  %3957 = vpow2.f32 %v4692_v36  ;;  %v4778_v18 = vadd.f32 %v2896_v6, %v4586_v53  ;;  %v2973_v21 = vpop.f32.mrb[44].mxu1  ;;  %v4128_v0 = vld [vmem:[%s4266_s8 + $0x150] sm:$0xff]  ;;  %v4129_v6 = vld [vmem:[%s4266_s8 + $0x148] sm:$0xff]  ;;  %v3742_v14 = vmul.f32 -1.442695, %v2518_v44 }
 0x205   : > { %v2898_v23 = vpop.f32.mrb[45].mxu0  ;;  %v3940_v5 = vpop.eup %3939  ;;  %3469 = vst [vmem:[%s4625_s28 + $0x128] sm:$0xff] %v3405_v63  ;;  %v3376_v25 = vmul.f32 %v4123_v56, %v3938_v7  ;;  %3959 = vpow2.f32 %v4710_v51  ;;  %v4784_v34 = vadd.f32 %v2973_v21, %v4586_v53  ;;  %v3740_v63 = vmul.f32 -1.442695, %v2441_v38  ;;  %v4130_v21 = vld [vmem:[%s4266_s8 + $0x158] sm:$0xff] }
 0x206   : > { %v4787_v30 = vadd.f32 %v2898_v23, %v4586_v53  ;;  %v2975_v36 = vpop.f32.mrb[45].mxu1  ;;  %v3942_v32 = vpop.eup %3941  ;;  %3471 = vst [vmem:[%s4625_s28 + $0x138] sm:$0xff] %v3407_v16  ;;  %v3378_v35 = vmul.f32 %v4124_v33, %v3940_v5  ;;  %3961 = vpow2.f32 %v4725_v3 }
 0x207   : > { %v4795_v51 = vadd.f32 %v2975_v36, %v4586_v53  ;;  %v3944_v42 = vpop.eup %3943  ;;  %3440 = vst [vmem:[%s4625_s28 + $0x40] sm:$0xff] %v3376_v25  ;;  %v3377_v41 = vmul.f32 %v4125_v13, %v3942_v32  ;;  %3963 = vpow2.f32 %v4730_v4  ;;  %v2902_v45 = vpop.f32.mrb[46].mxu0  ;;  %v2443_v53 = vadd.f32 %v4677_v11, %v4591_v60  ;;  %v4132_v36 = vld [vmem:[%s4266_s8 + $0x70] sm:$0xff] }
 0x208   : > { %v3946_v3 = vpop.eup %3945  ;;  %3442 = vst [vmem:[%s4625_s28 + $0x50] sm:$0xff] %v3378_v35  ;;  %v3379_v1 = vmul.f32 %v4126_v47, %v3944_v42  ;;  %3965 = vpow2.f32 %v4734_v19  ;;  %v4808_v50 = vadd.f32 %v2902_v45, %v4591_v60  ;;  %v2979_v4 = vpop.f32.mrb[46].mxu1 }
 0x209   : > { %v2904_v52 = vpop.f32.mrb[47].mxu0  ;;  %v3948_v55 = vpop.eup %3947  ;;  %3441 = vst [vmem:[%s4625_s28 + $0x48] sm:$0xff] %v3377_v41  ;;  %v3408_v57 = vmul.f32 %v4127_v8, %v3946_v3  ;;  %3967 = vpow2.f32 %v4750_v39  ;;  %v4814_v49 = vadd.f32 %v2979_v4, %v4591_v60  ;;  %v3741_v23 = vmul.f32 -1.442695, %v2443_v53 }
 0x20a   : > { %v4817_v19 = vadd.f32 %v2904_v52, %v4591_v60  ;;  %v2981_v11 = vpop.f32.mrb[47].mxu1  ;;  %v3950_v58 = vpop.eup %3949  ;;  %3443 = vst [vmem:[%s4625_s28 + $0x58] sm:$0xff] %v3379_v1  ;;  %v3410_v61 = vmul.f32 %v4128_v0, %v3948_v55  ;;  %3969 = vpow2.f32 %v3708_v12 }
 0x20b   : > { %v4822_v2 = vadd.f32 %v2981_v11, %v4591_v60  ;;  %v3952_v39 = vpop.eup %3951  ;;  %3472 = vst [vmem:[%s4625_s28 + $0x140] sm:$0xff] %v3408_v57  ;;  %v3409_v7 = vmul.f32 %v4129_v6, %v3950_v58  ;;  %3971 = vpow2.f32 %v4770_v31  ;;  %v4131_v60 = vld [vmem:[%s4266_s8 + $0x60] sm:$0xff] }
 0x20c   : > { %v3954_v16 = vpop.eup %3953  ;;  %3474 = vst [vmem:[%s4625_s28 + $0x150] sm:$0xff] %v3410_v61  ;;  %v3411_v12 = vmul.f32 %v4130_v21, %v3952_v39  ;;  %3973 = vpow2.f32 %v3709_v17 }
 0x20d   : > { %v3956_v5 = vpop.eup %3955  ;;  %3473 = vst [vmem:[%s4625_s28 + $0x148] sm:$0xff] %v3409_v7  ;;  %v3380_v56 = vmul.f32 %v4131_v60, %v3954_v16  ;;  %3975 = vpow2.f32 %v3711_v15  ;;  %v3712_v7 = vmul.f32 -1.442695, %v4695_v37  ;;  %v4133_v16 = vld [vmem:[%s4266_s8 + $0x68] sm:$0xff] }
 0x20e   : > { %v3958_v25 = vpop.eup %3957  ;;  %3475 = vst [vmem:[%s4625_s28 + $0x158] sm:$0xff] %v3411_v12  ;;  %v3382_v32 = vmul.f32 %v4132_v36, %v3956_v5  ;;  %3977 = vpow2.f32 %v3740_v63  ;;  %v3743_v63 = vmul.f32 -1.442695, %v4684_v24  ;;  %v3714_v12 = vmul.f32 -1.442695, %v4699_v10  ;;  %v4134_v5 = vld [vmem:[%s4266_s8 + $0x78] sm:$0xff] }
 0x20f   : > { %v3960_v31 = vpop.eup %3959  ;;  %3444 = vst [vmem:[%s4625_s28 + $0x60] sm:$0xff] %v3380_v56  ;;  %v3189_v33 = vadd.f32 1.0, %v3958_v25  ;;  %3979 = vpow2.f32 %v3742_v14  ;;  %v3713_v24 = vmul.f32 -1.442695, %v4702_v40  ;;  %v4135_v25 = vld [vmem:[%s4266_s8 + $0x160] sm:$0xff]  ;;  %v4136_v10 = vld [vmem:[%s4266_s8 + $0x170] sm:$0xff] }
 0x210   : > { %v3962_v35 = vpop.eup %3961  ;;  %3446 = vst [vmem:[%s4625_s28 + $0x70] sm:$0xff] %v3382_v32  ;;  %v3191_v38 = vadd.f32 1.0, %v3960_v31  ;;  %3981 = vpow2.f32 %v3741_v23  ;;  %v3715_v36 = vmul.f32 -1.442695, %v4708_v46  ;;  %v4137_v40 = vld [vmem:[%s4266_s8 + $0x168] sm:$0xff]  ;;  %v4138_v46 = vld [vmem:[%s4266_s8 + $0x178] sm:$0xff] }
 0x211   : > { %v3964_v17 = vpop.eup %3963  ;;  %3983 = vrcp.f32 %v3189_v33  ;;  %v3220_v42 = vadd.f32 1.0, %v3962_v35  ;;  %v3744_v33 = vmul.f32 -1.442695, %v4717_v22  ;;  %v4139_v22 = vld [vmem:[%s4266_s8 + $0x80] sm:$0xff] }
 0x212   : > { %v3966_v13 = vpop.eup %3965  ;;  %3985 = vrcp.f32 %v3191_v38  ;;  %v3222_v41 = vadd.f32 1.0, %v3964_v17  ;;  %v3746_v17 = vmul.f32 -1.442695, %v4720_v62  ;;  %v4140_v62 = vld [vmem:[%s4266_s8 + $0x90] sm:$0xff] }
 0x213   : > { %v3968_v15 = vpop.eup %3967  ;;  %3987 = vrcp.f32 %v3220_v42  ;;  %v3221_v44 = vadd.f32 1.0, %v3966_v13 }
 0x214   : > { %v3970_v45 = vpop.eup %3969  ;;  %3989 = vrcp.f32 %v3222_v41  ;;  %v3223_v3 = vadd.f32 1.0, %v3968_v15  ;;  %v3745_v41 = vmul.f32 -1.442695, %v4723_v27  ;;  %v4141_v27 = vld [vmem:[%s4266_s8 + $0x88] sm:$0xff] }
 0x215   : > { %v3972_v47 = vpop.eup %3971  ;;  %3991 = vrcp.f32 %v3221_v44  ;;  %v3192_v1 = vadd.f32 1.0, %v3970_v45  ;;  %v3747_v45 = vmul.f32 -1.442695, %v4728_v28  ;;  %v4142_v28 = vld [vmem:[%s4266_s8 + $0x98] sm:$0xff] }
 0x216   : > { %v3974_v53 = vpop.eup %3973  ;;  %3993 = vrcp.f32 %v3223_v3  ;;  %v3194_v4 = vadd.f32 1.0, %v3972_v47 }
 0x217   : > { %v3976_v52 = vpop.eup %3975  ;;  %3995 = vrcp.f32 %v3192_v1  ;;  %v3193_v55 = vadd.f32 1.0, %v3974_v53  ;;  %v3716_v1 = vmul.f32 -1.442695, %v4737_v20  ;;  %v4143_v20 = vld [vmem:[%s4266_s8 + $0x180] sm:$0xff] }
 0x218   : > { %v3978_v8 = vpop.eup %3977  ;;  %3997 = vrcp.f32 %v3194_v4  ;;  %v3195_v57 = vadd.f32 1.0, %v3976_v52  ;;  %v3718_v52 = vmul.f32 -1.442695, %v4740_v26  ;;  %v4144_v26 = vld [vmem:[%s4266_s8 + $0x190] sm:$0xff] }
 0x219   : > { %v3980_v11 = vpop.eup %3979  ;;  %3999 = vrcp.f32 %v3193_v55  ;;  %v3224_v58 = vadd.f32 1.0, %v3978_v8 }
 0x21a   : > { %v3982_v0 = vpop.eup %3981  ;;  %4001 = vrcp.f32 %v3195_v57  ;;  %v3226_v61 = vadd.f32 1.0, %v3980_v11  ;;  %v3717_v57 = vmul.f32 -1.442695, %v4743_v29 }
 0x21b   : > { %v3984_v39 = vpop.eup %3983  ;;  %4003 = vrcp.f32 %v3224_v58  ;;  %v3225_v6 = vadd.f32 1.0, %v3982_v0  ;;  %v3719_v0 = vmul.f32 -1.442695, %v4748_v9 }
 0x21c   : > { %v3986_v14 = vpop.eup %3985  ;;  %v3381_v21 = vmul.f32 %v4133_v16, %v3984_v39  ;;  %4005 = vrcp.f32 %v3226_v61 }
 0x21d   : > { %v3988_v23 = vpop.eup %3987  ;;  %v3383_v60 = vmul.f32 %v4134_v5, %v3986_v14  ;;  %4007 = vrcp.f32 %v3225_v6  ;;  %v4145_v6 = vld [vmem:[%s4266_s8 + $0x188] sm:$0xff] }
 0x21e   : > { %v3990_v56 = vpop.eup %3989  ;;  %3445 = vst [vmem:[%s4625_s28 + $0x68] sm:$0xff] %v3381_v21  ;;  %v3412_v37 = vmul.f32 %v4135_v25, %v3988_v23  ;;  %4009 = vpow2.f32 %v3743_v63 }
 0x21f   : > { %v3992_v32 = vpop.eup %3991  ;;  %3447 = vst [vmem:[%s4625_s28 + $0x78] sm:$0xff] %v3383_v60  ;;  %v3414_v31 = vmul.f32 %v4136_v10, %v3990_v56  ;;  %4011 = vpow2.f32 %v3712_v7 }
 0x220   : > { %v3994_v35 = vpop.eup %3993  ;;  %3476 = vst [vmem:[%s4625_s28 + $0x160] sm:$0xff] %v3412_v37  ;;  %v3413_v38 = vmul.f32 %v4137_v40, %v3992_v32  ;;  %4013 = vpow2.f32 %v3714_v12 }
 0x221   : > { %v3996_v42 = vpop.eup %3995  ;;  %3478 = vst [vmem:[%s4625_s28 + $0x170] sm:$0xff] %v3414_v31  ;;  %v3415_v13 = vmul.f32 %v4138_v46, %v3994_v35  ;;  %4015 = vpow2.f32 %v3713_v24 }
 0x222   : > { %v3998_v15 = vpop.eup %3997  ;;  %3477 = vst [vmem:[%s4625_s28 + $0x168] sm:$0xff] %v3413_v38  ;;  %v3384_v44 = vmul.f32 %v4139_v22, %v3996_v42  ;;  %4017 = vpow2.f32 %v3715_v36  ;;  %v3750_v22 = vmul.f32 -1.442695, %v4760_v54 }
 0x223   : > { %v4000_v3 = vpop.eup %3999  ;;  %3479 = vst [vmem:[%s4625_s28 + $0x178] sm:$0xff] %v3415_v13  ;;  %v3386_v47 = vmul.f32 %v4140_v62, %v3998_v15  ;;  %4019 = vpow2.f32 %v3744_v33  ;;  %v3748_v13 = vmul.f32 -1.442695, %v4757_v43  ;;  %v3749_v62 = vmul.f32 -1.442695, %v4763_v48  ;;  %v4149_v48 = vld [vmem:[%s4266_s8 + $0xa8] sm:$0xff] }
 0x224   : > { %v4002_v53 = vpop.eup %4001  ;;  %3448 = vst [vmem:[%s4625_s28 + $0x80] sm:$0xff] %v3384_v44  ;;  %v3385_v4 = vmul.f32 %v4141_v27, %v4000_v3  ;;  %4021 = vpow2.f32 %v3746_v17  ;;  %v3751_v43 = vmul.f32 -1.442695, %v4767_v59  ;;  %v4150_v59 = vld [vmem:[%s4266_s8 + $0xb8] sm:$0xff] }
 0x225   : > { %v4004_v55 = vpop.eup %4003  ;;  %3450 = vst [vmem:[%s4625_s28 + $0x90] sm:$0xff] %v3386_v47  ;;  %v3387_v8 = vmul.f32 %v4142_v28, %v4002_v53  ;;  %4023 = vpow2.f32 %v3745_v41 }
 0x226   : > { %v4006_v11 = vpop.eup %4005  ;;  %3449 = vst [vmem:[%s4625_s28 + $0x88] sm:$0xff] %v3385_v4  ;;  %v3416_v58 = vmul.f32 %v4143_v20, %v4004_v55  ;;  %4025 = vpow2.f32 %v3747_v45  ;;  %v4146_v45 = vld [vmem:[%s4266_s8 + $0x198] sm:$0xff]  ;;  %v4148_v4 = vld [vmem:[%s4266_s8 + $0xb0] sm:$0xff]  ;;  %v3721_v20 = vmul.f32 -1.442695, %v4787_v30  ;;  %v4153_v30 = vld [vmem:[%s4266_s8 + $0x1a8] sm:$0xff] }
 0x227   : > { %v4008_v61 = vpop.eup %4007  ;;  %3451 = vst [vmem:[%s4625_s28 + $0x98] sm:$0xff] %v3387_v8  ;;  %v3418_v63 = vmul.f32 %v4144_v26, %v4006_v11  ;;  %4027 = vpow2.f32 %v3716_v1  ;;  %v4147_v1 = vld [vmem:[%s4266_s8 + $0xa0] sm:$0xff]  ;;  %v3722_v8 = vmul.f32 -1.442695, %v4784_v34  ;;  %v4152_v34 = vld [vmem:[%s4266_s8 + $0x1b0] sm:$0xff] }
 0x228   : > { %v4010_v39 = vpop.eup %4009  ;;  %3480 = vst [vmem:[%s4625_s28 + $0x180] sm:$0xff] %v3416_v58  ;;  %v3417_v7 = vmul.f32 %v4145_v6, %v4008_v61  ;;  %4029 = vpow2.f32 %v3718_v52  ;;  %v3720_v52 = vmul.f32 -1.442695, %v4778_v18  ;;  %v4151_v18 = vld [vmem:[%s4266_s8 + $0x1a0] sm:$0xff]  ;;  %v3723_v61 = vmul.f32 -1.442695, %v4795_v51 }
 0x229   : > { %v4012_v29 = vpop.eup %4011  ;;  %3482 = vst [vmem:[%s4625_s28 + $0x190] sm:$0xff] %v3418_v63  ;;  %v3227_v14 = vadd.f32 1.0, %v4010_v39  ;;  %4031 = vpow2.f32 %v3717_v57  ;;  %v3752_v39 = vmul.f32 -1.442695, %v4808_v50  ;;  %v4154_v51 = vld [vmem:[%s4266_s8 + $0x1b8] sm:$0xff]  ;;  %v4155_v50 = vld [vmem:[%s4266_s8 + $0xc0] sm:$0xff] }
 0x22a   : > { %v4014_v16 = vpop.eup %4013  ;;  %3481 = vst [vmem:[%s4625_s28 + $0x188] sm:$0xff] %v3417_v7  ;;  %v3196_v21 = vadd.f32 1.0, %v4012_v29  ;;  %4033 = vpow2.f32 %v3719_v0  ;;  %v3754_v29 = vmul.f32 -1.442695, %v4814_v49  ;;  %v4156_v49 = vld [vmem:[%s4266_s8 + $0xd0] sm:$0xff] }
 0x22b   : > { %v4016_v9 = vpop.eup %4015  ;;  %4035 = vrcp.f32 %v3227_v14  ;;  %v3198_v12 = vadd.f32 1.0, %v4014_v16 }
 0x22c   : > { %v4018_v23 = vpop.eup %4017  ;;  %4037 = vrcp.f32 %v3196_v21  ;;  %v3197_v5 = vadd.f32 1.0, %v4016_v9  ;;  %v3753_v21 = vmul.f32 -1.442695, %v4817_v19 }
 0x22d   : > { %v4020_v60 = vpop.eup %4019  ;;  %4039 = vrcp.f32 %v3198_v12  ;;  %v3199_v24 = vadd.f32 1.0, %v4018_v23  ;;  %v3755_v23 = vmul.f32 -1.442695, %v4822_v2 }
 0x22e   : > { %v4022_v56 = vpop.eup %4021  ;;  %4041 = vrcp.f32 %v3197_v5  ;;  %v3228_v25 = vadd.f32 1.0, %v4020_v60 }
 0x22f   : > { %v4024_v37 = vpop.eup %4023  ;;  %4043 = vrcp.f32 %v3199_v24  ;;  %v3230_v36 = vadd.f32 1.0, %v4022_v56  ;;  %v4157_v56 = vld [vmem:[%s4266_s8 + $0xc8] sm:$0xff] }
 0x230   : > { %v4026_v32 = vpop.eup %4025  ;;  %4045 = vrcp.f32 %v3228_v25  ;;  %v3229_v10 = vadd.f32 1.0, %v4024_v37  ;;  %v4158_v37 = vld [vmem:[%s4266_s8 + $0xd8] sm:$0xff] }
 0x231   : > { %v4028_v31 = vpop.eup %4027  ;;  %4047 = vrcp.f32 %v3230_v36  ;;  %v3231_v33 = vadd.f32 1.0, %v4026_v32 }
 0x232   : > { %v4030_v35 = vpop.eup %4029  ;;  %4049 = vrcp.f32 %v3229_v10  ;;  %v3200_v40 = vadd.f32 1.0, %v4028_v31 }
 0x233   : > { %v4032_v38 = vpop.eup %4031  ;;  %4051 = vrcp.f32 %v3231_v33  ;;  %v3202_v17 = vadd.f32 1.0, %v4030_v35 }
 0x234   : > { %v4034_v42 = vpop.eup %4033  ;;  %4053 = vrcp.f32 %v3200_v40  ;;  %v3201_v46 = vadd.f32 1.0, %v4032_v38 }
 0x235   : > { %v4036_v41 = vpop.eup %4035  ;;  %4055 = vrcp.f32 %v3202_v17  ;;  %v3203_v15 = vadd.f32 1.0, %v4034_v42 }
 0x236   : > { %v4038_v44 = vpop.eup %4037  ;;  %v3419_v3 = vmul.f32 %v4146_v45, %v4036_v41  ;;  %4057 = vrcp.f32 %v3201_v46 }
 0x237   : > { %v4040_v47 = vpop.eup %4039  ;;  %v3388_v53 = vmul.f32 %v4147_v1, %v4038_v44  ;;  %4059 = vrcp.f32 %v3203_v15 }
 0x238   : > { %v4042_v27 = vpop.eup %4041  ;;  %3483 = vst [vmem:[%s4625_s28 + $0x198] sm:$0xff] %v3419_v3  ;;  %v3390_v54 = vmul.f32 %v4148_v4, %v4040_v47  ;;  %4061 = vpow2.f32 %v3748_v13 }
 0x239   : > { %v4044_v55 = vpop.eup %4043  ;;  %3452 = vst [vmem:[%s4625_s28 + $0xa0] sm:$0xff] %v3388_v53  ;;  %v3389_v28 = vmul.f32 %v4149_v48, %v4042_v27  ;;  %4063 = vpow2.f32 %v3750_v22  ;;  %v4160_v48 = vld [vmem:[%s4266_s8 + $0x1d0] sm:$0xff] }
 0x23a   : > { %v4046_v57 = vpop.eup %4045  ;;  %3454 = vst [vmem:[%s4625_s28 + $0xb0] sm:$0xff] %v3390_v54  ;;  %v3391_v11 = vmul.f32 %v4150_v59, %v4044_v55  ;;  %4065 = vpow2.f32 %v3749_v62  ;;  %v4159_v54 = vld [vmem:[%s4266_s8 + $0x1c0] sm:$0xff] }
 0x23b   : > { %v4048_v58 = vpop.eup %4047  ;;  %3453 = vst [vmem:[%s4625_s28 + $0xa8] sm:$0xff] %v3389_v28  ;;  %v3420_v0 = vmul.f32 %v4151_v18, %v4046_v57  ;;  %4067 = vpow2.f32 %v3751_v43  ;;  %v4161_v57 = vld [vmem:[%s4266_s8 + $0x1c8] sm:$0xff] }
 0x23c   : > { %v4050_v26 = vpop.eup %4049  ;;  %3455 = vst [vmem:[%s4625_s28 + $0xb8] sm:$0xff] %v3391_v11  ;;  %v3422_v63 = vmul.f32 %v4152_v34, %v4048_v58  ;;  %4069 = vpow2.f32 %v3720_v52  ;;  %v4164_v34 = vld [vmem:[%s4266_s8 + $0xf0] sm:$0xff] }
 0x23d   : > { %v4052_v6 = vpop.eup %4051  ;;  %3484 = vst [vmem:[%s4625_s28 + $0x1a0] sm:$0xff] %v3420_v0  ;;  %v3421_v7 = vmul.f32 %v4153_v30, %v4050_v26  ;;  %4071 = vpow2.f32 %v3722_v8  ;;  %v4163_v0 = vld [vmem:[%s4266_s8 + $0xe0] sm:$0xff] }
 0x23e   : > { %v4054_v14 = vpop.eup %4053  ;;  %3486 = vst [vmem:[%s4625_s28 + $0x1b0] sm:$0xff] %v3422_v63  ;;  %v3423_v16 = vmul.f32 %v4154_v51, %v4052_v6  ;;  %4073 = vpow2.f32 %v3721_v20  ;;  %v4162_v20 = vld [vmem:[%s4266_s8 + $0x1d8] sm:$0xff]  ;;  %v4165_v6 = vld [vmem:[%s4266_s8 + $0xe8] sm:$0xff] }
 0x23f   : > { %v4056_v9 = vpop.eup %4055  ;;  %3485 = vst [vmem:[%s4625_s28 + $0x1a8] sm:$0xff] %v3421_v7  ;;  %v3392_v12 = vmul.f32 %v4155_v50, %v4054_v14  ;;  %4075 = vpow2.f32 %v3723_v61  ;;  %v4168_v50 = vld [vmem:[%s4266_s8 + $0x1f0] sm:$0xff] }
 0x240   : > { %v4058_v5 = vpop.eup %4057  ;;  %3487 = vst [vmem:[%s4625_s28 + $0x1b8] sm:$0xff] %v3423_v16  ;;  %v3394_v60 = vmul.f32 %v4156_v49, %v4056_v9  ;;  %4077 = vpow2.f32 %v3752_v39  ;;  %v4167_v16 = vld [vmem:[%s4266_s8 + $0x1e0] sm:$0xff] }
 0x241   : > { %v4060_v24 = vpop.eup %4059  ;;  %3456 = vst [vmem:[%s4625_s28 + $0xc0] sm:$0xff] %v3392_v12  ;;  %v3393_v19 = vmul.f32 %v4157_v56, %v4058_v5  ;;  %4079 = vpow2.f32 %v3754_v29  ;;  %v4166_v29 = vld [vmem:[%s4266_s8 + $0xf8] sm:$0xff]  ;;  %v4169_v5 = vld [vmem:[%s4266_s8 + $0x1e8] sm:$0xff] }
 0x242   : > { %v4062_v25 = vpop.eup %4061  ;;  %3458 = vst [vmem:[%s4625_s28 + $0xd0] sm:$0xff] %v3394_v60  ;;  %v3395_v36 = vmul.f32 %v4158_v37, %v4060_v24  ;;  %4081 = vpow2.f32 %v3753_v21  ;;  %v4170_v60 = vld [vmem:[%s4266_s8 + $0x1f8] sm:$0xff] }
 0x243   : > { %v4064_v32 = vpop.eup %4063  ;;  %3457 = vst [vmem:[%s4625_s28 + $0xc8] sm:$0xff] %v3393_v19  ;;  %v3232_v2 = vadd.f32 1.0, %v4062_v25  ;;  %4083 = vpow2.f32 %v3755_v23 }
 0x244   : > { %v4066_v10 = vpop.eup %4065  ;;  %3459 = vst [vmem:[%s4625_s28 + $0xd8] sm:$0xff] %v3395_v36  ;;  %v3234_v31 = vadd.f32 1.0, %v4064_v32 }
 0x245   : > { %v4068_v33 = vpop.eup %4067  ;;  %4085 = vrcp.f32 %v3232_v2  ;;  %v3233_v35 = vadd.f32 1.0, %v4066_v10 }
 0x246   : > { %v4070_v40 = vpop.eup %4069  ;;  %4087 = vrcp.f32 %v3234_v31  ;;  %v3235_v38 = vadd.f32 1.0, %v4068_v33 }
 0x247   : > { %v4072_v17 = vpop.eup %4071  ;;  %4089 = vrcp.f32 %v3233_v35  ;;  %v3204_v42 = vadd.f32 1.0, %v4070_v40 }
 0x248   : > { %v4074_v46 = vpop.eup %4073  ;;  %4091 = vrcp.f32 %v3235_v38  ;;  %v3206_v13 = vadd.f32 1.0, %v4072_v17 }
 0x249   : > { %v4076_v41 = vpop.eup %4075  ;;  %4093 = vrcp.f32 %v3204_v42  ;;  %v3205_v15 = vadd.f32 1.0, %v4074_v46 }
 0x24a   : > { %v4078_v22 = vpop.eup %4077  ;;  %4095 = vrcp.f32 %v3206_v13  ;;  %v3207_v44 = vadd.f32 1.0, %v4076_v41 }
 0x24b   : > { %v4080_v45 = vpop.eup %4079  ;;  %4097 = vrcp.f32 %v3205_v15  ;;  %v3236_v3 = vadd.f32 1.0, %v4078_v22 }
 0x24c   : > { %v4082_v62 = vpop.eup %4081  ;;  %4099 = vrcp.f32 %v3207_v44  ;;  %v3238_v47 = vadd.f32 1.0, %v4080_v45 }
 0x24d   : > { %v4084_v1 = vpop.eup %4083  ;;  %4101 = vrcp.f32 %v3236_v3  ;;  %v3237_v53 = vadd.f32 1.0, %v4082_v62 }
 0x24e   : > { %4103 = vrcp.f32 %v3238_v47  ;;  %v3239_v43 = vadd.f32 1.0, %v4084_v1 }
 0x24f   : > { %v4086_v27 = vpop.eup %4085  ;;  %4105 = vrcp.f32 %v3237_v53 }
 0x250   : > { %v4088_v4 = vpop.eup %4087  ;;  %v3424_v52 = vmul.f32 %v4159_v54, %v4086_v27  ;;  %4107 = vrcp.f32 %v3239_v43 }
 0x251   : > { %v4090_v55 = vpop.eup %4089  ;;  %v3426_v28 = vmul.f32 %v4160_v48, %v4088_v4 }
 0x252   : > { %v4092_v8 = vpop.eup %4091  ;;  %3488 = vst [vmem:[%s4625_s28 + $0x1c0] sm:$0xff] %v3424_v52  ;;  %v3425_v59 = vmul.f32 %v4161_v57, %v4090_v55 }
 0x253   : > { %v4094_v11 = vpop.eup %4093  ;;  %3490 = vst [vmem:[%s4625_s28 + $0x1d0] sm:$0xff] %v3426_v28  ;;  %v3427_v58 = vmul.f32 %v4162_v20, %v4092_v8 }
 0x254   : > { %v4096_v18 = vpop.eup %4095  ;;  %3489 = vst [vmem:[%s4625_s28 + $0x1c8] sm:$0xff] %v3425_v59  ;;  %v3396_v61 = vmul.f32 %v4163_v0, %v4094_v11 }
 0x255   : > { %v4098_v26 = vpop.eup %4097  ;;  %3491 = vst [vmem:[%s4625_s28 + $0x1d8] sm:$0xff] %v3427_v58  ;;  %v3398_v63 = vmul.f32 %v4164_v34, %v4096_v18 }
 0x256   : > { %v4100_v39 = vpop.eup %4099  ;;  %3460 = vst [vmem:[%s4625_s28 + $0xe0] sm:$0xff] %v3396_v61  ;;  %v3397_v30 = vmul.f32 %v4165_v6, %v4098_v26 }
 0x257   : > { %v4102_v7 = vpop.eup %4101  ;;  %3462 = vst [vmem:[%s4625_s28 + $0xf0] sm:$0xff] %v3398_v63  ;;  %v3399_v14 = vmul.f32 %v4166_v29, %v4100_v39 }
 0x258   : > { %v4104_v51 = vpop.eup %4103  ;;  %3461 = vst [vmem:[%s4625_s28 + $0xe8] sm:$0xff] %v3397_v30  ;;  %v3428_v21 = vmul.f32 %v4167_v16, %v4102_v7 }
 0x259   : > { %v4106_v9 = vpop.eup %4105  ;;  %3463 = vst [vmem:[%s4625_s28 + $0xf8] sm:$0xff] %v3399_v14  ;;  %v3430_v12 = vmul.f32 %v4168_v50, %v4104_v51 }
 0x25a   : > { %v4108_v23 = vpop.eup %4107  ;;  %3492 = vst [vmem:[%s4625_s28 + $0x1e0] sm:$0xff] %v3428_v21  ;;  %v3429_v49 = vmul.f32 %v4169_v5, %v4106_v9 }
 0x25b   : > { %3494 = vst [vmem:[%s4625_s28 + $0x1f0] sm:$0xff] %v3430_v12  ;;  %v3431_v24 = vmul.f32 %v4170_v60, %v4108_v23 }
 0x25c   : > { %3493 = vst [vmem:[%s4625_s28 + $0x1e8] sm:$0xff] %v3429_v49 }
 0x25d   : > { %3495 = vst [vmem:[%s4625_s28 + $0x1f8] sm:$0xff] %v3431_v24 }
 0x25e PF: > { %s16_s23 = sadd.s32 1, %s4193_s23   ;;  %s4952_s21 = smov %s4189_s22 }
 0x25f   : > { %p13_p5 = scmp.ge.s32.totalorder %s16_s23, 4   ;;  %s4953_s22 = smov %s4955_s24 }
 0x261   :  { %15 = sbr.rel (!%p13_p5) target bundleno = 2 (0x2), region = 77 }

// kernel: esa_forward.3
= control target key start
LH: loop header
LB: loop body
LE: loop exit
PB: predicated region body
PF: predicated region fallthrough
CT: control target
= control target key end

     0   :  { %9 = vsyncpa [#allocation3], 0  ;;  %s10886_s0 = inlined_call_operand.hbm [shape: f32[2,1024,64], index: 0, kind: input, shape index: {}]   ;;  %s10887_s1 = inlined_call_operand.vmem [shape: f32[3,64,31], index: 1, kind: input, shape index: {}]   ;;  %s10888_s2 = inlined_call_operand.hbm [shape: f32[3,124,1024], index: 2, kind: input, shape index: {}]   ;;  %s10889_s3 = inlined_call_operand.vmem [shape: f32[124,1], index: 3, kind: input, shape index: {}]   ;;  %s10890_s4 = inlined_call_operand.vmem [shape: f32[2,124,31], index: 4, kind: output, shape index: {}]  }
   0x1   :  { %11 = vsyncpa [#allocation3 + $0x1], 0 }
   0x2   :  { %12 = vsyncpa [#allocation5], 0  ;;  %s8391_s15 = smov 0   ;;  %s8393_s16 = smov 0  }
   0x3   :  { %s8395_s17 = smov 0   ;;  %s8397_s18 = smov 0  }
   0x4 LB: > { %s8410_s19 = sadd.s32 4294967295, %s8357_s18   ;;  %p38_p0 = scmp.ne.s32.totalorder %s8349_s16, %s8345_s15  ;;  %s8357_s18 = sphi %s8397_s18, %s11118_s18   ;;  %s8353_s17 = sphi %s8395_s17, %s11117_s17   ;;  %s8349_s16 = sphi %s8393_s16, %s11116_s16   ;;  %s8345_s15 = sphi %s8391_s15, %s11115_s15  }
   0x5   : > { %p10891_p1 = scmp.eq.s32.totalorder %s8410_s19, 0  ;;  %p5237_p2 = scmp.ge.s32.totalorder %s8357_s18, 1 }
   0x6   : > { %p138_p3 = scmp.lt.s32.totalorder %s8357_s18, 3  ;;  %s8359_s22 = smov [#allocation4]  }
   0x7   : > { %p8418_p4 = por %p10891_p1, %p38_p0  ;;  %s153_s23 = sshll.u32 %s8359_s22, 4  ;;  %s154_s23 = int_to_ptr.vmem [resolvable:$true] %s153_s23 }
   0x8   : > { %p8422_p5 = pnand %p5237_p2, %p138_p3  ;;  %s8435_s25 = sadd.s32 1, %s8357_s18  }
   0x9   : > { %s10936_s20 = scalar_select %p8418_p4, 1, 0 }
   0xa   : > { %s10937_s21 = scalar_select %p8422_p5, 1, 0 }
   0xb   : > { %p8082_p6 = pneg %p8422_p5  ;;  %s25_s26 = sadd.s32 1, %s8353_s17 }
   0xc   : > { %s22_s27 = ssub.s32 %s8357_s18, %s8435_s25  ;;  %s8261_s30 = scalar_lea.hbm %s10888_s2, 49152 }
   0xd   : > { %p8430_p7 = pnand %p8082_p6, %p10891_p1  ;;  %p8262_p8 = scmp.ne.s32.totalorder %s10888_s2, %s8261_s30 }
   0xe   : > { %p8268_p12 = scmp.lt.u32.totalorder %s8261_s30, %s10888_s2 }
   0xf   : > { %p8263_p9 = pneg %p8430_p7 }
  0x11   : > { %p8264_p10 = pnand %p8263_p9, %p8262_p8 }
  0x13   : > { %p8265_p11 = pneg %p8264_p10 }
  0x15   : > { %p8270_p13 = pnand %p8268_p12, %p8265_p11 }
  0x17   : > { %8273 = shalt.err (!%p8270_p13)
}
  0x18   : > { %s8274_s9 = scalar_lea.vmem %s154_s23, 49152  ;;  %p8282_p6 = scmp.lt.s32.totalorder %s154_s23, %s154_s23 }
  0x19   : > { %p8275_p0 = scmp.ne.s32.totalorder %s154_s23, %s8274_s9  ;;  %p8283_p1 = scmp.lt.s32.totalorder %s8274_s9, %s8274_s9 }
  0x1b   : > { %p8277_p2 = pnand %p8275_p0, %p8263_p9  ;;  %p8284_p4 = por %p8283_p1, %p8282_p6 }
  0x1d   : > { %p8278_p3 = pneg %p8277_p2 }
  0x1f   : > { %p8285_p5 = pnand %p8284_p4, %p8278_p3 }
  0x21   : > { %8288 = shalt.err (!%p8285_p5)
}
  0x22   : > { %s8360_s10 = smov 1024   ;;  %s8361_s11 = smov 64  }
  0x23   : > { %8085 = dma.hbm_to_vmem [thread:$0]  (!%p8430_p7), %s10888_s2, 49152, %s154_s23, [#allocation5], %s8360_s10, %s8360_s10, %s8361_s11  }
  0x24   : > { %p23_p8 = scmp.eq.s32.totalorder %s22_s27, 0  ;;  %p32_p9 = scmp.ne.s32.totalorder %s8353_s17, %s8349_s16 }
  0x25   : > { %p33_p1 = scmp.eq.s32.totalorder %s8357_s18, 0  ;;  %p8091_p4 = scmp.lt.s32.totalorder %s8357_s18, 2 }
  0x26   : > { %s8461_s14 = scalar_select %p23_p8, %s8353_s17, %s25_s26  }
  0x27   : > { %p34_p5 = por %p33_p1, %p32_p9  ;;  %s170_s15 = sand.u32 1, %s8353_s17  }
  0x28   : > { %s5240_s22 = sshll.u32 %s170_s15, 10  ;;  %s5650_s28 = sshll.u32 %s8357_s18, 14 }
  0x29   : > { %s8468_s5 = scalar_lea.hbm %s10886_s0, %s5650_s28  ;;  %s174_s23 = scalar_lea.vmem [#allocation2], %s5240_s22 }
  0x2a   : > { %s181_s24 = sshll.u32 %s174_s23, 4  ;;  %p8472_p7 = pnand %p8091_p4, %p34_p5  ;;  %s8470_s24 = int_to_ptr.vmem [resolvable:$true] %s181_s24 }
  0x2b   : > { %s8476_s18 = scalar_lea.sflag [#allocation3], %s170_s15  ;;  %s8289_s27 = scalar_lea.hbm %s8468_s5, 16384 }
  0x2c   : > { %p8290_p10 = scmp.ne.s32.totalorder %s8468_s5, %s8289_s27  ;;  %p8291_p11 = pneg %p8472_p7 }
  0x2d   : > { %s8294_s8 = scalar_lea.hbm %s10886_s0, 32768  ;;  %p8295_p0 = scmp.lt.u32.totalorder %s8468_s5, %s10886_s0 }
  0x2e   : > { %p8292_p12 = pnand %p8291_p11, %p8290_p10  ;;  %p8296_p2 = scmp.lt.u32.totalorder %s8294_s8, %s8289_s27 }
  0x2f   : > { %p8298_p6 = scmp.lt.u32.totalorder %s8289_s27, %s8468_s5 }
  0x30   : > { %p8293_p13 = pneg %p8292_p12  ;;  %p8297_p3 = por %p8296_p2, %p8295_p0 }
  0x32   : > { %p8299_p8 = por %p8298_p6, %p8297_p3 }
  0x34   : > { %p8300_p9 = pnand %p8299_p8, %p8293_p13 }
  0x36   : > { %8303 = shalt.err (!%p8300_p9)
}
  0x37   : > { %s8304_s11 = scalar_lea.vmem %s8470_s24, 16384  ;;  %s8362_s12 = smov [#allocation2]  }
  0x38   : > { %p8305_p1 = scmp.ne.s32.totalorder %s8470_s24, %s8304_s11  ;;  %s8309_s13 = sshll.u32 %s8362_s12, 4  ;;  %s8310_s13 = int_to_ptr.vmem [resolvable:$false] %s8309_s13 }
  0x39   : > { %s8311_s15 = scalar_lea.vmem %s8310_s13, 32768  ;;  %p8312_p10 = scmp.lt.s32.totalorder %s8470_s24, %s8310_s13 }
  0x3a   : > { %p8307_p4 = pnand %p8305_p1, %p8291_p11  ;;  %p8313_p12 = scmp.lt.s32.totalorder %s8311_s15, %s8304_s11 }
  0x3c   : > { %p8308_p5 = pneg %p8307_p4  ;;  %p8314_p0 = por %p8313_p12, %p8312_p10 }
  0x3e   : > { %p8315_p2 = pnand %p8314_p0, %p8308_p5 }
  0x40   : > { %8318 = shalt.err (!%p8315_p2)
}
  0x41   : > { %s8363_s22 = smov 128   ;;  %s8364_s28 = smov 8  }
  0x42   : > { %8089 = dma.hbm_to_vmem [thread:$0]  (!%p8472_p7), %s8468_s5, 16384, %s8470_s24, %s8476_s18, %s8363_s22, %s8363_s22, %s8364_s28  }
  0x43   : > { %p10940_p11 = scmp.ne.s32.totalorder %s10937_s21, 0 }
  0x45   : > { %193 = sbr.rel (%p10940_p11) target bundleno = 1454 (0x5ae), region = 36 }
  0x4c   : > { %s195_s29 = sand.u32 1, %s8349_s16   ;;  %p10941_p13 = scmp.ne.s32.totalorder %s10936_s20, 0 }
  0x4d   : > { %s5244_s30 = sshll.u32 %s195_s29, 10  ;;  %s196_s23 = scalar_lea.sflag [#allocation3], %s195_s29 }
  0x4e   : > { %s8507_s27 = scalar_lea.vmem [#allocation2], %s5244_s30 }
  0x4f   : > { %8336 = dma.done.wait (%p10941_p13), %s196_s23, 16384  }
  0x50   : > { %8338 = vsyncadd (%p10941_p13), %s196_s23, 4294950912  ;;  %p10942_p3 = scmp.eq.s32.totalorder %s8410_s19, 0 }
  0x52   : > { %8340 = dma.done.wait (%p10942_p3), [#allocation5], 49152   ;;  %p10943_p7 = pmov %p10942_p3 }
  0x53   : > { %v5376_v0 = vld [vmem:[%s10887_s1 + $0x40] sm:$0xff]  ;;  %v5377_v1 = vld [vmem:[%s10887_s1 + $0x48] sm:$0xff]  ;;  %v5378_v2 = vld [vmem:[%s10887_s1 + $0x50] sm:$0xff]  ;;  %vm369_vm0 = vcmask 523264   ;;  %p228_p6 = scmp.lt.s32.totalorder %s8410_s19, 1  ;;  %vm5141_vm1 = vcmask 252928  }
  0x54   : > { %8342 = vsyncadd (%p10943_p7), [#allocation5], 4294918144  ;;  %v7660_v3 = vpack.c.bf16 %v5377_v1, %v5376_v0  ;;  %v5379_v4 = vld [vmem:[%s10887_s1 + $0x58] sm:$0xff]  ;;  %v5380_v6 = vld [vmem:[%s10887_s1 + $0x60] sm:$0xff]  ;;  %vm5157_vm2 = vcmask 248832  }
  0x55   : > { %v7664_v5 = vpack.c.bf16 %v5379_v4, %v5378_v2  ;;  %v5381_v7 = vld [vmem:[%s10887_s1 + $0x68] sm:$0xff]  ;;  %v233_v8 = vld [vmem:[%s8507_s27] sm:$0xff]  ;;  %v5382_v10 = vld [vmem:[%s10887_s1 + $0x70] sm:$0xff]  ;;  %s11120_s19 = smov (!%p228_p6, %s8410_s19), 1 }
  0x56   : > { %7661 = vmatprep.subr.bf16.mxu1 %v7660_v3  ;;  %7244 = vmatprep.mubr.msk.f32.mxu1 %vm369_vm0, %v233_v8  ;;  %v7668_v9 = vpack.c.bf16 %v5381_v7, %v5380_v6  ;;  %v5383_v11 = vld [vmem:[%s10887_s1 + $0x78] sm:$0xff]  ;;  %v361_v13 = vld [vmem:[%s10887_s1] sm:$0xff]  ;;  %v362_v14 = vld [vmem:[%s10887_s1 + $0x8] sm:$0xff]  ;;  %s5651_s30 = sshll.u32 %s11120_s19, 7 }
  0x57   : > { %7663 = vmatpush3.bf16.msra.mxu1 %v7660_v3  ;;  %7036 = vmatprep.mubr.msk.f32.mxu0 %vm369_vm0, %v233_v8  ;;  %v7672_v12 = vpack.c.bf16 %v5383_v11, %v5382_v10  ;;  %v234_v15 = vld [vmem:[%s8507_s27 + $0x8] sm:$0xff]  ;;  %v7644_v16 = vpack.c.bf16 %v362_v14, %v361_v13  ;;  %v363_v17 = vld [vmem:[%s10887_s1 + $0x10] sm:$0xff]  ;;  %v364_v18 = vld [vmem:[%s10887_s1 + $0x18] sm:$0xff]  ;;  %s10810_s5 = scalar_lea.vmem %s10890_s4, %s5651_s30 }
  0x58   : > { %7665 = vmatprep.subr.bf16.mxu1 %v7664_v5  ;;  %v235_v19 = vld [vmem:[%s8507_s27 + $0x10] sm:$0xff]  ;;  %v7648_v20 = vpack.c.bf16 %v364_v18, %v363_v17  ;;  %v365_v21 = vld [vmem:[%s10887_s1 + $0x20] sm:$0xff]  ;;  %v366_v22 = vld [vmem:[%s10887_s1 + $0x28] sm:$0xff] }
  0x59   : > { %7645 = vmatprep.subr.bf16.mxu0 %v7644_v16  ;;  %v236_v23 = vld [vmem:[%s8507_s27 + $0x18] sm:$0xff]  ;;  %v7652_v24 = vpack.c.bf16 %v366_v22, %v365_v21  ;;  %v237_v25 = vld [vmem:[%s8507_s27 + $0x20] sm:$0xff]  ;;  %v367_v26 = vld [vmem:[%s10887_s1 + $0x30] sm:$0xff] }
  0x5a   : > { %7647 = vmatpush3.bf16.msra.mxu0 %v7644_v16  ;;  %v368_v27 = vld [vmem:[%s10887_s1 + $0x38] sm:$0xff]  ;;  %v238_v28 = vld [vmem:[%s8507_s27 + $0x28] sm:$0xff]  ;;  %v239_v30 = vld [vmem:[%s8507_s27 + $0x30] sm:$0xff] }
  0x5b   : > { %7667 = vmatpush3.bf16.msra.mxu1 %v7664_v5  ;;  %7649 = vmatprep.subr.bf16.mxu0 %v7648_v20  ;;  %v7656_v29 = vpack.c.bf16 %v368_v27, %v367_v26  ;;  %v240_v31 = vld [vmem:[%s8507_s27 + $0x38] sm:$0xff]  ;;  %v241_v32 = vld [vmem:[%s8507_s27 + $0x40] sm:$0xff]  ;;  %v242_v33 = vld [vmem:[%s8507_s27 + $0x48] sm:$0xff] }
  0x5c   : > { %7669 = vmatprep.subr.bf16.mxu1 %v7668_v9  ;;  %v243_v34 = vld [vmem:[%s8507_s27 + $0x50] sm:$0xff]  ;;  %v244_v35 = vld [vmem:[%s8507_s27 + $0x58] sm:$0xff]  ;;  %v245_v36 = vld [vmem:[%s8507_s27 + $0x60] sm:$0xff] }
  0x5d   : > { %v246_v37 = vld [vmem:[%s8507_s27 + $0x68] sm:$0xff]  ;;  %v247_v38 = vld [vmem:[%s8507_s27 + $0x70] sm:$0xff]  ;;  %v248_v39 = vld [vmem:[%s8507_s27 + $0x78] sm:$0xff] }
  0x5e   : > { %7651 = vmatpush3.bf16.msra.mxu0 %v7648_v20  ;;  %v249_v40 = vld [vmem:[%s8507_s27 + $0x80] sm:$0xff]  ;;  %v250_v41 = vld [vmem:[%s8507_s27 + $0x88] sm:$0xff]  ;;  %v251_v42 = vld [vmem:[%s8507_s27 + $0x90] sm:$0xff] }
  0x5f   : > { %7671 = vmatpush3.bf16.msra.mxu1 %v7668_v9  ;;  %7653 = vmatprep.subr.bf16.mxu0 %v7652_v24  ;;  %v252_v43 = vld [vmem:[%s8507_s27 + $0x98] sm:$0xff]  ;;  %v253_v44 = vld [vmem:[%s8507_s27 + $0xa0] sm:$0xff]  ;;  %v254_v45 = vld [vmem:[%s8507_s27 + $0xa8] sm:$0xff] }
  0x60   : > { %7673 = vmatprep.subr.bf16.mxu1 %v7672_v12  ;;  %v255_v46 = vld [vmem:[%s8507_s27 + $0xb0] sm:$0xff]  ;;  %v256_v47 = vld [vmem:[%s8507_s27 + $0xb8] sm:$0xff]  ;;  %v257_v48 = vld [vmem:[%s8507_s27 + $0xc0] sm:$0xff] }
  0x61   : > { %v258_v49 = vld [vmem:[%s8507_s27 + $0xc8] sm:$0xff]  ;;  %v259_v50 = vld [vmem:[%s8507_s27 + $0xd0] sm:$0xff]  ;;  %v260_v51 = vld [vmem:[%s8507_s27 + $0xd8] sm:$0xff] }
  0x62   : > { %7655 = vmatpush3.bf16.msra.mxu0 %v7652_v24  ;;  %v261_v52 = vld [vmem:[%s8507_s27 + $0xe0] sm:$0xff]  ;;  %v262_v53 = vld [vmem:[%s8507_s27 + $0xe8] sm:$0xff]  ;;  %v263_v54 = vld [vmem:[%s8507_s27 + $0xf0] sm:$0xff] }
  0x63   : > { %7675 = vmatpush3.bf16.msra.mxu1 %v7672_v12  ;;  %7657 = vmatprep.subr.bf16.mxu0 %v7656_v29  ;;  %v264_v55 = vld [vmem:[%s8507_s27 + $0xf8] sm:$0xff]  ;;  %v265_v56 = vld [vmem:[%s8507_s27 + $0x100] sm:$0xff]  ;;  %v266_v57 = vld [vmem:[%s8507_s27 + $0x108] sm:$0xff] }
  0x64   : > { %v267_v58 = vld [vmem:[%s8507_s27 + $0x110] sm:$0xff]  ;;  %v268_v59 = vld [vmem:[%s8507_s27 + $0x118] sm:$0xff]  ;;  %v269_v60 = vld [vmem:[%s8507_s27 + $0x120] sm:$0xff] }
  0x65   : > { %v270_v61 = vld [vmem:[%s8507_s27 + $0x128] sm:$0xff]  ;;  %v271_v62 = vld [vmem:[%s8507_s27 + $0x130] sm:$0xff]  ;;  %v272_v63 = vld [vmem:[%s8507_s27 + $0x138] sm:$0xff] }
  0x66   : > { %7245 = vmatmul.mubr.msk.f32.vlgmr.msra.gmra.mrb[0].mxu1 %vm369_vm0, %v234_v15  ;;  %7659 = vmatpush3.bf16.msra.mxu0 %v7656_v29  ;;  %v273_v0 = vld [vmem:[%s8507_s27 + $0x140] sm:$0xff]  ;;  %v274_v1 = vld [vmem:[%s8507_s27 + $0x148] sm:$0xff]  ;;  %v275_v2 = vld [vmem:[%s8507_s27 + $0x150] sm:$0xff] }
  0x67   : > { %7247 = vmatprep.mubr.msk.f32.mxu1 %vm369_vm0, %v235_v19  ;;  %v276_v3 = vld [vmem:[%s8507_s27 + $0x158] sm:$0xff]  ;;  %v277_v4 = vld [vmem:[%s8507_s27 + $0x160] sm:$0xff]  ;;  %v278_v5 = vld [vmem:[%s8507_s27 + $0x168] sm:$0xff] }
  0x68   : > { %v279_v6 = vld [vmem:[%s8507_s27 + $0x170] sm:$0xff]  ;;  %v280_v7 = vld [vmem:[%s8507_s27 + $0x178] sm:$0xff]  ;;  %v281_v8 = vld [vmem:[%s8507_s27 + $0x180] sm:$0xff] }
  0x69   : > { %7037 = vmatmul.mubr.msk.f32.vlgmr.msra.gmra.mrb[0].mxu0 %vm369_vm0, %v234_v15  ;;  %v282_v9 = vld [vmem:[%s8507_s27 + $0x188] sm:$0xff]  ;;  %v283_v10 = vld [vmem:[%s8507_s27 + $0x190] sm:$0xff]  ;;  %v284_v11 = vld [vmem:[%s8507_s27 + $0x198] sm:$0xff] }
  0x6a   : > { %7248 = vmatmul.mubr.msk.f32.gmra.mrb[2].mxu1 %vm369_vm0, %v236_v23  ;;  %7039 = vmatprep.mubr.msk.f32.mxu0 %vm369_vm0, %v235_v19  ;;  %v285_v12 = vld [vmem:[%s8507_s27 + $0x1a0] sm:$0xff]  ;;  %v286_v13 = vld [vmem:[%s8507_s27 + $0x1a8] sm:$0xff]  ;;  %v287_v14 = vld [vmem:[%s8507_s27 + $0x1b0] sm:$0xff] }
  0x6b   : > { %7250 = vmatprep.mubr.msk.f32.mxu1 %vm369_vm0, %v237_v25  ;;  %v288_v15 = vld [vmem:[%s8507_s27 + $0x1b8] sm:$0xff]  ;;  %v289_v16 = vld [vmem:[%s8507_s27 + $0x1c0] sm:$0xff]  ;;  %v290_v17 = vld [vmem:[%s8507_s27 + $0x1c8] sm:$0xff] }
  0x6c   : > { %v291_v18 = vld [vmem:[%s8507_s27 + $0x1d0] sm:$0xff]  ;;  %v292_v19 = vld [vmem:[%s8507_s27 + $0x1d8] sm:$0xff]  ;;  %v293_v20 = vld [vmem:[%s8507_s27 + $0x1e0] sm:$0xff] }
  0x6d   : > { %7040 = vmatmul.mubr.msk.f32.gmra.mrb[2].mxu0 %vm369_vm0, %v236_v23  ;;  %v294_v21 = vld [vmem:[%s8507_s27 + $0x1e8] sm:$0xff]  ;;  %v295_v22 = vld [vmem:[%s8507_s27 + $0x1f0] sm:$0xff]  ;;  %v296_v23 = vld [vmem:[%s8507_s27 + $0x1f8] sm:$0xff] }
  0x6e   : > { %7251 = vmatmul.mubr.msk.f32.gmra.mrb[4].mxu1 %vm369_vm0, %v238_v28  ;;  %7042 = vmatprep.mubr.msk.f32.mxu0 %vm369_vm0, %v237_v25  ;;  %v297_v24 = vld [vmem:[%s8507_s27 + $0x200] sm:$0xff]  ;;  %v298_v25 = vld [vmem:[%s8507_s27 + $0x208] sm:$0xff]  ;;  %v299_v26 = vld [vmem:[%s8507_s27 + $0x210] sm:$0xff] }
  0x6f   : > { %7253 = vmatprep.mubr.msk.f32.mxu1 %vm369_vm0, %v239_v30  ;;  %v300_v27 = vld [vmem:[%s8507_s27 + $0x218] sm:$0xff]  ;;  %v302_v29 = vld [vmem:[%s8507_s27 + $0x228] sm:$0xff] }
  0x71   : > { %7043 = vmatmul.mubr.msk.f32.gmra.mrb[4].mxu0 %vm369_vm0, %v238_v28  ;;  %v301_v28 = vld [vmem:[%s8507_s27 + $0x220] sm:$0xff] }
  0x72   : > { %7254 = vmatmul.mubr.msk.f32.gmra.mrb[6].mxu1 %vm369_vm0, %v240_v31  ;;  %7045 = vmatprep.mubr.msk.f32.mxu0 %vm369_vm0, %v239_v30  ;;  %v303_v30 = vld [vmem:[%s8507_s27 + $0x230] sm:$0xff] }
  0x73   : > { %7256 = vmatprep.mubr.msk.f32.mxu1 %vm369_vm0, %v241_v32 }
  0x75   : > { %7046 = vmatmul.mubr.msk.f32.gmra.mrb[6].mxu0 %vm369_vm0, %v240_v31  ;;  %v304_v31 = vld [vmem:[%s8507_s27 + $0x238] sm:$0xff] }
  0x76   : > { %7257 = vmatmul.mubr.msk.f32.gmra.mrb[8].mxu1 %vm369_vm0, %v242_v33  ;;  %7048 = vmatprep.mubr.msk.f32.mxu0 %vm369_vm0, %v241_v32  ;;  %v305_v32 = vld [vmem:[%s8507_s27 + $0x240] sm:$0xff] }
  0x77   : > { %7259 = vmatprep.mubr.msk.f32.mxu1 %vm369_vm0, %v243_v34 }
  0x79   : > { %7049 = vmatmul.mubr.msk.f32.gmra.mrb[8].mxu0 %vm369_vm0, %v242_v33  ;;  %v306_v33 = vld [vmem:[%s8507_s27 + $0x248] sm:$0xff] }
  0x7a   : > { %7260 = vmatmul.mubr.msk.f32.gmra.mrb[10].mxu1 %vm369_vm0, %v244_v35  ;;  %7051 = vmatprep.mubr.msk.f32.mxu0 %vm369_vm0, %v243_v34  ;;  %v307_v34 = vld [vmem:[%s8507_s27 + $0x250] sm:$0xff] }
  0x7b   : > { %7262 = vmatprep.mubr.msk.f32.mxu1 %vm369_vm0, %v245_v36 }
  0x7d   : > { %7052 = vmatmul.mubr.msk.f32.gmra.mrb[10].mxu0 %vm369_vm0, %v244_v35  ;;  %v308_v35 = vld [vmem:[%s8507_s27 + $0x258] sm:$0xff] }
  0x7e   : > { %7263 = vmatmul.mubr.msk.f32.gmra.mrb[12].mxu1 %vm369_vm0, %v246_v37  ;;  %7054 = vmatprep.mubr.msk.f32.mxu0 %vm369_vm0, %v245_v36  ;;  %v309_v36 = vld [vmem:[%s8507_s27 + $0x260] sm:$0xff] }
  0x7f   : > { %7265 = vmatprep.mubr.msk.f32.mxu1 %vm369_vm0, %v247_v38 }
  0x81   : > { %7055 = vmatmul.mubr.msk.f32.gmra.mrb[12].mxu0 %vm369_vm0, %v246_v37  ;;  %v310_v37 = vld [vmem:[%s8507_s27 + $0x268] sm:$0xff] }
  0x82   : > { %7266 = vmatmul.mubr.msk.f32.gmra.mrb[14].mxu1 %vm369_vm0, %v248_v39  ;;  %7057 = vmatprep.mubr.msk.f32.mxu0 %vm369_vm0, %v247_v38  ;;  %v311_v38 = vld [vmem:[%s8507_s27 + $0x270] sm:$0xff] }
  0x83   : > { %7268 = vmatprep.mubr.msk.f32.mxu1 %vm369_vm0, %v249_v40 }
  0x85   : > { %7058 = vmatmul.mubr.msk.f32.gmra.mrb[14].mxu0 %vm369_vm0, %v248_v39  ;;  %v312_v39 = vld [vmem:[%s8507_s27 + $0x278] sm:$0xff] }
  0x86   : > { %7269 = vmatmul.mubr.msk.f32.gmra.mrb[16].mxu1 %vm369_vm0, %v250_v41  ;;  %7060 = vmatprep.mubr.msk.f32.mxu0 %vm369_vm0, %v249_v40  ;;  %v313_v40 = vld [vmem:[%s8507_s27 + $0x280] sm:$0xff] }
  0x87   : > { %7271 = vmatprep.mubr.msk.f32.mxu1 %vm369_vm0, %v251_v42 }
  0x89   : > { %7061 = vmatmul.mubr.msk.f32.gmra.mrb[16].mxu0 %vm369_vm0, %v250_v41  ;;  %v314_v41 = vld [vmem:[%s8507_s27 + $0x288] sm:$0xff] }
  0x8a   : > { %7272 = vmatmul.mubr.msk.f32.gmra.mrb[18].mxu1 %vm369_vm0, %v252_v43  ;;  %7063 = vmatprep.mubr.msk.f32.mxu0 %vm369_vm0, %v251_v42  ;;  %v315_v42 = vld [vmem:[%s8507_s27 + $0x290] sm:$0xff] }
  0x8b   : > { %7274 = vmatprep.mubr.msk.f32.mxu1 %vm369_vm0, %v253_v44 }
  0x8d   : > { %7064 = vmatmul.mubr.msk.f32.gmra.mrb[18].mxu0 %vm369_vm0, %v252_v43  ;;  %v316_v43 = vld [vmem:[%s8507_s27 + $0x298] sm:$0xff] }
  0x8e   : > { %7275 = vmatmul.mubr.msk.f32.gmra.mrb[20].mxu1 %vm369_vm0, %v254_v45  ;;  %7066 = vmatprep.mubr.msk.f32.mxu0 %vm369_vm0, %v253_v44  ;;  %v317_v44 = vld [vmem:[%s8507_s27 + $0x2a0] sm:$0xff] }
  0x8f   : > { %7277 = vmatprep.mubr.msk.f32.mxu1 %vm369_vm0, %v255_v46 }
  0x91   : > { %7067 = vmatmul.mubr.msk.f32.gmra.mrb[20].mxu0 %vm369_vm0, %v254_v45  ;;  %v318_v45 = vld [vmem:[%s8507_s27 + $0x2a8] sm:$0xff] }
  0x92   : > { %7278 = vmatmul.mubr.msk.f32.gmra.mrb[22].mxu1 %vm369_vm0, %v256_v47  ;;  %7069 = vmatprep.mubr.msk.f32.mxu0 %vm369_vm0, %v255_v46  ;;  %v319_v46 = vld [vmem:[%s8507_s27 + $0x2b0] sm:$0xff] }
  0x93   : > { %7280 = vmatprep.mubr.msk.f32.mxu1 %vm369_vm0, %v257_v48 }
  0x95   : > { %7070 = vmatmul.mubr.msk.f32.gmra.mrb[22].mxu0 %vm369_vm0, %v256_v47  ;;  %v320_v47 = vld [vmem:[%s8507_s27 + $0x2b8] sm:$0xff] }
  0x96   : > { %7281 = vmatmul.mubr.msk.f32.gmra.mrb[24].mxu1 %vm369_vm0, %v258_v49  ;;  %7072 = vmatprep.mubr.msk.f32.mxu0 %vm369_vm0, %v257_v48  ;;  %v321_v48 = vld [vmem:[%s8507_s27 + $0x2c0] sm:$0xff] }
  0x97   : > { %7283 = vmatprep.mubr.msk.f32.mxu1 %vm369_vm0, %v259_v50 }
  0x99   : > { %7073 = vmatmul.mubr.msk.f32.gmra.mrb[24].mxu0 %vm369_vm0, %v258_v49  ;;  %v322_v49 = vld [vmem:[%s8507_s27 + $0x2c8] sm:$0xff] }
  0x9a   : > { %7284 = vmatmul.mubr.msk.f32.gmra.mrb[26].mxu1 %vm369_vm0, %v260_v51  ;;  %7075 = vmatprep.mubr.msk.f32.mxu0 %vm369_vm0, %v259_v50  ;;  %v323_v50 = vld [vmem:[%s8507_s27 + $0x2d0] sm:$0xff] }
  0x9b   : > { %7286 = vmatprep.mubr.msk.f32.mxu1 %vm369_vm0, %v261_v52 }
  0x9d   : > { %7076 = vmatmul.mubr.msk.f32.gmra.mrb[26].mxu0 %vm369_vm0, %v260_v51  ;;  %v324_v51 = vld [vmem:[%s8507_s27 + $0x2d8] sm:$0xff] }
  0x9e   : > { %7287 = vmatmul.mubr.msk.f32.gmra.mrb[28].mxu1 %vm369_vm0, %v262_v53  ;;  %7078 = vmatprep.mubr.msk.f32.mxu0 %vm369_vm0, %v261_v52  ;;  %v325_v52 = vld [vmem:[%s8507_s27 + $0x2e0] sm:$0xff] }
  0x9f   : > { %7289 = vmatprep.mubr.msk.f32.mxu1 %vm369_vm0, %v263_v54 }
  0xa1   : > { %7079 = vmatmul.mubr.msk.f32.gmra.mrb[28].mxu0 %vm369_vm0, %v262_v53  ;;  %v326_v53 = vld [vmem:[%s8507_s27 + $0x2e8] sm:$0xff] }
  0xa2   : > { %7290 = vmatmul.mubr.msk.f32.gmra.mrb[30].mxu1 %vm369_vm0, %v264_v55  ;;  %7081 = vmatprep.mubr.msk.f32.mxu0 %vm369_vm0, %v263_v54  ;;  %v327_v54 = vld [vmem:[%s8507_s27 + $0x2f0] sm:$0xff] }
  0xa3   : > { %7292 = vmatprep.mubr.msk.f32.mxu1 %vm369_vm0, %v265_v56 }
  0xa5   : > { %7082 = vmatmul.mubr.msk.f32.gmra.mrb[30].mxu0 %vm369_vm0, %v264_v55  ;;  %v328_v55 = vld [vmem:[%s8507_s27 + $0x2f8] sm:$0xff] }
  0xa6   : > { %7293 = vmatmul.mubr.msk.f32.gmra.mrb[32].mxu1 %vm369_vm0, %v266_v57  ;;  %7084 = vmatprep.mubr.msk.f32.mxu0 %vm369_vm0, %v265_v56  ;;  %v329_v56 = vld [vmem:[%s8507_s27 + $0x300] sm:$0xff] }
  0xa7   : > { %7295 = vmatprep.mubr.msk.f32.mxu1 %vm369_vm0, %v267_v58 }
  0xa9   : > { %7085 = vmatmul.mubr.msk.f32.gmra.mrb[32].mxu0 %vm369_vm0, %v266_v57  ;;  %v330_v57 = vld [vmem:[%s8507_s27 + $0x308] sm:$0xff] }
  0xaa   : > { %7296 = vmatmul.mubr.msk.f32.gmra.mrb[34].mxu1 %vm369_vm0, %v268_v59  ;;  %7087 = vmatprep.mubr.msk.f32.mxu0 %vm369_vm0, %v267_v58  ;;  %v331_v58 = vld [vmem:[%s8507_s27 + $0x310] sm:$0xff] }
  0xab   : > { %7298 = vmatprep.mubr.msk.f32.mxu1 %vm369_vm0, %v269_v60 }
  0xad   : > { %7088 = vmatmul.mubr.msk.f32.gmra.mrb[34].mxu0 %vm369_vm0, %v268_v59  ;;  %v332_v59 = vld [vmem:[%s8507_s27 + $0x318] sm:$0xff] }
  0xae   : > { %7299 = vmatmul.mubr.msk.f32.gmra.mrb[36].mxu1 %vm369_vm0, %v270_v61  ;;  %7090 = vmatprep.mubr.msk.f32.mxu0 %vm369_vm0, %v269_v60  ;;  %v333_v60 = vld [vmem:[%s8507_s27 + $0x320] sm:$0xff] }
  0xaf   : > { %7301 = vmatprep.mubr.msk.f32.mxu1 %vm369_vm0, %v271_v62 }
  0xb1   : > { %7091 = vmatmul.mubr.msk.f32.gmra.mrb[36].mxu0 %vm369_vm0, %v270_v61  ;;  %v334_v61 = vld [vmem:[%s8507_s27 + $0x328] sm:$0xff] }
  0xb2   : > { %7302 = vmatmul.mubr.msk.f32.gmra.mrb[38].mxu1 %vm369_vm0, %v272_v63  ;;  %7093 = vmatprep.mubr.msk.f32.mxu0 %vm369_vm0, %v271_v62  ;;  %v335_v62 = vld [vmem:[%s8507_s27 + $0x330] sm:$0xff] }
  0xb3   : > { %7304 = vmatprep.mubr.msk.f32.mxu1 %vm369_vm0, %v273_v0 }
  0xb5   : > { %7094 = vmatmul.mubr.msk.f32.gmra.mrb[38].mxu0 %vm369_vm0, %v272_v63  ;;  %v336_v63 = vld [vmem:[%s8507_s27 + $0x338] sm:$0xff] }
  0xb6   : > { %7305 = vmatmul.mubr.msk.f32.gmra.mrb[40].mxu1 %vm369_vm0, %v274_v1  ;;  %7096 = vmatprep.mubr.msk.f32.mxu0 %vm369_vm0, %v273_v0  ;;  %v337_v0 = vld [vmem:[%s8507_s27 + $0x340] sm:$0xff] }
  0xb7   : > { %7307 = vmatprep.mubr.msk.f32.mxu1 %vm369_vm0, %v275_v2 }
  0xb9   : > { %7097 = vmatmul.mubr.msk.f32.gmra.mrb[40].mxu0 %vm369_vm0, %v274_v1  ;;  %v338_v1 = vld [vmem:[%s8507_s27 + $0x348] sm:$0xff] }
  0xba   : > { %7308 = vmatmul.mubr.msk.f32.gmra.mrb[42].mxu1 %vm369_vm0, %v276_v3  ;;  %7099 = vmatprep.mubr.msk.f32.mxu0 %vm369_vm0, %v275_v2  ;;  %v339_v2 = vld [vmem:[%s8507_s27 + $0x350] sm:$0xff] }
  0xbb   : > { %7310 = vmatprep.mubr.msk.f32.mxu1 %vm369_vm0, %v277_v4 }
  0xbd   : > { %7100 = vmatmul.mubr.msk.f32.gmra.mrb[42].mxu0 %vm369_vm0, %v276_v3  ;;  %v340_v3 = vld [vmem:[%s8507_s27 + $0x358] sm:$0xff] }
  0xbe   : > { %7311 = vmatmul.mubr.msk.f32.gmra.mrb[44].mxu1 %vm369_vm0, %v278_v5  ;;  %7102 = vmatprep.mubr.msk.f32.mxu0 %vm369_vm0, %v277_v4  ;;  %v341_v4 = vld [vmem:[%s8507_s27 + $0x360] sm:$0xff] }
  0xbf   : > { %7313 = vmatprep.mubr.msk.f32.mxu1 %vm369_vm0, %v279_v6 }
  0xc1   : > { %7103 = vmatmul.mubr.msk.f32.gmra.mrb[44].mxu0 %vm369_vm0, %v278_v5 }
  0xc2   : > { %7314 = vmatmul.mubr.msk.f32.gmra.mrb[46].mxu1 %vm369_vm0, %v280_v7  ;;  %7105 = vmatprep.mubr.msk.f32.mxu0 %vm369_vm0, %v279_v6 }
  0xc3   : > { %7316 = vmatprep.mubr.msk.f32.mxu1 %vm369_vm0, %v281_v8 }
  0xc5   : > { %7106 = vmatmul.mubr.msk.f32.gmra.mrb[46].mxu0 %vm369_vm0, %v280_v7 }
  0xc6   : > { %7317 = vmatmul.mubr.msk.f32.gmra.mrb[48].mxu1 %vm369_vm0, %v282_v9  ;;  %7108 = vmatprep.mubr.msk.f32.mxu0 %vm369_vm0, %v281_v8  ;;  %v342_v8 = vld [vmem:[%s8507_s27 + $0x368] sm:$0xff] }
  0xc7   : > { %7319 = vmatprep.mubr.msk.f32.mxu1 %vm369_vm0, %v283_v10 }
  0xc9   : > { %7109 = vmatmul.mubr.msk.f32.gmra.mrb[48].mxu0 %vm369_vm0, %v282_v9  ;;  %v343_v9 = vld [vmem:[%s8507_s27 + $0x370] sm:$0xff] }
  0xca   : > { %7320 = vmatmul.mubr.msk.f32.gmra.mrb[50].mxu1 %vm369_vm0, %v284_v11  ;;  %7111 = vmatprep.mubr.msk.f32.mxu0 %vm369_vm0, %v283_v10 }
  0xcb   : > { %7322 = vmatprep.mubr.msk.f32.mxu1 %vm369_vm0, %v285_v12 }
  0xcd   : > { %7112 = vmatmul.mubr.msk.f32.gmra.mrb[50].mxu0 %vm369_vm0, %v284_v11 }
  0xce   : > { %7323 = vmatmul.mubr.msk.f32.gmra.mrb[52].mxu1 %vm369_vm0, %v286_v13  ;;  %7114 = vmatprep.mubr.msk.f32.mxu0 %vm369_vm0, %v285_v12 }
  0xcf   : > { %7325 = vmatprep.mubr.msk.f32.mxu1 %vm369_vm0, %v287_v14 }
  0xd1   : > { %7115 = vmatmul.mubr.msk.f32.gmra.mrb[52].mxu0 %vm369_vm0, %v286_v13  ;;  %v344_v13 = vld [vmem:[%s8507_s27 + $0x378] sm:$0xff] }
  0xd2   : > { %7326 = vmatmul.mubr.msk.f32.gmra.mrb[54].mxu1 %vm369_vm0, %v288_v15  ;;  %7117 = vmatprep.mubr.msk.f32.mxu0 %vm369_vm0, %v287_v14  ;;  %v345_v14 = vld [vmem:[%s8507_s27 + $0x380] sm:$0xff] }
  0xd3   : > { %7328 = vmatprep.mubr.msk.f32.mxu1 %vm369_vm0, %v289_v16 }
  0xd5   : > { %7118 = vmatmul.mubr.msk.f32.gmra.mrb[54].mxu0 %vm369_vm0, %v288_v15 }
  0xd6   : > { %7329 = vmatmul.mubr.msk.f32.gmra.mrb[56].mxu1 %vm369_vm0, %v290_v17  ;;  %7120 = vmatprep.mubr.msk.f32.mxu0 %vm369_vm0, %v289_v16 }
  0xd7   : > { %7331 = vmatprep.mubr.msk.f32.mxu1 %vm369_vm0, %v291_v18 }
  0xd9   : > { %7121 = vmatmul.mubr.msk.f32.gmra.mrb[56].mxu0 %vm369_vm0, %v290_v17 }
  0xda   : > { %7332 = vmatmul.mubr.msk.f32.gmra.mrb[58].mxu1 %vm369_vm0, %v292_v19  ;;  %7123 = vmatprep.mubr.msk.f32.mxu0 %vm369_vm0, %v291_v18  ;;  %v346_v18 = vld [vmem:[%s8507_s27 + $0x388] sm:$0xff] }
  0xdb   : > { %7334 = vmatprep.mubr.msk.f32.mxu1 %vm369_vm0, %v293_v20 }
  0xdd   : > { %7124 = vmatmul.mubr.msk.f32.gmra.mrb[58].mxu0 %vm369_vm0, %v292_v19  ;;  %v347_v19 = vld [vmem:[%s8507_s27 + $0x390] sm:$0xff] }
  0xde   : > { %7335 = vmatmul.mubr.msk.f32.gmra.mrb[60].mxu1 %vm369_vm0, %v294_v21  ;;  %7126 = vmatprep.mubr.msk.f32.mxu0 %vm369_vm0, %v293_v20 }
  0xdf   : > { %7337 = vmatprep.mubr.msk.f32.mxu1 %vm369_vm0, %v295_v22 }
  0xe1   : > { %7127 = vmatmul.mubr.msk.f32.gmra.mrb[60].mxu0 %vm369_vm0, %v294_v21 }
  0xe2   : > { %7338 = vmatmul.mubr.msk.f32.gmra.mrb[62].mxu1 %vm369_vm0, %v296_v23  ;;  %7129 = vmatprep.mubr.msk.f32.mxu0 %vm369_vm0, %v295_v22 }
  0xe3   : > { %7340 = vmatprep.mubr.msk.f32.mxu1 %vm369_vm0, %v297_v24 }
  0xe5   : > { %7130 = vmatmul.mubr.msk.f32.gmra.mrb[62].mxu0 %vm369_vm0, %v296_v23  ;;  %v348_v23 = vld [vmem:[%s8507_s27 + $0x398] sm:$0xff] }
  0xe6   : > { %7341 = vmatmul.mubr.msk.f32.gmra.mrb[64].mxu1 %vm369_vm0, %v298_v25  ;;  %7132 = vmatprep.mubr.msk.f32.mxu0 %vm369_vm0, %v297_v24  ;;  %v349_v24 = vld [vmem:[%s8507_s27 + $0x3a0] sm:$0xff] }
  0xe7   : > { %7343 = vmatprep.mubr.msk.f32.mxu1 %vm369_vm0, %v299_v26 }
  0xe9   : > { %7133 = vmatmul.mubr.msk.f32.gmra.mrb[64].mxu0 %vm369_vm0, %v298_v25 }
  0xea   : > { %7344 = vmatmul.mubr.msk.f32.gmra.mrb[66].mxu1 %vm369_vm0, %v300_v27  ;;  %7135 = vmatprep.mubr.msk.f32.mxu0 %vm369_vm0, %v299_v26 }
  0xeb   : > { %7346 = vmatprep.mubr.msk.f32.mxu1 %vm369_vm0, %v301_v28 }
  0xed   : > { %7136 = vmatmul.mubr.msk.f32.gmra.mrb[66].mxu0 %vm369_vm0, %v300_v27 }
  0xee   : > { %7347 = vmatmul.mubr.msk.f32.gmra.mrb[68].mxu1 %vm369_vm0, %v302_v29  ;;  %7138 = vmatprep.mubr.msk.f32.mxu0 %vm369_vm0, %v301_v28 }
  0xef   : > { %7349 = vmatprep.mubr.msk.f32.mxu1 %vm369_vm0, %v303_v30 }
  0xf1   : > { %7139 = vmatmul.mubr.msk.f32.gmra.mrb[68].mxu0 %vm369_vm0, %v302_v29  ;;  %v2350_v29 = vld [vmem:[#allocation4 + $0x580] sm:$0xff] }
  0xf2   : > { %7350 = vmatmul.mubr.msk.f32.gmra.mrb[70].mxu1 %vm369_vm0, %v304_v31  ;;  %7141 = vmatprep.mubr.msk.f32.mxu0 %vm369_vm0, %v303_v30 }
  0xf3   : > { %7352 = vmatprep.mubr.msk.f32.mxu1 %vm369_vm0, %v305_v32 }
  0xf5   : > { %7142 = vmatmul.mubr.msk.f32.gmra.mrb[70].mxu0 %vm369_vm0, %v304_v31  ;;  %v350_v31 = vld [vmem:[%s8507_s27 + $0x3a8] sm:$0xff] }
  0xf6   : > { %7353 = vmatmul.mubr.msk.f32.gmra.mrb[72].mxu1 %vm369_vm0, %v306_v33  ;;  %7144 = vmatprep.mubr.msk.f32.mxu0 %vm369_vm0, %v305_v32  ;;  %v351_v32 = vld [vmem:[%s8507_s27 + $0x3b0] sm:$0xff] }
  0xf7   : > { %7355 = vmatprep.mubr.msk.f32.mxu1 %vm369_vm0, %v307_v34 }
  0xf9   : > { %7145 = vmatmul.mubr.msk.f32.gmra.mrb[72].mxu0 %vm369_vm0, %v306_v33 }
  0xfa   : > { %7356 = vmatmul.mubr.msk.f32.gmra.mrb[74].mxu1 %vm369_vm0, %v308_v35  ;;  %7147 = vmatprep.mubr.msk.f32.mxu0 %vm369_vm0, %v307_v34 }
  0xfb   : > { %7358 = vmatprep.mubr.msk.f32.mxu1 %vm369_vm0, %v309_v36 }
  0xfd   : > { %7148 = vmatmul.mubr.msk.f32.gmra.mrb[74].mxu0 %vm369_vm0, %v308_v35 }
  0xfe   : > { %7359 = vmatmul.mubr.msk.f32.gmra.mrb[76].mxu1 %vm369_vm0, %v310_v37  ;;  %7150 = vmatprep.mubr.msk.f32.mxu0 %vm369_vm0, %v309_v36 }
  0xff   : > { %7361 = vmatprep.mubr.msk.f32.mxu1 %vm369_vm0, %v311_v38 }
 0x101   : > { %7151 = vmatmul.mubr.msk.f32.gmra.mrb[76].mxu0 %vm369_vm0, %v310_v37 }
 0x102   : > { %7362 = vmatmul.mubr.msk.f32.gmra.mrb[78].mxu1 %vm369_vm0, %v312_v39  ;;  %7153 = vmatprep.mubr.msk.f32.mxu0 %vm369_vm0, %v311_v38 }
 0x103   : > { %7364 = vmatprep.mubr.msk.f32.mxu1 %vm369_vm0, %v313_v40 }
 0x105   : > { %7154 = vmatmul.mubr.msk.f32.gmra.mrb[78].mxu0 %vm369_vm0, %v312_v39  ;;  %v352_v39 = vld [vmem:[%s8507_s27 + $0x3b8] sm:$0xff] }
 0x106   : > { %7365 = vmatmul.mubr.msk.f32.gmra.mrb[80].mxu1 %vm369_vm0, %v314_v41  ;;  %7156 = vmatprep.mubr.msk.f32.mxu0 %vm369_vm0, %v313_v40  ;;  %v353_v40 = vld [vmem:[%s8507_s27 + $0x3c0] sm:$0xff] }
 0x107   : > { %7367 = vmatprep.mubr.msk.f32.mxu1 %vm369_vm0, %v315_v42 }
 0x109   : > { %7157 = vmatmul.mubr.msk.f32.gmra.mrb[80].mxu0 %vm369_vm0, %v314_v41 }
 0x10a   : > { %7368 = vmatmul.mubr.msk.f32.gmra.mrb[82].mxu1 %vm369_vm0, %v316_v43  ;;  %7159 = vmatprep.mubr.msk.f32.mxu0 %vm369_vm0, %v315_v42 }
 0x10b   : > { %7370 = vmatprep.mubr.msk.f32.mxu1 %vm369_vm0, %v317_v44 }
 0x10d   : > { %7160 = vmatmul.mubr.msk.f32.gmra.mrb[82].mxu0 %vm369_vm0, %v316_v43 }
 0x10e   : > { %7371 = vmatmul.mubr.msk.f32.gmra.mrb[84].mxu1 %vm369_vm0, %v318_v45  ;;  %7162 = vmatprep.mubr.msk.f32.mxu0 %vm369_vm0, %v317_v44 }
 0x10f   : > { %7373 = vmatprep.mubr.msk.f32.mxu1 %vm369_vm0, %v319_v46 }
 0x111   : > { %7163 = vmatmul.mubr.msk.f32.gmra.mrb[84].mxu0 %vm369_vm0, %v318_v45  ;;  %v2351_v45 = vld [vmem:[#allocation4 + $0x588] sm:$0xff] }
 0x112   : > { %7374 = vmatmul.mubr.msk.f32.gmra.mrb[86].mxu1 %vm369_vm0, %v320_v47  ;;  %7165 = vmatprep.mubr.msk.f32.mxu0 %vm369_vm0, %v319_v46 }
 0x113   : > { %7376 = vmatprep.mubr.msk.f32.mxu1 %vm369_vm0, %v321_v48 }
 0x115   : > { %7166 = vmatmul.mubr.msk.f32.gmra.mrb[86].mxu0 %vm369_vm0, %v320_v47  ;;  %v354_v47 = vld [vmem:[%s8507_s27 + $0x3c8] sm:$0xff] }
 0x116   : > { %7377 = vmatmul.mubr.msk.f32.gmra.mrb[88].mxu1 %vm369_vm0, %v322_v49  ;;  %7168 = vmatprep.mubr.msk.f32.mxu0 %vm369_vm0, %v321_v48  ;;  %v355_v48 = vld [vmem:[%s8507_s27 + $0x3d0] sm:$0xff] }
 0x117   : > { %7379 = vmatprep.mubr.msk.f32.mxu1 %vm369_vm0, %v323_v50 }
 0x119   : > { %7169 = vmatmul.mubr.msk.f32.gmra.mrb[88].mxu0 %vm369_vm0, %v322_v49 }
 0x11a   : > { %7380 = vmatmul.mubr.msk.f32.gmra.mrb[90].mxu1 %vm369_vm0, %v324_v51  ;;  %7171 = vmatprep.mubr.msk.f32.mxu0 %vm369_vm0, %v323_v50 }
 0x11b   : > { %7382 = vmatprep.mubr.msk.f32.mxu1 %vm369_vm0, %v325_v52 }
 0x11d   : > { %7172 = vmatmul.mubr.msk.f32.gmra.mrb[90].mxu0 %vm369_vm0, %v324_v51 }
 0x11e   : > { %7383 = vmatmul.mubr.msk.f32.gmra.mrb[92].mxu1 %vm369_vm0, %v326_v53  ;;  %7174 = vmatprep.mubr.msk.f32.mxu0 %vm369_vm0, %v325_v52 }
 0x11f   : > { %7385 = vmatprep.mubr.msk.f32.mxu1 %vm369_vm0, %v327_v54 }
 0x121   : > { %7175 = vmatmul.mubr.msk.f32.gmra.mrb[92].mxu0 %vm369_vm0, %v326_v53 }
 0x122   : > { %7386 = vmatmul.mubr.msk.f32.gmra.mrb[94].mxu1 %vm369_vm0, %v328_v55  ;;  %7177 = vmatprep.mubr.msk.f32.mxu0 %vm369_vm0, %v327_v54 }
 0x123   : > { %7388 = vmatprep.mubr.msk.f32.mxu1 %vm369_vm0, %v329_v56 }
 0x125   : > { %7178 = vmatmul.mubr.msk.f32.gmra.mrb[94].mxu0 %vm369_vm0, %v328_v55  ;;  %v356_v55 = vld [vmem:[%s8507_s27 + $0x3d8] sm:$0xff] }
 0x126   : > { %7389 = vmatmul.mubr.msk.f32.gmra.mrb[96].mxu1 %vm369_vm0, %v330_v57  ;;  %7180 = vmatprep.mubr.msk.f32.mxu0 %vm369_vm0, %v329_v56  ;;  %v357_v56 = vld [vmem:[%s8507_s27 + $0x3e0] sm:$0xff] }
 0x127   : > { %7391 = vmatprep.mubr.msk.f32.mxu1 %vm369_vm0, %v331_v58 }
 0x129   : > { %7181 = vmatmul.mubr.msk.f32.gmra.mrb[96].mxu0 %vm369_vm0, %v330_v57 }
 0x12a   : > { %7392 = vmatmul.mubr.msk.f32.gmra.mrb[98].mxu1 %vm369_vm0, %v332_v59  ;;  %7183 = vmatprep.mubr.msk.f32.mxu0 %vm369_vm0, %v331_v58 }
 0x12b   : > { %7394 = vmatprep.mubr.msk.f32.mxu1 %vm369_vm0, %v333_v60 }
 0x12d   : > { %7184 = vmatmul.mubr.msk.f32.gmra.mrb[98].mxu0 %vm369_vm0, %v332_v59 }
 0x12e   : > { %7395 = vmatmul.mubr.msk.f32.gmra.mrb[100].mxu1 %vm369_vm0, %v334_v61  ;;  %7186 = vmatprep.mubr.msk.f32.mxu0 %vm369_vm0, %v333_v60 }
 0x12f   : > { %7397 = vmatprep.mubr.msk.f32.mxu1 %vm369_vm0, %v335_v62 }
 0x131   : > { %7187 = vmatmul.mubr.msk.f32.gmra.mrb[100].mxu0 %vm369_vm0, %v334_v61 }
 0x132   : > { %7398 = vmatmul.mubr.msk.f32.gmra.mrb[102].mxu1 %vm369_vm0, %v336_v63  ;;  %7189 = vmatprep.mubr.msk.f32.mxu0 %vm369_vm0, %v335_v62 }
 0x133   : > { %7400 = vmatprep.mubr.msk.f32.mxu1 %vm369_vm0, %v337_v0 }
 0x135   : > { %7190 = vmatmul.mubr.msk.f32.gmra.mrb[102].mxu0 %vm369_vm0, %v336_v63  ;;  %v358_v63 = vld [vmem:[%s8507_s27 + $0x3e8] sm:$0xff] }
 0x136   : > { %7401 = vmatmul.mubr.msk.f32.gmra.mrb[104].mxu1 %vm369_vm0, %v338_v1  ;;  %7192 = vmatprep.mubr.msk.f32.mxu0 %vm369_vm0, %v337_v0  ;;  %v359_v0 = vld [vmem:[%s8507_s27 + $0x3f0] sm:$0xff] }
 0x137   : > { %7403 = vmatprep.mubr.msk.f32.mxu1 %vm369_vm0, %v339_v2 }
 0x139   : > { %v8880_v5 = vpop.f32.mrb[0].mxu1  ;;  %7193 = vmatmul.mubr.msk.f32.gmra.mrb[104].mxu0 %vm369_vm0, %v338_v1 }
 0x13a   : > { %v8883_v6 = vpop.f32.mrb[1].mxu1  ;;  %7404 = vmatmul.mubr.msk.f32.gmra.mrb[106].mxu1 %vm369_vm0, %v340_v3  ;;  %7195 = vmatprep.mubr.msk.f32.mxu0 %vm369_vm0, %v339_v2 }
 0x13b   : > { %v7678_v7 = vpack.c.bf16 %v8880_v5, %v8883_v6  ;;  %7406 = vmatprep.mubr.msk.f32.mxu1 %vm369_vm0, %v341_v4 }
 0x13c   : > { %v8928_v25 = vpop.f32.mrb[0].mxu0 }
 0x13d   : > { %v8892_v10 = vpop.f32.mrb[2].mxu1  ;;  %7196 = vmatmul.mubr.msk.f32.gmra.mrb[106].mxu0 %vm369_vm0, %v340_v3  ;;  %v8933_v27 = vpop.f32.mrb[1].mxu0 }
 0x13e   : > { %v8895_v11 = vpop.f32.mrb[3].mxu1  ;;  %7407 = vmatmul.mubr.msk.f32.gmra.mrb[108].mxu1 %vm369_vm0, %v342_v8  ;;  %7198 = vmatprep.mubr.msk.f32.mxu0 %vm369_vm0, %v341_v4 }
 0x13f   : > { %v7682_v12 = vpack.c.bf16 %v8892_v10, %v8895_v11  ;;  %7409 = vmatprep.mubr.msk.f32.mxu1 %vm369_vm0, %v343_v9 }
 0x140   : > { %v8946_v33 = vpop.f32.mrb[2].mxu0 }
 0x141   : > { %v8904_v15 = vpop.f32.mrb[4].mxu1  ;;  %7199 = vmatmul.mubr.msk.f32.gmra.mrb[108].mxu0 %vm369_vm0, %v342_v8  ;;  %v8951_v35 = vpop.f32.mrb[3].mxu0  ;;  %v2334_v8 = vld [vmem:[#allocation4 + $0x500] sm:$0xff] }
 0x142   : > { %v8907_v16 = vpop.f32.mrb[5].mxu1  ;;  %7410 = vmatmul.mubr.msk.f32.gmra.mrb[110].mxu1 %vm369_vm0, %v344_v13  ;;  %7201 = vmatprep.mubr.msk.f32.mxu0 %vm369_vm0, %v343_v9 }
 0x143   : > { %v7686_v17 = vpack.c.bf16 %v8904_v15, %v8907_v16  ;;  %7412 = vmatprep.mubr.msk.f32.mxu1 %vm369_vm0, %v345_v14  ;;  %v2359_v15 = vld [vmem:[#allocation4 + $0x5c8] sm:$0xff] }
 0x144   : > { %v8964_v41 = vpop.f32.mrb[4].mxu0 }
 0x145   : > { %v8916_v20 = vpop.f32.mrb[6].mxu1  ;;  %7202 = vmatmul.mubr.msk.f32.gmra.mrb[110].mxu0 %vm369_vm0, %v344_v13  ;;  %v8969_v43 = vpop.f32.mrb[5].mxu0  ;;  %v360_v13 = vld [vmem:[%s8507_s27 + $0x3f8] sm:$0xff] }
 0x146   : > { %v8919_v21 = vpop.f32.mrb[7].mxu1  ;;  %7413 = vmatmul.mubr.msk.f32.gmra.mrb[112].mxu1 %vm369_vm0, %v346_v18  ;;  %7204 = vmatprep.mubr.msk.f32.mxu0 %vm369_vm0, %v345_v14  ;;  %v2305_v14 = vld [vmem:[#allocation4 + $0x418] sm:$0xff] }
 0x147   : > { %v7690_v22 = vpack.c.bf16 %v8916_v20, %v8919_v21  ;;  %7415 = vmatprep.mubr.msk.f32.mxu1 %vm369_vm0, %v347_v19 }
 0x148   : > { %v8982_v49 = vpop.f32.mrb[6].mxu0 }
 0x149   : > { %v8930_v26 = vpop.f32.mrb[8].mxu1  ;;  %7205 = vmatmul.mubr.msk.f32.gmra.mrb[112].mxu0 %vm369_vm0, %v346_v18  ;;  %v8987_v51 = vpop.f32.mrb[7].mxu0 }
 0x14a   : > { %v8935_v28 = vpop.f32.mrb[9].mxu1  ;;  %7416 = vmatmul.mubr.msk.f32.gmra.mrb[114].mxu1 %vm369_vm0, %v348_v23  ;;  %7207 = vmatprep.mubr.msk.f32.mxu0 %vm369_vm0, %v347_v19 }
 0x14b   : > { %v7694_v30 = vpack.c.bf16 %v8930_v26, %v8935_v28  ;;  %7418 = vmatprep.mubr.msk.f32.mxu1 %vm369_vm0, %v349_v24 }
 0x14c   : > { %v9000_v57 = vpop.f32.mrb[8].mxu0 }
 0x14d   : > { %v8948_v34 = vpop.f32.mrb[10].mxu1  ;;  %7208 = vmatmul.mubr.msk.f32.gmra.mrb[114].mxu0 %vm369_vm0, %v348_v23  ;;  %v9003_v59 = vpop.f32.mrb[9].mxu0 }
 0x14e   : > { %v8953_v36 = vpop.f32.mrb[11].mxu1  ;;  %7419 = vmatmul.mubr.msk.f32.gmra.mrb[116].mxu1 %vm369_vm0, %v350_v31  ;;  %7210 = vmatprep.mubr.msk.f32.mxu0 %vm369_vm0, %v349_v24 }
 0x14f   : > { %v7698_v38 = vpack.c.bf16 %v8948_v34, %v8953_v36  ;;  %7421 = vmatprep.mubr.msk.f32.mxu1 %vm369_vm0, %v351_v32  ;;  %v2342_v34 = vld [vmem:[#allocation4 + $0x540] sm:$0xff] }
 0x150   : > { %v9012_v1 = vpop.f32.mrb[10].mxu0 }
 0x151   : > { %v8966_v42 = vpop.f32.mrb[12].mxu1  ;;  %7211 = vmatmul.mubr.msk.f32.gmra.mrb[116].mxu0 %vm369_vm0, %v350_v31  ;;  %v9015_v3 = vpop.f32.mrb[11].mxu0 }
 0x152   : > { %v8971_v44 = vpop.f32.mrb[13].mxu1  ;;  %7422 = vmatmul.mubr.msk.f32.gmra.mrb[118].mxu1 %vm369_vm0, %v352_v39  ;;  %7213 = vmatprep.mubr.msk.f32.mxu0 %vm369_vm0, %v351_v32 }
 0x153   : > { %v7702_v46 = vpack.c.bf16 %v8966_v42, %v8971_v44  ;;  %7424 = vmatprep.mubr.msk.f32.mxu1 %vm369_vm0, %v353_v40 }
 0x154   : > { %v9026_v18 = vpop.f32.mrb[12].mxu0 }
 0x155   : > { %v8984_v50 = vpop.f32.mrb[14].mxu1  ;;  %7214 = vmatmul.mubr.msk.f32.gmra.mrb[118].mxu0 %vm369_vm0, %v352_v39  ;;  %v9029_v23 = vpop.f32.mrb[13].mxu0 }
 0x156   : > { %v8989_v52 = vpop.f32.mrb[15].mxu1  ;;  %7425 = vmatmul.mubr.msk.f32.gmra.mrb[120].mxu1 %vm369_vm0, %v354_v47  ;;  %7216 = vmatprep.mubr.msk.f32.mxu0 %vm369_vm0, %v353_v40 }
 0x157   : > { %v7706_v54 = vpack.c.bf16 %v8984_v50, %v8989_v52  ;;  %7427 = vmatprep.mubr.msk.f32.mxu1 %vm369_vm0, %v355_v48  ;;  %v2310_v50 = vld [vmem:[#allocation4 + $0x440] sm:$0xff]  ;;  %v2343_v52 = vld [vmem:[#allocation4 + $0x548] sm:$0xff] }
 0x158   : > { %v9038_v24 = vpop.f32.mrb[14].mxu0 }
 0x159   : > { %v7270_v58 = vpop.f32.mrb[16].mxu1  ;;  %7217 = vmatmul.mubr.msk.f32.gmra.mrb[120].mxu0 %vm369_vm0, %v354_v47  ;;  %v9041_v32 = vpop.f32.mrb[15].mxu0 }
 0x15a   : > { %v1742_v60 = vpop.f32.mrb[17].mxu1  ;;  %7428 = vmatmul.mubr.msk.f32.gmra.mrb[122].mxu1 %vm369_vm0, %v356_v55  ;;  %7219 = vmatprep.mubr.msk.f32.mxu0 %vm369_vm0, %v355_v48 }
 0x15b   : > { %v7676_v62 = vpack.c.bf16 %v7270_v58, %v1742_v60  ;;  %7430 = vmatprep.mubr.msk.f32.mxu1 %vm369_vm0, %v357_v56 }
 0x15d   : > { %v7273_v2 = vpop.f32.mrb[18].mxu1  ;;  %7677 = vmatprep.subr.bf16.mxu0 %v7676_v62  ;;  %7220 = vmatmul.mubr.msk.f32.gmra.mrb[122].mxu0 %vm369_vm0, %v356_v55 }
 0x15e   : > { %v1752_v4 = vpop.f32.mrb[19].mxu1  ;;  %7431 = vmatmul.mubr.msk.f32.gmra.mrb[124].mxu1 %vm369_vm0, %v358_v63  ;;  %7679 = vmatpush3.bf16.msra.mxu0 %v7678_v7 }
 0x15f   : > { %v7680_v9 = vpack.c.bf16 %v7273_v2, %v1752_v4  ;;  %7433 = vmatprep.mubr.msk.f32.mxu1 %vm369_vm0, %v359_v0  ;;  %7222 = vmatprep.mubr.msk.f32.mxu0 %vm369_vm0, %v357_v56 }
 0x161   : > { %v7276_v19 = vpop.f32.mrb[20].mxu1  ;;  %7681 = vmatprep.subr.bf16.mxu0 %v7680_v9  ;;  %7223 = vmatmul.mubr.msk.f32.gmra.mrb[124].mxu0 %vm369_vm0, %v358_v63 }
 0x162   : > { %v1762_v5 = vpop.f32.mrb[21].mxu1  ;;  %7434 = vmatmul.mubr.msk.f32.gmra.mrb[126].mxu1 %vm369_vm0, %v360_v13  ;;  %7683 = vmatpush3.bf16.msra.mxu0 %v7682_v12  ;;  %v9049_v12 = vpop.f32.mrb[16].mxu0 }
 0x163   : > { %v7684_v7 = vpack.c.bf16 %v7276_v19, %v1762_v5  ;;  %2639 = vmatprep.mubr.f32.mxu1 %v2305_v14  ;;  %v9052_v47 = vpop.f32.mrb[17].mxu0  ;;  %7225 = vmatprep.mubr.msk.f32.mxu0 %vm369_vm0, %v359_v0  ;;  %v2302_v5 = vld [vmem:[#allocation4 + $0x400] sm:$0xff] }
 0x165   : > { %v7279_v31 = vpop.f32.mrb[22].mxu1  ;;  %7685 = vmatprep.subr.bf16.mxu0 %v7684_v7  ;;  %7226 = vmatmul.mubr.msk.f32.gmra.mrb[126].mxu0 %vm369_vm0, %v360_v13 }
 0x166   : > { %v1772_v39 = vpop.f32.mrb[23].mxu1  ;;  %7687 = vmatpush3.bf16.msra.mxu0 %v7686_v17  ;;  %v9060_v17 = vpop.f32.mrb[18].mxu0 }
 0x167   : > { %v7688_v11 = vpack.c.bf16 %v7279_v31, %v1772_v39  ;;  %v9063_v55 = vpop.f32.mrb[19].mxu0 }
 0x168   : > { %v9071_v56 = vpop.f32.mrb[20].mxu0 }
 0x169   : > { %v7282_v40 = vpop.f32.mrb[24].mxu1  ;;  %7689 = vmatprep.subr.bf16.mxu0 %v7688_v11  ;;  %v9074_v63 = vpop.f32.mrb[21].mxu0 }
 0x16a   : > { %v1782_v58 = vpop.f32.mrb[25].mxu1  ;;  %7691 = vmatpush3.bf16.msra.mxu0 %v7690_v22  ;;  %v2303_v22 = vld [vmem:[#allocation4 + $0x408] sm:$0xff] }
 0x16b   : > { %v7692_v16 = vpack.c.bf16 %v7282_v40, %v1782_v58  ;;  %2494 = vmatprep.mubr.f32.mxu0 %v2303_v22  ;;  %v2319_v40 = vld [vmem:[#allocation4 + $0x488] sm:$0xff] }
 0x16d   : > { %v7285_v48 = vpop.f32.mrb[26].mxu1  ;;  %7693 = vmatprep.subr.bf16.mxu0 %v7692_v16 }
 0x16e   : > { %v1792_v60 = vpop.f32.mrb[27].mxu1  ;;  %7695 = vmatpush3.bf16.msra.mxu0 %v7694_v30  ;;  %v9081_v30 = vpop.f32.mrb[22].mxu0 }
 0x16f   : > { %v7696_v21 = vpack.c.bf16 %v7285_v48, %v1792_v60  ;;  %v9083_v4 = vpop.f32.mrb[23].mxu0 }
 0x171   : > { %v7288_v62 = vpop.f32.mrb[28].mxu1  ;;  %7697 = vmatprep.subr.bf16.mxu0 %v7696_v21  ;;  %v2318_v21 = vld [vmem:[#allocation4 + $0x480] sm:$0xff] }
 0x172   : > { %v1802_v2 = vpop.f32.mrb[29].mxu1  ;;  %7699 = vmatpush3.bf16.msra.mxu0 %v7698_v38  ;;  %v9090_v38 = vpop.f32.mrb[24].mxu0 }
 0x173   : > { %v7700_v28 = vpack.c.bf16 %v7288_v62, %v1802_v2  ;;  %v9094_v14 = vpop.f32.mrb[25].mxu0  ;;  %v2327_v2 = vld [vmem:[#allocation4 + $0x4c8] sm:$0xff]  ;;  %v2358_v62 = vld [vmem:[#allocation4 + $0x5c0] sm:$0xff] }
 0x174   : > { %v9105_v7 = vpop.f32.mrb[26].mxu0 }
 0x175   : > { %v7291_v0 = vpop.f32.mrb[30].mxu1  ;;  %7701 = vmatprep.subr.bf16.mxu0 %v7700_v28  ;;  %v9109_v39 = vpop.f32.mrb[27].mxu0 }
 0x176   : > { %v1812_v9 = vpop.f32.mrb[31].mxu1  ;;  %7703 = vmatpush3.bf16.msra.mxu0 %v7702_v46  ;;  %v2311_v46 = vld [vmem:[#allocation4 + $0x448] sm:$0xff]  ;;  %v9117_v58 = vpop.f32.mrb[28].mxu0 }
 0x177   : > { %v7704_v36 = vpack.c.bf16 %v7291_v0, %v1812_v9  ;;  %v9121_v48 = vpop.f32.mrb[29].mxu0 }
 0x178   : > { %v9129_v28 = vpop.f32.mrb[30].mxu0 }
 0x179   : > { %7705 = vmatprep.subr.bf16.mxu0 %v7704_v36  ;;  %v9092_v13 = vpop.f32.mrb[32].mxu1  ;;  %v9133_v9 = vpop.f32.mrb[31].mxu0 }
 0x17a   : > { %7707 = vmatpush3.bf16.msra.mxu0 %v7706_v54  ;;  %v9099_v19 = vpop.f32.mrb[33].mxu1  ;;  %v2367_v54 = vld [vmem:[#allocation4 + $0x608] sm:$0xff] }
 0x17c   : > { %v9141_v10 = vpop.f32.mrb[32].mxu0 }
 0x17d   : > { %v9107_v31 = vpop.f32.mrb[34].mxu1  ;;  %2495 = vmatmul.mubr.f32.vlgmr.msra.gmra.mrb[128].mxu0 %v2302_v5  ;;  %v2326_v5 = vld [vmem:[#allocation4 + $0x4c0] sm:$0xff]  ;;  %10944 = vst [vmem:[#allocation8_spill] sm:$0xff] %v9141_v10  ;;  %v9145_v22 = vpop.f32.mrb[33].mxu0  ;;  %v2377_v10 = vld [vmem:[#allocation4 + $0x658] sm:$0xff] }
 0x17e   : > { %v9111_v11 = vpop.f32.mrb[35].mxu1  ;;  %2499 = vmatprep.mubr.f32.mxu0 %v2311_v46  ;;  %10945 = vst [vmem:[#allocation9_spill] sm:$0xff] %v9145_v22 }
 0x180   : > { %v9153_v61 = vpop.f32.mrb[34].mxu0 }
 0x181   : > { %v9119_v16 = vpop.f32.mrb[36].mxu1  ;;  %2500 = vmatmul.mubr.f32.gmra.mrb[130].mxu0 %v2310_v50  ;;  %10946 = vst [vmem:[#allocation10_spill] sm:$0xff] %v9153_v61  ;;  %v9157_v53 = vpop.f32.mrb[35].mxu0  ;;  %v2375_v61 = vld [vmem:[#allocation4 + $0x648] sm:$0xff] }
 0x182   : > { %v9123_v60 = vpop.f32.mrb[37].mxu1  ;;  %2504 = vmatprep.mubr.f32.mxu0 %v2319_v40  ;;  %v2335_v40 = vld [vmem:[#allocation4 + $0x508] sm:$0xff]  ;;  %10947 = vst [vmem:[#allocation11_spill] sm:$0xff] %v9157_v53 }
 0x184   : > { %v9165_v26 = vpop.f32.mrb[36].mxu0 }
 0x185   : > { %v9131_v0 = vpop.f32.mrb[38].mxu1  ;;  %2505 = vmatmul.mubr.f32.gmra.mrb[132].mxu0 %v2318_v21  ;;  %10948 = vst [vmem:[#allocation12_spill] sm:$0xff] %v9165_v26  ;;  %v9169_v20 = vpop.f32.mrb[37].mxu0  ;;  %v2366_v26 = vld [vmem:[#allocation4 + $0x600] sm:$0xff] }
 0x186   : > { %v9135_v36 = vpop.f32.mrb[39].mxu1  ;;  %2509 = vmatprep.mubr.f32.mxu0 %v2327_v2  ;;  %10949 = vst [vmem:[#allocation13_spill] sm:$0xff] %v9169_v20 }
 0x188   : > { %v9177_v2 = vpop.f32.mrb[38].mxu0 }
 0x189   : > { %v9143_v6 = vpop.f32.mrb[40].mxu1  ;;  %2510 = vmatmul.mubr.f32.gmra.mrb[134].mxu0 %v2326_v5  ;;  %10950 = vst [vmem:[#allocation14_spill] sm:$0xff] %v9177_v2  ;;  %v9181_v50 = vpop.f32.mrb[39].mxu0  ;;  %v10962_v2 = vpack.c.bf16 %v9119_v16, %v9123_v60  ;;  %v2398_v16 = vld [vmem:[#allocation4 + $0x700] sm:$0xff] }
 0x18a   : > { %v9147_v21 = vpop.f32.mrb[41].mxu1  ;;  %2514 = vmatprep.mubr.f32.mxu0 %v2335_v40  ;;  %10951 = vst [vmem:[#allocation15_spill] sm:$0xff] %v9181_v50 }
 0x18c   : > { %v9189_v40 = vpop.f32.mrb[40].mxu0 }
 0x18d   : > { %v9155_v42 = vpop.f32.mrb[42].mxu1  ;;  %2515 = vmatmul.mubr.f32.gmra.mrb[136].mxu0 %v2334_v8  ;;  %10952 = vst [vmem:[#allocation16_spill] sm:$0xff] %v9189_v40  ;;  %v9191_v20 = vpop.f32.mrb[41].mxu0  ;;  %v10959_v40 = vpack.c.bf16 %v9107_v31, %v9111_v11  ;;  %v2390_v31 = vld [vmem:[#allocation4 + $0x6c0] sm:$0xff]  ;;  %v10967_v11 = vpack.c.bf16 %v9143_v6, %v9147_v21 }
 0x18e   : > { %v9159_v5 = vpop.f32.mrb[43].mxu1  ;;  %2519 = vmatprep.mubr.f32.mxu0 %v2343_v52  ;;  %10953 = vst [vmem:[#allocation17_spill] sm:$0xff] %v9191_v20  ;;  %v2414_v6 = vld [vmem:[#allocation4 + $0x780] sm:$0xff] }
 0x18f   : > { %v10970_v60 = vpack.c.bf16 %v9155_v42, %v9159_v5  ;;  %v2422_v42 = vld [vmem:[#allocation4 + $0x7c0] sm:$0xf] }
 0x190   : > { %v9195_v22 = vpop.f32.mrb[42].mxu0 }
 0x191   : > { %v9167_v37 = vpop.f32.mrb[44].mxu1  ;;  %2520 = vmatmul.mubr.f32.gmra.mrb[138].mxu0 %v2342_v34  ;;  %10954 = vst [vmem:[#allocation18_spill] sm:$0xff] %v9195_v22  ;;  %v9197_v52 = vpop.f32.mrb[43].mxu0 }
 0x192   : > { %v9171_v8 = vpop.f32.mrb[45].mxu1  ;;  %2524 = vmatprep.mubr.f32.mxu0 %v2351_v45  ;;  %10955 = vst [vmem:[#allocation19_spill] sm:$0xff] %v9197_v52  ;;  %v2328_v52 = vld [vmem:[#allocation4 + $0x4d0] sm:$0xff] }
 0x195   : > { %v9179_v46 = vpop.f32.mrb[46].mxu1  ;;  %2525 = vmatmul.mubr.f32.gmra.mrb[140].mxu0 %v2350_v29 }
 0x196   : > { %v9183_v34 = vpop.f32.mrb[47].mxu1  ;;  %2529 = vmatprep.mubr.f32.mxu0 %v2359_v15 }
 0x199   : > { %v7318_v44 = vpop.f32.mrb[48].mxu1  ;;  %2530 = vmatmul.mubr.f32.gmra.mrb[142].mxu0 %v2358_v62  ;;  %v10956_v62 = vpack.c.bf16 %v9092_v13, %v9099_v19  ;;  %v10964_v13 = vpack.c.bf16 %v9131_v0, %v9135_v36  ;;  %v2406_v0 = vld [vmem:[#allocation4 + $0x740] sm:$0xff]  ;;  %v10973_v36 = vpack.c.bf16 %v9167_v37, %v9171_v8  ;;  %v10976_v37 = vpack.c.bf16 %v9179_v46, %v9183_v34  ;;  %v2304_v8 = vld [vmem:[#allocation4 + $0x410] sm:$0xff] }
 0x19a   : > { %v1902_v29 = vpop.f32.mrb[49].mxu1  ;;  %2534 = vmatprep.mubr.f32.mxu0 %v2367_v54  ;;  %v2374_v54 = vld [vmem:[#allocation4 + $0x640] sm:$0xff]  ;;  %v2312_v46 = vld [vmem:[#allocation4 + $0x450] sm:$0xff] }
 0x19b   : > { %v7708_v53 = vpack.c.bf16 %v7318_v44, %v1902_v29  ;;  %v2383_v44 = vld [vmem:[#allocation4 + $0x688] sm:$0xff]  ;;  %v9204_v29 = vpop.f32.mrb[44].mxu0 }
 0x19c   : > { %10957 = vst [vmem:[#allocation20_spill] sm:$0xff] %v9204_v29 }
 0x19d   : > { %v7321_v45 = vpop.f32.mrb[50].mxu1  ;;  %2535 = vmatmul.mubr.f32.gmra.mrb[144].mxu0 %v2366_v26  ;;  %7709 = vmatprep.subr.bf16.mxu1 %v7708_v53  ;;  %v9206_v53 = vpop.f32.mrb[45].mxu0 }
 0x19e   : > { %v1912_v50 = vpop.f32.mrb[51].mxu1  ;;  %7711 = vmatpush3.bf16.msra.mxu1 %v10956_v62  ;;  %2539 = vmatprep.mubr.f32.mxu0 %v2375_v61  ;;  %10958 = vst [vmem:[#allocation21_spill] sm:$0xff] %v9206_v53  ;;  %v2382_v61 = vld [vmem:[#allocation4 + $0x680] sm:$0xff] }
 0x19f   : > { %v7712_v15 = vpack.c.bf16 %v7321_v45, %v1912_v50  ;;  %v2391_v50 = vld [vmem:[#allocation4 + $0x6c8] sm:$0xff]  ;;  %v9213_v45 = vpop.f32.mrb[46].mxu0 }
 0x1a0   : > { %10960 = vst [vmem:[#allocation22_spill] sm:$0xff] %v9213_v45  ;;  %v2329_v45 = vld [vmem:[#allocation4 + $0x4d8] sm:$0xff] }
 0x1a1   : > { %v7324_v20 = vpop.f32.mrb[52].mxu1  ;;  %2540 = vmatmul.mubr.f32.gmra.mrb[146].mxu0 %v2374_v54  ;;  %7713 = vmatprep.subr.bf16.mxu1 %v7712_v15  ;;  %v9215_v15 = vpop.f32.mrb[47].mxu0 }
 0x1a2   : > { %v1922_v26 = vpop.f32.mrb[53].mxu1  ;;  %7715 = vmatpush3.bf16.msra.mxu1 %v10959_v40  ;;  %2544 = vmatprep.mubr.f32.mxu0 %v2383_v44  ;;  %10961 = vst [vmem:[#allocation23_spill] sm:$0xff] %v9215_v15  ;;  %v9222_v44 = vpop.f32.mrb[48].mxu0  ;;  %v2320_v15 = vld [vmem:[#allocation4 + $0x490] sm:$0xff] }
 0x1a3   : > { %v7716_v19 = vpack.c.bf16 %v7324_v20, %v1922_v26  ;;  %v2399_v20 = vld [vmem:[#allocation4 + $0x708] sm:$0xff] }
 0x1a5   : > { %v7327_v62 = vpop.f32.mrb[54].mxu1  ;;  %2545 = vmatmul.mubr.f32.gmra.mrb[148].mxu0 %v2382_v61  ;;  %7717 = vmatprep.subr.bf16.mxu1 %v7716_v19  ;;  %v9224_v61 = vpop.f32.mrb[49].mxu0 }
 0x1a6   : > { %v1932_v54 = vpop.f32.mrb[55].mxu1  ;;  %7719 = vmatpush3.bf16.msra.mxu1 %v10962_v2  ;;  %2549 = vmatprep.mubr.f32.mxu0 %v2391_v50  ;;  %10963 = vst [vmem:[#allocation24_spill] sm:$0xff] %v9224_v61  ;;  %v2407_v50 = vld [vmem:[#allocation4 + $0x748] sm:$0xff] }
 0x1a7   : > { %v7720_v40 = vpack.c.bf16 %v7327_v62, %v1932_v54  ;;  %v9231_v62 = vpop.f32.mrb[50].mxu0 }
 0x1a8   : > { %10965 = vst [vmem:[#allocation25_spill] sm:$0xff] %v9231_v62 }
 0x1a9   : > { %v7330_v26 = vpop.f32.mrb[56].mxu1  ;;  %2550 = vmatmul.mubr.f32.gmra.mrb[150].mxu0 %v2390_v31  ;;  %7721 = vmatprep.subr.bf16.mxu1 %v7720_v40  ;;  %v9233_v31 = vpop.f32.mrb[51].mxu0 }
 0x1aa   : > { %v1942_v19 = vpop.f32.mrb[57].mxu1  ;;  %7723 = vmatpush3.bf16.msra.mxu1 %v10964_v13  ;;  %2554 = vmatprep.mubr.f32.mxu0 %v2399_v20  ;;  %10966 = vst [vmem:[#allocation26_spill] sm:$0xff] %v9233_v31  ;;  %v2415_v20 = vld [vmem:[#allocation4 + $0x788] sm:$0xff]  ;;  %v2360_v31 = vld [vmem:[#allocation4 + $0x5d0] sm:$0xff] }
 0x1ab   : > { %v7724_v2 = vpack.c.bf16 %v7330_v26, %v1942_v19  ;;  %v9240_v26 = vpop.f32.mrb[52].mxu0 }
 0x1ac   : > { %10968 = vst [vmem:[#allocation27_spill] sm:$0xff] %v9240_v26  ;;  %v2361_v26 = vld [vmem:[#allocation4 + $0x5d8] sm:$0xff] }
 0x1ad   : > { %v7333_v54 = vpop.f32.mrb[58].mxu1  ;;  %2555 = vmatmul.mubr.f32.gmra.mrb[152].mxu0 %v2398_v16  ;;  %7725 = vmatprep.subr.bf16.mxu1 %v7724_v2  ;;  %v9242_v16 = vpop.f32.mrb[53].mxu0 }
 0x1ae   : > { %v1952_v40 = vpop.f32.mrb[59].mxu1  ;;  %7727 = vmatpush3.bf16.msra.mxu1 %v10967_v11  ;;  %2559 = vmatprep.mubr.f32.mxu0 %v2407_v50  ;;  %10969 = vst [vmem:[#allocation28_spill] sm:$0xff] %v9242_v16  ;;  %v2423_v50 = vld [vmem:[#allocation4 + $0x7c8] sm:$0xf]  ;;  %v2352_v16 = vld [vmem:[#allocation4 + $0x590] sm:$0xff] }
 0x1af   : > { %v7728_v13 = vpack.c.bf16 %v7333_v54, %v1952_v40  ;;  %v9249_v54 = vpop.f32.mrb[54].mxu0 }
 0x1b0   : > { %10971 = vst [vmem:[#allocation29_spill] sm:$0xff] %v9249_v54 }
 0x1b1   : > { %v7336_v19 = vpop.f32.mrb[60].mxu1  ;;  %2560 = vmatmul.mubr.f32.gmra.mrb[154].mxu0 %v2406_v0  ;;  %7729 = vmatprep.subr.bf16.mxu1 %v7728_v13  ;;  %v9251_v0 = vpop.f32.mrb[55].mxu0 }
 0x1b2   : > { %v1962_v2 = vpop.f32.mrb[61].mxu1  ;;  %7731 = vmatpush3.bf16.msra.mxu1 %v10970_v60  ;;  %2564 = vmatprep.mubr.f32.mxu0 %v2415_v20  ;;  %10972 = vst [vmem:[#allocation30_spill] sm:$0xff] %v9251_v0  ;;  %v2307_v20 = vld [vmem:[#allocation4 + $0x428] sm:$0xff] }
 0x1b3   : > { %v7732_v11 = vpack.c.bf16 %v7336_v19, %v1962_v2  ;;  %v9258_v19 = vpop.f32.mrb[56].mxu0 }
 0x1b4   : > { %10974 = vst [vmem:[#allocation31_spill] sm:$0xff] %v9258_v19  ;;  %v2353_v19 = vld [vmem:[#allocation4 + $0x598] sm:$0xff] }
 0x1b5   : > { %v7339_v40 = vpop.f32.mrb[62].mxu1  ;;  %2565 = vmatmul.mubr.f32.gmra.mrb[156].mxu0 %v2414_v6  ;;  %7733 = vmatprep.subr.bf16.mxu1 %v7732_v11  ;;  %v9262_v6 = vpop.f32.mrb[57].mxu0 }
 0x1b6   : > { %v1972_v13 = vpop.f32.mrb[63].mxu1  ;;  %7735 = vmatpush3.bf16.msra.mxu1 %v10973_v36  ;;  %2569 = vmatprep.mubr.f32.mxu0 %v2423_v50  ;;  %10975 = vst [vmem:[#allocation32_spill] sm:$0xff] %v9262_v6  ;;  %v2344_v6 = vld [vmem:[#allocation4 + $0x550] sm:$0xff] }
 0x1b7   : > { %v7736_v60 = vpack.c.bf16 %v7339_v40, %v1972_v13  ;;  %v2313_v40 = vld [vmem:[#allocation4 + $0x458] sm:$0xff]  ;;  %v9273_v13 = vpop.f32.mrb[58].mxu0 }
 0x1b8   : > { %10977 = vst [vmem:[#allocation33_spill] sm:$0xff] %v9273_v13 }
 0x1b9   : > { %v9260_v2 = vpop.f32.mrb[64].mxu1  ;;  %2570 = vmatmul.mubr.f32.gmra.mrb[158].mxu0 %v2422_v42  ;;  %7737 = vmatprep.subr.bf16.mxu1 %v7736_v60  ;;  %v9277_v60 = vpop.f32.mrb[59].mxu0 }
 0x1ba   : > { %v9264_v11 = vpop.f32.mrb[65].mxu1  ;;  %7739 = vmatpush3.bf16.msra.mxu1 %v10976_v37  ;;  %2784 = vmatprep.mubr.f32.mxu0 %v2307_v20  ;;  %10978 = vst [vmem:[#allocation34_spill] sm:$0xff] %v9277_v60  ;;  %v2321_v37 = vld [vmem:[#allocation4 + $0x498] sm:$0xff]  ;;  %v9285_v36 = vpop.f32.mrb[60].mxu0  ;;  %v2336_v60 = vld [vmem:[#allocation4 + $0x510] sm:$0xff] }
 0x1bb   : > { %10979 = vst [vmem:[#allocation35_spill] sm:$0xff] %v9285_v36  ;;  %v9289_v50 = vpop.f32.mrb[61].mxu0 }
 0x1bc   : > { %10980 = vst [vmem:[#allocation36_spill] sm:$0xff] %v9289_v50  ;;  %v9297_v20 = vpop.f32.mrb[62].mxu0  ;;  %v2337_v50 = vld [vmem:[#allocation4 + $0x518] sm:$0xff] }
 0x1bd   : > { %v9275_v42 = vpop.f32.mrb[66].mxu1  ;;  %2640 = vmatmul.mubr.f32.vlgmr.msra.gmra.mrb[128].mxu1 %v2304_v8  ;;  %10981 = vst [vmem:[#allocation37_spill] sm:$0xff] %v9297_v20  ;;  %v9301_v29 = vpop.f32.mrb[63].mxu0 }
 0x1be   : > { %v9279_v5 = vpop.f32.mrb[67].mxu1  ;;  %2644 = vmatprep.mubr.f32.mxu1 %v2313_v40  ;;  %10982 = vst [vmem:[#allocation38_spill] sm:$0xff] %v9301_v29  ;;  %v9309_v34 = vpop.f32.mrb[64].mxu0  ;;  %v2345_v29 = vld [vmem:[#allocation4 + $0x558] sm:$0xff] }
 0x1bf   : > { %10983 = vst [vmem:[#allocation39_spill] sm:$0xff] %v9309_v34  ;;  %v9313_v22 = vpop.f32.mrb[65].mxu0 }
 0x1c0   : > { %10984 = vst [vmem:[#allocation40_spill] sm:$0xff] %v9313_v22  ;;  %v9321_v40 = vpop.f32.mrb[66].mxu0  ;;  %v2368_v22 = vld [vmem:[#allocation4 + $0x610] sm:$0xff] }
 0x1c1   : > { %v9287_v21 = vpop.f32.mrb[68].mxu1  ;;  %2645 = vmatmul.mubr.f32.gmra.mrb[130].mxu1 %v2312_v46  ;;  %10985 = vst [vmem:[#allocation41_spill] sm:$0xff] %v9321_v40  ;;  %v9325_v13 = vpop.f32.mrb[67].mxu0 }
 0x1c2   : > { %v9291_v8 = vpop.f32.mrb[69].mxu1  ;;  %2649 = vmatprep.mubr.f32.mxu1 %v2321_v37  ;;  %10986 = vst [vmem:[#allocation42_spill] sm:$0xff] %v9325_v13 }
 0x1c4   : > { %v9333_v37 = vpop.f32.mrb[68].mxu0 }
 0x1c5   : > { %v9299_v53 = vpop.f32.mrb[70].mxu1  ;;  %2650 = vmatmul.mubr.f32.gmra.mrb[132].mxu1 %v2320_v15  ;;  %10987 = vst [vmem:[#allocation43_spill] sm:$0xff] %v9333_v37  ;;  %v9337_v54 = vpop.f32.mrb[69].mxu0 }
 0x1c6   : > { %v9303_v46 = vpop.f32.mrb[71].mxu1  ;;  %2654 = vmatprep.mubr.f32.mxu1 %v2329_v45  ;;  %10988 = vst [vmem:[#allocation44_spill] sm:$0xff] %v9337_v54  ;;  %v2369_v54 = vld [vmem:[#allocation4 + $0x618] sm:$0xff] }
 0x1c8   : > { %v9345_v45 = vpop.f32.mrb[70].mxu0 }
 0x1c9   : > { %v9311_v36 = vpop.f32.mrb[72].mxu1  ;;  %2655 = vmatmul.mubr.f32.gmra.mrb[134].mxu1 %v2328_v52  ;;  %10989 = vst [vmem:[#allocation45_spill] sm:$0xff] %v9345_v45  ;;  %v9349_v40 = vpop.f32.mrb[71].mxu0  ;;  %v10995_v45 = vpack.c.bf16 %v9287_v21, %v9291_v8  ;;  %v2400_v21 = vld [vmem:[#allocation4 + $0x710] sm:$0xff] }
 0x1ca   : > { %v9315_v15 = vpop.f32.mrb[73].mxu1  ;;  %2659 = vmatprep.mubr.f32.mxu1 %v2337_v50  ;;  %10990 = vst [vmem:[#allocation46_spill] sm:$0xff] %v9349_v40 }
 0x1cc   : > { %v9357_v50 = vpop.f32.mrb[72].mxu0 }
 0x1cd   : > { %v9323_v20 = vpop.f32.mrb[74].mxu1  ;;  %2660 = vmatmul.mubr.f32.gmra.mrb[136].mxu1 %v2336_v60  ;;  %10991 = vst [vmem:[#allocation47_spill] sm:$0xff] %v9357_v50  ;;  %v9359_v62 = vpop.f32.mrb[73].mxu0  ;;  %v10994_v50 = vpack.c.bf16 %v9275_v42, %v9279_v5  ;;  %v2392_v5 = vld [vmem:[#allocation4 + $0x6d0] sm:$0xff]  ;;  %v10997_v42 = vpack.c.bf16 %v9311_v36, %v9315_v15 }
 0x1ce   : > { %v9327_v52 = vpop.f32.mrb[75].mxu1  ;;  %2664 = vmatprep.mubr.f32.mxu1 %v2345_v29  ;;  %10992 = vst [vmem:[#allocation48_spill] sm:$0xff] %v9359_v62  ;;  %v2416_v36 = vld [vmem:[#allocation4 + $0x790] sm:$0xff] }
 0x1cf   : > { %v10998_v8 = vpack.c.bf16 %v9323_v20, %v9327_v52  ;;  %v2424_v20 = vld [vmem:[#allocation4 + $0x7d0] sm:$0xf] }
 0x1d0   : > { %v9363_v61 = vpop.f32.mrb[74].mxu0 }
 0x1d1   : > { %v9335_v0 = vpop.f32.mrb[76].mxu1  ;;  %2665 = vmatmul.mubr.f32.gmra.mrb[138].mxu1 %v2344_v6  ;;  %v9365_v29 = vpop.f32.mrb[75].mxu0 }
 0x1d2   : > { %v9339_v60 = vpop.f32.mrb[77].mxu1  ;;  %2669 = vmatprep.mubr.f32.mxu1 %v2353_v19 }
 0x1d5   : > { %v9347_v13 = vpop.f32.mrb[78].mxu1  ;;  %2670 = vmatmul.mubr.f32.gmra.mrb[140].mxu1 %v2352_v16 }
 0x1d6   : > { %v9351_v6 = vpop.f32.mrb[79].mxu1  ;;  %2674 = vmatprep.mubr.f32.mxu1 %v2361_v26 }
 0x1d9   : > { %v7366_v37 = vpop.f32.mrb[80].mxu1  ;;  %2675 = vmatmul.mubr.f32.gmra.mrb[142].mxu1 %v2360_v31  ;;  %v10993_v31 = vpack.c.bf16 %v9260_v2, %v9264_v11  ;;  %v10996_v2 = vpack.c.bf16 %v9299_v53, %v9303_v46  ;;  %v2408_v53 = vld [vmem:[#allocation4 + $0x750] sm:$0xff]  ;;  %v10999_v46 = vpack.c.bf16 %v9335_v0, %v9339_v60  ;;  %v2306_v0 = vld [vmem:[#allocation4 + $0x420] sm:$0xff] }
 0x1da   : > { %v2062_v16 = vpop.f32.mrb[81].mxu1  ;;  %2679 = vmatprep.mubr.f32.mxu1 %v2369_v54  ;;  %v2376_v54 = vld [vmem:[#allocation4 + $0x650] sm:$0xff] }
 0x1db   : > { %v7740_v34 = vpack.c.bf16 %v7366_v37, %v2062_v16  ;;  %v2385_v37 = vld [vmem:[#allocation4 + $0x698] sm:$0xff]  ;;  %v9372_v16 = vpop.f32.mrb[76].mxu0 }
 0x1dd   : > { %v7369_v19 = vpop.f32.mrb[82].mxu1  ;;  %7741 = vmatprep.subr.bf16.mxu0 %v7740_v34  ;;  %2680 = vmatmul.mubr.f32.gmra.mrb[144].mxu1 %v2368_v22  ;;  %v9374_v22 = vpop.f32.mrb[77].mxu0 }
 0x1de   : > { %v2072_v40 = vpop.f32.mrb[83].mxu1  ;;  %7743 = vmatpush3.bf16.msra.mxu0 %v10993_v31  ;;  %2684 = vmatprep.mubr.f32.mxu1 %v2377_v10  ;;  %v2384_v10 = vld [vmem:[#allocation4 + $0x690] sm:$0xff] }
 0x1df   : > { %v7744_v26 = vpack.c.bf16 %v7369_v19, %v2072_v40  ;;  %v2393_v40 = vld [vmem:[#allocation4 + $0x6d8] sm:$0xff]  ;;  %v9381_v19 = vpop.f32.mrb[78].mxu0 }
 0x1e1   : > { %v7372_v62 = vpop.f32.mrb[84].mxu1  ;;  %7745 = vmatprep.subr.bf16.mxu0 %v7744_v26  ;;  %2685 = vmatmul.mubr.f32.gmra.mrb[146].mxu1 %v2376_v54  ;;  %v9383_v26 = vpop.f32.mrb[79].mxu0 }
 0x1e2   : > { %v2082_v34 = vpop.f32.mrb[85].mxu1  ;;  %7747 = vmatpush3.bf16.msra.mxu0 %v10994_v50  ;;  %2689 = vmatprep.mubr.f32.mxu1 %v2385_v37  ;;  %v9390_v37 = vpop.f32.mrb[80].mxu0 }
 0x1e3   : > { %v7748_v11 = vpack.c.bf16 %v7372_v62, %v2082_v34  ;;  %v2401_v62 = vld [vmem:[#allocation4 + $0x718] sm:$0xff] }
 0x1e5   : > { %v7375_v31 = vpop.f32.mrb[86].mxu1  ;;  %7749 = vmatprep.subr.bf16.mxu0 %v7748_v11  ;;  %2690 = vmatmul.mubr.f32.gmra.mrb[148].mxu1 %v2384_v10  ;;  %v9392_v10 = vpop.f32.mrb[81].mxu0 }
 0x1e6   : > { %v2092_v54 = vpop.f32.mrb[87].mxu1  ;;  %7751 = vmatpush3.bf16.msra.mxu0 %v10995_v45  ;;  %2694 = vmatprep.mubr.f32.mxu1 %v2393_v40  ;;  %v2409_v40 = vld [vmem:[#allocation4 + $0x758] sm:$0xff] }
 0x1e7   : > { %v7752_v50 = vpack.c.bf16 %v7375_v31, %v2092_v54  ;;  %v9399_v31 = vpop.f32.mrb[82].mxu0 }
 0x1e9   : > { %v7378_v34 = vpop.f32.mrb[88].mxu1  ;;  %7753 = vmatprep.subr.bf16.mxu0 %v7752_v50  ;;  %2695 = vmatmul.mubr.f32.gmra.mrb[150].mxu1 %v2392_v5  ;;  %v9401_v5 = vpop.f32.mrb[83].mxu0 }
 0x1ea   : > { %v2102_v11 = vpop.f32.mrb[89].mxu1  ;;  %7755 = vmatpush3.bf16.msra.mxu0 %v10996_v2  ;;  %2699 = vmatprep.mubr.f32.mxu1 %v2401_v62  ;;  %v2417_v62 = vld [vmem:[#allocation4 + $0x798] sm:$0xff] }
 0x1eb   : > { %v7756_v45 = vpack.c.bf16 %v7378_v34, %v2102_v11  ;;  %v9408_v34 = vpop.f32.mrb[84].mxu0 }
 0x1ed   : > { %v7381_v54 = vpop.f32.mrb[90].mxu1  ;;  %7757 = vmatprep.subr.bf16.mxu0 %v7756_v45  ;;  %2700 = vmatmul.mubr.f32.gmra.mrb[152].mxu1 %v2400_v21  ;;  %v9410_v21 = vpop.f32.mrb[85].mxu0 }
 0x1ee   : > { %v2112_v50 = vpop.f32.mrb[91].mxu1  ;;  %7759 = vmatpush3.bf16.msra.mxu0 %v10997_v42  ;;  %2704 = vmatprep.mubr.f32.mxu1 %v2409_v40  ;;  %v2425_v40 = vld [vmem:[#allocation4 + $0x7d8] sm:$0xf] }
 0x1ef   : > { %v7760_v2 = vpack.c.bf16 %v7381_v54, %v2112_v50  ;;  %v9417_v54 = vpop.f32.mrb[86].mxu0 }
 0x1f1   : > { %v7384_v11 = vpop.f32.mrb[92].mxu1  ;;  %7761 = vmatprep.subr.bf16.mxu0 %v7760_v2  ;;  %2705 = vmatmul.mubr.f32.gmra.mrb[154].mxu1 %v2408_v53  ;;  %v9419_v53 = vpop.f32.mrb[87].mxu0 }
 0x1f2   : > { %v2122_v45 = vpop.f32.mrb[93].mxu1  ;;  %7763 = vmatpush3.bf16.msra.mxu0 %v10998_v8  ;;  %2709 = vmatprep.mubr.f32.mxu1 %v2417_v62  ;;  %v2309_v62 = vld [vmem:[#allocation4 + $0x438] sm:$0xff] }
 0x1f3   : > { %v7764_v42 = vpack.c.bf16 %v7384_v11, %v2122_v45  ;;  %v9426_v11 = vpop.f32.mrb[88].mxu0 }
 0x1f5   : > { %v7387_v50 = vpop.f32.mrb[94].mxu1  ;;  %7765 = vmatprep.subr.bf16.mxu0 %v7764_v42  ;;  %2710 = vmatmul.mubr.f32.gmra.mrb[156].mxu1 %v2416_v36  ;;  %v9430_v36 = vpop.f32.mrb[89].mxu0  ;;  %v11000_v42 = vpack.c.bf16 %v9347_v13, %v9351_v6 }
 0x1f6   : > { %v2132_v2 = vpop.f32.mrb[95].mxu1  ;;  %7767 = vmatpush3.bf16.msra.mxu0 %v10999_v46  ;;  %2714 = vmatprep.mubr.f32.mxu1 %v2425_v40  ;;  %v2315_v40 = vld [vmem:[#allocation4 + $0x468] sm:$0xff] }
 0x1f7   : > { %v7768_v8 = vpack.c.bf16 %v7387_v50, %v2132_v2  ;;  %v11001_v2 = vpack.c.bf16 %v9049_v12, %v9052_v47  ;;  %v2323_v12 = vld [vmem:[#allocation4 + $0x4a8] sm:$0xff] }
 0x1f9   : > { %7769 = vmatprep.subr.bf16.mxu0 %v7768_v8  ;;  %v9428_v45 = vpop.f32.mrb[96].mxu1  ;;  %2715 = vmatmul.mubr.f32.gmra.mrb[158].mxu1 %v2424_v20  ;;  %v9444_v20 = vpop.f32.mrb[90].mxu0  ;;  %v2314_v8 = vld [vmem:[#allocation4 + $0x460] sm:$0xff] }
 0x1fa   : > { %7771 = vmatpush3.bf16.msra.mxu0 %v11000_v42  ;;  %v9435_v60 = vpop.f32.mrb[97].mxu1  ;;  %2929 = vmatprep.mubr.f32.mxu1 %v2309_v62  ;;  %v9448_v6 = vpop.f32.mrb[91].mxu0  ;;  %v11002_v42 = vpack.c.bf16 %v8928_v25, %v8933_v27  ;;  %v2322_v25 = vld [vmem:[#allocation4 + $0x4a0] sm:$0xff] }
 0x1fb   : > { %v7774_v50 = vpack.c.bf16 %v9428_v45, %v9435_v60  ;;  %7805 = vmatprep.subr.bf16.mxu0 %v11001_v2  ;;  %v9462_v2 = vpop.f32.mrb[92].mxu0  ;;  %v2386_v45 = vld [vmem:[#allocation4 + $0x6a0] sm:$0xff] }
 0x1fc   : > { %v9466_v52 = vpop.f32.mrb[93].mxu0 }
 0x1fd   : > { %2785 = vmatmul.mubr.f32.vlgmr.msra.gmra.mrb[160].mxu0 %v2306_v0  ;;  %v9446_v13 = vpop.f32.mrb[98].mxu1  ;;  %v11003_v0 = vpack.c.bf16 %v9060_v17, %v9063_v55  ;;  %v2331_v17 = vld [vmem:[#allocation4 + $0x4e8] sm:$0xff] }
 0x1fe   : > { %2789 = vmatprep.mubr.f32.mxu0 %v2315_v40  ;;  %v9450_v62 = vpop.f32.mrb[99].mxu1  ;;  %7807 = vmatpush3.bf16.msra.mxu0 %v11002_v42  ;;  %v11004_v42 = vpack.c.bf16 %v8946_v33, %v8951_v35  ;;  %v2330_v33 = vld [vmem:[#allocation4 + $0x4e0] sm:$0xff] }
 0x1ff   : > { %7809 = vmatprep.subr.bf16.mxu0 %v11003_v0  ;;  %v9480_v0 = vpop.f32.mrb[94].mxu0 }
 0x200   : > { %v9484_v15 = vpop.f32.mrb[95].mxu0 }
 0x201   : > { %2790 = vmatmul.mubr.f32.gmra.mrb[162].mxu0 %v2314_v8  ;;  %v9464_v40 = vpop.f32.mrb[100].mxu1  ;;  %v11005_v8 = vpack.c.bf16 %v9071_v56, %v9074_v63  ;;  %v2339_v56 = vld [vmem:[#allocation4 + $0x528] sm:$0xff] }
 0x202   : > { %2794 = vmatprep.mubr.f32.mxu0 %v2323_v12  ;;  %v9468_v27 = vpop.f32.mrb[101].mxu1  ;;  %7811 = vmatpush3.bf16.msra.mxu0 %v11004_v42  ;;  %v11006_v42 = vpack.c.bf16 %v8964_v41, %v8969_v43  ;;  %v2338_v41 = vld [vmem:[#allocation4 + $0x520] sm:$0xff] }
 0x203   : > { %7813 = vmatprep.subr.bf16.mxu0 %v11005_v8  ;;  %v9498_v8 = vpop.f32.mrb[96].mxu0 }
 0x204   : > { %v9502_v55 = vpop.f32.mrb[97].mxu0 }
 0x205   : > { %2795 = vmatmul.mubr.f32.gmra.mrb[164].mxu0 %v2322_v25  ;;  %v9482_v12 = vpop.f32.mrb[102].mxu1  ;;  %v11007_v25 = vpack.c.bf16 %v9081_v30, %v9083_v4  ;;  %v2347_v30 = vld [vmem:[#allocation4 + $0x568] sm:$0xff] }
 0x206   : > { %2799 = vmatprep.mubr.f32.mxu0 %v2331_v17  ;;  %v9486_v35 = vpop.f32.mrb[103].mxu1  ;;  %7815 = vmatpush3.bf16.msra.mxu0 %v11006_v42  ;;  %v11008_v42 = vpack.c.bf16 %v8982_v49, %v8987_v51  ;;  %v2346_v49 = vld [vmem:[#allocation4 + $0x560] sm:$0xff] }
 0x207   : > { %7817 = vmatprep.subr.bf16.mxu0 %v11007_v25  ;;  %v9516_v25 = vpop.f32.mrb[98].mxu0  ;;  %v11021_v60 = vpack.c.bf16 %v9482_v12, %v9486_v35  ;;  %v2410_v12 = vld [vmem:[#allocation4 + $0x760] sm:$0xff] }
 0x208   : > { %v9520_v63 = vpop.f32.mrb[99].mxu0 }
 0x209   : > { %2800 = vmatmul.mubr.f32.gmra.mrb[166].mxu0 %v2330_v33  ;;  %v9500_v17 = vpop.f32.mrb[104].mxu1  ;;  %v11009_v33 = vpack.c.bf16 %v9090_v38, %v9094_v14  ;;  %v2355_v14 = vld [vmem:[#allocation4 + $0x5a8] sm:$0xff] }
 0x20a   : > { %2804 = vmatprep.mubr.f32.mxu0 %v2339_v56  ;;  %v9504_v43 = vpop.f32.mrb[105].mxu1  ;;  %7819 = vmatpush3.bf16.msra.mxu0 %v11008_v42  ;;  %v11010_v42 = vpack.c.bf16 %v9000_v57, %v9003_v59  ;;  %v2354_v57 = vld [vmem:[#allocation4 + $0x5a0] sm:$0xff] }
 0x20b   : > { %7821 = vmatprep.subr.bf16.mxu0 %v11009_v33  ;;  %v9534_v33 = vpop.f32.mrb[100].mxu0 }
 0x20c   : > { %v9538_v4 = vpop.f32.mrb[101].mxu0 }
 0x20d   : > { %2805 = vmatmul.mubr.f32.gmra.mrb[168].mxu0 %v2338_v41  ;;  %v9518_v56 = vpop.f32.mrb[106].mxu1  ;;  %v11011_v41 = vpack.c.bf16 %v9105_v7, %v9109_v39  ;;  %v2363_v39 = vld [vmem:[#allocation4 + $0x5e8] sm:$0xff] }
 0x20e   : > { %2809 = vmatprep.mubr.f32.mxu0 %v2347_v30  ;;  %v9522_v51 = vpop.f32.mrb[107].mxu1  ;;  %7823 = vmatpush3.bf16.msra.mxu0 %v11010_v42  ;;  %v11012_v42 = vpack.c.bf16 %v9012_v1, %v9015_v3  ;;  %v2362_v3 = vld [vmem:[#allocation4 + $0x5e0] sm:$0xff] }
 0x20f   : > { %7825 = vmatprep.subr.bf16.mxu0 %v11011_v41  ;;  %v9552_v41 = vpop.f32.mrb[102].mxu0 }
 0x210   : > { %v9556_v38 = vpop.f32.mrb[103].mxu0 }
 0x211   : > { %2810 = vmatmul.mubr.f32.gmra.mrb[170].mxu0 %v2346_v49  ;;  %v9536_v30 = vpop.f32.mrb[108].mxu1  ;;  %v11013_v49 = vpack.c.bf16 %v9117_v58, %v9121_v48  ;;  %v2371_v48 = vld [vmem:[#allocation4 + $0x628] sm:$0xff] }
 0x212   : > { %2814 = vmatprep.mubr.f32.mxu0 %v2355_v14  ;;  %v9540_v59 = vpop.f32.mrb[109].mxu1  ;;  %7827 = vmatpush3.bf16.msra.mxu0 %v11012_v42  ;;  %v11014_v42 = vpack.c.bf16 %v9026_v18, %v9029_v23  ;;  %v2370_v18 = vld [vmem:[#allocation4 + $0x620] sm:$0xff]  ;;  %v11016_v23 = vpack.c.bf16 %v9038_v24, %v9041_v32  ;;  %v2379_v58 = vld [vmem:[#allocation4 + $0x668] sm:$0xff]  ;;  %v11023_v32 = vpack.c.bf16 %v9518_v56, %v9522_v51 }
 0x213   : > { %7829 = vmatprep.subr.bf16.mxu0 %v11013_v49  ;;  %v9570_v49 = vpop.f32.mrb[104].mxu0  ;;  %v2378_v24 = vld [vmem:[#allocation4 + $0x660] sm:$0xff] }
 0x214   : > { %v2426_v56 = vld [vmem:[#allocation4 + $0x7e0] sm:$0xf] }
 0x215   : > { %2815 = vmatmul.mubr.f32.gmra.mrb[172].mxu0 %v2354_v57  ;;  %v9554_v14 = vpop.f32.mrb[110].mxu1  ;;  %v11015_v57 = vpack.c.bf16 %v9129_v28, %v9133_v9  ;;  %v11017_v28 = vpack.c.bf16 %v9390_v37, %v9392_v10  ;;  %v2387_v37 = vld [vmem:[#allocation4 + $0x6a8] sm:$0xff]  ;;  %v11028_v51 = vld [vmem:[#allocation8_spill] sm:$0xff] }
 0x216   : > { %v9558_v1 = vpop.f32.mrb[111].mxu1  ;;  %2819 = vmatprep.mubr.f32.mxu0 %v2363_v39  ;;  %7831 = vmatpush3.bf16.msra.mxu0 %v11014_v42  ;;  %v9572_v39 = vpop.f32.mrb[105].mxu0  ;;  %v11024_v42 = vpack.c.bf16 %v9536_v30, %v9540_v59  ;;  %v2308_v30 = vld [vmem:[#allocation4 + $0x430] sm:$0xff]  ;;  %v1459_v59 = vld [vmem:[#allocation4] sm:$0xff] }
 0x217   : > { %7833 = vmatprep.subr.bf16.mxu0 %v11015_v57  ;;  %v9582_v9 = vpop.f32.mrb[106].mxu0 }
 0x219   : > { %v7414_v7 = vpop.f32.mrb[112].mxu1  ;;  %2820 = vmatmul.mubr.f32.gmra.mrb[174].mxu0 %v2362_v3 }
 0x21a   : > { %v2222_v47 = vpop.f32.mrb[113].mxu1  ;;  %2824 = vmatprep.mubr.f32.mxu0 %v2371_v48  ;;  %7835 = vmatpush3.bf16.msra.mxu0 %v11016_v23  ;;  %v9584_v48 = vpop.f32.mrb[107].mxu0  ;;  %v11018_v23 = vpack.c.bf16 %v9446_v13, %v9450_v62  ;;  %v2394_v13 = vld [vmem:[#allocation4 + $0x6e0] sm:$0xff]  ;;  %v11022_v62 = vpack.c.bf16 %v9500_v17, %v9504_v43  ;;  %v11029_v43 = vld [vmem:[#allocation9_spill] sm:$0xff] }
 0x21b   : > { %v7772_v46 = vpack.c.bf16 %v7414_v7, %v2222_v47  ;;  %7869 = vmatprep.subr.bf16.mxu0 %v11017_v28  ;;  %v9591_v10 = vpop.f32.mrb[108].mxu0  ;;  %v2418_v17 = vld [vmem:[#allocation4 + $0x7a0] sm:$0xff]  ;;  %v11030_v35 = vpack.c.bf16 %v11028_v51, %v11029_v43 }
 0x21c   : > { %v1475_v43 = vld [vmem:[#allocation4 + $0x80] sm:$0xff] }
 0x21d   : > { %v7417_v3 = vpop.f32.mrb[114].mxu1  ;;  %2825 = vmatmul.mubr.f32.gmra.mrb[176].mxu0 %v2370_v18  ;;  %7773 = vmatprep.subr.bf16.mxu1 %v7772_v46  ;;  %v9593_v46 = vpop.f32.mrb[109].mxu0 }
 0x21e   : > { %v2232_v57 = vpop.f32.mrb[115].mxu1  ;;  %7775 = vmatpush3.bf16.msra.mxu1 %v7774_v50  ;;  %2829 = vmatprep.mubr.f32.mxu0 %v2379_v58  ;;  %v2395_v58 = vld [vmem:[#allocation4 + $0x6e8] sm:$0xff]  ;;  %v9600_v28 = vpop.f32.mrb[110].mxu0 }
 0x21f   : > { %v7776_v47 = vpack.c.bf16 %v7417_v3, %v2232_v57  ;;  %v9602_v57 = vpop.f32.mrb[111].mxu0 }
 0x220   : > { %11019 = vst [vmem:[#allocation49_spill] sm:$0xff] %v9602_v57  ;;  %v11059_v57 = vld [vmem:[#allocation15_spill] sm:$0xff] }
 0x221   : > { %v7420_v7 = vpop.f32.mrb[116].mxu1  ;;  %2830 = vmatmul.mubr.f32.gmra.mrb[178].mxu0 %v2378_v24  ;;  %7777 = vmatprep.subr.bf16.mxu1 %v7776_v47  ;;  %v11020_v47 = vpack.c.bf16 %v9464_v40, %v9468_v27  ;;  %v2402_v40 = vld [vmem:[#allocation4 + $0x720] sm:$0xff] }
 0x222   : > { %v2242_v18 = vpop.f32.mrb[117].mxu1  ;;  %7779 = vmatpush3.bf16.msra.mxu1 %v11018_v23  ;;  %2834 = vmatprep.mubr.f32.mxu0 %v2387_v37 }
 0x223   : > { %v7780_v50 = vpack.c.bf16 %v7420_v7, %v2242_v18  ;;  %v2403_v7 = vld [vmem:[#allocation4 + $0x728] sm:$0xff]  ;;  %v9609_v18 = vpop.f32.mrb[112].mxu0 }
 0x225   : > { %v7423_v3 = vpop.f32.mrb[118].mxu1  ;;  %2835 = vmatmul.mubr.f32.gmra.mrb[180].mxu0 %v2386_v45  ;;  %7781 = vmatprep.subr.bf16.mxu1 %v7780_v50  ;;  %v9611_v45 = vpop.f32.mrb[113].mxu0 }
 0x226   : > { %v2252_v24 = vpop.f32.mrb[119].mxu1  ;;  %7783 = vmatpush3.bf16.msra.mxu1 %v11020_v47  ;;  %2839 = vmatprep.mubr.f32.mxu0 %v2395_v58 }
 0x227   : > { %v7784_v37 = vpack.c.bf16 %v7423_v3, %v2252_v24  ;;  %v2411_v3 = vld [vmem:[#allocation4 + $0x768] sm:$0xff]  ;;  %v9618_v24 = vpop.f32.mrb[114].mxu0 }
 0x229   : > { %v7426_v23 = vpop.f32.mrb[120].mxu1  ;;  %2840 = vmatmul.mubr.f32.gmra.mrb[182].mxu0 %v2394_v13  ;;  %7785 = vmatprep.subr.bf16.mxu1 %v7784_v37  ;;  %v9620_v13 = vpop.f32.mrb[115].mxu0 }
 0x22a   : > { %v2262_v50 = vpop.f32.mrb[121].mxu1  ;;  %7787 = vmatpush3.bf16.msra.mxu1 %v11021_v60  ;;  %2844 = vmatprep.mubr.f32.mxu0 %v2403_v7  ;;  %v2419_v7 = vld [vmem:[#allocation4 + $0x7a8] sm:$0xff] }
 0x22b   : > { %v7788_v58 = vpack.c.bf16 %v7426_v23, %v2262_v50  ;;  %v9627_v23 = vpop.f32.mrb[116].mxu0 }
 0x22d   : > { %v7429_v47 = vpop.f32.mrb[122].mxu1  ;;  %2845 = vmatmul.mubr.f32.gmra.mrb[184].mxu0 %v2402_v40  ;;  %7789 = vmatprep.subr.bf16.mxu1 %v7788_v58  ;;  %v9629_v40 = vpop.f32.mrb[117].mxu0 }
 0x22e   : > { %v2272_v37 = vpop.f32.mrb[123].mxu1  ;;  %7791 = vmatpush3.bf16.msra.mxu1 %v11022_v62  ;;  %2849 = vmatprep.mubr.f32.mxu0 %v2411_v3  ;;  %v2427_v3 = vld [vmem:[#allocation4 + $0x7e8] sm:$0xf] }
 0x22f   : > { %v7792_v60 = vpack.c.bf16 %v7429_v47, %v2272_v37  ;;  %v9636_v47 = vpop.f32.mrb[118].mxu0 }
 0x231   : > { %v7432_v50 = vpop.f32.mrb[124].mxu1  ;;  %2850 = vmatmul.mubr.f32.gmra.mrb[186].mxu0 %v2410_v12  ;;  %7793 = vmatprep.subr.bf16.mxu1 %v7792_v60  ;;  %v9638_v12 = vpop.f32.mrb[119].mxu0 }
 0x232   : > { %v2282_v58 = vpop.f32.mrb[125].mxu1  ;;  %7795 = vmatpush3.bf16.msra.mxu1 %v11023_v32  ;;  %2854 = vmatprep.mubr.f32.mxu0 %v2419_v7  ;;  %v1460_v7 = vld [vmem:[#allocation4 + $0x8] sm:$0xff] }
 0x233   : > { %v7796_v62 = vpack.c.bf16 %v7432_v50, %v2282_v58  ;;  %v9645_v50 = vpop.f32.mrb[120].mxu0 }
 0x234   : > { %v9647_v58 = vpop.f32.mrb[121].mxu0 }
 0x235   : > { %v7435_v37 = vpop.f32.mrb[126].mxu1  ;;  %2855 = vmatmul.mubr.f32.gmra.mrb[188].mxu0 %v2418_v17  ;;  %7797 = vmatprep.subr.bf16.mxu1 %v7796_v62  ;;  %v11025_v17 = vpack.c.bf16 %v9554_v14, %v9558_v1  ;;  %v2317_v62 = vld [vmem:[#allocation4 + $0x478] sm:$0xff]  ;;  %v2316_v14 = vld [vmem:[#allocation4 + $0x470] sm:$0xff]  ;;  %v1467_v1 = vld [vmem:[#allocation4 + $0x40] sm:$0xff] }
 0x236   : > { %v2292_v60 = vpop.f32.mrb[127].mxu1  ;;  %7799 = vmatpush3.bf16.msra.mxu1 %v11024_v42  ;;  %2859 = vmatprep.mubr.f32.mxu0 %v2427_v3  ;;  %v1468_v3 = vld [vmem:[#allocation4 + $0x48] sm:$0xff] }
 0x237   : > { %v7800_v32 = vpack.c.bf16 %v7435_v37, %v2292_v60  ;;  %v11026_v37 = vld [vmem:[#allocation24_spill] sm:$0xff]  ;;  %v1476_v42 = vld [vmem:[#allocation4 + $0x88] sm:$0xff] }
 0x238   : > { %v11027_v60 = vpack.c.bf16 %v9222_v44, %v11026_v37  ;;  %v11031_v44 = vld [vmem:[#allocation39_spill] sm:$0xff]  ;;  %v11032_v37 = vld [vmem:[#allocation40_spill] sm:$0xff] }
 0x239   : > { %2860 = vmatmul.mubr.f32.gmra.mrb[190].mxu0 %v2426_v56  ;;  %7801 = vmatprep.subr.bf16.mxu1 %v7800_v32  ;;  %v9657_v56 = vpop.f32.mrb[122].mxu0 }
 0x23a   : > { %7803 = vmatpush3.bf16.msra.mxu1 %v11025_v17  ;;  %3074 = vmatprep.mubr.f32.mxu0 %v1460_v7  ;;  %v9659_v32 = vpop.f32.mrb[123].mxu0  ;;  %v2325_v17 = vld [vmem:[#allocation4 + $0x4b8] sm:$0xff] }
 0x23b   : > { %7837 = vmatprep.subr.bf16.mxu1 %v11027_v60  ;;  %v11033_v60 = vpack.c.bf16 %v11031_v44, %v11032_v37  ;;  %v2333_v44 = vld [vmem:[#allocation4 + $0x4f8] sm:$0xff]  ;;  %v1484_v37 = vld [vmem:[#allocation4 + $0xc8] sm:$0xff] }
 0x23d   : > { %2930 = vmatmul.mubr.f32.vlgmr.msra.gmra.mrb[160].mxu1 %v2308_v30  ;;  %3075 = vmatmul.mubr.f32.vlgmr.msra.gmra.mrb[192].mxu0 %v1459_v59  ;;  %v11034_v30 = vld [vmem:[#allocation25_spill] sm:$0xff]  ;;  %v11035_v59 = vld [vmem:[#allocation26_spill] sm:$0xff] }
 0x23e   : > { %2934 = vmatprep.mubr.f32.mxu1 %v2317_v62  ;;  %3079 = vmatprep.mubr.f32.mxu0 %v1468_v3  ;;  %v11036_v27 = vpack.c.bf16 %v11034_v30, %v11035_v59  ;;  %v11037_v62 = vpack.c.bf16 %v9399_v31, %v9401_v5  ;;  %v9675_v3 = vpop.f32.mrb[124].mxu0  ;;  %v11041_v31 = vld [vmem:[#allocation41_spill] sm:$0xff]  ;;  %v11042_v5 = vld [vmem:[#allocation42_spill] sm:$0xff] }
 0x23f   : > { %7839 = vmatpush3.bf16.msra.mxu1 %v11030_v35  ;;  %7871 = vmatpush3.bf16.msra.mxu0 %v11033_v60  ;;  %v9677_v7 = vpop.f32.mrb[125].mxu0  ;;  %v2324_v35 = vld [vmem:[#allocation4 + $0x4b0] sm:$0xff]  ;;  %v11039_v60 = vld [vmem:[#allocation11_spill] sm:$0xff]  ;;  %v11043_v59 = vpack.c.bf16 %v11041_v31, %v11042_v5  ;;  %v1492_v5 = vld [vmem:[#allocation4 + $0x108] sm:$0xff] }
 0x240   : > { %7841 = vmatprep.subr.bf16.mxu1 %v11036_v27  ;;  %7873 = vmatprep.subr.bf16.mxu0 %v11037_v62  ;;  %v11038_v27 = vld [vmem:[#allocation10_spill] sm:$0xff]  ;;  %v2341_v31 = vld [vmem:[#allocation4 + $0x538] sm:$0xff] }
 0x241   : > { %2935 = vmatmul.mubr.f32.gmra.mrb[162].mxu1 %v2316_v14  ;;  %3080 = vmatmul.mubr.f32.gmra.mrb[194].mxu0 %v1467_v1  ;;  %v11040_v30 = vpack.c.bf16 %v11038_v27, %v11039_v60  ;;  %v11044_v14 = vld [vmem:[#allocation27_spill] sm:$0xff]  ;;  %v11045_v1 = vld [vmem:[#allocation28_spill] sm:$0xff]  ;;  %v2332_v27 = vld [vmem:[#allocation4 + $0x4f0] sm:$0xff] }
 0x242   : > { %2939 = vmatprep.mubr.f32.mxu1 %v2325_v17  ;;  %3084 = vmatprep.mubr.f32.mxu0 %v1476_v42  ;;  %v11046_v62 = vpack.c.bf16 %v11044_v14, %v11045_v1  ;;  %v11047_v42 = vpack.c.bf16 %v9408_v34, %v9410_v21  ;;  %v9693_v17 = vpop.f32.mrb[126].mxu0  ;;  %v1483_v60 = vld [vmem:[#allocation4 + $0xc0] sm:$0xff]  ;;  %v11049_v14 = vld [vmem:[#allocation13_spill] sm:$0xff]  ;;  %v11051_v34 = vld [vmem:[#allocation43_spill] sm:$0xff] }
 0x243   : > { %7843 = vmatpush3.bf16.msra.mxu1 %v11040_v30  ;;  %7875 = vmatpush3.bf16.msra.mxu0 %v11043_v59  ;;  %v9695_v51 = vpop.f32.mrb[127].mxu0  ;;  %v11048_v59 = vld [vmem:[#allocation12_spill] sm:$0xff] }
 0x244   : > { %7845 = vmatprep.subr.bf16.mxu1 %v11046_v62  ;;  %7877 = vmatprep.subr.bf16.mxu0 %v11047_v42  ;;  %v11050_v1 = vpack.c.bf16 %v11048_v59, %v11049_v14  ;;  %v11052_v21 = vld [vmem:[#allocation44_spill] sm:$0xff]  ;;  %v2349_v59 = vld [vmem:[#allocation4 + $0x578] sm:$0xff]  ;;  %v1500_v14 = vld [vmem:[#allocation4 + $0x148] sm:$0xff] }
 0x245   : > { %2940 = vmatmul.mubr.f32.gmra.mrb[164].mxu1 %v2324_v35  ;;  %3085 = vmatmul.mubr.f32.gmra.mrb[196].mxu0 %v1475_v43  ;;  %v11053_v62 = vpack.c.bf16 %v11051_v34, %v11052_v21  ;;  %v11054_v35 = vld [vmem:[#allocation29_spill] sm:$0xff]  ;;  %v11055_v43 = vld [vmem:[#allocation30_spill] sm:$0xff]  ;;  %v1491_v30 = vld [vmem:[#allocation4 + $0x100] sm:$0xff] }
 0x246   : > { %2944 = vmatprep.mubr.f32.mxu1 %v2333_v44  ;;  %3089 = vmatprep.mubr.f32.mxu0 %v1484_v37  ;;  %v11056_v42 = vpack.c.bf16 %v11054_v35, %v11055_v43  ;;  %v11057_v44 = vpack.c.bf16 %v9417_v54, %v9419_v53  ;;  %v2340_v37 = vld [vmem:[#allocation4 + $0x530] sm:$0xff]  ;;  %v11061_v21 = vld [vmem:[#allocation45_spill] sm:$0xff]  ;;  %v11064_v43 = vld [vmem:[#allocation31_spill] sm:$0xff]  ;;  %v11067_v53 = vpack.c.bf16 %v9426_v11, %v9430_v36 }
 0x247   : > { %7847 = vmatpush3.bf16.msra.mxu1 %v11050_v1  ;;  %7879 = vmatpush3.bf16.msra.mxu0 %v11053_v62  ;;  %v11058_v1 = vld [vmem:[#allocation14_spill] sm:$0xff]  ;;  %v11077_v36 = vpack.c.bf16 %v9444_v20, %v9448_v6  ;;  %v11081_v20 = vpack.c.bf16 %v9363_v61, %v9365_v29  ;;  %v11082_v6 = vld [vmem:[#allocation35_spill] sm:$0xff]  ;;  %v5513_v61 = vld [vmem:[%s10887_s1 + $0x88] sm:$0xff] }
 0x248   : > { %7849 = vmatprep.subr.bf16.mxu1 %v11056_v42  ;;  %7881 = vmatprep.subr.bf16.mxu0 %v11057_v44  ;;  %v11060_v34 = vpack.c.bf16 %v11058_v1, %v11059_v57  ;;  %v11062_v62 = vld [vmem:[#allocation46_spill] sm:$0xff]  ;;  %v11065_v42 = vld [vmem:[#allocation32_spill] sm:$0xff]  ;;  %v2357_v57 = vld [vmem:[#allocation4 + $0x5b8] sm:$0xff] }
 0x249   : > { %2945 = vmatmul.mubr.f32.gmra.mrb[166].mxu1 %v2332_v27  ;;  %3090 = vmatmul.mubr.f32.gmra.mrb[198].mxu0 %v1483_v60  ;;  %v11063_v35 = vpack.c.bf16 %v11061_v21, %v11062_v62  ;;  %v11066_v54 = vpack.c.bf16 %v11064_v43, %v11065_v42  ;;  %v2348_v27 = vld [vmem:[#allocation4 + $0x570] sm:$0xff]  ;;  %v1499_v60 = vld [vmem:[#allocation4 + $0x140] sm:$0xff]  ;;  %v11069_v44 = vld [vmem:[#allocation17_spill] sm:$0xff] }
 0x24a   : > { %2949 = vmatprep.mubr.f32.mxu1 %v2341_v31  ;;  %3094 = vmatprep.mubr.f32.mxu0 %v1492_v5  ;;  %v1508_v31 = vld [vmem:[#allocation4 + $0x188] sm:$0xff]  ;;  %v11068_v5 = vld [vmem:[#allocation16_spill] sm:$0xff]  ;;  %v11075_v43 = vld [vmem:[#allocation34_spill] sm:$0xff] }
 0x24b   : > { %7851 = vmatpush3.bf16.msra.mxu1 %v11060_v34  ;;  %7883 = vmatpush3.bf16.msra.mxu0 %v11063_v35  ;;  %v11070_v1 = vpack.c.bf16 %v11068_v5, %v11069_v44  ;;  %v11071_v34 = vld [vmem:[#allocation47_spill] sm:$0xff]  ;;  %v11072_v21 = vld [vmem:[#allocation48_spill] sm:$0xff]  ;;  %v11074_v35 = vld [vmem:[#allocation33_spill] sm:$0xff] }
 0x24c   : > { %7853 = vmatprep.subr.bf16.mxu1 %v11066_v54  ;;  %7885 = vmatprep.subr.bf16.mxu0 %v11067_v53  ;;  %v11073_v62 = vpack.c.bf16 %v11071_v34, %v11072_v21  ;;  %v11076_v11 = vpack.c.bf16 %v11074_v35, %v11075_v43  ;;  %v2365_v54 = vld [vmem:[#allocation4 + $0x5f8] sm:$0xff]  ;;  %v1516_v53 = vld [vmem:[#allocation4 + $0x1c8] sm:$0xff]  ;;  %v11078_v5 = vld [vmem:[#allocation18_spill] sm:$0xff] }
 0x24d   : > { %2950 = vmatmul.mubr.f32.gmra.mrb[168].mxu1 %v2340_v37  ;;  %3095 = vmatmul.mubr.f32.gmra.mrb[200].mxu0 %v1491_v30  ;;  %v11079_v44 = vld [vmem:[#allocation19_spill] sm:$0xff]  ;;  %v5512_v34 = vld [vmem:[%s10887_s1 + $0x80] sm:$0xff]  ;;  %v2364_v21 = vld [vmem:[#allocation4 + $0x5f0] sm:$0xff] }
 0x24e   : > { %2954 = vmatprep.mubr.f32.mxu1 %v2349_v59  ;;  %3099 = vmatprep.mubr.f32.mxu0 %v1500_v14  ;;  %v2356_v59 = vld [vmem:[#allocation4 + $0x5b0] sm:$0xff]  ;;  %v1507_v14 = vld [vmem:[#allocation4 + $0x180] sm:$0xff] }
 0x24f   : > { %7855 = vmatpush3.bf16.msra.mxu1 %v11070_v1  ;;  %7887 = vmatpush3.bf16.msra.mxu0 %v11073_v62  ;;  %v11080_v1 = vpack.c.bf16 %v11078_v5, %v11079_v44  ;;  %v1515_v62 = vld [vmem:[#allocation4 + $0x1c0] sm:$0xff] }
 0x250   : > { %7857 = vmatprep.subr.bf16.mxu1 %v11076_v11  ;;  %7889 = vmatprep.subr.bf16.mxu0 %v11077_v36  ;;  %v5956_v30 = vpop.f32.mrb[128].mxu0  ;;  %v11086_v43 = vld [vmem:[#allocation20_spill] sm:$0xff]  ;;  %v11087_v11 = vld [vmem:[#allocation21_spill] sm:$0xff] }
 0x251   : > { %2955 = vmatmul.mubr.f32.gmra.mrb[170].mxu1 %v2348_v27  ;;  %3100 = vmatmul.mubr.f32.gmra.mrb[202].mxu0 %v1499_v60  ;;  %v5957_v37 = vpop.f32.mrb[129].mxu0  ;;  %v11083_v27 = vld [vmem:[#allocation36_spill] sm:$0xff]  ;;  %v11088_v36 = vpack.c.bf16 %v11086_v43, %v11087_v11  ;;  %v2397_v43 = vld [vmem:[#allocation4 + $0x6f8] sm:$0xff]  ;;  %v1548_v11 = vld [vmem:[#allocation4 + $0x2c8] sm:$0xff] }
 0x252   : > { %2959 = vmatprep.mubr.f32.mxu1 %v2357_v57  ;;  %3104 = vmatprep.mubr.f32.mxu0 %v1508_v31  ;;  %v9735_v42 = vadd.f32 %v5957_v37, %v5956_v30  ;;  %v11084_v60 = vpack.c.bf16 %v11082_v6, %v11083_v27  ;;  %v11085_v57 = vpack.c.bf16 %v9462_v2, %v9466_v52  ;;  %v2373_v52 = vld [vmem:[#allocation4 + $0x638] sm:$0xff]  ;;  %v1524_v2 = vld [vmem:[#allocation4 + $0x208] sm:$0xff]  ;;  %v11094_v27 = vld [vmem:[#allocation22_spill] sm:$0xff] }
 0x253   : > { %7859 = vmatpush3.bf16.msra.mxu1 %v11080_v1  ;;  %7891 = vmatpush3.bf16.msra.mxu0 %v11081_v20  ;;  %v11089_v30 = vpack.c.bf16 %v9372_v16, %v9374_v22  ;;  %v11090_v37 = vld [vmem:[#allocation37_spill] sm:$0xff]  ;;  %v2372_v1 = vld [vmem:[#allocation4 + $0x630] sm:$0xff]  ;;  %v1523_v20 = vld [vmem:[#allocation4 + $0x200] sm:$0xff] }
 0x254   : > { %7861 = vmatprep.subr.bf16.mxu1 %v11084_v60  ;;  %7893 = vmatprep.subr.bf16.mxu0 %v11085_v57  ;;  %v5959_v31 = vpop.f32.mrb[130].mxu0  ;;  %v2381_v22 = vld [vmem:[#allocation4 + $0x678] sm:$0xff]  ;;  %v1532_v6 = vld [vmem:[#allocation4 + $0x248] sm:$0xff] }
 0x255   : > { %2960 = vmatmul.mubr.f32.gmra.mrb[172].mxu1 %v2356_v59  ;;  %3105 = vmatmul.mubr.f32.gmra.mrb[204].mxu0 %v1507_v14  ;;  %v5960_v29 = vpop.f32.mrb[131].mxu0  ;;  %v11091_v59 = vld [vmem:[#allocation38_spill] sm:$0xff]  ;;  %v11095_v60 = vld [vmem:[#allocation23_spill] sm:$0xff] }
 0x256   : > { %2964 = vmatprep.mubr.f32.mxu1 %v2365_v54  ;;  %3109 = vmatprep.mubr.f32.mxu0 %v1516_v53  ;;  %v9755_v35 = vadd.f32 %v5960_v29, %v5959_v31  ;;  %v11092_v14 = vpack.c.bf16 %v11090_v37, %v11091_v59  ;;  %v11093_v54 = vpack.c.bf16 %v9480_v0, %v9484_v15  ;;  %v1531_v29 = vld [vmem:[#allocation4 + $0x240] sm:$0xff]  ;;  %v2396_v37 = vld [vmem:[#allocation4 + $0x6f0] sm:$0xff] }
 0x257   : > { %7863 = vmatpush3.bf16.msra.mxu1 %v11088_v36  ;;  %7895 = vmatpush3.bf16.msra.mxu0 %v11089_v30  ;;  %v9769_v53 = vpack.c.bf16 %v5513_v61, %v5512_v34  ;;  %v11096_v57 = vpack.c.bf16 %v11094_v27, %v11095_v60  ;;  %v11097_v15 = vpack.c.bf16 %v9381_v19, %v9383_v26  ;;  %v2380_v61 = vld [vmem:[#allocation4 + $0x670] sm:$0xff]  ;;  %v1547_v59 = vld [vmem:[#allocation4 + $0x2c0] sm:$0xff]  ;;  %v2413_v27 = vld [vmem:[#allocation4 + $0x778] sm:$0xff] }
 0x258   : > { %7865 = vmatprep.subr.bf16.mxu1 %v11092_v14  ;;  %7897 = vmatprep.subr.bf16.mxu0 %v11093_v54  ;;  %v5962_v5 = vpop.f32.mrb[132].mxu0  ;;  %v11098_v0 = vpack.c.bf16 %v9609_v18, %v9611_v45  ;;  %v2388_v18 = vld [vmem:[#allocation4 + $0x6b0] sm:$0xff]  ;;  %v1539_v45 = vld [vmem:[#allocation4 + $0x280] sm:$0xff]  ;;  %v2405_v54 = vld [vmem:[#allocation4 + $0x738] sm:$0xff] }
 0x259   : > { %2965 = vmatmul.mubr.f32.gmra.mrb[174].mxu1 %v2364_v21  ;;  %3110 = vmatmul.mubr.f32.gmra.mrb[206].mxu0 %v1515_v62  ;;  %v5963_v44 = vpop.f32.mrb[133].mxu0  ;;  %v2389_v62 = vld [vmem:[#allocation4 + $0x6b8] sm:$0xff]  ;;  %v1564_v60 = vld [vmem:[#allocation4 + $0x348] sm:$0xff] }
 0x25a   : > { %2969 = vmatprep.mubr.f32.mxu1 %v2373_v52  ;;  %3114 = vmatprep.mubr.f32.mxu0 %v1524_v2  ;;  %v9771_v16 = vadd.f32 %v5963_v44, %v5962_v5  ;;  %v1540_v52 = vld [vmem:[#allocation4 + $0x288] sm:$0xff] }
 0x25b   : > { %7867 = vmatpush3.bf16.msra.mxu1 %v11096_v57  ;;  %7899 = vmatpush3.bf16.msra.mxu0 %v11097_v15  ;;  %v1556_v5 = vld [vmem:[#allocation4 + $0x308] sm:$0xff] }
 0x25c   : > { %7901 = vmatprep.subr.bf16.mxu1 %v11098_v0  ;;  %7933 = vmatprep.subr.bf16.mxu0 %v9769_v53  ;;  %v5965_v31 = vpop.f32.mrb[134].mxu0  ;;  %v2412_v0 = vld [vmem:[#allocation4 + $0x770] sm:$0xff] }
 0x25d   : > { %2970 = vmatmul.mubr.f32.gmra.mrb[176].mxu1 %v2372_v1  ;;  %3115 = vmatmul.mubr.f32.gmra.mrb[208].mxu0 %v1523_v20  ;;  %v5966_v34 = vpop.f32.mrb[135].mxu0  ;;  %v2404_v20 = vld [vmem:[#allocation4 + $0x730] sm:$0xff] }
 0x25e   : > { %2974 = vmatprep.mubr.f32.mxu1 %v2381_v22  ;;  %3119 = vmatprep.mubr.f32.mxu0 %v1532_v6  ;;  %v9783_v21 = vadd.f32 %v5966_v34, %v5965_v31  ;;  %v1555_v22 = vld [vmem:[#allocation4 + $0x300] sm:$0xff] }
 0x25f   : > { %v1563_v31 = vld [vmem:[#allocation4 + $0x340] sm:$0xff] }
 0x260   : > { %v5968_v19 = vpop.f32.mrb[136].mxu0 }
 0x261   : > { %2975 = vmatmul.mubr.f32.gmra.mrb[178].mxu1 %v2380_v61  ;;  %3120 = vmatmul.mubr.f32.gmra.mrb[210].mxu0 %v1531_v29  ;;  %v5969_v26 = vpop.f32.mrb[137].mxu0  ;;  %v2421_v61 = vld [vmem:[#allocation4 + $0x7b8] sm:$0xff]  ;;  %v1572_v29 = vld [vmem:[#allocation4 + $0x388] sm:$0xff] }
 0x262   : > { %2979 = vmatprep.mubr.f32.mxu1 %v2389_v62  ;;  %3124 = vmatprep.mubr.f32.mxu0 %v1540_v52  ;;  %v9785_v2 = vadd.f32 %v5969_v26, %v5968_v19  ;;  %v2420_v19 = vld [vmem:[#allocation4 + $0x7b0] sm:$0xff]  ;;  %v1571_v26 = vld [vmem:[#allocation4 + $0x380] sm:$0xff] }
 0x264   : > { %v5971_v36 = vpop.f32.mrb[138].mxu0 }
 0x265   : > { %2980 = vmatmul.mubr.f32.gmra.mrb[180].mxu1 %v2388_v18  ;;  %3125 = vmatmul.mubr.f32.gmra.mrb[212].mxu0 %v1539_v45  ;;  %v5972_v30 = vpop.f32.mrb[139].mxu0  ;;  %v2429_v45 = vld [vmem:[#allocation4 + $0x7f8] sm:$0xf] }
 0x266   : > { %2984 = vmatprep.mubr.f32.mxu1 %v2397_v43  ;;  %3129 = vmatprep.mubr.f32.mxu0 %v1548_v11  ;;  %v9787_v14 = vadd.f32 %v5972_v30, %v5971_v36  ;;  %v1580_v43 = vld [vmem:[#allocation4 + $0x3c8] sm:$0xf]  ;;  %v2428_v30 = vld [vmem:[#allocation4 + $0x7f0] sm:$0xf] }
 0x268   : > { %v5974_v44 = vpop.f32.mrb[140].mxu0 }
 0x269   : > { %2985 = vmatmul.mubr.f32.gmra.mrb[182].mxu1 %v2396_v37  ;;  %3130 = vmatmul.mubr.f32.gmra.mrb[214].mxu0 %v1547_v59  ;;  %v5975_v1 = vpop.f32.mrb[141].mxu0  ;;  %v1579_v37 = vld [vmem:[#allocation4 + $0x3c0] sm:$0xf] }
 0x26a   : > { %2989 = vmatprep.mubr.f32.mxu1 %v2405_v54  ;;  %3134 = vmatprep.mubr.f32.mxu0 %v1556_v5  ;;  %v9789_v6 = vadd.f32 %v5975_v1, %v5974_v44  ;;  %v1462_v54 = vld [vmem:[#allocation4 + $0x18] sm:$0xff]  ;;  %v1464_v5 = vld [vmem:[#allocation4 + $0x28] sm:$0xff]  ;;  %v5514_v1 = vld [vmem:[%s10887_s1 + $0x90] sm:$0xff] }
 0x26c   : > { %v5977_v57 = vpop.f32.mrb[142].mxu0 }
 0x26d   : > { %2990 = vmatmul.mubr.f32.gmra.mrb[184].mxu1 %v2404_v20  ;;  %3135 = vmatmul.mubr.f32.gmra.mrb[216].mxu0 %v1555_v22  ;;  %v5978_v15 = vpop.f32.mrb[143].mxu0  ;;  %v5515_v20 = vld [vmem:[%s10887_s1 + $0x98] sm:$0xff] }
 0x26e   : > { %2994 = vmatprep.mubr.f32.mxu1 %v2413_v27  ;;  %3139 = vmatprep.mubr.f32.mxu0 %v1564_v60  ;;  %v9791_v34 = vadd.f32 %v5978_v15, %v5977_v57  ;;  %v1461_v27 = vld [vmem:[#allocation4 + $0x10] sm:$0xff]  ;;  %v1463_v60 = vld [vmem:[#allocation4 + $0x20] sm:$0xff]  ;;  %v1470_v15 = vld [vmem:[#allocation4 + $0x58] sm:$0xff] }
 0x270   : > { %v5980_v62 = vpop.f32.mrb[144].mxu0 }
 0x271   : > { %2995 = vmatmul.mubr.f32.gmra.mrb[186].mxu1 %v2412_v0  ;;  %3140 = vmatmul.mubr.f32.gmra.mrb[218].mxu0 %v1563_v31  ;;  %v5981_v52 = vpop.f32.mrb[145].mxu0  ;;  %v1472_v0 = vld [vmem:[#allocation4 + $0x68] sm:$0xff]  ;;  %v7936_v31 = vpack.c.bf16 %v5515_v20, %v5514_v1  ;;  %v11101_v20 = vpack.c.bf16 %v9516_v25, %v9520_v63  ;;  %v11103_v25 = vpack.c.bf16 %v9534_v33, %v9538_v4 }
 0x272   : > { %2999 = vmatprep.mubr.f32.mxu1 %v2421_v61  ;;  %3144 = vmatprep.mubr.f32.mxu0 %v1572_v29  ;;  %v9793_v18 = vadd.f32 %v5981_v52, %v5980_v62  ;;  %v5516_v29 = vld [vmem:[%s10887_s1 + $0xa0] sm:$0xff]  ;;  %v5517_v62 = vld [vmem:[%s10887_s1 + $0xa8] sm:$0xff]  ;;  %v11105_v4 = vpack.c.bf16 %v9552_v41, %v9556_v38  ;;  %v11106_v33 = vpack.c.bf16 %v9645_v50, %v9647_v58 }
 0x273   : > { %v1488_v1 = vld [vmem:[#allocation4 + $0xe8] sm:$0xff]  ;;  %v11107_v38 = vpack.c.bf16 %v9570_v49, %v9572_v39  ;;  %v11108_v41 = vpack.c.bf16 %v9657_v56, %v9659_v32  ;;  %v11110_v49 = vpack.c.bf16 %v9675_v3, %v9677_v7 }
 0x274   : > { %v5983_v11 = vpop.f32.mrb[146].mxu0  ;;  %v1496_v63 = vld [vmem:[#allocation4 + $0x128] sm:$0xff] }
 0x275   : > { %3000 = vmatmul.mubr.f32.gmra.mrb[188].mxu1 %v2420_v19  ;;  %3145 = vmatmul.mubr.f32.gmra.mrb[220].mxu0 %v1571_v26  ;;  %v5984_v36 = vpop.f32.mrb[147].mxu0  ;;  %v1469_v19 = vld [vmem:[#allocation4 + $0x50] sm:$0xff]  ;;  %v1471_v26 = vld [vmem:[#allocation4 + $0x60] sm:$0xff] }
 0x276   : > { %3004 = vmatprep.mubr.f32.mxu1 %v2429_v45  ;;  %3149 = vmatprep.mubr.f32.mxu0 %v1580_v43  ;;  %v9795_v59 = vadd.f32 %v5984_v36, %v5983_v11  ;;  %v1478_v43 = vld [vmem:[#allocation4 + $0x98] sm:$0xff]  ;;  %v1480_v11 = vld [vmem:[#allocation4 + $0xa8] sm:$0xff]  ;;  %v11099_v36 = vpack.c.bf16 %v9498_v8, %v9502_v55 }
 0x277   : > { %v5519_v55 = vld [vmem:[%s10887_s1 + $0xb8] sm:$0xff] }
 0x278   : > { %v5986_v44 = vpop.f32.mrb[148].mxu0 }
 0x279   : > { %3005 = vmatmul.mubr.f32.gmra.mrb[190].mxu1 %v2428_v30  ;;  %3150 = vmatmul.mubr.f32.gmra.mrb[222].mxu0 %v1579_v37  ;;  %v5987_v22 = vpop.f32.mrb[149].mxu0  ;;  %v11100_v30 = vpack.c.bf16 %v9618_v24, %v9620_v13  ;;  %v7940_v37 = vpack.c.bf16 %v5517_v62, %v5516_v29  ;;  %v1486_v13 = vld [vmem:[#allocation4 + $0xd8] sm:$0xff] }
 0x27a   : > { %3219 = vmatprep.mubr.f32.mxu1 %v1462_v54  ;;  %3364 = vmatprep.mubr.f32.mxu0 %v1464_v5  ;;  %v9803_v57 = vadd.f32 %v5987_v22, %v5986_v44  ;;  %v5518_v5 = vld [vmem:[%s10887_s1 + $0xb0] sm:$0xff]  ;;  %v1479_v44 = vld [vmem:[#allocation4 + $0xa0] sm:$0xff]  ;;  %v11102_v22 = vpack.c.bf16 %v9627_v23, %v9629_v40  ;;  %v1494_v62 = vld [vmem:[#allocation4 + $0x118] sm:$0xff]  ;;  %v11104_v23 = vpack.c.bf16 %v9636_v47, %v9638_v12 }
 0x27c   : > { %v5989_v61 = vpop.f32.mrb[150].mxu0 }
 0x27d   : > { %3220 = vmatmul.mubr.f32.vlgmr.msra.gmra.mrb[192].mxu1 %v1461_v27  ;;  %3365 = vmatmul.mubr.f32.vlgmr.msra.gmra.mrb[224].mxu0 %v1463_v60  ;;  %v5990_v52 = vpop.f32.mrb[151].mxu0  ;;  %v7944_v27 = vpack.c.bf16 %v5519_v55, %v5518_v5  ;;  %v1512_v5 = vld [vmem:[#allocation4 + $0x1a8] sm:$0xff]  ;;  %v1509_v55 = vld [vmem:[#allocation4 + $0x190] sm:$0xff] }
 0x27e   : > { %3224 = vmatprep.mubr.f32.mxu1 %v1470_v15  ;;  %3369 = vmatprep.mubr.f32.mxu0 %v1472_v0  ;;  %v9811_v45 = vadd.f32 %v5990_v52, %v5989_v61  ;;  %v1485_v0 = vld [vmem:[#allocation4 + $0xd0] sm:$0xff]  ;;  %v1487_v61 = vld [vmem:[#allocation4 + $0xe0] sm:$0xff] }
 0x27f   : > { %7903 = vmatpush3.bf16.msra.mxu1 %v11099_v36  ;;  %7935 = vmatpush3.bf16.msra.mxu0 %v9769_v53  ;;  %v1477_v53 = vld [vmem:[#allocation4 + $0x90] sm:$0xff] }
 0x280   : > { %7905 = vmatprep.subr.bf16.mxu1 %v11100_v30  ;;  %7937 = vmatprep.subr.bf16.mxu0 %v7936_v31  ;;  %v5992_v54 = vpop.f32.mrb[152].mxu0  ;;  %v1493_v52 = vld [vmem:[#allocation4 + $0x110] sm:$0xff]  ;;  %v1503_v30 = vld [vmem:[#allocation4 + $0x160] sm:$0xff] }
 0x281   : > { %3225 = vmatmul.mubr.f32.gmra.mrb[194].mxu1 %v1469_v19  ;;  %3370 = vmatmul.mubr.f32.gmra.mrb[226].mxu0 %v1471_v26  ;;  %v5993_v8 = vpop.f32.mrb[153].mxu0  ;;  %v1495_v19 = vld [vmem:[#allocation4 + $0x120] sm:$0xff]  ;;  %v1501_v36 = vld [vmem:[#allocation4 + $0x150] sm:$0xff] }
 0x282   : > { %3229 = vmatprep.mubr.f32.mxu1 %v1478_v43  ;;  %3374 = vmatprep.mubr.f32.mxu0 %v1480_v11  ;;  %v9826_v24 = vadd.f32 %v5993_v8, %v5992_v54  ;;  %v1502_v43 = vld [vmem:[#allocation4 + $0x158] sm:$0xff]  ;;  %v1504_v11 = vld [vmem:[#allocation4 + $0x168] sm:$0xff]  ;;  %v1511_v8 = vld [vmem:[#allocation4 + $0x1a0] sm:$0xff] }
 0x283   : > { %7907 = vmatpush3.bf16.msra.mxu1 %v11101_v20  ;;  %7939 = vmatpush3.bf16.msra.mxu0 %v7936_v31  ;;  %v1510_v54 = vld [vmem:[#allocation4 + $0x198] sm:$0xff]  ;;  %v1517_v20 = vld [vmem:[#allocation4 + $0x1d0] sm:$0xff] }
 0x284   : > { %7909 = vmatprep.subr.bf16.mxu1 %v11102_v22  ;;  %7941 = vmatprep.subr.bf16.mxu0 %v7940_v37  ;;  %v5995_v60 = vpop.f32.mrb[154].mxu0  ;;  %v1519_v22 = vld [vmem:[#allocation4 + $0x1e0] sm:$0xff] }
 0x285   : > { %3230 = vmatmul.mubr.f32.gmra.mrb[196].mxu1 %v1477_v53  ;;  %3375 = vmatmul.mubr.f32.gmra.mrb[228].mxu0 %v1479_v44  ;;  %v5996_v15 = vpop.f32.mrb[155].mxu0  ;;  %v1518_v44 = vld [vmem:[#allocation4 + $0x1d8] sm:$0xff] }
 0x286   : > { %3234 = vmatprep.mubr.f32.mxu1 %v1486_v13  ;;  %3379 = vmatprep.mubr.f32.mxu0 %v1488_v1  ;;  %v9834_v29 = vadd.f32 %v5996_v15, %v5995_v60  ;;  %v1520_v13 = vld [vmem:[#allocation4 + $0x1e8] sm:$0xff]  ;;  %v11109_v1 = vpack.c.bf16 %v9582_v9, %v9584_v48  ;;  %v1526_v60 = vld [vmem:[#allocation4 + $0x218] sm:$0xff]  ;;  %v11111_v9 = vpack.c.bf16 %v9591_v10, %v9593_v46 }
 0x287   : > { %7911 = vmatpush3.bf16.msra.mxu1 %v11103_v25  ;;  %7943 = vmatpush3.bf16.msra.mxu0 %v7940_v37  ;;  %v1528_v15 = vld [vmem:[#allocation4 + $0x228] sm:$0xff]  ;;  %v11112_v48 = vpack.c.bf16 %v9693_v17, %v9695_v51 }
 0x288   : > { %7913 = vmatprep.subr.bf16.mxu1 %v11104_v23  ;;  %7945 = vmatprep.subr.bf16.mxu0 %v7944_v27  ;;  %v5998_v40 = vpop.f32.mrb[156].mxu0  ;;  %v1536_v25 = vld [vmem:[#allocation4 + $0x268] sm:$0xff]  ;;  %v1533_v23 = vld [vmem:[#allocation4 + $0x250] sm:$0xff] }
 0x289   : > { %3235 = vmatmul.mubr.f32.gmra.mrb[198].mxu1 %v1485_v0  ;;  %3380 = vmatmul.mubr.f32.gmra.mrb[230].mxu0 %v1487_v61  ;;  %v5999_v31 = vpop.f32.mrb[157].mxu0  ;;  %v1525_v0 = vld [vmem:[#allocation4 + $0x210] sm:$0xff]  ;;  %v1527_v61 = vld [vmem:[#allocation4 + $0x220] sm:$0xff]  ;;  %v11113_v10 = vld [vmem:[#allocation49_spill] sm:$0xff] }
 0x28a   : > { %3239 = vmatprep.mubr.f32.mxu1 %v1494_v62  ;;  %3384 = vmatprep.mubr.f32.mxu0 %v1496_v63  ;;  %v9842_v26 = vadd.f32 %v5999_v31, %v5998_v40  ;;  %v1534_v63 = vld [vmem:[#allocation4 + $0x258] sm:$0xff]  ;;  %v11114_v46 = vpack.c.bf16 %v9600_v28, %v11113_v10  ;;  %v1535_v40 = vld [vmem:[#allocation4 + $0x260] sm:$0xff] }
 0x28b   : > { %7915 = vmatpush3.bf16.msra.mxu1 %v11105_v4  ;;  %7947 = vmatpush3.bf16.msra.mxu0 %v7944_v27  ;;  %v1543_v4 = vld [vmem:[#allocation4 + $0x2a0] sm:$0xff] }
 0x28c   : > { %7917 = vmatprep.subr.bf16.mxu1 %v11106_v33  ;;  %v6001_v47 = vpop.f32.mrb[158].mxu0  ;;  %v1583_v10 = vld [vmem:[#allocation4 + $0x3e0] sm:$0xf] }
 0x28d   : > { %3240 = vmatmul.mubr.f32.gmra.mrb[200].mxu1 %v1493_v52  ;;  %3385 = vmatmul.mubr.f32.gmra.mrb[232].mxu0 %v1495_v19  ;;  %v6002_v12 = vpop.f32.mrb[159].mxu0  ;;  %v1542_v52 = vld [vmem:[#allocation4 + $0x298] sm:$0xff]  ;;  %v1544_v19 = vld [vmem:[#allocation4 + $0x2a8] sm:$0xff] }
 0x28e   : > { %3244 = vmatprep.mubr.f32.mxu1 %v1502_v43  ;;  %3389 = vmatprep.mubr.f32.mxu0 %v1504_v11  ;;  %v9850_v37 = vadd.f32 %v6002_v12, %v6001_v47  ;;  %v1550_v47 = vld [vmem:[#allocation4 + $0x2d8] sm:$0xff]  ;;  %v1552_v12 = vld [vmem:[#allocation4 + $0x2e8] sm:$0xff] }
 0x28f   : > { %7919 = vmatpush3.bf16.msra.mxu1 %v11107_v38 }
 0x290   : > { %7921 = vmatprep.subr.bf16.mxu1 %v11108_v41  ;;  %v6036_v50 = vpop.f32.mrb[128].mxu1  ;;  %v1558_v41 = vld [vmem:[#allocation4 + $0x318] sm:$0xff] }
 0x291   : > { %3245 = vmatmul.mubr.f32.gmra.mrb[202].mxu1 %v1501_v36  ;;  %3390 = vmatmul.mubr.f32.gmra.mrb[234].mxu0 %v1503_v30  ;;  %v6037_v58 = vpop.f32.mrb[129].mxu1 }
 0x292   : > { %3249 = vmatprep.mubr.f32.mxu1 %v1510_v54  ;;  %3394 = vmatprep.mubr.f32.mxu0 %v1512_v5  ;;  %v6038_v53 = vadd.f32 %v6037_v58, %v6036_v50  ;;  %v1551_v5 = vld [vmem:[#allocation4 + $0x2e0] sm:$0xff]  ;;  %v1560_v50 = vld [vmem:[#allocation4 + $0x328] sm:$0xff] }
 0x293   : > { %7923 = vmatpush3.bf16.msra.mxu1 %v11109_v1  ;;  %v1568_v1 = vld [vmem:[#allocation4 + $0x368] sm:$0xff] }
 0x294   : > { %7925 = vmatprep.subr.bf16.mxu1 %v11110_v49  ;;  %v9865_v39 = vadd.f32 %v6038_v53, %v9735_v42  ;;  %v6039_v56 = vpop.f32.mrb[130].mxu1  ;;  %v1559_v53 = vld [vmem:[#allocation4 + $0x320] sm:$0xff] }
 0x295   : > { %3250 = vmatmul.mubr.f32.gmra.mrb[204].mxu1 %v1509_v55  ;;  %3395 = vmatmul.mubr.f32.gmra.mrb[236].mxu0 %v1511_v8  ;;  %v6040_v32 = vpop.f32.mrb[131].mxu1 }
 0x296   : > { %3254 = vmatprep.mubr.f32.mxu1 %v1518_v44  ;;  %3399 = vmatprep.mubr.f32.mxu0 %v1520_v13  ;;  %v6041_v27 = vadd.f32 %v6040_v32, %v6039_v56  ;;  %v1566_v13 = vld [vmem:[#allocation4 + $0x358] sm:$0xff] }
 0x297   : > { %7927 = vmatpush3.bf16.msra.mxu1 %v11111_v9 }
 0x298   : > { %7929 = vmatprep.subr.bf16.mxu1 %v11112_v48  ;;  %v9874_v7 = vadd.f32 %v6041_v27, %v9755_v35  ;;  %v6042_v3 = vpop.f32.mrb[132].mxu1  ;;  %v1574_v27 = vld [vmem:[#allocation4 + $0x398] sm:$0xff] }
 0x299   : > { %3255 = vmatmul.mubr.f32.gmra.mrb[206].mxu1 %v1517_v20  ;;  %3400 = vmatmul.mubr.f32.gmra.mrb[238].mxu0 %v1519_v22  ;;  %v6043_v42 = vpop.f32.mrb[133].mxu1  ;;  %v1567_v20 = vld [vmem:[#allocation4 + $0x360] sm:$0xff] }
 0x29a   : > { %3259 = vmatprep.mubr.f32.mxu1 %v1526_v60  ;;  %3404 = vmatprep.mubr.f32.mxu0 %v1528_v15  ;;  %v6044_v62 = vadd.f32 %v6043_v42, %v6042_v3  ;;  %v1576_v60 = vld [vmem:[#allocation4 + $0x3a8] sm:$0xff]  ;;  %v1575_v3 = vld [vmem:[#allocation4 + $0x3a0] sm:$0xff] }
 0x29b   : > { %7931 = vmatpush3.bf16.msra.mxu1 %v11114_v46 }
 0x29c   : > { %v9880_v51 = vadd.f32 %v6044_v62, %v9771_v16  ;;  %v6045_v17 = vpop.f32.mrb[134].mxu1  ;;  %v1541_v16 = vld [vmem:[#allocation4 + $0x290] sm:$0xff] }
 0x29d   : > { %3260 = vmatmul.mubr.f32.gmra.mrb[208].mxu1 %v1525_v0  ;;  %3405 = vmatmul.mubr.f32.gmra.mrb[240].mxu0 %v1527_v61  ;;  %v6046_v35 = vpop.f32.mrb[135].mxu1  ;;  %v1582_v0 = vld [vmem:[#allocation4 + $0x3d8] sm:$0xf]  ;;  %v1584_v61 = vld [vmem:[#allocation4 + $0x3e8] sm:$0xf] }
 0x29e   : > { %3264 = vmatprep.mubr.f32.mxu1 %v1534_v63  ;;  %3409 = vmatprep.mubr.f32.mxu0 %v1536_v25  ;;  %v6047_v31 = vadd.f32 %v6046_v35, %v6045_v17  ;;  %v1581_v25 = vld [vmem:[#allocation4 + $0x3d0] sm:$0xf]  ;;  %v1466_v17 = vld [vmem:[#allocation4 + $0x38] sm:$0xff] }
 0x2a0   : > { %v9883_v43 = vadd.f32 %v6047_v31, %v9783_v21  ;;  %v6048_v11 = vpop.f32.mrb[136].mxu1  ;;  %v1549_v21 = vld [vmem:[#allocation4 + $0x2d0] sm:$0xff] }
 0x2a1   : > { %3265 = vmatmul.mubr.f32.gmra.mrb[210].mxu1 %v1533_v23  ;;  %3410 = vmatmul.mubr.f32.gmra.mrb[242].mxu0 %v1535_v40  ;;  %v6049_v28 = vpop.f32.mrb[137].mxu1  ;;  %v8133_v40 = vld [vmem:[%s8507_s27] sm:$0xff]  ;;  %v1465_v31 = vld [vmem:[#allocation4 + $0x30] sm:$0xff] }
 0x2a2   : > { %3269 = vmatprep.mubr.f32.mxu1 %v1542_v52  ;;  %3414 = vmatprep.mubr.f32.mxu0 %v1544_v19  ;;  %v6050_v33 = vadd.f32 %v6049_v28, %v6048_v11  ;;  %v1474_v19 = vld [vmem:[#allocation4 + $0x78] sm:$0xff] }
 0x2a4   : > { %v9886_v36 = vadd.f32 %v6050_v33, %v9785_v2  ;;  %v6051_v30 = vpop.f32.mrb[138].mxu1  ;;  %v1557_v2 = vld [vmem:[#allocation4 + $0x310] sm:$0xff] }
 0x2a5   : > { %3270 = vmatmul.mubr.f32.gmra.mrb[212].mxu1 %v1541_v16  ;;  %3415 = vmatmul.mubr.f32.gmra.mrb[244].mxu0 %v1543_v4  ;;  %v6052_v54 = vpop.f32.mrb[139].mxu1  ;;  %v8135_v4 = vld [vmem:[%s8507_s27 + $0x10] sm:$0xff] }
 0x2a6   : > { %3274 = vmatprep.mubr.f32.mxu1 %v1550_v47  ;;  %3419 = vmatprep.mubr.f32.mxu0 %v1552_v12  ;;  %v6053_v38 = vadd.f32 %v6052_v54, %v6051_v30  ;;  %v1473_v33 = vld [vmem:[#allocation4 + $0x70] sm:$0xff]  ;;  %v1482_v12 = vld [vmem:[#allocation4 + $0xb8] sm:$0xff] }
 0x2a7   : > { %v8136_v54 = vld [vmem:[%s8507_s27 + $0x18] sm:$0xff] }
 0x2a8   : > { %v9889_v58 = vadd.f32 %v6053_v38, %v9787_v14  ;;  %v6054_v55 = vpop.f32.mrb[140].mxu1  ;;  %v1565_v14 = vld [vmem:[#allocation4 + $0x350] sm:$0xff] }
 0x2a9   : > { %3275 = vmatmul.mubr.f32.gmra.mrb[214].mxu1 %v1549_v21  ;;  %3420 = vmatmul.mubr.f32.gmra.mrb[246].mxu0 %v1551_v5  ;;  %v6055_v8 = vpop.f32.mrb[141].mxu1  ;;  %v8137_v5 = vld [vmem:[%s8507_s27 + $0x20] sm:$0xff]  ;;  %v1481_v38 = vld [vmem:[#allocation4 + $0xb0] sm:$0xff] }
 0x2aa   : > { %3279 = vmatprep.mubr.f32.mxu1 %v1558_v41  ;;  %3424 = vmatprep.mubr.f32.mxu0 %v1560_v50  ;;  %v6056_v44 = vadd.f32 %v6055_v8, %v6054_v55  ;;  %v1490_v50 = vld [vmem:[#allocation4 + $0xf8] sm:$0xff]  ;;  %v8138_v8 = vld [vmem:[%s8507_s27 + $0x28] sm:$0xff] }
 0x2ac   : > { %v9892_v49 = vadd.f32 %v6056_v44, %v9789_v6  ;;  %v6057_v56 = vpop.f32.mrb[142].mxu1  ;;  %v1573_v6 = vld [vmem:[#allocation4 + $0x390] sm:$0xff] }
 0x2ad   : > { %3280 = vmatmul.mubr.f32.gmra.mrb[216].mxu1 %v1557_v2  ;;  %3425 = vmatmul.mubr.f32.gmra.mrb[248].mxu0 %v1559_v53  ;;  %v6058_v32 = vpop.f32.mrb[143].mxu1  ;;  %v8139_v53 = vld [vmem:[%s8507_s27 + $0x30] sm:$0xff] }
 0x2ae   : > { %3284 = vmatprep.mubr.f32.mxu1 %v1566_v13  ;;  %3429 = vmatprep.mubr.f32.mxu0 %v1568_v1  ;;  %v6059_v22 = vadd.f32 %v6058_v32, %v6057_v56  ;;  %v1489_v44 = vld [vmem:[#allocation4 + $0xf0] sm:$0xff]  ;;  %v1498_v1 = vld [vmem:[#allocation4 + $0x138] sm:$0xff] }
 0x2af   : > { %v8140_v32 = vld [vmem:[%s8507_s27 + $0x38] sm:$0xff] }
 0x2b0   : > { %v9895_v15 = vadd.f32 %v6059_v22, %v9791_v34  ;;  %v6060_v9 = vpop.f32.mrb[144].mxu1  ;;  %v1497_v22 = vld [vmem:[#allocation4 + $0x130] sm:$0xff] }
 0x2b1   : > { %3285 = vmatmul.mubr.f32.gmra.mrb[218].mxu1 %v1565_v14  ;;  %3430 = vmatmul.mubr.f32.gmra.mrb[250].mxu0 %v1567_v20  ;;  %v6061_v48 = vpop.f32.mrb[145].mxu1  ;;  %v8141_v20 = vld [vmem:[%s8507_s27 + $0x40] sm:$0xff] }
 0x2b2   : > { %3289 = vmatprep.mubr.f32.mxu1 %v1574_v27  ;;  %3434 = vmatprep.mubr.f32.mxu0 %v1576_v60  ;;  %v6062_v42 = vadd.f32 %v6061_v48, %v6060_v9  ;;  %v1506_v60 = vld [vmem:[#allocation4 + $0x178] sm:$0xff]  ;;  %v8142_v48 = vld [vmem:[%s8507_s27 + $0x48] sm:$0xff] }
 0x2b4   : > { %v9898_v62 = vadd.f32 %v6062_v42, %v9793_v18  ;;  %v6063_v63 = vpop.f32.mrb[146].mxu1  ;;  %v1505_v42 = vld [vmem:[#allocation4 + $0x170] sm:$0xff] }
 0x2b5   : > { %3290 = vmatmul.mubr.f32.gmra.mrb[220].mxu1 %v1573_v6  ;;  %3435 = vmatmul.mubr.f32.gmra.mrb[252].mxu0 %v1575_v3  ;;  %v6064_v34 = vpop.f32.mrb[147].mxu1  ;;  %v8143_v3 = vld [vmem:[%s8507_s27 + $0x50] sm:$0xff] }
 0x2b6   : > { %3294 = vmatprep.mubr.f32.mxu1 %v1582_v0  ;;  %3439 = vmatprep.mubr.f32.mxu0 %v1584_v61  ;;  %v6065_v46 = vadd.f32 %v6064_v34, %v6063_v63  ;;  %v1514_v61 = vld [vmem:[#allocation4 + $0x1b8] sm:$0xff] }
 0x2b8   : > { %v9901_v35 = vadd.f32 %v6065_v46, %v9795_v59  ;;  %v6066_v23 = vpop.f32.mrb[148].mxu1  ;;  %v8134_v59 = vld [vmem:[%s8507_s27 + $0x8] sm:$0xff]  ;;  %v1513_v46 = vld [vmem:[#allocation4 + $0x1b0] sm:$0xff] }
 0x2b9   : > { %3295 = vmatmul.mubr.f32.gmra.mrb[222].mxu1 %v1581_v25  ;;  %3440 = vmatmul.mubr.f32.gmra.mrb[254].mxu0 %v1583_v10  ;;  %v6067_v18 = vpop.f32.mrb[149].mxu1  ;;  %v8145_v10 = vld [vmem:[%s8507_s27 + $0x60] sm:$0xff] }
 0x2ba   : > { %3509 = vmatprep.mubr.f32.mxu1 %v1466_v17  ;;  %7452 = vmatprep.mubr.msk.f32.mxu0 %vm369_vm0, %v8133_v40  ;;  %v6068_v52 = vadd.f32 %v6067_v18, %v6066_v23  ;;  %v1522_v23 = vld [vmem:[#allocation4 + $0x1f8] sm:$0xff] }
 0x2bc   : > { %v9906_v11 = vadd.f32 %v6068_v52, %v9803_v57  ;;  %v6069_v28 = vpop.f32.mrb[150].mxu1  ;;  %v8147_v52 = vld [vmem:[%s8507_s27 + $0x70] sm:$0xff] }
 0x2bd   : > { %3510 = vmatmul.mubr.f32.vlgmr.msra.gmra.mrb[224].mxu1 %v1465_v31  ;;  %7453 = vmatmul.mubr.msk.f32.vlgmr.msra.gmra.mrb[0].mxu0 %vm369_vm0, %v8134_v59  ;;  %v6070_v16 = vpop.f32.mrb[151].mxu1  ;;  %v1530_v59 = vld [vmem:[#allocation4 + $0x238] sm:$0xff] }
 0x2be   : > { %3514 = vmatprep.mubr.f32.mxu1 %v1474_v19  ;;  %7455 = vmatprep.mubr.msk.f32.mxu0 %vm369_vm0, %v8135_v4  ;;  %v6071_v47 = vadd.f32 %v6070_v16, %v6069_v28  ;;  %v1521_v19 = vld [vmem:[#allocation4 + $0x1f0] sm:$0xff]  ;;  %v8148_v4 = vld [vmem:[%s8507_s27 + $0x78] sm:$0xff] }
 0x2c0   : > { %v9913_v30 = vadd.f32 %v6071_v47, %v9811_v45  ;;  %v6072_v57 = vpop.f32.mrb[152].mxu1  ;;  %v8149_v47 = vld [vmem:[%s8507_s27 + $0x80] sm:$0xff] }
 0x2c1   : > { %3515 = vmatmul.mubr.f32.gmra.mrb[226].mxu1 %v1473_v33  ;;  %7456 = vmatmul.mubr.msk.f32.gmra.mrb[2].mxu0 %vm369_vm0, %v8136_v54  ;;  %v6073_v21 = vpop.f32.mrb[153].mxu1  ;;  %v1538_v54 = vld [vmem:[#allocation4 + $0x278] sm:$0xff] }
 0x2c2   : > { %3519 = vmatprep.mubr.f32.mxu1 %v1482_v12  ;;  %7458 = vmatprep.mubr.msk.f32.mxu0 %vm369_vm0, %v8137_v5  ;;  %v6074_v41 = vadd.f32 %v6073_v21, %v6072_v57  ;;  %v1529_v12 = vld [vmem:[#allocation4 + $0x230] sm:$0xff]  ;;  %v8150_v5 = vld [vmem:[%s8507_s27 + $0x88] sm:$0xff] }
 0x2c4   : > { %v9920_v55 = vadd.f32 %v6074_v41, %v9826_v24  ;;  %v6075_v45 = vpop.f32.mrb[154].mxu1  ;;  %v8151_v41 = vld [vmem:[%s8507_s27 + $0x90] sm:$0xff] }
 0x2c5   : > { %3520 = vmatmul.mubr.f32.gmra.mrb[228].mxu1 %v1481_v38  ;;  %7459 = vmatmul.mubr.msk.f32.gmra.mrb[4].mxu0 %vm369_vm0, %v8138_v8  ;;  %v6076_v2 = vpop.f32.mrb[155].mxu1  ;;  %v1546_v8 = vld [vmem:[#allocation4 + $0x2b8] sm:$0xff] }
 0x2c6   : > { %3524 = vmatprep.mubr.f32.mxu1 %v1490_v50  ;;  %7461 = vmatprep.mubr.msk.f32.mxu0 %vm369_vm0, %v8139_v53  ;;  %v6077_v13 = vadd.f32 %v6076_v2, %v6075_v45  ;;  %v1537_v50 = vld [vmem:[#allocation4 + $0x270] sm:$0xff]  ;;  %v8152_v53 = vld [vmem:[%s8507_s27 + $0x98] sm:$0xff] }
 0x2c8   : > { %v9927_v56 = vadd.f32 %v6077_v13, %v9834_v29  ;;  %v6078_v24 = vpop.f32.mrb[156].mxu1  ;;  %v8153_v13 = vld [vmem:[%s8507_s27 + $0xa0] sm:$0xff] }
 0x2c9   : > { %3525 = vmatmul.mubr.f32.gmra.mrb[230].mxu1 %v1489_v44  ;;  %7462 = vmatmul.mubr.msk.f32.gmra.mrb[6].mxu0 %vm369_vm0, %v8140_v32  ;;  %v6079_v14 = vpop.f32.mrb[157].mxu1  ;;  %v1554_v32 = vld [vmem:[#allocation4 + $0x2f8] sm:$0xff] }
 0x2ca   : > { %3529 = vmatprep.mubr.f32.mxu1 %v1498_v1  ;;  %7464 = vmatprep.mubr.msk.f32.mxu0 %vm369_vm0, %v8141_v20  ;;  %v6080_v27 = vadd.f32 %v6079_v14, %v6078_v24  ;;  %v1545_v1 = vld [vmem:[#allocation4 + $0x2b0] sm:$0xff]  ;;  %v8154_v20 = vld [vmem:[%s8507_s27 + $0xa8] sm:$0xff] }
 0x2cc   : > { %v9934_v9 = vadd.f32 %v6080_v27, %v9842_v26  ;;  %v6081_v29 = vpop.f32.mrb[158].mxu1  ;;  %v8144_v26 = vld [vmem:[%s8507_s27 + $0x58] sm:$0xff]  ;;  %v8155_v27 = vld [vmem:[%s8507_s27 + $0xb0] sm:$0xff] }
 0x2cd   : > { %3530 = vmatmul.mubr.f32.gmra.mrb[232].mxu1 %v1497_v22  ;;  %7465 = vmatmul.mubr.msk.f32.gmra.mrb[8].mxu0 %vm369_vm0, %v8142_v48  ;;  %v6082_v6 = vpop.f32.mrb[159].mxu1  ;;  %v1562_v48 = vld [vmem:[#allocation4 + $0x338] sm:$0xff] }
 0x2ce   : > { %3534 = vmatprep.mubr.f32.mxu1 %v1506_v60  ;;  %7467 = vmatprep.mubr.msk.f32.mxu0 %vm369_vm0, %v8143_v3  ;;  %v6083_v0 = vadd.f32 %v6082_v6, %v6081_v29  ;;  %v1553_v60 = vld [vmem:[#allocation4 + $0x2f0] sm:$0xff]  ;;  %v8156_v3 = vld [vmem:[%s8507_s27 + $0xb8] sm:$0xff] }
 0x2d0   : > { %v6116_v63 = vpop.f32.mrb[160].mxu0  ;;  %v9941_v34 = vadd.f32 %v6083_v0, %v9850_v37  ;;  %v8146_v37 = vld [vmem:[%s8507_s27 + $0x68] sm:$0xff]  ;;  %v8157_v0 = vld [vmem:[%s8507_s27 + $0xc0] sm:$0xff] }
 0x2d1   : > { %3535 = vmatmul.mubr.f32.gmra.mrb[234].mxu1 %v1505_v42  ;;  %7468 = vmatmul.mubr.msk.f32.gmra.mrb[10].mxu0 %vm369_vm0, %v8144_v26  ;;  %v6117_v25 = vpop.f32.mrb[161].mxu0  ;;  %v1570_v26 = vld [vmem:[#allocation4 + $0x378] sm:$0xff] }
 0x2d2   : > { %3539 = vmatprep.mubr.f32.mxu1 %v1514_v61  ;;  %7470 = vmatprep.mubr.msk.f32.mxu0 %vm369_vm0, %v8145_v10  ;;  %v6118_v17 = vadd.f32 %v6117_v25, %v6116_v63  ;;  %v1561_v61 = vld [vmem:[#allocation4 + $0x330] sm:$0xff]  ;;  %v8158_v10 = vld [vmem:[%s8507_s27 + $0xc8] sm:$0xff] }
 0x2d4   : > { %v9948_v18 = vadd.f32 %v6118_v17, %v9865_v39  ;;  %v6119_v40 = vpop.f32.mrb[162].mxu0  ;;  %v8159_v17 = vld [vmem:[%s8507_s27 + $0xd0] sm:$0xff] }
 0x2d5   : > { %3540 = vmatmul.mubr.f32.gmra.mrb[236].mxu1 %v1513_v46  ;;  %7471 = vmatmul.mubr.msk.f32.gmra.mrb[12].mxu0 %vm369_vm0, %v8146_v37  ;;  %v6120_v31 = vpop.f32.mrb[163].mxu0  ;;  %v1578_v37 = vld [vmem:[#allocation4 + $0x3b8] sm:$0xff] }
 0x2d6   : > { %3544 = vmatprep.mubr.f32.mxu1 %v1522_v23  ;;  %7473 = vmatprep.mubr.msk.f32.mxu0 %vm369_vm0, %v8147_v52  ;;  %v6121_v28 = vadd.f32 %v6120_v31, %v6119_v40  ;;  %v1569_v23 = vld [vmem:[#allocation4 + $0x370] sm:$0xff]  ;;  %v8160_v52 = vld [vmem:[%s8507_s27 + $0xd8] sm:$0xff] }
 0x2d8   : > { %v9955_v16 = vadd.f32 %v6121_v28, %v9874_v7  ;;  %v6122_v39 = vpop.f32.mrb[164].mxu0  ;;  %v8161_v28 = vld [vmem:[%s8507_s27 + $0xe0] sm:$0xff] }
 0x2d9   : > { %3545 = vmatmul.mubr.f32.gmra.mrb[238].mxu1 %v1521_v19  ;;  %7474 = vmatmul.mubr.msk.f32.gmra.mrb[14].mxu0 %vm369_vm0, %v8148_v4  ;;  %v6123_v33 = vpop.f32.mrb[165].mxu0  ;;  %v1586_v4 = vld [vmem:[#allocation4 + $0x3f8] sm:$0xf] }
 0x2da   : > { %3549 = vmatprep.mubr.f32.mxu1 %v1530_v59  ;;  %7476 = vmatprep.mubr.msk.f32.mxu0 %vm369_vm0, %v8149_v47  ;;  %v6124_v57 = vadd.f32 %v6123_v33, %v6122_v39  ;;  %v1577_v59 = vld [vmem:[#allocation4 + $0x3b0] sm:$0xff]  ;;  %v8162_v47 = vld [vmem:[%s8507_s27 + $0xe8] sm:$0xff] }
 0x2dc   : > { %v9962_v21 = vadd.f32 %v6124_v57, %v9880_v51  ;;  %v6125_v7 = vpop.f32.mrb[166].mxu0  ;;  %v8163_v57 = vld [vmem:[%s8507_s27 + $0xf0] sm:$0xff] }
 0x2dd   : > { %3550 = vmatmul.mubr.f32.gmra.mrb[240].mxu1 %v1529_v12  ;;  %7477 = vmatmul.mubr.msk.f32.gmra.mrb[16].mxu0 %vm369_vm0, %v8150_v5  ;;  %v6126_v38 = vpop.f32.mrb[167].mxu0 }
 0x2de   : > { %3554 = vmatprep.mubr.f32.mxu1 %v1538_v54  ;;  %7479 = vmatprep.mubr.msk.f32.mxu0 %vm369_vm0, %v8151_v41  ;;  %v6127_v45 = vadd.f32 %v6126_v38, %v6125_v7  ;;  %v1585_v54 = vld [vmem:[#allocation4 + $0x3f0] sm:$0xf]  ;;  %v8164_v38 = vld [vmem:[%s8507_s27 + $0xf8] sm:$0xff] }
 0x2e0   : > { %v9969_v2 = vadd.f32 %v6127_v45, %v9883_v43  ;;  %v6128_v51 = vpop.f32.mrb[168].mxu0 }
 0x2e1   : > { %3555 = vmatmul.mubr.f32.gmra.mrb[242].mxu1 %v1537_v50  ;;  %7480 = vmatmul.mubr.msk.f32.gmra.mrb[18].mxu0 %vm369_vm0, %v8152_v53  ;;  %v6129_v44 = vpop.f32.mrb[169].mxu0  ;;  %v8165_v50 = vld [vmem:[%s8507_s27 + $0x100] sm:$0xff]  ;;  %v8166_v53 = vld [vmem:[%s8507_s27 + $0x108] sm:$0xff] }
 0x2e2   : > { %3559 = vmatprep.mubr.f32.mxu1 %v1546_v8  ;;  %7482 = vmatprep.mubr.msk.f32.mxu0 %vm369_vm0, %v8153_v13  ;;  %v6130_v24 = vadd.f32 %v6129_v44, %v6128_v51  ;;  %v8167_v44 = vld [vmem:[%s8507_s27 + $0x110] sm:$0xff] }
 0x2e4   : > { %v9976_v14 = vadd.f32 %v6130_v24, %v9886_v36  ;;  %v6131_v43 = vpop.f32.mrb[170].mxu0 }
 0x2e5   : > { %3560 = vmatmul.mubr.f32.gmra.mrb[244].mxu1 %v1545_v1  ;;  %7483 = vmatmul.mubr.msk.f32.gmra.mrb[20].mxu0 %vm369_vm0, %v8154_v20  ;;  %v6132_v22 = vpop.f32.mrb[171].mxu0 }
 0x2e6   : > { %3564 = vmatprep.mubr.f32.mxu1 %v1554_v32  ;;  %7485 = vmatprep.mubr.msk.f32.mxu0 %vm369_vm0, %v8155_v27  ;;  %v6133_v29 = vadd.f32 %v6132_v22, %v6131_v43  ;;  %v8168_v32 = vld [vmem:[%s8507_s27 + $0x118] sm:$0xff]  ;;  %v8169_v43 = vld [vmem:[%s8507_s27 + $0x120] sm:$0xff] }
 0x2e8   : > { %v9983_v6 = vadd.f32 %v6133_v29, %v9889_v58  ;;  %v6134_v36 = vpop.f32.mrb[172].mxu0  ;;  %v8171_v29 = vld [vmem:[%s8507_s27 + $0x130] sm:$0xff] }
 0x2e9   : > { %3565 = vmatmul.mubr.f32.gmra.mrb[246].mxu1 %v1553_v60  ;;  %7486 = vmatmul.mubr.msk.f32.gmra.mrb[22].mxu0 %vm369_vm0, %v8156_v3  ;;  %v6135_v42 = vpop.f32.mrb[173].mxu0  ;;  %v8170_v60 = vld [vmem:[%s8507_s27 + $0x128] sm:$0xff] }
 0x2ea   : > { %3569 = vmatprep.mubr.f32.mxu1 %v1562_v48  ;;  %7488 = vmatprep.mubr.msk.f32.mxu0 %vm369_vm0, %v8157_v0  ;;  %v6136_v63 = vadd.f32 %v6135_v42, %v6134_v36  ;;  %v8172_v42 = vld [vmem:[%s8507_s27 + $0x138] sm:$0xff]  ;;  %v8173_v0 = vld [vmem:[%s8507_s27 + $0x140] sm:$0xff] }
 0x2ec   : > { %v9990_v25 = vadd.f32 %v6136_v63, %v9892_v49  ;;  %v6137_v58 = vpop.f32.mrb[174].mxu0 }
 0x2ed   : > { %3570 = vmatmul.mubr.f32.gmra.mrb[248].mxu1 %v1561_v61  ;;  %7489 = vmatmul.mubr.msk.f32.gmra.mrb[24].mxu0 %vm369_vm0, %v8158_v10  ;;  %v6138_v46 = vpop.f32.mrb[175].mxu0  ;;  %v8175_v10 = vld [vmem:[%s8507_s27 + $0x150] sm:$0xff] }
 0x2ee   : > { %3574 = vmatprep.mubr.f32.mxu1 %v1570_v26  ;;  %7491 = vmatprep.mubr.msk.f32.mxu0 %vm369_vm0, %v8159_v17  ;;  %v6139_v40 = vadd.f32 %v6138_v46, %v6137_v58  ;;  %v8174_v58 = vld [vmem:[%s8507_s27 + $0x148] sm:$0xff] }
 0x2f0   : > { %v9997_v31 = vadd.f32 %v6139_v40, %v9895_v15  ;;  %v6140_v49 = vpop.f32.mrb[176].mxu0 }
 0x2f1   : > { %3575 = vmatmul.mubr.f32.gmra.mrb[250].mxu1 %v1569_v23  ;;  %7492 = vmatmul.mubr.msk.f32.gmra.mrb[26].mxu0 %vm369_vm0, %v8160_v52  ;;  %v6141_v19 = vpop.f32.mrb[177].mxu0 }
 0x2f2   : > { %3579 = vmatprep.mubr.f32.mxu1 %v1578_v37  ;;  %7494 = vmatprep.mubr.msk.f32.mxu0 %vm369_vm0, %v8161_v28  ;;  %v6142_v39 = vadd.f32 %v6141_v19, %v6140_v49  ;;  %v8176_v37 = vld [vmem:[%s8507_s27 + $0x158] sm:$0xff]  ;;  %v8177_v19 = vld [vmem:[%s8507_s27 + $0x160] sm:$0xff] }
 0x2f4   : > { %v10004_v33 = vadd.f32 %v6142_v39, %v9898_v62  ;;  %v6143_v15 = vpop.f32.mrb[178].mxu0 }
 0x2f5   : > { %3580 = vmatmul.mubr.f32.gmra.mrb[252].mxu1 %v1577_v59  ;;  %7495 = vmatmul.mubr.msk.f32.gmra.mrb[28].mxu0 %vm369_vm0, %v8162_v47  ;;  %v6144_v12 = vpop.f32.mrb[179].mxu0 }
 0x2f6   : > { %3584 = vmatprep.mubr.f32.mxu1 %v1586_v4  ;;  %7497 = vmatprep.mubr.msk.f32.mxu0 %vm369_vm0, %v8163_v57  ;;  %v6145_v7 = vadd.f32 %v6144_v12, %v6143_v15  ;;  %v8178_v15 = vld [vmem:[%s8507_s27 + $0x168] sm:$0xff] }
 0x2f8   : > { %v10011_v5 = vadd.f32 %v6145_v7, %v9901_v35  ;;  %v6146_v62 = vpop.f32.mrb[180].mxu0 }
 0x2f9   : > { %3585 = vmatmul.mubr.f32.gmra.mrb[254].mxu1 %v1585_v54  ;;  %7498 = vmatmul.mubr.msk.f32.gmra.mrb[30].mxu0 %vm369_vm0, %v8164_v38  ;;  %v6147_v41 = vpop.f32.mrb[181].mxu0  ;;  %v8179_v54 = vld [vmem:[%s8507_s27 + $0x170] sm:$0xff] }
 0x2fa   : > { %7500 = vmatprep.mubr.msk.f32.mxu0 %vm369_vm0, %v8165_v50  ;;  %v6148_v45 = vadd.f32 %v6147_v41, %v6146_v62  ;;  %v8180_v41 = vld [vmem:[%s8507_s27 + $0x178] sm:$0xff] }
 0x2fc   : > { %v10018_v8 = vadd.f32 %v6148_v45, %v9906_v11  ;;  %v6149_v51 = vpop.f32.mrb[182].mxu0 }
 0x2fd   : > { %7501 = vmatmul.mubr.msk.f32.gmra.mrb[32].mxu0 %vm369_vm0, %v8166_v53  ;;  %v6150_v35 = vpop.f32.mrb[183].mxu0 }
 0x2fe   : > { %7503 = vmatprep.mubr.msk.f32.mxu0 %vm369_vm0, %v8167_v44  ;;  %v6151_v13 = vadd.f32 %v6150_v35, %v6149_v51  ;;  %v8181_v35 = vld [vmem:[%s8507_s27 + $0x180] sm:$0xff] }
 0x300   : > { %v10025_v1 = vadd.f32 %v6151_v13, %v9913_v30  ;;  %v6152_v24 = vpop.f32.mrb[184].mxu0 }
 0x301   : > { %7504 = vmatmul.mubr.msk.f32.gmra.mrb[34].mxu0 %vm369_vm0, %v8168_v32  ;;  %v6153_v11 = vpop.f32.mrb[185].mxu0  ;;  %v8182_v32 = vld [vmem:[%s8507_s27 + $0x188] sm:$0xff] }
 0x302   : > { %7506 = vmatprep.mubr.msk.f32.mxu0 %vm369_vm0, %v8169_v43  ;;  %v6154_v20 = vadd.f32 %v6153_v11, %v6152_v24 }
 0x304   : > { %v10032_v22 = vadd.f32 %v6154_v20, %v9920_v55  ;;  %v6155_v27 = vpop.f32.mrb[186].mxu0 }
 0x305   : > { %7507 = vmatmul.mubr.msk.f32.gmra.mrb[36].mxu0 %vm369_vm0, %v8170_v60  ;;  %v6156_v30 = vpop.f32.mrb[187].mxu0  ;;  %v8183_v60 = vld [vmem:[%s8507_s27 + $0x190] sm:$0xff] }
 0x306   : > { %7509 = vmatprep.mubr.msk.f32.mxu0 %vm369_vm0, %v8171_v29  ;;  %v6157_v48 = vadd.f32 %v6156_v30, %v6155_v27 }
 0x308   : > { %v10039_v36 = vadd.f32 %v6157_v48, %v9927_v56  ;;  %v6158_v3 = vpop.f32.mrb[188].mxu0 }
 0x309   : > { %7510 = vmatmul.mubr.msk.f32.gmra.mrb[38].mxu0 %vm369_vm0, %v8172_v42  ;;  %v6159_v55 = vpop.f32.mrb[189].mxu0 }
 0x30a   : > { %7512 = vmatprep.mubr.msk.f32.mxu0 %vm369_vm0, %v8173_v0  ;;  %v6160_v61 = vadd.f32 %v6159_v55, %v6158_v3  ;;  %v8184_v3 = vld [vmem:[%s8507_s27 + $0x198] sm:$0xff] }
 0x30c   : > { %v10046_v63 = vadd.f32 %v6160_v61, %v9934_v9  ;;  %v6161_v26 = vpop.f32.mrb[190].mxu0 }
 0x30d   : > { %7513 = vmatmul.mubr.msk.f32.gmra.mrb[40].mxu0 %vm369_vm0, %v8174_v58  ;;  %v6162_v56 = vpop.f32.mrb[191].mxu0 }
 0x30e   : > { %7515 = vmatprep.mubr.msk.f32.mxu0 %vm369_vm0, %v8175_v10  ;;  %v6163_v46 = vadd.f32 %v6162_v56, %v6161_v26  ;;  %v8185_v26 = vld [vmem:[%s8507_s27 + $0x1a0] sm:$0xff] }
 0x310   : > { %v6196_v17 = vpop.f32.mrb[160].mxu1  ;;  %v10053_v23 = vadd.f32 %v6163_v46, %v9941_v34  ;;  %v6276_v40 = vpop.f32.mrb[192].mxu0  ;;  %v8186_v46 = vld [vmem:[%s8507_s27 + $0x1a8] sm:$0xff] }
 0x311   : > { %7516 = vmatmul.mubr.msk.f32.gmra.mrb[42].mxu0 %vm369_vm0, %v8176_v37  ;;  %v6197_v9 = vpop.f32.mrb[161].mxu1  ;;  %v6277_v49 = vpop.f32.mrb[193].mxu0 }
 0x312   : > { %v6198_v52 = vadd.f32 %v6197_v9, %v6196_v17  ;;  %7518 = vmatprep.mubr.msk.f32.mxu0 %vm369_vm0, %v8177_v19  ;;  %v6278_v28 = vadd.f32 %v6277_v49, %v6276_v40  ;;  %v8187_v49 = vld [vmem:[%s8507_s27 + $0x1b0] sm:$0xff] }
 0x314   : > { %v2932_v59 = vadd.f32 %v6198_v52, %v9948_v18  ;;  %v6199_v39 = vpop.f32.mrb[162].mxu1  ;;  %v6279_v4 = vpop.f32.mrb[194].mxu0 }
 0x315   : > { %7519 = vmatmul.mubr.msk.f32.gmra.mrb[44].mxu0 %vm369_vm0, %v8178_v15  ;;  %v6200_v34 = vpop.f32.mrb[163].mxu1  ;;  %v6280_v47 = vpop.f32.mrb[195].mxu0 }
 0x316   : > { %v10062_v12 = vadd.f32 %v6278_v28, %v2932_v59  ;;  %v6201_v57 = vadd.f32 %v6200_v34, %v6199_v39  ;;  %7521 = vmatprep.mubr.msk.f32.mxu0 %vm369_vm0, %v8179_v54  ;;  %v6281_v7 = vadd.f32 %v6280_v47, %v6279_v4  ;;  %v8188_v59 = vld [vmem:[%s8507_s27 + $0x1b8] sm:$0xff]  ;;  %v8189_v47 = vld [vmem:[%s8507_s27 + $0x1c0] sm:$0xff] }
 0x318   : > { %v2937_v62 = vadd.f32 %v6201_v57, %v9955_v16  ;;  %v6202_v38 = vpop.f32.mrb[164].mxu1  ;;  %v6282_v18 = vpop.f32.mrb[196].mxu0 }
 0x319   : > { %7522 = vmatmul.mubr.msk.f32.gmra.mrb[46].mxu0 %vm369_vm0, %v8180_v41  ;;  %v6203_v50 = vpop.f32.mrb[165].mxu1  ;;  %v6283_v45 = vpop.f32.mrb[197].mxu0 }
 0x31a   : > { %v10069_v51 = vadd.f32 %v6281_v7, %v2937_v62  ;;  %v6204_v53 = vadd.f32 %v6203_v50, %v6202_v38  ;;  %7524 = vmatprep.mubr.msk.f32.mxu0 %vm369_vm0, %v8181_v35  ;;  %v6284_v44 = vadd.f32 %v6283_v45, %v6282_v18  ;;  %v8190_v62 = vld [vmem:[%s8507_s27 + $0x1c8] sm:$0xff]  ;;  %v8191_v45 = vld [vmem:[%s8507_s27 + $0x1d0] sm:$0xff] }
 0x31c   : > { %v2942_v13 = vadd.f32 %v6204_v53, %v9962_v21  ;;  %v6205_v24 = vpop.f32.mrb[166].mxu1  ;;  %v6285_v16 = vpop.f32.mrb[198].mxu0 }
 0x31d   : > { %7525 = vmatmul.mubr.msk.f32.gmra.mrb[48].mxu0 %vm369_vm0, %v8182_v32  ;;  %v6206_v11 = vpop.f32.mrb[167].mxu1  ;;  %v6286_v43 = vpop.f32.mrb[199].mxu0 }
 0x31e   : > { %v10076_v20 = vadd.f32 %v6284_v44, %v2942_v13  ;;  %v6207_v27 = vadd.f32 %v6206_v11, %v6205_v24  ;;  %7527 = vmatprep.mubr.msk.f32.mxu0 %vm369_vm0, %v8183_v60  ;;  %v6287_v30 = vadd.f32 %v6286_v43, %v6285_v16  ;;  %v8192_v13 = vld [vmem:[%s8507_s27 + $0x1d8] sm:$0xff]  ;;  %v8193_v43 = vld [vmem:[%s8507_s27 + $0x1e0] sm:$0xff] }
 0x320   : > { %v2947_v29 = vadd.f32 %v6207_v27, %v9969_v2  ;;  %v6208_v48 = vpop.f32.mrb[168].mxu1  ;;  %v6288_v21 = vpop.f32.mrb[200].mxu0 }
 0x321   : > { %7528 = vmatmul.mubr.msk.f32.gmra.mrb[50].mxu0 %vm369_vm0, %v8184_v3  ;;  %v6209_v42 = vpop.f32.mrb[169].mxu1  ;;  %v6289_v55 = vpop.f32.mrb[201].mxu0 }
 0x322   : > { %v10083_v0 = vadd.f32 %v6287_v30, %v2947_v29  ;;  %v6210_v61 = vadd.f32 %v6209_v42, %v6208_v48  ;;  %7530 = vmatprep.mubr.msk.f32.mxu0 %vm369_vm0, %v8185_v26  ;;  %v6290_v58 = vadd.f32 %v6289_v55, %v6288_v21  ;;  %v8194_v29 = vld [vmem:[%s8507_s27 + $0x1e8] sm:$0xff]  ;;  %v8195_v55 = vld [vmem:[%s8507_s27 + $0x1f0] sm:$0xff] }
 0x324   : > { %v2952_v56 = vadd.f32 %v6210_v61, %v9976_v14  ;;  %v6211_v10 = vpop.f32.mrb[170].mxu1  ;;  %v6291_v2 = vpop.f32.mrb[202].mxu0 }
 0x325   : > { %7531 = vmatmul.mubr.msk.f32.gmra.mrb[52].mxu0 %vm369_vm0, %v8186_v46  ;;  %v6212_v17 = vpop.f32.mrb[171].mxu1  ;;  %v6292_v40 = vpop.f32.mrb[203].mxu0 }
 0x326   : > { %v10090_v37 = vadd.f32 %v6290_v58, %v2952_v56  ;;  %v6213_v9 = vadd.f32 %v6212_v17, %v6211_v10  ;;  %7533 = vmatprep.mubr.msk.f32.mxu0 %vm369_vm0, %v8187_v49  ;;  %v6293_v52 = vadd.f32 %v6292_v40, %v6291_v2  ;;  %v8196_v56 = vld [vmem:[%s8507_s27 + $0x1f8] sm:$0xff]  ;;  %v8197_v40 = vld [vmem:[%s8507_s27 + $0x200] sm:$0xff] }
 0x328   : > { %v2957_v19 = vadd.f32 %v6213_v9, %v9983_v6  ;;  %v6214_v28 = vpop.f32.mrb[172].mxu1  ;;  %v6294_v14 = vpop.f32.mrb[204].mxu0 }
 0x329   : > { %7534 = vmatmul.mubr.msk.f32.gmra.mrb[54].mxu0 %vm369_vm0, %v8188_v59  ;;  %v6215_v39 = vpop.f32.mrb[173].mxu1  ;;  %v6295_v4 = vpop.f32.mrb[205].mxu0 }
 0x32a   : > { %v10097_v15 = vadd.f32 %v6293_v52, %v2957_v19  ;;  %v6216_v34 = vadd.f32 %v6215_v39, %v6214_v28  ;;  %7536 = vmatprep.mubr.msk.f32.mxu0 %vm369_vm0, %v8189_v47  ;;  %v6296_v57 = vadd.f32 %v6295_v4, %v6294_v14  ;;  %v8198_v19 = vld [vmem:[%s8507_s27 + $0x208] sm:$0xff]  ;;  %v8199_v4 = vld [vmem:[%s8507_s27 + $0x210] sm:$0xff] }
 0x32c   : > { %v2962_v54 = vadd.f32 %v6216_v34, %v9990_v25  ;;  %v6217_v7 = vpop.f32.mrb[174].mxu1  ;;  %v6297_v6 = vpop.f32.mrb[206].mxu0 }
 0x32d   : > { %7537 = vmatmul.mubr.msk.f32.gmra.mrb[56].mxu0 %vm369_vm0, %v8190_v62  ;;  %v6218_v38 = vpop.f32.mrb[175].mxu1  ;;  %v6298_v18 = vpop.f32.mrb[207].mxu0 }
 0x32e   : > { %v10104_v41 = vadd.f32 %v6296_v57, %v2962_v54  ;;  %v6219_v50 = vadd.f32 %v6218_v38, %v6217_v7  ;;  %7539 = vmatprep.mubr.msk.f32.mxu0 %vm369_vm0, %v8191_v45  ;;  %v6299_v53 = vadd.f32 %v6298_v18, %v6297_v6  ;;  %v8200_v54 = vld [vmem:[%s8507_s27 + $0x218] sm:$0xff]  ;;  %v8201_v18 = vld [vmem:[%s8507_s27 + $0x220] sm:$0xff] }
 0x330   : > { %v2967_v35 = vadd.f32 %v6219_v50, %v9997_v31  ;;  %v6220_v44 = vpop.f32.mrb[176].mxu1  ;;  %v6300_v25 = vpop.f32.mrb[208].mxu0 }
 0x331   : > { %7540 = vmatmul.mubr.msk.f32.gmra.mrb[58].mxu0 %vm369_vm0, %v8192_v13  ;;  %v6221_v24 = vpop.f32.mrb[177].mxu1  ;;  %v6301_v16 = vpop.f32.mrb[209].mxu0 }
 0x332   : > { %v10111_v32 = vadd.f32 %v6299_v53, %v2967_v35  ;;  %v6222_v11 = vadd.f32 %v6221_v24, %v6220_v44  ;;  %7542 = vmatprep.mubr.msk.f32.mxu0 %vm369_vm0, %v8193_v43  ;;  %v6302_v27 = vadd.f32 %v6301_v16, %v6300_v25  ;;  %v8202_v35 = vld [vmem:[%s8507_s27 + $0x228] sm:$0xff]  ;;  %v8203_v16 = vld [vmem:[%s8507_s27 + $0x230] sm:$0xff] }
 0x334   : > { %v2972_v60 = vadd.f32 %v6222_v11, %v10004_v33  ;;  %v6223_v30 = vpop.f32.mrb[178].mxu1  ;;  %v6303_v31 = vpop.f32.mrb[210].mxu0 }
 0x335   : > { %7543 = vmatmul.mubr.msk.f32.gmra.mrb[60].mxu0 %vm369_vm0, %v8194_v29  ;;  %v6224_v48 = vpop.f32.mrb[179].mxu1  ;;  %v6304_v21 = vpop.f32.mrb[211].mxu0 }
 0x336   : > { %v10118_v3 = vadd.f32 %v6302_v27, %v2972_v60  ;;  %v6225_v42 = vadd.f32 %v6224_v48, %v6223_v30  ;;  %7545 = vmatprep.mubr.msk.f32.mxu0 %vm369_vm0, %v8195_v55  ;;  %v6305_v61 = vadd.f32 %v6304_v21, %v6303_v31  ;;  %v8204_v60 = vld [vmem:[%s8507_s27 + $0x238] sm:$0xff]  ;;  %v8205_v21 = vld [vmem:[%s8507_s27 + $0x240] sm:$0xff] }
 0x338   : > { %v2977_v26 = vadd.f32 %v6225_v42, %v10011_v5  ;;  %v6226_v58 = vpop.f32.mrb[180].mxu1  ;;  %v6306_v33 = vpop.f32.mrb[212].mxu0 }
 0x339   : > { %7546 = vmatmul.mubr.msk.f32.gmra.mrb[62].mxu0 %vm369_vm0, %v8196_v56  ;;  %v6227_v10 = vpop.f32.mrb[181].mxu1  ;;  %v6307_v2 = vpop.f32.mrb[213].mxu0 }
 0x33a   : > { %v10125_v46 = vadd.f32 %v6305_v61, %v2977_v26  ;;  %v6228_v17 = vadd.f32 %v6227_v10, %v6226_v58  ;;  %7548 = vmatprep.mubr.msk.f32.mxu0 %vm369_vm0, %v8197_v40  ;;  %v6308_v9 = vadd.f32 %v6307_v2, %v6306_v33  ;;  %v8206_v26 = vld [vmem:[%s8507_s27 + $0x248] sm:$0xff]  ;;  %v8207_v2 = vld [vmem:[%s8507_s27 + $0x250] sm:$0xff] }
 0x33c   : > { %v2982_v49 = vadd.f32 %v6228_v17, %v10018_v8  ;;  %v6229_v52 = vpop.f32.mrb[182].mxu1  ;;  %v6309_v5 = vpop.f32.mrb[214].mxu0 }
 0x33d   : > { %7549 = vmatmul.mubr.msk.f32.gmra.mrb[64].mxu0 %vm369_vm0, %v8198_v19  ;;  %v6230_v28 = vpop.f32.mrb[183].mxu1  ;;  %v6310_v14 = vpop.f32.mrb[215].mxu0  ;;  %v4306_v19 = vld [vmem:[#allocation4 + $0x808] sm:$0xff] }
 0x33e   : > { %v10132_v59 = vadd.f32 %v6308_v9, %v2982_v49  ;;  %v6231_v39 = vadd.f32 %v6230_v28, %v6229_v52  ;;  %7551 = vmatprep.mubr.msk.f32.mxu0 %vm369_vm0, %v8199_v4  ;;  %v6311_v34 = vadd.f32 %v6310_v14, %v6309_v5  ;;  %v8208_v52 = vld [vmem:[%s8507_s27 + $0x258] sm:$0xff]  ;;  %v8209_v4 = vld [vmem:[%s8507_s27 + $0x260] sm:$0xff]  ;;  %4497 = vmatprep.mubr.f32.mxu1 %v4306_v19 }
 0x340   : > { %v2987_v47 = vadd.f32 %v6231_v39, %v10025_v1  ;;  %v6232_v57 = vpop.f32.mrb[184].mxu1  ;;  %v6312_v8 = vpop.f32.mrb[216].mxu0 }
 0x341   : > { %7552 = vmatmul.mubr.msk.f32.gmra.mrb[66].mxu0 %vm369_vm0, %v8200_v54  ;;  %v6233_v7 = vpop.f32.mrb[185].mxu1  ;;  %v6313_v6 = vpop.f32.mrb[217].mxu0 }
 0x342   : > { %v10139_v62 = vadd.f32 %v6311_v34, %v2987_v47  ;;  %v6234_v38 = vadd.f32 %v6233_v7, %v6232_v57  ;;  %7554 = vmatprep.mubr.msk.f32.mxu0 %vm369_vm0, %v8201_v18  ;;  %v6314_v50 = vadd.f32 %v6313_v6, %v6312_v8  ;;  %v8210_v8 = vld [vmem:[%s8507_s27 + $0x268] sm:$0xff]  ;;  %v8211_v18 = vld [vmem:[%s8507_s27 + $0x270] sm:$0xff] }
 0x344   : > { %v2992_v45 = vadd.f32 %v6234_v38, %v10032_v22  ;;  %v6235_v53 = vpop.f32.mrb[186].mxu1  ;;  %v6315_v1 = vpop.f32.mrb[218].mxu0 }
 0x345   : > { %7555 = vmatmul.mubr.msk.f32.gmra.mrb[68].mxu0 %vm369_vm0, %v8202_v35  ;;  %v6236_v44 = vpop.f32.mrb[187].mxu1  ;;  %v6316_v25 = vpop.f32.mrb[219].mxu0 }
 0x346   : > { %v10146_v13 = vadd.f32 %v6314_v50, %v2992_v45  ;;  %v6237_v24 = vadd.f32 %v6236_v44, %v6235_v53  ;;  %7557 = vmatprep.mubr.msk.f32.mxu0 %vm369_vm0, %v8203_v16  ;;  %v6317_v11 = vadd.f32 %v6316_v25, %v6315_v1  ;;  %v8212_v1 = vld [vmem:[%s8507_s27 + $0x278] sm:$0xff]  ;;  %v8213_v16 = vld [vmem:[%s8507_s27 + $0x280] sm:$0xff] }
 0x348   : > { %v2997_v43 = vadd.f32 %v6237_v24, %v10039_v36  ;;  %v6238_v27 = vpop.f32.mrb[188].mxu1  ;;  %v6318_v22 = vpop.f32.mrb[220].mxu0 }
 0x349   : > { %7558 = vmatmul.mubr.msk.f32.gmra.mrb[70].mxu0 %vm369_vm0, %v8204_v60  ;;  %v6239_v30 = vpop.f32.mrb[189].mxu1  ;;  %v6319_v31 = vpop.f32.mrb[221].mxu0 }
 0x34a   : > { %v10153_v29 = vadd.f32 %v6317_v11, %v2997_v43  ;;  %v6240_v48 = vadd.f32 %v6239_v30, %v6238_v27  ;;  %7560 = vmatprep.mubr.msk.f32.mxu0 %vm369_vm0, %v8205_v21  ;;  %v6320_v42 = vadd.f32 %v6319_v31, %v6318_v22  ;;  %v8214_v22 = vld [vmem:[%s8507_s27 + $0x288] sm:$0xff]  ;;  %v8215_v21 = vld [vmem:[%s8507_s27 + $0x290] sm:$0xff] }
 0x34c   : > { %v3002_v55 = vadd.f32 %v6240_v48, %v10046_v63  ;;  %v6241_v61 = vpop.f32.mrb[190].mxu1  ;;  %v6321_v36 = vpop.f32.mrb[222].mxu0 }
 0x34d   : > { %7561 = vmatmul.mubr.msk.f32.gmra.mrb[72].mxu0 %vm369_vm0, %v8206_v26  ;;  %v6242_v58 = vpop.f32.mrb[191].mxu1  ;;  %v6322_v33 = vpop.f32.mrb[223].mxu0 }
 0x34e   : > { %v10160_v56 = vadd.f32 %v6320_v42, %v3002_v55  ;;  %v6243_v10 = vadd.f32 %v6242_v58, %v6241_v61  ;;  %7563 = vmatprep.mubr.msk.f32.mxu0 %vm369_vm0, %v8207_v2  ;;  %v6323_v17 = vadd.f32 %v6322_v33, %v6321_v36  ;;  %v8216_v36 = vld [vmem:[%s8507_s27 + $0x298] sm:$0xff]  ;;  %v8217_v2 = vld [vmem:[%s8507_s27 + $0x2a0] sm:$0xff] }
 0x350   : > { %v3007_v40 = vadd.f32 %v6243_v10, %v10053_v23  ;;  %v6356_v9 = vpop.f32.mrb[192].mxu1  ;;  %v6436_v63 = vpop.f32.mrb[224].mxu0 }
 0x351   : > { %v6357_v49 = vpop.f32.mrb[193].mxu1  ;;  %7564 = vmatmul.mubr.msk.f32.gmra.mrb[74].mxu0 %vm369_vm0, %v8208_v52  ;;  %v6437_v5 = vpop.f32.mrb[225].mxu0 }
 0x352   : > { %v10167_v28 = vadd.f32 %v6323_v17, %v3007_v40  ;;  %v6358_v14 = vadd.f32 %v6357_v49, %v6356_v9  ;;  %v6438_v39 = vadd.f32 %v6437_v5, %v6436_v63  ;;  %7566 = vmatprep.mubr.msk.f32.mxu0 %vm369_vm0, %v8209_v4  ;;  %v8218_v63 = vld [vmem:[%s8507_s27 + $0x2a8] sm:$0xff] }
 0x354   : > { %v3222_v23 = vadd.f32 %v6358_v14, %v10062_v12  ;;  %v6359_v34 = vpop.f32.mrb[194].mxu1  ;;  %v6439_v47 = vpop.f32.mrb[226].mxu0  ;;  %v8219_v14 = vld [vmem:[%s8507_s27 + $0x2b0] sm:$0xff] }
 0x355   : > { %v6360_v57 = vpop.f32.mrb[195].mxu1  ;;  %7567 = vmatmul.mubr.msk.f32.gmra.mrb[76].mxu0 %vm369_vm0, %v8210_v8  ;;  %v6440_v54 = vpop.f32.mrb[227].mxu0 }
 0x356   : > { %v10174_v7 = vadd.f32 %v6438_v39, %v3222_v23  ;;  %v6361_v6 = vadd.f32 %v6360_v57, %v6359_v34  ;;  %v6441_v38 = vadd.f32 %v6440_v54, %v6439_v47  ;;  %7569 = vmatprep.mubr.msk.f32.mxu0 %vm369_vm0, %v8211_v18  ;;  %v8220_v34 = vld [vmem:[%s8507_s27 + $0x2b8] sm:$0xff] }
 0x358   : > { %v3227_v50 = vadd.f32 %v6361_v6, %v10069_v51  ;;  %v6362_v12 = vpop.f32.mrb[196].mxu1  ;;  %v6442_v45 = vpop.f32.mrb[228].mxu0  ;;  %v8221_v6 = vld [vmem:[%s8507_s27 + $0x2c0] sm:$0xff] }
 0x359   : > { %v6363_v53 = vpop.f32.mrb[197].mxu1  ;;  %7570 = vmatmul.mubr.msk.f32.gmra.mrb[78].mxu0 %vm369_vm0, %v8212_v1  ;;  %v6443_v35 = vpop.f32.mrb[229].mxu0 }
 0x35a   : > { %v10181_v44 = vadd.f32 %v6441_v38, %v3227_v50  ;;  %v6364_v25 = vadd.f32 %v6363_v53, %v6362_v12  ;;  %v6444_v24 = vadd.f32 %v6443_v35, %v6442_v45  ;;  %7572 = vmatprep.mubr.msk.f32.mxu0 %vm369_vm0, %v8213_v16  ;;  %v8222_v12 = vld [vmem:[%s8507_s27 + $0x2c8] sm:$0xff] }
 0x35c   : > { %v3232_v11 = vadd.f32 %v6364_v25, %v10076_v20  ;;  %v6365_v51 = vpop.f32.mrb[198].mxu1  ;;  %v6445_v43 = vpop.f32.mrb[230].mxu0  ;;  %v8223_v25 = vld [vmem:[%s8507_s27 + $0x2d0] sm:$0xff] }
 0x35d   : > { %v6366_v27 = vpop.f32.mrb[199].mxu1  ;;  %7573 = vmatmul.mubr.msk.f32.gmra.mrb[80].mxu0 %vm369_vm0, %v8214_v22  ;;  %v6446_v60 = vpop.f32.mrb[231].mxu0 }
 0x35e   : > { %v10188_v30 = vadd.f32 %v6444_v24, %v3232_v11  ;;  %v6367_v31 = vadd.f32 %v6366_v27, %v6365_v51  ;;  %v6447_v48 = vadd.f32 %v6446_v60, %v6445_v43  ;;  %7575 = vmatprep.mubr.msk.f32.mxu0 %vm369_vm0, %v8215_v21  ;;  %v8224_v51 = vld [vmem:[%s8507_s27 + $0x2d8] sm:$0xff] }
 0x360   : > { %v3237_v42 = vadd.f32 %v6367_v31, %v10083_v0  ;;  %v6368_v20 = vpop.f32.mrb[200].mxu1  ;;  %v6448_v55 = vpop.f32.mrb[232].mxu0  ;;  %v8225_v31 = vld [vmem:[%s8507_s27 + $0x2e0] sm:$0xff] }
 0x361   : > { %v6369_v61 = vpop.f32.mrb[201].mxu1  ;;  %7576 = vmatmul.mubr.msk.f32.gmra.mrb[82].mxu0 %vm369_vm0, %v8216_v36  ;;  %v6449_v26 = vpop.f32.mrb[233].mxu0 }
 0x362   : > { %v10195_v58 = vadd.f32 %v6447_v48, %v3237_v42  ;;  %v6370_v33 = vadd.f32 %v6369_v61, %v6368_v20  ;;  %v6450_v10 = vadd.f32 %v6449_v26, %v6448_v55  ;;  %7578 = vmatprep.mubr.msk.f32.mxu0 %vm369_vm0, %v8217_v2  ;;  %v8226_v20 = vld [vmem:[%s8507_s27 + $0x2e8] sm:$0xff] }
 0x364   : > { %v3242_v17 = vadd.f32 %v6370_v33, %v10090_v37  ;;  %v6371_v0 = vpop.f32.mrb[202].mxu1  ;;  %v6451_v40 = vpop.f32.mrb[234].mxu0  ;;  %v8227_v33 = vld [vmem:[%s8507_s27 + $0x2f0] sm:$0xff] }
 0x365   : > { %v6372_v9 = vpop.f32.mrb[203].mxu1  ;;  %7579 = vmatmul.mubr.msk.f32.gmra.mrb[84].mxu0 %vm369_vm0, %v8218_v63  ;;  %v6452_v49 = vpop.f32.mrb[235].mxu0 }
 0x366   : > { %v10202_v52 = vadd.f32 %v6450_v10, %v3242_v17  ;;  %v6373_v5 = vadd.f32 %v6372_v9, %v6371_v0  ;;  %v6453_v19 = vadd.f32 %v6452_v49, %v6451_v40  ;;  %7581 = vmatprep.mubr.msk.f32.mxu0 %vm369_vm0, %v8219_v14  ;;  %v8228_v0 = vld [vmem:[%s8507_s27 + $0x2f8] sm:$0xff] }
 0x368   : > { %v3247_v39 = vadd.f32 %v6373_v5, %v10097_v15  ;;  %v6374_v37 = vpop.f32.mrb[204].mxu1  ;;  %v6454_v4 = vpop.f32.mrb[236].mxu0  ;;  %v8229_v5 = vld [vmem:[%s8507_s27 + $0x300] sm:$0xff] }
 0x369   : > { %v6375_v23 = vpop.f32.mrb[205].mxu1  ;;  %7582 = vmatmul.mubr.msk.f32.gmra.mrb[86].mxu0 %vm369_vm0, %v8220_v34  ;;  %v6455_v47 = vpop.f32.mrb[237].mxu0 }
 0x36a   : > { %v10209_v57 = vadd.f32 %v6453_v19, %v3247_v39  ;;  %v6376_v8 = vadd.f32 %v6375_v23, %v6374_v37  ;;  %v6456_v54 = vadd.f32 %v6455_v47, %v6454_v4  ;;  %7584 = vmatprep.mubr.msk.f32.mxu0 %vm369_vm0, %v8221_v6  ;;  %v8230_v37 = vld [vmem:[%s8507_s27 + $0x308] sm:$0xff] }
 0x36c   : > { %v3252_v38 = vadd.f32 %v6376_v8, %v10104_v41  ;;  %v6377_v15 = vpop.f32.mrb[206].mxu1  ;;  %v6457_v18 = vpop.f32.mrb[238].mxu0  ;;  %v8231_v8 = vld [vmem:[%s8507_s27 + $0x310] sm:$0xff] }
 0x36d   : > { %v6378_v50 = vpop.f32.mrb[207].mxu1  ;;  %7585 = vmatmul.mubr.msk.f32.gmra.mrb[88].mxu0 %vm369_vm0, %v8222_v12  ;;  %v6458_v45 = vpop.f32.mrb[239].mxu0 }
 0x36e   : > { %v10216_v53 = vadd.f32 %v6456_v54, %v3252_v38  ;;  %v6379_v1 = vadd.f32 %v6378_v50, %v6377_v15  ;;  %v6459_v35 = vadd.f32 %v6458_v45, %v6457_v18  ;;  %7587 = vmatprep.mubr.msk.f32.mxu0 %vm369_vm0, %v8223_v25  ;;  %v8232_v15 = vld [vmem:[%s8507_s27 + $0x318] sm:$0xff] }
 0x370   : > { %v3257_v24 = vadd.f32 %v6379_v1, %v10111_v32  ;;  %v6380_v41 = vpop.f32.mrb[208].mxu1  ;;  %v6460_v16 = vpop.f32.mrb[240].mxu0  ;;  %v8233_v1 = vld [vmem:[%s8507_s27 + $0x320] sm:$0xff] }
 0x371   : > { %v6381_v11 = vpop.f32.mrb[209].mxu1  ;;  %7588 = vmatmul.mubr.msk.f32.gmra.mrb[90].mxu0 %vm369_vm0, %v8224_v51  ;;  %v6461_v43 = vpop.f32.mrb[241].mxu0 }
 0x372   : > { %v10223_v27 = vadd.f32 %v6459_v35, %v3257_v24  ;;  %v6382_v22 = vadd.f32 %v6381_v11, %v6380_v41  ;;  %v6462_v60 = vadd.f32 %v6461_v43, %v6460_v16  ;;  %7590 = vmatprep.mubr.msk.f32.mxu0 %vm369_vm0, %v8225_v31  ;;  %v8234_v41 = vld [vmem:[%s8507_s27 + $0x328] sm:$0xff] }
 0x374   : > { %v3262_v48 = vadd.f32 %v6382_v22, %v10118_v3  ;;  %v6383_v32 = vpop.f32.mrb[210].mxu1  ;;  %v6463_v21 = vpop.f32.mrb[242].mxu0  ;;  %v8235_v22 = vld [vmem:[%s8507_s27 + $0x330] sm:$0xff] }
 0x375   : > { %v6384_v42 = vpop.f32.mrb[211].mxu1  ;;  %7591 = vmatmul.mubr.msk.f32.gmra.mrb[92].mxu0 %vm369_vm0, %v8226_v20  ;;  %v6464_v55 = vpop.f32.mrb[243].mxu0 }
 0x376   : > { %v10230_v61 = vadd.f32 %v6462_v60, %v3262_v48  ;;  %v6385_v36 = vadd.f32 %v6384_v42, %v6383_v32  ;;  %v6465_v26 = vadd.f32 %v6464_v55, %v6463_v21  ;;  %7593 = vmatprep.mubr.msk.f32.mxu0 %vm369_vm0, %v8227_v33  ;;  %v8236_v32 = vld [vmem:[%s8507_s27 + $0x338] sm:$0xff] }
 0x378   : > { %v3267_v10 = vadd.f32 %v6385_v36, %v10125_v46  ;;  %v6386_v3 = vpop.f32.mrb[212].mxu1  ;;  %v6466_v2 = vpop.f32.mrb[244].mxu0  ;;  %v8237_v36 = vld [vmem:[%s8507_s27 + $0x340] sm:$0xff] }
 0x379   : > { %v6387_v17 = vpop.f32.mrb[213].mxu1  ;;  %7594 = vmatmul.mubr.msk.f32.gmra.mrb[94].mxu0 %vm369_vm0, %v8228_v0  ;;  %v6467_v40 = vpop.f32.mrb[245].mxu0 }
 0x37a   : > { %v10237_v9 = vadd.f32 %v6465_v26, %v3267_v10  ;;  %v6388_v63 = vadd.f32 %v6387_v17, %v6386_v3  ;;  %v6468_v49 = vadd.f32 %v6467_v40, %v6466_v2  ;;  %7596 = vmatprep.mubr.msk.f32.mxu0 %vm369_vm0, %v8229_v5  ;;  %v8238_v3 = vld [vmem:[%s8507_s27 + $0x348] sm:$0xff] }
 0x37c   : > { %v3272_v19 = vadd.f32 %v6388_v63, %v10132_v59  ;;  %v6389_v46 = vpop.f32.mrb[214].mxu1  ;;  %v6469_v14 = vpop.f32.mrb[246].mxu0  ;;  %v8239_v63 = vld [vmem:[%s8507_s27 + $0x350] sm:$0xff] }
 0x37d   : > { %v6390_v39 = vpop.f32.mrb[215].mxu1  ;;  %7597 = vmatmul.mubr.msk.f32.gmra.mrb[96].mxu0 %vm369_vm0, %v8230_v37  ;;  %v6470_v4 = vpop.f32.mrb[247].mxu0 }
 0x37e   : > { %v10244_v23 = vadd.f32 %v6468_v49, %v3272_v19  ;;  %v6391_v34 = vadd.f32 %v6390_v39, %v6389_v46  ;;  %v6471_v47 = vadd.f32 %v6470_v4, %v6469_v14  ;;  %7599 = vmatprep.mubr.msk.f32.mxu0 %vm369_vm0, %v8231_v8  ;;  %v8240_v46 = vld [vmem:[%s8507_s27 + $0x358] sm:$0xff]  ;;  %v8241_v4 = vld [vmem:[%s8507_s27 + $0x360] sm:$0xff] }
 0x380   : > { %v3277_v54 = vadd.f32 %v6391_v34, %v10139_v62  ;;  %v6392_v59 = vpop.f32.mrb[216].mxu1  ;;  %v6472_v6 = vpop.f32.mrb[248].mxu0 }
 0x381   : > { %v6393_v38 = vpop.f32.mrb[217].mxu1  ;;  %7600 = vmatmul.mubr.msk.f32.gmra.mrb[98].mxu0 %vm369_vm0, %v8232_v15  ;;  %v6473_v18 = vpop.f32.mrb[249].mxu0  ;;  %v8243_v15 = vld [vmem:[%s8507_s27 + $0x370] sm:$0xff] }
 0x382   : > { %v10251_v50 = vadd.f32 %v6471_v47, %v3277_v54  ;;  %v6394_v12 = vadd.f32 %v6393_v38, %v6392_v59  ;;  %v6474_v45 = vadd.f32 %v6473_v18, %v6472_v6  ;;  %7602 = vmatprep.mubr.msk.f32.mxu0 %vm369_vm0, %v8233_v1  ;;  %v8242_v59 = vld [vmem:[%s8507_s27 + $0x368] sm:$0xff] }
 0x384   : > { %v3282_v35 = vadd.f32 %v6394_v12, %v10146_v13  ;;  %v6395_v62 = vpop.f32.mrb[218].mxu1  ;;  %v6475_v25 = vpop.f32.mrb[250].mxu0 }
 0x385   : > { %v6396_v24 = vpop.f32.mrb[219].mxu1  ;;  %7603 = vmatmul.mubr.msk.f32.gmra.mrb[100].mxu0 %vm369_vm0, %v8234_v41  ;;  %v6476_v16 = vpop.f32.mrb[251].mxu0 }
 0x386   : > { %v10258_v11 = vadd.f32 %v6474_v45, %v3282_v35  ;;  %v6397_v51 = vadd.f32 %v6396_v24, %v6395_v62  ;;  %v6477_v43 = vadd.f32 %v6476_v16, %v6475_v25  ;;  %7605 = vmatprep.mubr.msk.f32.mxu0 %vm369_vm0, %v8235_v22  ;;  %v8244_v35 = vld [vmem:[%s8507_s27 + $0x378] sm:$0xff]  ;;  %v8245_v24 = vld [vmem:[%s8507_s27 + $0x380] sm:$0xff]  ;;  %v8246_v22 = vld [vmem:[%s8507_s27 + $0x388] sm:$0xff] }
 0x388   : > { %v3287_v60 = vadd.f32 %v6397_v51, %v10153_v29  ;;  %v6398_v13 = vpop.f32.mrb[220].mxu1  ;;  %v6478_v31 = vpop.f32.mrb[252].mxu0 }
 0x389   : > { %v6399_v48 = vpop.f32.mrb[221].mxu1  ;;  %7606 = vmatmul.mubr.msk.f32.gmra.mrb[102].mxu0 %vm369_vm0, %v8236_v32  ;;  %v6479_v21 = vpop.f32.mrb[253].mxu0 }
 0x38a   : > { %v10265_v42 = vadd.f32 %v6477_v43, %v3287_v60  ;;  %v6400_v20 = vadd.f32 %v6399_v48, %v6398_v13  ;;  %v6480_v55 = vadd.f32 %v6479_v21, %v6478_v31  ;;  %7608 = vmatprep.mubr.msk.f32.mxu0 %vm369_vm0, %v8237_v36  ;;  %v8247_v31 = vld [vmem:[%s8507_s27 + $0x390] sm:$0xff] }
 0x38c   : > { %v3292_v26 = vadd.f32 %v6400_v20, %v10160_v56  ;;  %v6401_v29 = vpop.f32.mrb[222].mxu1  ;;  %v6481_v33 = vpop.f32.mrb[254].mxu0 }
 0x38d   : > { %v6402_v10 = vpop.f32.mrb[223].mxu1  ;;  %7609 = vmatmul.mubr.msk.f32.gmra.mrb[104].mxu0 %vm369_vm0, %v8238_v3  ;;  %v6482_v2 = vpop.f32.mrb[255].mxu0 }
 0x38e   : > { %v10272_v17 = vadd.f32 %v6480_v55, %v3292_v26  ;;  %v6403_v0 = vadd.f32 %v6402_v10, %v6401_v29  ;;  %v6483_v40 = vadd.f32 %v6482_v2, %v6481_v33  ;;  %7611 = vmatprep.mubr.msk.f32.mxu0 %vm369_vm0, %v8239_v63  ;;  %v8248_v55 = vld [vmem:[%s8507_s27 + $0x398] sm:$0xff]  ;;  %v8249_v29 = vld [vmem:[%s8507_s27 + $0x3a0] sm:$0xff] }
 0x390   : > { %v3297_v49 = vadd.f32 %v6403_v0, %v10167_v28  ;;  %v6516_v56 = vpop.f32.mrb[224].mxu1  ;;  %v10277_v5 = vpop.f32.mrb[0].mxu0  ;;  %v8250_v0 = vld [vmem:[%s8507_s27 + $0x3a8] sm:$0xff] }
 0x391   : > { %v6517_v19 = vpop.f32.mrb[225].mxu1  ;;  %7612 = vmatmul.mubr.msk.f32.gmra.mrb[106].mxu0 %vm369_vm0, %v8240_v46  ;;  %v10281_v14 = vpop.f32.mrb[1].mxu0 }
 0x392   : > { %v10283_v39 = vadd.f32 %v6483_v40, %v3297_v49  ;;  %v6518_v37 = vadd.f32 %v6517_v19, %v6516_v56  ;;  %7614 = vmatprep.mubr.msk.f32.mxu0 %vm369_vm0, %v8241_v4  ;;  %v7950_v28 = vpack.c.bf16 %v10277_v5, %v10281_v14  ;;  %v8251_v49 = vld [vmem:[%s8507_s27 + $0x3b0] sm:$0xff]  ;;  %v8252_v4 = vld [vmem:[%s8507_s27 + $0x3b8] sm:$0xff] }
 0x394   : > { %v10290_v34 = vadd.f32 %v6518_v37, %v10174_v7  ;;  %v6519_v47 = vpop.f32.mrb[226].mxu1  ;;  %v10292_v8 = vpop.f32.mrb[2].mxu0 }
 0x395   : > { %v6520_v54 = vpop.f32.mrb[227].mxu1  ;;  %7615 = vmatmul.mubr.msk.f32.gmra.mrb[108].mxu0 %vm369_vm0, %v8242_v59  ;;  %v10296_v6 = vpop.f32.mrb[3].mxu0  ;;  %v8253_v59 = vld [vmem:[%s8507_s27 + $0x3c0] sm:$0xff] }
 0x396   : > { %v6521_v38 = vadd.f32 %v6520_v54, %v6519_v47  ;;  %7617 = vmatprep.mubr.msk.f32.mxu0 %vm369_vm0, %v8243_v15  ;;  %v7954_v18 = vpack.c.bf16 %v10292_v8, %v10296_v6 }
 0x398   : > { %v10303_v7 = vadd.f32 %v6521_v38, %v10181_v44  ;;  %v6522_v12 = vpop.f32.mrb[228].mxu1  ;;  %v10305_v45 = vpop.f32.mrb[4].mxu0 }
 0x399   : > { %v6523_v1 = vpop.f32.mrb[229].mxu1  ;;  %7618 = vmatmul.mubr.msk.f32.gmra.mrb[110].mxu0 %vm369_vm0, %v8244_v35  ;;  %v10309_v62 = vpop.f32.mrb[5].mxu0  ;;  %v8254_v35 = vld [vmem:[%s8507_s27 + $0x3c8] sm:$0xff] }
 0x39a   : > { %v6524_v25 = vadd.f32 %v6523_v1, %v6522_v12  ;;  %7620 = vmatprep.mubr.msk.f32.mxu0 %vm369_vm0, %v8245_v24  ;;  %v7958_v41 = vpack.c.bf16 %v10305_v45, %v10309_v62 }
 0x39c   : > { %v10316_v44 = vadd.f32 %v6524_v25, %v10188_v30  ;;  %v6525_v16 = vpop.f32.mrb[230].mxu1  ;;  %v10318_v51 = vpop.f32.mrb[6].mxu0 }
 0x39d   : > { %v6526_v43 = vpop.f32.mrb[231].mxu1  ;;  %7621 = vmatmul.mubr.msk.f32.gmra.mrb[112].mxu0 %vm369_vm0, %v8246_v22  ;;  %v10322_v60 = vpop.f32.mrb[7].mxu0 }
 0x39e   : > { %v6527_v13 = vadd.f32 %v6526_v43, %v6525_v16  ;;  %7623 = vmatprep.mubr.msk.f32.mxu0 %vm369_vm0, %v8247_v31  ;;  %v7962_v48 = vpack.c.bf16 %v10318_v51, %v10322_v60  ;;  %v8255_v43 = vld [vmem:[%s8507_s27 + $0x3d0] sm:$0xff] }
 0x3a0   : > { %v10329_v30 = vadd.f32 %v6527_v13, %v10195_v58  ;;  %v6528_v32 = vpop.f32.mrb[232].mxu1  ;;  %v10331_v21 = vpop.f32.mrb[8].mxu0 }
 0x3a1   : > { %v6529_v20 = vpop.f32.mrb[233].mxu1  ;;  %7624 = vmatmul.mubr.msk.f32.gmra.mrb[114].mxu0 %vm369_vm0, %v8248_v55  ;;  %v10335_v36 = vpop.f32.mrb[9].mxu0 }
 0x3a2   : > { %v6530_v26 = vadd.f32 %v6529_v20, %v6528_v32  ;;  %7626 = vmatprep.mubr.msk.f32.mxu0 %vm369_vm0, %v8249_v29  ;;  %v7966_v33 = vpack.c.bf16 %v10331_v21, %v10335_v36  ;;  %v8256_v20 = vld [vmem:[%s8507_s27 + $0x3d8] sm:$0xff]  ;;  %v8257_v29 = vld [vmem:[%s8507_s27 + $0x3e0] sm:$0xff] }
 0x3a4   : > { %v10342_v58 = vadd.f32 %v6530_v26, %v10202_v52  ;;  %v6531_v10 = vpop.f32.mrb[234].mxu1  ;;  %v10344_v3 = vpop.f32.mrb[10].mxu0 }
 0x3a5   : > { %v6532_v2 = vpop.f32.mrb[235].mxu1  ;;  %7627 = vmatmul.mubr.msk.f32.gmra.mrb[116].mxu0 %vm369_vm0, %v8250_v0  ;;  %v10348_v40 = vpop.f32.mrb[11].mxu0 }
 0x3a6   : > { %v6533_v63 = vadd.f32 %v6532_v2, %v6531_v10  ;;  %7629 = vmatprep.mubr.msk.f32.mxu0 %vm369_vm0, %v8251_v49  ;;  %v7970_v56 = vpack.c.bf16 %v10344_v3, %v10348_v40  ;;  %v8258_v49 = vld [vmem:[%s8507_s27 + $0x3e8] sm:$0xff] }
 0x3a8   : > { %v10355_v52 = vadd.f32 %v6533_v63, %v10209_v57  ;;  %v6534_v19 = vpop.f32.mrb[236].mxu1  ;;  %v10357_v46 = vpop.f32.mrb[12].mxu0 }
 0x3a9   : > { %v6535_v37 = vpop.f32.mrb[237].mxu1  ;;  %7630 = vmatmul.mubr.msk.f32.gmra.mrb[118].mxu0 %vm369_vm0, %v8252_v4  ;;  %v10361_v47 = vpop.f32.mrb[13].mxu0  ;;  %v8259_v4 = vld [vmem:[%s8507_s27 + $0x3f0] sm:$0xff] }
 0x3aa   : > { %v6536_v54 = vadd.f32 %v6535_v37, %v6534_v19  ;;  %7632 = vmatprep.mubr.msk.f32.mxu0 %vm369_vm0, %v8253_v59  ;;  %v7974_v38 = vpack.c.bf16 %v10357_v46, %v10361_v47 }
 0x3ac   : > { %v10368_v57 = vadd.f32 %v6536_v54, %v10216_v53  ;;  %v6537_v15 = vpop.f32.mrb[238].mxu1  ;;  %v10370_v12 = vpop.f32.mrb[14].mxu0 }
 0x3ad   : > { %v6538_v1 = vpop.f32.mrb[239].mxu1  ;;  %7633 = vmatmul.mubr.msk.f32.gmra.mrb[120].mxu0 %vm369_vm0, %v8254_v35  ;;  %v10374_v25 = vpop.f32.mrb[15].mxu0  ;;  %v8260_v35 = vld [vmem:[%s8507_s27 + $0x3f8] sm:$0xff] }
 0x3ae   : > { %v6539_v24 = vadd.f32 %v6538_v1, %v6537_v15  ;;  %v7978_v16 = vpack.c.bf16 %v10370_v12, %v10374_v25  ;;  %7635 = vmatprep.mubr.msk.f32.mxu0 %vm369_vm0, %v8255_v43  ;;  %v4321_v25 = vld [vmem:[#allocation4 + $0x880] sm:$0xff] }
 0x3b0   : > { %v10381_v53 = vadd.f32 %v6539_v24, %v10223_v27  ;;  %v6540_v22 = vpop.f32.mrb[240].mxu1  ;;  %v7478_v13 = vpop.f32.mrb[16].mxu0 }
 0x3b1   : > { %v6541_v31 = vpop.f32.mrb[241].mxu1  ;;  %v3745_v32 = vpop.f32.mrb[17].mxu0  ;;  %7636 = vmatmul.mubr.msk.f32.gmra.mrb[122].mxu0 %vm369_vm0, %v8256_v20 }
 0x3b2   : > { %v6542_v55 = vadd.f32 %v6541_v31, %v6540_v22  ;;  %v7948_v26 = vpack.c.bf16 %v7478_v13, %v3745_v32  ;;  %7638 = vmatprep.mubr.msk.f32.mxu0 %vm369_vm0, %v8257_v29 }
 0x3b4   : > { %v10388_v10 = vadd.f32 %v6542_v55, %v10230_v61  ;;  %v6543_v2 = vpop.f32.mrb[242].mxu1  ;;  %v7481_v27 = vpop.f32.mrb[18].mxu0  ;;  %7949 = vmatprep.subr.bf16.mxu1 %v7948_v26 }
 0x3b5   : > { %v6544_v0 = vpop.f32.mrb[243].mxu1  ;;  %v3755_v63 = vpop.f32.mrb[19].mxu0  ;;  %7639 = vmatmul.mubr.msk.f32.gmra.mrb[124].mxu0 %vm369_vm0, %v8258_v49  ;;  %7951 = vmatpush3.bf16.msra.mxu1 %v7950_v28 }
 0x3b6   : > { %v6545_v19 = vadd.f32 %v6544_v0, %v6543_v2  ;;  %v7952_v37 = vpack.c.bf16 %v7481_v27, %v3755_v63  ;;  %7641 = vmatprep.mubr.msk.f32.mxu0 %vm369_vm0, %v8259_v4 }
 0x3b8   : > { %v10398_v61 = vadd.f32 %v6545_v19, %v10237_v9  ;;  %v6546_v54 = vpop.f32.mrb[244].mxu1  ;;  %v7484_v59 = vpop.f32.mrb[20].mxu0  ;;  %7953 = vmatprep.subr.bf16.mxu1 %v7952_v37 }
 0x3b9   : > { %v6547_v15 = vpop.f32.mrb[245].mxu1  ;;  %v3765_v1 = vpop.f32.mrb[21].mxu0  ;;  %7642 = vmatmul.mubr.msk.f32.gmra.mrb[126].mxu0 %vm369_vm0, %v8260_v35  ;;  %7955 = vmatpush3.bf16.msra.mxu1 %v7954_v18 }
 0x3ba   : > { %v6548_v5 = vadd.f32 %v6547_v15, %v6546_v54  ;;  %v7956_v14 = vpack.c.bf16 %v7484_v59, %v3765_v1  ;;  %v4322_v54 = vld [vmem:[#allocation4 + $0x888] sm:$0xff] }
 0x3bb   : > { %v4330_v15 = vld [vmem:[#allocation4 + $0x8c8] sm:$0xff] }
 0x3bc   : > { %v10406_v28 = vadd.f32 %v6548_v5, %v10244_v23  ;;  %v6549_v24 = vpop.f32.mrb[246].mxu1  ;;  %v7487_v9 = vpop.f32.mrb[22].mxu0  ;;  %7957 = vmatprep.subr.bf16.mxu1 %v7956_v14  ;;  %v4329_v5 = vld [vmem:[#allocation4 + $0x8c0] sm:$0xff] }
 0x3bd   : > { %v6550_v43 = vpop.f32.mrb[247].mxu1  ;;  %v3775_v22 = vpop.f32.mrb[23].mxu0  ;;  %7959 = vmatpush3.bf16.msra.mxu1 %v7958_v41 }
 0x3be   : > { %v6551_v13 = vadd.f32 %v6550_v43, %v6549_v24  ;;  %v7960_v31 = vpack.c.bf16 %v7487_v9, %v3775_v22  ;;  %v4338_v24 = vld [vmem:[#allocation4 + $0x908] sm:$0xff]  ;;  %v4337_v22 = vld [vmem:[#allocation4 + $0x900] sm:$0xff] }
 0x3c0   : > { %v10412_v32 = vadd.f32 %v6551_v13, %v10251_v50  ;;  %v6552_v8 = vpop.f32.mrb[248].mxu1  ;;  %v7490_v6 = vpop.f32.mrb[24].mxu0  ;;  %7961 = vmatprep.subr.bf16.mxu1 %v7960_v31  ;;  %v4346_v31 = vld [vmem:[#allocation4 + $0x948] sm:$0xff] }
 0x3c1   : > { %v6553_v18 = vpop.f32.mrb[249].mxu1  ;;  %v3785_v23 = vpop.f32.mrb[25].mxu0  ;;  %7963 = vmatpush3.bf16.msra.mxu1 %v7962_v48 }
 0x3c2   : > { %v6554_v20 = vadd.f32 %v6553_v18, %v6552_v8  ;;  %v7964_v55 = vpack.c.bf16 %v7490_v6, %v3785_v23  ;;  %v4345_v18 = vld [vmem:[#allocation4 + $0x940] sm:$0xff] }
 0x3c4   : > { %v10418_v26 = vadd.f32 %v6554_v20, %v10258_v11  ;;  %v6555_v45 = vpop.f32.mrb[250].mxu1  ;;  %v7493_v62 = vpop.f32.mrb[26].mxu0  ;;  %7965 = vmatprep.subr.bf16.mxu1 %v7964_v55  ;;  %v4354_v55 = vld [vmem:[#allocation4 + $0x988] sm:$0xff] }
 0x3c5   : > { %v6556_v41 = vpop.f32.mrb[251].mxu1  ;;  %v3795_v50 = vpop.f32.mrb[27].mxu0  ;;  %7967 = vmatpush3.bf16.msra.mxu1 %v7966_v33 }
 0x3c6   : > { %v6557_v29 = vadd.f32 %v6556_v41, %v6555_v45  ;;  %v7968_v2 = vpack.c.bf16 %v7493_v62, %v3795_v50  ;;  %v4353_v62 = vld [vmem:[#allocation4 + $0x980] sm:$0xff] }
 0x3c8   : > { %v10424_v27 = vadd.f32 %v6557_v29, %v10265_v42  ;;  %v6558_v51 = vpop.f32.mrb[252].mxu1  ;;  %v7496_v60 = vpop.f32.mrb[28].mxu0  ;;  %7969 = vmatprep.subr.bf16.mxu1 %v7968_v2  ;;  %v4362_v29 = vld [vmem:[#allocation4 + $0x9c8] sm:$0xff] }
 0x3c9   : > { %v6559_v48 = vpop.f32.mrb[253].mxu1  ;;  %v3805_v11 = vpop.f32.mrb[29].mxu0  ;;  %7971 = vmatpush3.bf16.msra.mxu1 %v7970_v56  ;;  %v4314_v56 = vld [vmem:[#allocation4 + $0x848] sm:$0xff] }
 0x3ca   : > { %v6560_v0 = vadd.f32 %v6559_v48, %v6558_v51  ;;  %v7972_v63 = vpack.c.bf16 %v7496_v60, %v3805_v11  ;;  %v4361_v60 = vld [vmem:[#allocation4 + $0x9c0] sm:$0xff]  ;;  %v4370_v11 = vld [vmem:[#allocation4 + $0xa08] sm:$0xff] }
 0x3cc   : > { %v10430_v49 = vadd.f32 %v6560_v0, %v10272_v17  ;;  %v6561_v21 = vpop.f32.mrb[254].mxu1  ;;  %v7499_v36 = vpop.f32.mrb[30].mxu0  ;;  %7973 = vmatprep.subr.bf16.mxu1 %v7972_v63  ;;  %v4305_v17 = vld [vmem:[#allocation4 + $0x800] sm:$0xff] }
 0x3cd   : > { %v6562_v33 = vpop.f32.mrb[255].mxu1  ;;  %v3815_v42 = vpop.f32.mrb[31].mxu0  ;;  %7975 = vmatpush3.bf16.msra.mxu1 %v7974_v38 }
 0x3ce   : > { %v6563_v19 = vadd.f32 %v6562_v33, %v6561_v21  ;;  %v7976_v37 = vpack.c.bf16 %v7499_v36, %v3815_v42  ;;  %v4369_v21 = vld [vmem:[#allocation4 + $0xa00] sm:$0xff]  ;;  %v4378_v33 = vld [vmem:[#allocation4 + $0xa48] sm:$0xff] }
 0x3d0   : > { %v10436_v4 = vadd.f32 %v6563_v19, %v10283_v39  ;;  %7977 = vmatprep.subr.bf16.mxu1 %v7976_v37  ;;  %v10438_v3 = vpop.f32.mrb[32].mxu0  ;;  %v4313_v39 = vld [vmem:[#allocation4 + $0x840] sm:$0xff] }
 0x3d1   : > { %7979 = vmatpush3.bf16.msra.mxu1 %v7978_v16  ;;  %v10443_v40 = vpop.f32.mrb[33].mxu0  ;;  %v4377_v37 = vld [vmem:[#allocation4 + $0xa40] sm:$0xff] }
 0x3d2   : > { %v7982_v46 = vpack.c.bf16 %v10438_v3, %v10443_v40 }
 0x3d4   : > { %4498 = vmatmul.mubr.f32.vlgmr.msra.gmra.mrb[0].mxu1 %v4305_v17  ;;  %v10447_v47 = vpop.f32.mrb[34].mxu0  ;;  %v4386_v17 = vld [vmem:[#allocation4 + $0xa88] sm:$0xff] }
 0x3d5   : > { %4502 = vmatprep.mubr.f32.mxu1 %v4314_v56  ;;  %v10449_v38 = vpop.f32.mrb[35].mxu0 }
 0x3d6   : > { %v7986_v59 = vpack.c.bf16 %v10447_v47, %v10449_v38  ;;  %v4385_v47 = vld [vmem:[#allocation4 + $0xa80] sm:$0xff]  ;;  %v4394_v38 = vld [vmem:[#allocation4 + $0xac8] sm:$0xff] }
 0x3d8   : > { %4503 = vmatmul.mubr.f32.gmra.mrb[2].mxu1 %v4313_v39  ;;  %v10453_v12 = vpop.f32.mrb[36].mxu0 }
 0x3d9   : > { %4507 = vmatprep.mubr.f32.mxu1 %v4322_v54  ;;  %v10455_v16 = vpop.f32.mrb[37].mxu0 }
 0x3da   : > { %v7990_v1 = vpack.c.bf16 %v10453_v12, %v10455_v16  ;;  %v4409_v16 = vld [vmem:[#allocation4 + $0xb40] sm:$0xff] }
 0x3dc   : > { %4508 = vmatmul.mubr.f32.gmra.mrb[4].mxu1 %v4321_v25  ;;  %v10459_v35 = vpop.f32.mrb[38].mxu0 }
 0x3dd   : > { %4512 = vmatprep.mubr.f32.mxu1 %v4330_v15  ;;  %v10461_v14 = vpop.f32.mrb[39].mxu0 }
 0x3de   : > { %v7994_v9 = vpack.c.bf16 %v10459_v35, %v10461_v14  ;;  %v4417_v14 = vld [vmem:[#allocation4 + $0xb80] sm:$0xff] }
 0x3e0   : > { %4513 = vmatmul.mubr.f32.gmra.mrb[6].mxu1 %v4329_v5  ;;  %v10465_v43 = vpop.f32.mrb[40].mxu0  ;;  %v4402_v5 = vld [vmem:[#allocation4 + $0xb08] sm:$0xff] }
 0x3e1   : > { %4517 = vmatprep.mubr.f32.mxu1 %v4338_v24  ;;  %v10467_v13 = vpop.f32.mrb[41].mxu0 }
 0x3e2   : > { %v7998_v8 = vpack.c.bf16 %v10465_v43, %v10467_v13  ;;  %v4425_v13 = vld [vmem:[#allocation4 + $0xbc0] sm:$0xf] }
 0x3e4   : > { %4518 = vmatmul.mubr.f32.gmra.mrb[8].mxu1 %v4337_v22  ;;  %v10471_v6 = vpop.f32.mrb[42].mxu0  ;;  %v4401_v22 = vld [vmem:[#allocation4 + $0xb00] sm:$0xff] }
 0x3e5   : > { %4522 = vmatprep.mubr.f32.mxu1 %v4346_v31  ;;  %v10473_v23 = vpop.f32.mrb[43].mxu0 }
 0x3e6   : > { %v8002_v20 = vpack.c.bf16 %v10471_v6, %v10473_v23  ;;  %v4307_v23 = vld [vmem:[#allocation4 + $0x810] sm:$0xff] }
 0x3e8   : > { %4523 = vmatmul.mubr.f32.gmra.mrb[10].mxu1 %v4345_v18  ;;  %v10477_v45 = vpop.f32.mrb[44].mxu0  ;;  %v4410_v18 = vld [vmem:[#allocation4 + $0xb48] sm:$0xff] }
 0x3e9   : > { %4527 = vmatprep.mubr.f32.mxu1 %v4354_v55  ;;  %v10479_v41 = vpop.f32.mrb[45].mxu0 }
 0x3ea   : > { %v8006_v50 = vpack.c.bf16 %v10477_v45, %v10479_v41 }
 0x3ec   : > { %4528 = vmatmul.mubr.f32.gmra.mrb[12].mxu1 %v4353_v62  ;;  %v10483_v2 = vpop.f32.mrb[46].mxu0  ;;  %v4418_v62 = vld [vmem:[#allocation4 + $0xb88] sm:$0xff] }
 0x3ed   : > { %v10485_v51 = vpop.f32.mrb[47].mxu0  ;;  %4532 = vmatprep.mubr.f32.mxu1 %v4362_v29 }
 0x3ee   : > { %v8010_v48 = vpack.c.bf16 %v10483_v2, %v10485_v51 }
 0x3f0   : > { %v7526_v0 = vpop.f32.mrb[48].mxu0  ;;  %4533 = vmatmul.mubr.f32.gmra.mrb[14].mxu1 %v4361_v60  ;;  %v4426_v60 = vld [vmem:[#allocation4 + $0xbc8] sm:$0xf] }
 0x3f1   : > { %v3905_v63 = vpop.f32.mrb[49].mxu0  ;;  %4537 = vmatprep.mubr.f32.mxu1 %v4370_v11 }
 0x3f2   : > { %v7980_v36 = vpack.c.bf16 %v7526_v0, %v3905_v63  ;;  %v4308_v0 = vld [vmem:[#allocation4 + $0x818] sm:$0xff] }
 0x3f3   : > { %v4316_v63 = vld [vmem:[#allocation4 + $0x858] sm:$0xff] }
 0x3f4   : > { %v7529_v42 = vpop.f32.mrb[50].mxu0  ;;  %4538 = vmatmul.mubr.f32.gmra.mrb[16].mxu1 %v4369_v21  ;;  %7981 = vmatprep.subr.bf16.mxu1 %v7980_v36  ;;  %v4324_v36 = vld [vmem:[#allocation4 + $0x898] sm:$0xff] }
 0x3f5   : > { %v3915_v19 = vpop.f32.mrb[51].mxu0  ;;  %7983 = vmatpush3.bf16.msra.mxu1 %v7982_v46  ;;  %4542 = vmatprep.mubr.f32.mxu1 %v4378_v33  ;;  %v4393_v46 = vld [vmem:[#allocation4 + $0xac0] sm:$0xff] }
 0x3f6   : > { %v7984_v3 = vpack.c.bf16 %v7529_v42, %v3915_v19  ;;  %v4332_v42 = vld [vmem:[#allocation4 + $0x8d8] sm:$0xff] }
 0x3f8   : > { %v7532_v40 = vpop.f32.mrb[52].mxu0  ;;  %4543 = vmatmul.mubr.f32.gmra.mrb[18].mxu1 %v4377_v37  ;;  %7985 = vmatprep.subr.bf16.mxu1 %v7984_v3  ;;  %v4331_v3 = vld [vmem:[#allocation4 + $0x8d0] sm:$0xff] }
 0x3f9   : > { %v3925_v56 = vpop.f32.mrb[53].mxu0  ;;  %7987 = vmatpush3.bf16.msra.mxu1 %v7986_v59  ;;  %4547 = vmatprep.mubr.f32.mxu1 %v4386_v17 }
 0x3fa   : > { %v7988_v39 = vpack.c.bf16 %v7532_v40, %v3925_v56  ;;  %v4340_v40 = vld [vmem:[#allocation4 + $0x918] sm:$0xff] }
 0x3fc   : > { %v7535_v54 = vpop.f32.mrb[54].mxu0  ;;  %4548 = vmatmul.mubr.f32.gmra.mrb[20].mxu1 %v4385_v47  ;;  %7989 = vmatprep.subr.bf16.mxu1 %v7988_v39  ;;  %v4339_v39 = vld [vmem:[#allocation4 + $0x910] sm:$0xff] }
 0x3fd   : > { %v3935_v25 = vpop.f32.mrb[55].mxu0  ;;  %7991 = vmatpush3.bf16.msra.mxu1 %v7990_v1  ;;  %4552 = vmatprep.mubr.f32.mxu1 %v4394_v38 }
 0x3fe   : > { %v7992_v15 = vpack.c.bf16 %v7535_v54, %v3935_v25  ;;  %v4348_v54 = vld [vmem:[#allocation4 + $0x958] sm:$0xff] }
 0x400   : > { %v7538_v24 = vpop.f32.mrb[56].mxu0  ;;  %4553 = vmatmul.mubr.f32.gmra.mrb[22].mxu1 %v4393_v46  ;;  %7993 = vmatprep.subr.bf16.mxu1 %v7992_v15  ;;  %v4347_v15 = vld [vmem:[#allocation4 + $0x950] sm:$0xff] }
 0x401   : > { %v3945_v59 = vpop.f32.mrb[57].mxu0  ;;  %7995 = vmatpush3.bf16.msra.mxu1 %v7994_v9  ;;  %4557 = vmatprep.mubr.f32.mxu1 %v4402_v5 }
 0x402   : > { %v7996_v31 = vpack.c.bf16 %v7538_v24, %v3945_v59  ;;  %v4356_v59 = vld [vmem:[#allocation4 + $0x998] sm:$0xff] }
 0x404   : > { %v7541_v55 = vpop.f32.mrb[58].mxu0  ;;  %4558 = vmatmul.mubr.f32.gmra.mrb[24].mxu1 %v4401_v22  ;;  %7997 = vmatprep.subr.bf16.mxu1 %v7996_v31  ;;  %v4355_v31 = vld [vmem:[#allocation4 + $0x990] sm:$0xff] }
 0x405   : > { %v3955_v12 = vpop.f32.mrb[59].mxu0  ;;  %7999 = vmatpush3.bf16.msra.mxu1 %v7998_v8  ;;  %4562 = vmatprep.mubr.f32.mxu1 %v4410_v18 }
 0x406   : > { %v8000_v1 = vpack.c.bf16 %v7541_v55, %v3955_v12  ;;  %v4364_v12 = vld [vmem:[#allocation4 + $0x9d8] sm:$0xff] }
 0x408   : > { %v7544_v29 = vpop.f32.mrb[60].mxu0  ;;  %4563 = vmatmul.mubr.f32.gmra.mrb[26].mxu1 %v4409_v16  ;;  %8001 = vmatprep.subr.bf16.mxu1 %v8000_v1 }
 0x409   : > { %v3965_v35 = vpop.f32.mrb[61].mxu0  ;;  %8003 = vmatpush3.bf16.msra.mxu1 %v8002_v20  ;;  %4567 = vmatprep.mubr.f32.mxu1 %v4418_v62  ;;  %v4363_v62 = vld [vmem:[#allocation4 + $0x9d0] sm:$0xff] }
 0x40a   : > { %v8004_v9 = vpack.c.bf16 %v7544_v29, %v3965_v35  ;;  %v4372_v35 = vld [vmem:[#allocation4 + $0xa18] sm:$0xff] }
 0x40c   : > { %v7547_v11 = vpop.f32.mrb[62].mxu0  ;;  %4568 = vmatmul.mubr.f32.gmra.mrb[28].mxu1 %v4417_v14  ;;  %8005 = vmatprep.subr.bf16.mxu1 %v8004_v9 }
 0x40d   : > { %v3975_v43 = vpop.f32.mrb[63].mxu0  ;;  %8007 = vmatpush3.bf16.msra.mxu1 %v8006_v50  ;;  %4572 = vmatprep.mubr.f32.mxu1 %v4426_v60  ;;  %v4315_v50 = vld [vmem:[#allocation4 + $0x850] sm:$0xff] }
 0x40e   : > { %v8008_v8 = vpack.c.bf16 %v7547_v11, %v3975_v43  ;;  %v4371_v60 = vld [vmem:[#allocation4 + $0xa10] sm:$0xff]  ;;  %v4380_v43 = vld [vmem:[#allocation4 + $0xa58] sm:$0xff] }
 0x410   : > { %4573 = vmatmul.mubr.f32.gmra.mrb[30].mxu1 %v4425_v13  ;;  %8009 = vmatprep.subr.bf16.mxu1 %v8008_v8  ;;  %v10504_v6 = vpop.f32.mrb[64].mxu0 }
 0x411   : > { %8011 = vmatpush3.bf16.msra.mxu1 %v8010_v48  ;;  %4642 = vmatprep.mubr.f32.mxu1 %v4308_v0  ;;  %v10509_v20 = vpop.f32.mrb[65].mxu0  ;;  %v4323_v48 = vld [vmem:[#allocation4 + $0x890] sm:$0xff] }
 0x412   : > { %v8014_v45 = vpack.c.bf16 %v10504_v6, %v10509_v20  ;;  %v4379_v0 = vld [vmem:[#allocation4 + $0xa50] sm:$0xff] }
 0x414   : > { %4643 = vmatmul.mubr.f32.vlgmr.msra.gmra.mrb[32].mxu1 %v4307_v23  ;;  %v10513_v41 = vpop.f32.mrb[66].mxu0  ;;  %v4388_v23 = vld [vmem:[#allocation4 + $0xa98] sm:$0xff] }
 0x415   : > { %4647 = vmatprep.mubr.f32.mxu1 %v4316_v63  ;;  %v10515_v21 = vpop.f32.mrb[67].mxu0 }
 0x416   : > { %v8018_v2 = vpack.c.bf16 %v10513_v41, %v10515_v21  ;;  %v4387_v41 = vld [vmem:[#allocation4 + $0xa90] sm:$0xff]  ;;  %v4396_v21 = vld [vmem:[#allocation4 + $0xad8] sm:$0xff] }
 0x418   : > { %4648 = vmatmul.mubr.f32.gmra.mrb[34].mxu1 %v4315_v50  ;;  %v10519_v51 = vpop.f32.mrb[68].mxu0 }
 0x419   : > { %4652 = vmatprep.mubr.f32.mxu1 %v4324_v36  ;;  %v10521_v33 = vpop.f32.mrb[69].mxu0 }
 0x41a   : > { %v8022_v19 = vpack.c.bf16 %v10519_v51, %v10521_v33  ;;  %v4411_v33 = vld [vmem:[#allocation4 + $0xb50] sm:$0xff] }
 0x41c   : > { %4653 = vmatmul.mubr.f32.gmra.mrb[36].mxu1 %v4323_v48  ;;  %v10525_v37 = vpop.f32.mrb[70].mxu0 }
 0x41d   : > { %4657 = vmatprep.mubr.f32.mxu1 %v4332_v42  ;;  %v10527_v17 = vpop.f32.mrb[71].mxu0 }
 0x41e   : > { %v8026_v56 = vpack.c.bf16 %v10525_v37, %v10527_v17  ;;  %v4419_v17 = vld [vmem:[#allocation4 + $0xb90] sm:$0xff] }
 0x420   : > { %4658 = vmatmul.mubr.f32.gmra.mrb[38].mxu1 %v4331_v3  ;;  %v10531_v47 = vpop.f32.mrb[72].mxu0  ;;  %v4404_v3 = vld [vmem:[#allocation4 + $0xb18] sm:$0xff] }
 0x421   : > { %4662 = vmatprep.mubr.f32.mxu1 %v4340_v40  ;;  %v10533_v38 = vpop.f32.mrb[73].mxu0 }
 0x422   : > { %v8030_v25 = vpack.c.bf16 %v10531_v47, %v10533_v38  ;;  %v4427_v38 = vld [vmem:[#allocation4 + $0xbd0] sm:$0xf] }
 0x424   : > { %4663 = vmatmul.mubr.f32.gmra.mrb[40].mxu1 %v4339_v39  ;;  %v10537_v46 = vpop.f32.mrb[74].mxu0  ;;  %v4403_v39 = vld [vmem:[#allocation4 + $0xb10] sm:$0xff] }
 0x425   : > { %4667 = vmatprep.mubr.f32.mxu1 %v4348_v54  ;;  %v10539_v5 = vpop.f32.mrb[75].mxu0 }
 0x426   : > { %v8034_v24 = vpack.c.bf16 %v10537_v46, %v10539_v5  ;;  %v5029_v5 = vld [vmem:[%s10889_s3] sm:$0xff] }
 0x428   : > { %4668 = vmatmul.mubr.f32.gmra.mrb[42].mxu1 %v4347_v15  ;;  %v10543_v22 = vpop.f32.mrb[76].mxu0  ;;  %v4412_v15 = vld [vmem:[#allocation4 + $0xb58] sm:$0xff] }
 0x429   : > { %4672 = vmatprep.mubr.f32.mxu1 %v4356_v59  ;;  %v10545_v18 = vpop.f32.mrb[77].mxu0 }
 0x42a   : > { %v8038_v55 = vpack.c.bf16 %v10543_v22, %v10545_v18  ;;  %v4309_v22 = vld [vmem:[#allocation4 + $0x820] sm:$0xff] }
 0x42c   : > { %4673 = vmatmul.mubr.f32.gmra.mrb[44].mxu1 %v4355_v31  ;;  %v10549_v16 = vpop.f32.mrb[78].mxu0  ;;  %v4420_v31 = vld [vmem:[#allocation4 + $0xb98] sm:$0xff] }
 0x42d   : > { %v10551_v1 = vpop.f32.mrb[79].mxu0  ;;  %4677 = vmatprep.mubr.f32.mxu1 %v4364_v12 }
 0x42e   : > { %v8042_v29 = vpack.c.bf16 %v10549_v16, %v10551_v1  ;;  %v5030_v16 = vld [vmem:[%s10889_s3 + $0x8] sm:$0xff]  ;;  %v5032_v1 = vld [vmem:[%s10889_s3 + $0x18] sm:$0xff] }
 0x430   : > { %v7574_v14 = vpop.f32.mrb[80].mxu0  ;;  %4678 = vmatmul.mubr.f32.gmra.mrb[46].mxu1 %v4363_v62  ;;  %v4428_v62 = vld [vmem:[#allocation4 + $0xbd8] sm:$0xf] }
 0x431   : > { %v4065_v9 = vpop.f32.mrb[81].mxu0  ;;  %4682 = vmatprep.mubr.f32.mxu1 %v4372_v35 }
 0x432   : > { %v8012_v11 = vpack.c.bf16 %v7574_v14, %v4065_v9  ;;  %v4310_v14 = vld [vmem:[#allocation4 + $0x828] sm:$0xff] }
 0x434   : > { %v7577_v13 = vpop.f32.mrb[82].mxu0  ;;  %4683 = vmatmul.mubr.f32.gmra.mrb[48].mxu1 %v4371_v60  ;;  %8013 = vmatprep.subr.bf16.mxu1 %v8012_v11  ;;  %v8365_v60 = vmov 0  }
 0x435   : > { %v4075_v8 = vpop.f32.mrb[83].mxu0  ;;  %8015 = vmatpush3.bf16.msra.mxu1 %v8014_v45  ;;  %4687 = vmatprep.mubr.f32.mxu1 %v4380_v43  ;;  %v4395_v45 = vld [vmem:[#allocation4 + $0xad0] sm:$0xff] }
 0x436   : > { %v8016_v6 = vpack.c.bf16 %v7577_v13, %v4075_v8  ;;  %8131 = vset.pattern.permute.xlu0 %v8365_v60  ;;  %8132 = vset.pattern.permute.xlu1 %v8365_v60  ;;  %v4326_v13 = vld [vmem:[#allocation4 + $0x8a8] sm:$0xff] }
 0x437   : > { %5047 = vperm.xlu0 %8131, %v5029_v5  }
 0x438   : > { %v7580_v20 = vpop.f32.mrb[84].mxu0  ;;  %4688 = vmatmul.mubr.f32.gmra.mrb[50].mxu1 %v4379_v0  ;;  %8017 = vmatprep.subr.bf16.mxu1 %v8016_v6  ;;  %v5033_v6 = vld [vmem:[%s10889_s3 + $0x20] sm:$0xff] }
 0x439   : > { %v4085_v63 = vpop.f32.mrb[85].mxu0  ;;  %8019 = vmatpush3.bf16.msra.mxu1 %v8018_v2  ;;  %4692 = vmatprep.mubr.f32.mxu1 %v4388_v23  ;;  %v5034_v23 = vld [vmem:[%s10889_s3 + $0x28] sm:$0xff] }
 0x43a   : > { %v8020_v50 = vpack.c.bf16 %v7580_v20, %v4085_v63  ;;  %v4325_v20 = vld [vmem:[#allocation4 + $0x8a0] sm:$0xff] }
 0x43b   : > { %5052 = vperm.xlu0 %8131, %v5030_v16   ;;  %v4365_v16 = vld [vmem:[#allocation4 + $0x9e0] sm:$0xff] }
 0x43c   : > { %v7583_v36 = vpop.f32.mrb[86].mxu0  ;;  %4693 = vmatmul.mubr.f32.gmra.mrb[52].mxu1 %v4387_v41  ;;  %8021 = vmatprep.subr.bf16.mxu1 %v8020_v50  ;;  %v4334_v41 = vld [vmem:[#allocation4 + $0x8e8] sm:$0xff] }
 0x43d   : > { %v4095_v48 = vpop.f32.mrb[87].mxu0  ;;  %8023 = vmatpush3.bf16.msra.mxu1 %v8022_v19  ;;  %4697 = vmatprep.mubr.f32.mxu1 %v4396_v21 }
 0x43e   : > { %v8024_v42 = vpack.c.bf16 %v7583_v36, %v4095_v48  ;;  %v5035_v36 = vld [vmem:[%s10889_s3 + $0x30] sm:$0xff]  ;;  %v5036_v48 = vld [vmem:[%s10889_s3 + $0x38] sm:$0xff] }
 0x43f   : > { %5067 = vperm.xlu0 %8131, %v5033_v6  }
 0x440   : > { %v7586_v40 = vpop.f32.mrb[88].mxu0  ;;  %4698 = vmatmul.mubr.f32.gmra.mrb[54].mxu1 %v4395_v45  ;;  %8025 = vmatprep.subr.bf16.mxu1 %v8024_v42  ;;  %v4333_v45 = vld [vmem:[#allocation4 + $0x8e0] sm:$0xff] }
 0x441   : > { %v4105_v2 = vpop.f32.mrb[89].mxu0  ;;  %8027 = vmatpush3.bf16.msra.mxu1 %v8026_v56  ;;  %4702 = vmatprep.mubr.f32.mxu1 %v4404_v3  ;;  %v4342_v3 = vld [vmem:[#allocation4 + $0x928] sm:$0xff] }
 0x442   : > { %v8028_v54 = vpack.c.bf16 %v7586_v40, %v4105_v2 }
 0x443   : > { %5077 = vperm.xlu0 %8131, %v5035_v36   ;;  %v4382_v36 = vld [vmem:[#allocation4 + $0xa68] sm:$0xff] }
 0x444   : > { %v7589_v59 = vpop.f32.mrb[90].mxu0  ;;  %4703 = vmatmul.mubr.f32.gmra.mrb[56].mxu1 %v4403_v39  ;;  %8029 = vmatprep.subr.bf16.mxu1 %v8028_v54  ;;  %v5037_v39 = vld [vmem:[%s10889_s3 + $0x40] sm:$0xff]  ;;  %v5038_v54 = vld [vmem:[%s10889_s3 + $0x48] sm:$0xff] }
 0x445   : > { %v4115_v51 = vpop.f32.mrb[91].mxu0  ;;  %8031 = vmatpush3.bf16.msra.mxu1 %v8030_v25  ;;  %4707 = vmatprep.mubr.f32.mxu1 %v4412_v15  ;;  %v4341_v15 = vld [vmem:[#allocation4 + $0x920] sm:$0xff] }
 0x446   : > { %v8032_v19 = vpack.c.bf16 %v7589_v59, %v4115_v51  ;;  %v4350_v51 = vld [vmem:[#allocation4 + $0x968] sm:$0xff] }
 0x447   : > { %5087 = vperm.xlu0 %8131, %v5037_v39  }
 0x448   : > { %v7592_v12 = vpop.f32.mrb[92].mxu0  ;;  %4708 = vmatmul.mubr.f32.gmra.mrb[58].mxu1 %v4411_v33  ;;  %8033 = vmatprep.subr.bf16.mxu1 %v8032_v19 }
 0x449   : > { %v4125_v37 = vpop.f32.mrb[93].mxu0  ;;  %8035 = vmatpush3.bf16.msra.mxu1 %v8034_v24  ;;  %4712 = vmatprep.mubr.f32.mxu1 %v4420_v31  ;;  %v5031_v24 = vld [vmem:[%s10889_s3 + $0x10] sm:$0xff] }
 0x44a   : > { %v8036_v56 = vpack.c.bf16 %v7592_v12, %v4125_v37  ;;  %5057 = vperm.xlu1 %8132, %v5031_v24   ;;  %v5039_v31 = vld [vmem:[%s10889_s3 + $0x50] sm:$0xff]  ;;  %v5040_v12 = vld [vmem:[%s10889_s3 + $0x58] sm:$0xff]  ;;  %v4349_v37 = vld [vmem:[#allocation4 + $0x960] sm:$0xff] }
 0x44b   : > { %5097 = vperm.xlu0 %8131, %v5039_v31   ;;  %v4366_v24 = vld [vmem:[#allocation4 + $0x9e8] sm:$0xff]  ;;  %v4389_v31 = vld [vmem:[#allocation4 + $0xaa0] sm:$0xff] }
 0x44c   : > { %v7595_v35 = vpop.f32.mrb[94].mxu0  ;;  %4713 = vmatmul.mubr.f32.gmra.mrb[60].mxu1 %v4419_v17  ;;  %8037 = vmatprep.subr.bf16.mxu1 %v8036_v56 }
 0x44d   : > { %v4135_v47 = vpop.f32.mrb[95].mxu0  ;;  %8039 = vmatpush3.bf16.msra.mxu1 %v8038_v55  ;;  %4717 = vmatprep.mubr.f32.mxu1 %v4428_v62  ;;  %v4318_v55 = vld [vmem:[#allocation4 + $0x868] sm:$0xff] }
 0x44e   : > { %v8040_v25 = vpack.c.bf16 %v7595_v35, %v4135_v47  ;;  %5062 = vperm.xlu1 %8132, %v5032_v1   ;;  %v4358_v62 = vld [vmem:[#allocation4 + $0x9a8] sm:$0xff]  ;;  %v5041_v47 = vld [vmem:[%s10889_s3 + $0x60] sm:$0xff] }
 0x44f   : > { %5107 = vperm.xlu0 %8131, %v5041_v47   ;;  %v4406_v47 = vld [vmem:[#allocation4 + $0xb28] sm:$0xff] }
 0x450   : > { %4718 = vmatmul.mubr.f32.gmra.mrb[62].mxu1 %v4427_v38  ;;  %8041 = vmatprep.subr.bf16.mxu1 %v8040_v25  ;;  %v10570_v46 = vpop.f32.mrb[96].mxu0  ;;  %v5042_v38 = vld [vmem:[%s10889_s3 + $0x68] sm:$0xff]  ;;  %v4357_v25 = vld [vmem:[#allocation4 + $0x9a0] sm:$0xff] }
 0x451   : > { %8043 = vmatpush3.bf16.msra.mxu1 %v8042_v29  ;;  %4787 = vmatprep.mubr.f32.mxu1 %v4310_v14  ;;  %v10581_v18 = vpop.f32.mrb[97].mxu0  ;;  %v4317_v29 = vld [vmem:[#allocation4 + $0x860] sm:$0xff] }
 0x452   : > { %v8046_v9 = vpack.c.bf16 %v10570_v46, %v10581_v18  ;;  %5072 = vperm.xlu1 %8132, %v5034_v23   ;;  %v4397_v18 = vld [vmem:[#allocation4 + $0xae0] sm:$0xff] }
 0x454   : > { %4788 = vmatmul.mubr.f32.vlgmr.msra.gmra.mrb[64].mxu1 %v4309_v22  ;;  %v10585_v11 = vpop.f32.mrb[98].mxu0 }
 0x455   : > { %4792 = vmatprep.mubr.f32.mxu1 %v4318_v55  ;;  %v10593_v43 = vpop.f32.mrb[99].mxu0  ;;  %v5043_v55 = vld [vmem:[%s10889_s3 + $0x70] sm:$0xff] }
 0x456   : > { %v8050_v8 = vpack.c.bf16 %v10585_v11, %v10593_v43  ;;  %5082 = vperm.xlu1 %8132, %v5036_v48   ;;  %5117 = vperm.xlu0 %8131, %v5043_v55   ;;  %v4405_v43 = vld [vmem:[#allocation4 + $0xb20] sm:$0xff]  ;;  %v4422_v55 = vld [vmem:[#allocation4 + $0xba8] sm:$0xff] }
 0x458   : > { %4793 = vmatmul.mubr.f32.gmra.mrb[66].mxu1 %v4317_v29  ;;  %v10597_v0 = vpop.f32.mrb[100].mxu0  ;;  %v4374_v29 = vld [vmem:[#allocation4 + $0xa28] sm:$0xff] }
 0x459   : > { %4797 = vmatprep.mubr.f32.mxu1 %v4326_v13  ;;  %v10605_v63 = vpop.f32.mrb[101].mxu0  ;;  %v5044_v13 = vld [vmem:[%s10889_s3 + $0x78] sm:$0xf] }
 0x45a   : > { %v8054_v50 = vpack.c.bf16 %v10597_v0, %v10605_v63  ;;  %5092 = vperm.xlu1 %8132, %v5038_v54   ;;  %v4390_v54 = vld [vmem:[#allocation4 + $0xaa8] sm:$0xff]  ;;  %v4413_v63 = vld [vmem:[#allocation4 + $0xb60] sm:$0xff] }
 0x45c   : > { %4798 = vmatmul.mubr.f32.gmra.mrb[68].mxu1 %v4325_v20  ;;  %v10609_v21 = vpop.f32.mrb[102].mxu0  ;;  %v4373_v20 = vld [vmem:[#allocation4 + $0xa20] sm:$0xff] }
 0x45d   : > { %4802 = vmatprep.mubr.f32.mxu1 %v4334_v41  ;;  %v10617_v42 = vpop.f32.mrb[103].mxu0 }
 0x45e   : > { %v8058_v40 = vpack.c.bf16 %v10609_v21, %v10617_v42  ;;  %5102 = vperm.xlu1 %8132, %v5040_v12   ;;  %v4421_v42 = vld [vmem:[#allocation4 + $0xba0] sm:$0xff] }
 0x460   : > { %4803 = vmatmul.mubr.f32.gmra.mrb[70].mxu1 %v4333_v45  ;;  %v10621_v2 = vpop.f32.mrb[104].mxu0 }
 0x461   : > { %4807 = vmatprep.mubr.f32.mxu1 %v4342_v3  ;;  %v10629_v59 = vpop.f32.mrb[105].mxu0  ;;  %v4381_v3 = vld [vmem:[#allocation4 + $0xa60] sm:$0xff] }
 0x462   : > { %v8062_v33 = vpack.c.bf16 %v10621_v2, %v10629_v59  ;;  %5112 = vperm.xlu1 %8132, %v5042_v38   ;;  %v4429_v59 = vld [vmem:[#allocation4 + $0xbe0] sm:$0xf] }
 0x464   : > { %4808 = vmatmul.mubr.f32.gmra.mrb[72].mxu1 %v4341_v15  ;;  %v10633_v19 = vpop.f32.mrb[106].mxu0 }
 0x465   : > { %4812 = vmatprep.mubr.f32.mxu1 %v4350_v51  ;;  %v10641_v17 = vpop.f32.mrb[107].mxu0 }
 0x466   : > { %v8066_v56 = vpack.c.bf16 %v10633_v19, %v10641_v17  ;;  %5122 = vperm.xlu1 %8132, %v5044_v13   ;;  %v4311_v19 = vld [vmem:[#allocation4 + $0x830] sm:$0xff]  ;;  %v4320_v17 = vld [vmem:[#allocation4 + $0x878] sm:$0xff] }
 0x468   : > { %4813 = vmatmul.mubr.f32.gmra.mrb[74].mxu1 %v4349_v37  ;;  %v10645_v35 = vpop.f32.mrb[108].mxu0  ;;  %v4398_v37 = vld [vmem:[#allocation4 + $0xae8] sm:$0xff] }
 0x469   : > { %4817 = vmatprep.mubr.f32.mxu1 %v4358_v62  ;;  %v10653_v14 = vpop.f32.mrb[109].mxu0 }
 0x46a   : > { %v8070_v5 = vpack.c.bf16 %v10645_v35, %v10653_v14  ;;  %v4327_v35 = vld [vmem:[#allocation4 + $0x8b0] sm:$0xff]  ;;  %v4336_v14 = vld [vmem:[#allocation4 + $0x8f8] sm:$0xff] }
 0x46c   : > { %4818 = vmatmul.mubr.f32.gmra.mrb[76].mxu1 %v4357_v25  ;;  %v10657_v22 = vpop.f32.mrb[110].mxu0  ;;  %v4414_v25 = vld [vmem:[#allocation4 + $0xb68] sm:$0xff] }
 0x46d   : > { %v10662_v60 = vpop.f32.mrb[111].mxu0  ;;  %4822 = vmatprep.mubr.f32.mxu1 %v4366_v24 }
 0x46e   : > { %v8074_v1 = vpack.c.bf16 %v10657_v22, %v10662_v60  ;;  %v4352_v22 = vld [vmem:[#allocation4 + $0x978] sm:$0xff]  ;;  %v4351_v60 = vld [vmem:[#allocation4 + $0x970] sm:$0xff] }
 0x470   : > { %v7622_v6 = vpop.f32.mrb[112].mxu0  ;;  %4823 = vmatmul.mubr.f32.gmra.mrb[78].mxu1 %v4365_v16 }
 0x471   : > { %v4225_v23 = vpop.f32.mrb[113].mxu0  ;;  %4827 = vmatprep.mubr.f32.mxu1 %v4374_v29  ;;  %v4430_v29 = vld [vmem:[#allocation4 + $0xbe8] sm:$0xf] }
 0x472   : > { %v8044_v41 = vpack.c.bf16 %v7622_v6, %v4225_v23  ;;  %v4312_v6 = vld [vmem:[#allocation4 + $0x838] sm:$0xff] }
 0x473   : > { %v4328_v23 = vld [vmem:[#allocation4 + $0x8b8] sm:$0xff] }
 0x474   : > { %v7625_v48 = vpop.f32.mrb[114].mxu0  ;;  %4828 = vmatmul.mubr.f32.gmra.mrb[80].mxu1 %v4373_v20  ;;  %8045 = vmatprep.subr.bf16.mxu1 %v8044_v41  ;;  %v4344_v20 = vld [vmem:[#allocation4 + $0x938] sm:$0xff]  ;;  %v4343_v41 = vld [vmem:[#allocation4 + $0x930] sm:$0xff] }
 0x475   : > { %v4235_v45 = vpop.f32.mrb[115].mxu0  ;;  %8047 = vmatpush3.bf16.msra.mxu1 %v8046_v9  ;;  %4832 = vmatprep.mubr.f32.mxu1 %v4382_v36 }
 0x476   : > { %v8048_v39 = vpack.c.bf16 %v7625_v48, %v4235_v45  ;;  %v4359_v45 = vld [vmem:[#allocation4 + $0x9b0] sm:$0xff] }
 0x478   : > { %v7628_v15 = vpop.f32.mrb[116].mxu0  ;;  %4833 = vmatmul.mubr.f32.gmra.mrb[82].mxu1 %v4381_v3  ;;  %8049 = vmatprep.subr.bf16.mxu1 %v8048_v39  ;;  %v4368_v39 = vld [vmem:[#allocation4 + $0x9f8] sm:$0xff] }
 0x479   : > { %v4245_v51 = vpop.f32.mrb[117].mxu0  ;;  %8051 = vmatpush3.bf16.msra.mxu1 %v8050_v8  ;;  %4837 = vmatprep.mubr.f32.mxu1 %v4390_v54 }
 0x47a   : > { %v8052_v12 = vpack.c.bf16 %v7628_v15, %v4245_v51  ;;  %v4367_v51 = vld [vmem:[#allocation4 + $0x9f0] sm:$0xff] }
 0x47c   : > { %v7631_v62 = vpop.f32.mrb[118].mxu0  ;;  %4838 = vmatmul.mubr.f32.gmra.mrb[84].mxu1 %v4389_v31  ;;  %8053 = vmatprep.subr.bf16.mxu1 %v8052_v12  ;;  %v4376_v12 = vld [vmem:[#allocation4 + $0xa38] sm:$0xff] }
 0x47d   : > { %v4255_v46 = vpop.f32.mrb[119].mxu0  ;;  %8055 = vmatpush3.bf16.msra.mxu1 %v8054_v50  ;;  %4842 = vmatprep.mubr.f32.mxu1 %v4398_v37 }
 0x47e   : > { %v8056_v9 = vpack.c.bf16 %v7631_v62, %v4255_v46  ;;  %v4375_v46 = vld [vmem:[#allocation4 + $0xa30] sm:$0xff] }
 0x480   : > { %v7634_v38 = vpop.f32.mrb[120].mxu0  ;;  %4843 = vmatmul.mubr.f32.gmra.mrb[86].mxu1 %v4397_v18  ;;  %8057 = vmatprep.subr.bf16.mxu1 %v8056_v9  ;;  %v4384_v9 = vld [vmem:[#allocation4 + $0xa78] sm:$0xff] }
 0x481   : > { %v4265_v11 = vpop.f32.mrb[121].mxu0  ;;  %8059 = vmatpush3.bf16.msra.mxu1 %v8058_v40  ;;  %4847 = vmatprep.mubr.f32.mxu1 %v4406_v47 }
 0x482   : > { %v8060_v8 = vpack.c.bf16 %v7634_v38, %v4265_v11  ;;  %v4383_v11 = vld [vmem:[#allocation4 + $0xa70] sm:$0xff] }
 0x484   : > { %v7637_v24 = vpop.f32.mrb[122].mxu0  ;;  %4848 = vmatmul.mubr.f32.gmra.mrb[88].mxu1 %v4405_v43  ;;  %8061 = vmatprep.subr.bf16.mxu1 %v8060_v8  ;;  %v4392_v8 = vld [vmem:[#allocation4 + $0xab8] sm:$0xff] }
 0x485   : > { %v4275_v0 = vpop.f32.mrb[123].mxu0  ;;  %8063 = vmatpush3.bf16.msra.mxu1 %v8062_v33  ;;  %4852 = vmatprep.mubr.f32.mxu1 %v4414_v25 }
 0x486   : > { %v8064_v50 = vpack.c.bf16 %v7637_v24, %v4275_v0  ;;  %v4391_v0 = vld [vmem:[#allocation4 + $0xab0] sm:$0xff] }
 0x488   : > { %v7640_v16 = vpop.f32.mrb[124].mxu0  ;;  %4853 = vmatmul.mubr.f32.gmra.mrb[90].mxu1 %v4413_v63  ;;  %8065 = vmatprep.subr.bf16.mxu1 %v8064_v50  ;;  %v4400_v50 = vld [vmem:[#allocation4 + $0xaf8] sm:$0xff] }
 0x489   : > { %v4285_v21 = vpop.f32.mrb[125].mxu0  ;;  %8067 = vmatpush3.bf16.msra.mxu1 %v8066_v56  ;;  %4857 = vmatprep.mubr.f32.mxu1 %v4422_v55  ;;  %v4319_v56 = vld [vmem:[#allocation4 + $0x870] sm:$0xff] }
 0x48a   : > { %v8068_v40 = vpack.c.bf16 %v7640_v16, %v4285_v21  ;;  %v4399_v21 = vld [vmem:[#allocation4 + $0xaf0] sm:$0xff] }
 0x48c   : > { %v7643_v13 = vpop.f32.mrb[126].mxu0  ;;  %4858 = vmatmul.mubr.f32.gmra.mrb[92].mxu1 %v4421_v42  ;;  %8069 = vmatprep.subr.bf16.mxu1 %v8068_v40  ;;  %v4408_v40 = vld [vmem:[#allocation4 + $0xb38] sm:$0xff] }
 0x48d   : > { %v4295_v2 = vpop.f32.mrb[127].mxu0  ;;  %8071 = vmatpush3.bf16.msra.mxu1 %v8070_v5  ;;  %4862 = vmatprep.mubr.f32.mxu1 %v4430_v29  ;;  %v4335_v5 = vld [vmem:[#allocation4 + $0x8f0] sm:$0xff] }
 0x48e   : > { %v8072_v33 = vpack.c.bf16 %v7643_v13, %v4295_v2  ;;  %v4407_v2 = vld [vmem:[#allocation4 + $0xb30] sm:$0xff] }
 0x490   : > { %4863 = vmatmul.mubr.f32.gmra.mrb[94].mxu1 %v4429_v59  ;;  %8073 = vmatprep.subr.bf16.mxu1 %v8072_v33  ;;  %v4416_v33 = vld [vmem:[#allocation4 + $0xb78] sm:$0xff] }
 0x491   : > { %8075 = vmatpush3.bf16.msra.mxu1 %v8074_v1  ;;  %4932 = vmatprep.mubr.f32.mxu1 %v4312_v6  ;;  %v4360_v1 = vld [vmem:[#allocation4 + $0x9b8] sm:$0xff] }
 0x494   : > { %4933 = vmatmul.mubr.f32.vlgmr.msra.gmra.mrb[96].mxu1 %v4311_v19 }
 0x495   : > { %4937 = vmatprep.mubr.f32.mxu1 %v4320_v17  ;;  %v4415_v17 = vld [vmem:[#allocation4 + $0xb70] sm:$0xff] }
 0x498   : > { %4938 = vmatmul.mubr.f32.gmra.mrb[98].mxu1 %v4319_v56 }
 0x499   : > { %4942 = vmatprep.mubr.f32.mxu1 %v4328_v23  ;;  %v4424_v23 = vld [vmem:[#allocation4 + $0xbb8] sm:$0xff] }
 0x49c   : > { %4943 = vmatmul.mubr.f32.gmra.mrb[100].mxu1 %v4327_v35 }
 0x49d   : > { %4947 = vmatprep.mubr.f32.mxu1 %v4336_v14 }
 0x4a0   : > { %4948 = vmatmul.mubr.f32.gmra.mrb[102].mxu1 %v4335_v5  ;;  %v4423_v5 = vld [vmem:[#allocation4 + $0xbb0] sm:$0xff] }
 0x4a1   : > { %4952 = vmatprep.mubr.f32.mxu1 %v4344_v20 }
 0x4a4   : > { %4953 = vmatmul.mubr.f32.gmra.mrb[104].mxu1 %v4343_v41  ;;  %v4432_v41 = vld [vmem:[#allocation4 + $0xbf8] sm:$0xf] }
 0x4a5   : > { %4957 = vmatprep.mubr.f32.mxu1 %v4352_v22 }
 0x4a7   : > { %v6732_v36 = vpop.f32.mrb[0].mxu1 }
 0x4a8   : > { %4958 = vmatmul.mubr.f32.gmra.mrb[106].mxu1 %v4351_v60  ;;  %v6733_v48 = vpop.f32.mrb[1].mxu1 }
 0x4a9   : > { %4962 = vmatprep.mubr.f32.mxu1 %v4360_v1  ;;  %v10693_v3 = vadd.f32 %v6733_v48, %v6732_v36  ;;  %v4431_v1 = vld [vmem:[#allocation4 + $0xbf0] sm:$0xf] }
 0x4ab   : > { %v6735_v54 = vpop.f32.mrb[2].mxu1 }
 0x4ac   : > { %4963 = vmatmul.mubr.f32.gmra.mrb[108].mxu1 %v4359_v45  ;;  %v6736_v15 = vpop.f32.mrb[3].mxu1 }
 0x4ad   : > { %4967 = vmatprep.mubr.f32.mxu1 %v4368_v39  ;;  %v10695_v31 = vadd.f32 %v6736_v15, %v6735_v54 }
 0x4af   : > { %v6738_v37 = vpop.f32.mrb[4].mxu1 }
 0x4b0   : > { %4968 = vmatmul.mubr.f32.gmra.mrb[110].mxu1 %v4367_v51  ;;  %v6739_v62 = vpop.f32.mrb[5].mxu1 }
 0x4b1   : > { %4972 = vmatprep.mubr.f32.mxu1 %v4376_v12  ;;  %v10697_v18 = vadd.f32 %v6739_v62, %v6738_v37 }
 0x4b3   : > { %v6741_v47 = vpop.f32.mrb[6].mxu1 }
 0x4b4   : > { %4973 = vmatmul.mubr.f32.gmra.mrb[112].mxu1 %v4375_v46  ;;  %v6742_v38 = vpop.f32.mrb[7].mxu1 }
 0x4b5   : > { %4977 = vmatprep.mubr.f32.mxu1 %v4384_v9  ;;  %v10699_v43 = vadd.f32 %v6742_v38, %v6741_v47 }
 0x4b7   : > { %v6744_v25 = vpop.f32.mrb[8].mxu1 }
 0x4b8   : > { %4978 = vmatmul.mubr.f32.gmra.mrb[114].mxu1 %v4383_v11  ;;  %v6745_v24 = vpop.f32.mrb[9].mxu1 }
 0x4b9   : > { %4982 = vmatprep.mubr.f32.mxu1 %v4392_v8  ;;  %v10701_v63 = vadd.f32 %v6745_v24, %v6744_v25 }
 0x4bb   : > { %v6747_v55 = vpop.f32.mrb[10].mxu1 }
 0x4bc   : > { %4983 = vmatmul.mubr.f32.gmra.mrb[116].mxu1 %v4391_v0  ;;  %v6748_v16 = vpop.f32.mrb[11].mxu1 }
 0x4bd   : > { %4987 = vmatprep.mubr.f32.mxu1 %v4400_v50  ;;  %v10703_v42 = vadd.f32 %v6748_v16, %v6747_v55 }
 0x4bf   : > { %v6750_v29 = vpop.f32.mrb[12].mxu1 }
 0x4c0   : > { %4988 = vmatmul.mubr.f32.gmra.mrb[118].mxu1 %v4399_v21  ;;  %v6751_v13 = vpop.f32.mrb[13].mxu1 }
 0x4c1   : > { %4992 = vmatprep.mubr.f32.mxu1 %v4408_v40  ;;  %v10705_v59 = vadd.f32 %v6751_v13, %v6750_v29 }
 0x4c3   : > { %v6753_v6 = vpop.f32.mrb[14].mxu1 }
 0x4c4   : > { %4993 = vmatmul.mubr.f32.gmra.mrb[120].mxu1 %v4407_v2  ;;  %v6754_v19 = vpop.f32.mrb[15].mxu1 }
 0x4c5   : > { %4997 = vmatprep.mubr.f32.mxu1 %v4416_v33  ;;  %v10707_v56 = vadd.f32 %v6754_v19, %v6753_v6 }
 0x4c7   : > { %v6756_v35 = vpop.f32.mrb[16].mxu1 }
 0x4c8   : > { %4998 = vmatmul.mubr.f32.gmra.mrb[122].mxu1 %v4415_v17  ;;  %v6757_v14 = vpop.f32.mrb[17].mxu1 }
 0x4c9   : > { %5002 = vmatprep.mubr.f32.mxu1 %v4424_v23  ;;  %v6758_v20 = vadd.f32 %v6757_v14, %v6756_v35 }
 0x4cb   : > { %v6759_v22 = vpop.f32.mrb[18].mxu1 }
 0x4cc   : > { %5003 = vmatmul.mubr.f32.gmra.mrb[124].mxu1 %v4423_v5  ;;  %v6760_v60 = vpop.f32.mrb[19].mxu1 }
 0x4cd   : > { %5007 = vmatprep.mubr.f32.mxu1 %v4432_v41  ;;  %v6761_v36 = vadd.f32 %v6760_v60, %v6759_v22 }
 0x4cf   : > { %v6762_v48 = vpop.f32.mrb[20].mxu1 }
 0x4d0   : > { %5008 = vmatmul.mubr.f32.gmra.mrb[126].mxu1 %v4431_v1  ;;  %v6763_v45 = vpop.f32.mrb[21].mxu1 }
 0x4d1   : > { %v6764_v39 = vadd.f32 %v6763_v45, %v6762_v48 }
 0x4d3   : > { %v6765_v54 = vpop.f32.mrb[22].mxu1 }
 0x4d4   : > { %v6766_v15 = vpop.f32.mrb[23].mxu1 }
 0x4d5   : > { %v6767_v51 = vadd.f32 %v6766_v15, %v6765_v54 }
 0x4d7   : > { %v6768_v12 = vpop.f32.mrb[24].mxu1 }
 0x4d8   : > { %v6769_v37 = vpop.f32.mrb[25].mxu1 }
 0x4d9   : > { %v6770_v62 = vadd.f32 %v6769_v37, %v6768_v12 }
 0x4db   : > { %v6771_v46 = vpop.f32.mrb[26].mxu1 }
 0x4dc   : > { %v6772_v9 = vpop.f32.mrb[27].mxu1 }
 0x4dd   : > { %v6773_v47 = vadd.f32 %v6772_v9, %v6771_v46 }
 0x4df   : > { %v6774_v38 = vpop.f32.mrb[28].mxu1 }
 0x4e0   : > { %v6775_v11 = vpop.f32.mrb[29].mxu1 }
 0x4e1   : > { %v10709_v8 = vadd.f32 %v6775_v11, %v6774_v38 }
 0x4e3   : > { %v6777_v25 = vpop.f32.mrb[30].mxu1 }
 0x4e4   : > { %v6778_v24 = vpop.f32.mrb[31].mxu1 }
 0x4e5   : > { %v10711_v0 = vadd.f32 %v6778_v24, %v6777_v25 }
 0x4e7   : > { %v6812_v50 = vpop.f32.mrb[32].mxu1 }
 0x4e8   : > { %v6813_v55 = vpop.f32.mrb[33].mxu1 }
 0x4e9   : > { %v6814_v16 = vadd.f32 %v6813_v55, %v6812_v50 }
 0x4eb   : > { %v10714_v21 = vadd.f32 %v6814_v16, %v10693_v3  ;;  %v6815_v40 = vpop.f32.mrb[34].mxu1 }
 0x4ec   : > { %v6816_v29 = vpop.f32.mrb[35].mxu1 }
 0x4ed   : > { %v6817_v13 = vadd.f32 %v6816_v29, %v6815_v40 }
 0x4ef   : > { %v10717_v2 = vadd.f32 %v6817_v13, %v10695_v31  ;;  %v6818_v33 = vpop.f32.mrb[36].mxu1 }
 0x4f0   : > { %v6819_v6 = vpop.f32.mrb[37].mxu1 }
 0x4f1   : > { %v6820_v19 = vadd.f32 %v6819_v6, %v6818_v33 }
 0x4f3   : > { %v10720_v17 = vadd.f32 %v6820_v19, %v10697_v18  ;;  %v6821_v23 = vpop.f32.mrb[38].mxu1 }
 0x4f4   : > { %v6822_v35 = vpop.f32.mrb[39].mxu1 }
 0x4f5   : > { %v6823_v14 = vadd.f32 %v6822_v35, %v6821_v23 }
 0x4f7   : > { %v10723_v5 = vadd.f32 %v6823_v14, %v10699_v43  ;;  %v6824_v3 = vpop.f32.mrb[40].mxu1 }
 0x4f8   : > { %v6825_v41 = vpop.f32.mrb[41].mxu1 }
 0x4f9   : > { %v6826_v22 = vadd.f32 %v6825_v41, %v6824_v3 }
 0x4fb   : > { %v10726_v60 = vadd.f32 %v6826_v22, %v10701_v63  ;;  %v6827_v31 = vpop.f32.mrb[42].mxu1 }
 0x4fc   : > { %v6828_v1 = vpop.f32.mrb[43].mxu1 }
 0x4fd   : > { %v6829_v48 = vadd.f32 %v6828_v1, %v6827_v31 }
 0x4ff   : > { %v10729_v45 = vadd.f32 %v6829_v48, %v10703_v42  ;;  %v6830_v18 = vpop.f32.mrb[44].mxu1 }
 0x500   : > { %v6831_v54 = vpop.f32.mrb[45].mxu1 }
 0x501   : > { %v6832_v15 = vadd.f32 %v6831_v54, %v6830_v18 }
 0x503   : > { %v10732_v12 = vadd.f32 %v6832_v15, %v10705_v59  ;;  %v6833_v43 = vpop.f32.mrb[46].mxu1 }
 0x504   : > { %v6834_v37 = vpop.f32.mrb[47].mxu1 }
 0x505   : > { %v6835_v46 = vadd.f32 %v6834_v37, %v6833_v43 }
 0x507   : > { %v10735_v9 = vadd.f32 %v6835_v46, %v10707_v56  ;;  %v6836_v63 = vpop.f32.mrb[48].mxu1 }
 0x508   : > { %v6837_v38 = vpop.f32.mrb[49].mxu1 }
 0x509   : > { %v6838_v11 = vadd.f32 %v6837_v38, %v6836_v63 }
 0x50b   : > { %v10737_v25 = vadd.f32 %v6838_v11, %v6758_v20  ;;  %v6839_v24 = vpop.f32.mrb[50].mxu1 }
 0x50c   : > { %v6840_v42 = vpop.f32.mrb[51].mxu1 }
 0x50d   : > { %v6841_v50 = vadd.f32 %v6840_v42, %v6839_v24 }
 0x50f   : > { %v10739_v55 = vadd.f32 %v6841_v50, %v6761_v36  ;;  %v6842_v16 = vpop.f32.mrb[52].mxu1 }
 0x510   : > { %v6843_v40 = vpop.f32.mrb[53].mxu1 }
 0x511   : > { %v6844_v59 = vadd.f32 %v6843_v40, %v6842_v16 }
 0x513   : > { %v10741_v29 = vadd.f32 %v6844_v59, %v6764_v39  ;;  %v6845_v13 = vpop.f32.mrb[54].mxu1 }
 0x514   : > { %v6846_v33 = vpop.f32.mrb[55].mxu1 }
 0x515   : > { %v6847_v6 = vadd.f32 %v6846_v33, %v6845_v13 }
 0x517   : > { %v10743_v56 = vadd.f32 %v6847_v6, %v6767_v51  ;;  %v6848_v19 = vpop.f32.mrb[56].mxu1 }
 0x518   : > { %v6849_v23 = vpop.f32.mrb[57].mxu1 }
 0x519   : > { %v6850_v35 = vadd.f32 %v6849_v23, %v6848_v19 }
 0x51b   : > { %v10745_v20 = vadd.f32 %v6850_v35, %v6770_v62  ;;  %v6851_v14 = vpop.f32.mrb[58].mxu1 }
 0x51c   : > { %v6852_v3 = vpop.f32.mrb[59].mxu1 }
 0x51d   : > { %v6853_v41 = vadd.f32 %v6852_v3, %v6851_v14 }
 0x51f   : > { %v10747_v36 = vadd.f32 %v6853_v41, %v6773_v47  ;;  %v6854_v22 = vpop.f32.mrb[60].mxu1 }
 0x520   : > { %v6855_v31 = vpop.f32.mrb[61].mxu1 }
 0x521   : > { %v6856_v1 = vadd.f32 %v6855_v31, %v6854_v22 }
 0x523   : > { %v10750_v39 = vadd.f32 %v6856_v1, %v10709_v8  ;;  %v6857_v48 = vpop.f32.mrb[62].mxu1 }
 0x524   : > { %v6858_v18 = vpop.f32.mrb[63].mxu1 }
 0x525   : > { %v6859_v51 = vadd.f32 %v6858_v18, %v6857_v48 }
 0x527   : > { %v10753_v54 = vadd.f32 %v6859_v51, %v10711_v0  ;;  %v6892_v15 = vpop.f32.mrb[64].mxu1 }
 0x528   : > { %v6893_v62 = vpop.f32.mrb[65].mxu1 }
 0x529   : > { %v6894_v43 = vadd.f32 %v6893_v62, %v6892_v15 }
 0x52b   : > { %v10756_v37 = vadd.f32 %v6894_v43, %v10714_v21  ;;  %v6895_v47 = vpop.f32.mrb[66].mxu1 }
 0x52c   : > { %v6896_v46 = vpop.f32.mrb[67].mxu1 }
 0x52d   : > { %v6897_v63 = vadd.f32 %v6896_v46, %v6895_v47 }
 0x52f   : > { %v10759_v38 = vadd.f32 %v6897_v63, %v10717_v2  ;;  %v6898_v8 = vpop.f32.mrb[68].mxu1 }
 0x530   : > { %v6899_v11 = vpop.f32.mrb[69].mxu1 }
 0x531   : > { %v6900_v24 = vadd.f32 %v6899_v11, %v6898_v8 }
 0x533   : > { %v10762_v42 = vadd.f32 %v6900_v24, %v10720_v17  ;;  %v6901_v0 = vpop.f32.mrb[70].mxu1 }
 0x534   : > { %v6902_v50 = vpop.f32.mrb[71].mxu1 }
 0x535   : > { %v6903_v16 = vadd.f32 %v6902_v50, %v6901_v0 }
 0x537   : > { %v10765_v40 = vadd.f32 %v6903_v16, %v10723_v5  ;;  %v6904_v21 = vpop.f32.mrb[72].mxu1 }
 0x538   : > { %v6905_v59 = vpop.f32.mrb[73].mxu1 }
 0x539   : > { %v6906_v13 = vadd.f32 %v6905_v59, %v6904_v21 }
 0x53b   : > { %v10768_v33 = vadd.f32 %v6906_v13, %v10726_v60  ;;  %v6907_v2 = vpop.f32.mrb[74].mxu1 }
 0x53c   : > { %v6908_v6 = vpop.f32.mrb[75].mxu1 }
 0x53d   : > { %v6909_v19 = vadd.f32 %v6908_v6, %v6907_v2 }
 0x53f   : > { %v10771_v23 = vadd.f32 %v6909_v19, %v10729_v45  ;;  %v6910_v17 = vpop.f32.mrb[76].mxu1 }
 0x540   : > { %v6911_v35 = vpop.f32.mrb[77].mxu1 }
 0x541   : > { %v6912_v14 = vadd.f32 %v6911_v35, %v6910_v17 }
 0x543   : > { %v10774_v3 = vadd.f32 %v6912_v14, %v10732_v12  ;;  %v6913_v5 = vpop.f32.mrb[78].mxu1 }
 0x544   : > { %v6914_v41 = vpop.f32.mrb[79].mxu1 }
 0x545   : > { %v6915_v22 = vadd.f32 %v6914_v41, %v6913_v5  ;;  %v5048_v41 = vpop.permute.xlu0 %5047 }
 0x547   : > { %v10777_v31 = vadd.f32 %v6915_v22, %v10735_v9  ;;  %v6916_v60 = vpop.f32.mrb[80].mxu1 }
 0x548   : > { %v6917_v1 = vpop.f32.mrb[81].mxu1 }
 0x549   : > { %v6918_v48 = vadd.f32 %v6917_v1, %v6916_v60 }
 0x54b   : > { %v10780_v18 = vadd.f32 %v6918_v48, %v10737_v25  ;;  %v6919_v45 = vpop.f32.mrb[82].mxu1 }
 0x54c   : > { %v6920_v51 = vpop.f32.mrb[83].mxu1 }
 0x54d   : > { %v6921_v15 = vadd.f32 %v6920_v51, %v6919_v45 }
 0x54f   : > { %v10783_v62 = vadd.f32 %v6921_v15, %v10739_v55  ;;  %v6922_v12 = vpop.f32.mrb[84].mxu1 }
 0x550   : > { %v6923_v43 = vpop.f32.mrb[85].mxu1 }
 0x551   : > { %v6924_v47 = vadd.f32 %v6923_v43, %v6922_v12 }
 0x553   : > { %v10786_v46 = vadd.f32 %v6924_v47, %v10741_v29  ;;  %v6925_v9 = vpop.f32.mrb[86].mxu1 }
 0x554   : > { %v6926_v63 = vpop.f32.mrb[87].mxu1 }
 0x555   : > { %v6927_v8 = vadd.f32 %v6926_v63, %v6925_v9  ;;  %v5058_v63 = vpop.permute.xlu1 %5057 }
 0x557   : > { %v10789_v11 = vadd.f32 %v6927_v8, %v10743_v56  ;;  %v6928_v25 = vpop.f32.mrb[88].mxu1 }
 0x558   : > { %v6929_v24 = vpop.f32.mrb[89].mxu1 }
 0x559   : > { %v6930_v0 = vadd.f32 %v6929_v24, %v6928_v25 }
 0x55b   : > { %v10792_v55 = vadd.f32 %v6930_v0, %v10745_v20  ;;  %v6931_v50 = vpop.f32.mrb[90].mxu1 }
 0x55c   : > { %v6932_v16 = vpop.f32.mrb[91].mxu1 }
 0x55d   : > { %v6933_v21 = vadd.f32 %v6932_v16, %v6931_v50  ;;  %v5063_v16 = vpop.permute.xlu1 %5062 }
 0x55f   : > { %v10795_v29 = vadd.f32 %v6933_v21, %v10747_v36  ;;  %v6934_v59 = vpop.f32.mrb[92].mxu1 }
 0x560   : > { %v6935_v13 = vpop.f32.mrb[93].mxu1 }
 0x561   : > { %v6936_v2 = vadd.f32 %v6935_v13, %v6934_v59 }
 0x563   : > { %v10798_v6 = vadd.f32 %v6936_v2, %v10750_v39  ;;  %v6937_v56 = vpop.f32.mrb[94].mxu1 }
 0x564   : > { %v6938_v19 = vpop.f32.mrb[95].mxu1 }
 0x565   : > { %v6939_v17 = vadd.f32 %v6938_v19, %v6937_v56 }
 0x567   : > { %v10802_v35 = vadd.f32 %v6939_v17, %v10753_v54  ;;  %v6972_v20 = vpop.f32.mrb[96].mxu1 }
 0x568   : > { %v6973_v14 = vpop.f32.mrb[97].mxu1 }
 0x569   : > { %v6974_v5 = vadd.f32 %v6973_v14, %v6972_v20 }
 0x56b   : > { %v4935_v36 = vadd.f32 %v6974_v5, %v10756_v37  ;;  %v6975_v22 = vpop.f32.mrb[98].mxu1  ;;  %v5053_v37 = vpop.permute.xlu0 %5052 }
 0x56c   : > { %v6976_v60 = vpop.f32.mrb[99].mxu1  ;;  %v5073_v5 = vpop.permute.xlu1 %5072 }
 0x56d   : > { %v6977_v1 = vadd.f32 %v6976_v60, %v6975_v22  ;;  %v5013_v39 = vadd.f32 %v4935_v36, %v10290_v34 }
 0x56f   : > { %v4940_v54 = vadd.f32 %v6977_v1, %v10759_v38  ;;  %v5125_v48 = vadd.f32 %v5048_v41, %v5013_v39  ;;  %v6978_v45 = vpop.f32.mrb[100].mxu1  ;;  %v5068_v56 = vpop.permute.xlu0 %5067 }
 0x570   : > { %v6979_v51 = vpop.f32.mrb[101].mxu1 }
 0x571   : > { %5142 = vst.msk [vmem:[%s10810_s5] sm:$0xff] %vm5141_vm1, %v5125_v48  ;;  %v6980_v15 = vadd.f32 %v6979_v51, %v6978_v45  ;;  %v5014_v34 = vadd.f32 %v4940_v54, %v10303_v7  ;;  %v5083_v51 = vpop.permute.xlu1 %5082 }
 0x573   : > { %v4945_v12 = vadd.f32 %v6980_v15, %v10762_v42  ;;  %v5126_v43 = vadd.f32 %v5053_v37, %v5014_v34  ;;  %v6981_v47 = vpop.f32.mrb[102].mxu1  ;;  %v5078_v1 = vpop.permute.xlu0 %5077 }
 0x574   : > { %v6982_v9 = vpop.f32.mrb[103].mxu1 }
 0x575   : > { %5143 = vst.msk [vmem:[%s10810_s5 + $0x8] sm:$0xff] %vm5141_vm1, %v5126_v43  ;;  %v6983_v38 = vadd.f32 %v6982_v9, %v6981_v47  ;;  %v5015_v8 = vadd.f32 %v4945_v12, %v10316_v44 }
 0x577   : > { %v4950_v25 = vadd.f32 %v6983_v38, %v10765_v40  ;;  %v5127_v24 = vadd.f32 %v5058_v63, %v5015_v8  ;;  %v6984_v0 = vpop.f32.mrb[104].mxu1  ;;  %v5088_v43 = vpop.permute.xlu0 %5087 }
 0x578   : > { %v6985_v50 = vpop.f32.mrb[105].mxu1  ;;  %v5093_v8 = vpop.permute.xlu1 %5092 }
 0x579   : > { %5144 = vst.msk [vmem:[%s10810_s5 + $0x10] sm:$0xff] %vm5141_vm1, %v5127_v24  ;;  %v6986_v7 = vadd.f32 %v6985_v50, %v6984_v0  ;;  %v5016_v42 = vadd.f32 %v4950_v25, %v10329_v30 }
 0x57b   : > { %v4955_v21 = vadd.f32 %v6986_v7, %v10768_v33  ;;  %v5128_v59 = vadd.f32 %v5063_v16, %v5016_v42  ;;  %v6987_v13 = vpop.f32.mrb[106].mxu1  ;;  %v5098_v7 = vpop.permute.xlu0 %5097 }
 0x57c   : > { %v6988_v2 = vpop.f32.mrb[107].mxu1 }
 0x57d   : > { %5145 = vst.msk [vmem:[%s10810_s5 + $0x18] sm:$0xff] %vm5141_vm1, %v5128_v59  ;;  %v6989_v44 = vadd.f32 %v6988_v2, %v6987_v13  ;;  %v5017_v40 = vadd.f32 %v4955_v21, %v10342_v58  ;;  %v5103_v13 = vpop.permute.xlu1 %5102 }
 0x57f   : > { %v4960_v19 = vadd.f32 %v6989_v44, %v10771_v23  ;;  %v5129_v17 = vadd.f32 %v5068_v56, %v5017_v40  ;;  %v6990_v20 = vpop.f32.mrb[108].mxu1 }
 0x580   : > { %v6991_v14 = vpop.f32.mrb[109].mxu1 }
 0x581   : > { %5146 = vst.msk [vmem:[%s10810_s5 + $0x20] sm:$0xff] %vm5141_vm1, %v5129_v17  ;;  %v6992_v30 = vadd.f32 %v6991_v14, %v6990_v20  ;;  %v5018_v33 = vadd.f32 %v4960_v19, %v10355_v52  ;;  %v5108_v19 = vpop.permute.xlu0 %5107 }
 0x583   : > { %v4965_v41 = vadd.f32 %v6992_v30, %v10774_v3  ;;  %v5130_v36 = vadd.f32 %v5073_v5, %v5018_v33  ;;  %v6993_v22 = vpop.f32.mrb[110].mxu1  ;;  %v5113_v33 = vpop.permute.xlu1 %5112 }
 0x584   : > { %v6994_v60 = vpop.f32.mrb[111].mxu1 }
 0x585   : > { %5147 = vst.msk [vmem:[%s10810_s5 + $0x28] sm:$0xff] %vm5141_vm1, %v5130_v36  ;;  %v6995_v58 = vadd.f32 %v6994_v60, %v6993_v22  ;;  %v5019_v23 = vadd.f32 %v4965_v41, %v10368_v57  ;;  %v5118_v60 = vpop.permute.xlu0 %5117 }
 0x587   : > { %v4970_v39 = vadd.f32 %v6995_v58, %v10777_v31  ;;  %v5131_v54 = vadd.f32 %v5078_v1, %v5019_v23  ;;  %v6996_v48 = vpop.f32.mrb[112].mxu1  ;;  %v5123_v1 = vpop.permute.xlu1 %5122 }
 0x588   : > { %v6997_v45 = vpop.f32.mrb[113].mxu1 }
 0x589   : > { %5148 = vst.msk [vmem:[%s10810_s5 + $0x30] sm:$0xff] %vm5141_vm1, %v5131_v54  ;;  %v6998_v52 = vadd.f32 %v6997_v45, %v6996_v48  ;;  %v5020_v3 = vadd.f32 %v4970_v39, %v10381_v53 }
 0x58b   : > { %v4975_v37 = vadd.f32 %v6998_v52, %v10780_v18  ;;  %v5132_v15 = vadd.f32 %v5083_v51, %v5020_v3  ;;  %v6999_v34 = vpop.f32.mrb[114].mxu1 }
 0x58c   : > { %v7000_v12 = vpop.f32.mrb[115].mxu1 }
 0x58d   : > { %5149 = vst.msk [vmem:[%s10810_s5 + $0x38] sm:$0xff] %vm5141_vm1, %v5132_v15  ;;  %v7001_v57 = vadd.f32 %v7000_v12, %v6999_v34  ;;  %v5021_v31 = vadd.f32 %v4975_v37, %v10388_v10 }
 0x58f   : > { %v4980_v47 = vadd.f32 %v7001_v57, %v10783_v62  ;;  %v5133_v9 = vadd.f32 %v5088_v43, %v5021_v31  ;;  %v7002_v63 = vpop.f32.mrb[116].mxu1 }
 0x590   : > { %v7003_v38 = vpop.f32.mrb[117].mxu1 }
 0x591   : > { %5150 = vst.msk [vmem:[%s10810_s5 + $0x40] sm:$0xff] %vm5141_vm1, %v5133_v9  ;;  %v7004_v53 = vadd.f32 %v7003_v38, %v7002_v63  ;;  %v5022_v18 = vadd.f32 %v4980_v47, %v10398_v61 }
 0x593   : > { %v4985_v25 = vadd.f32 %v7004_v53, %v10786_v46  ;;  %v5134_v24 = vadd.f32 %v5093_v8, %v5022_v18  ;;  %v7005_v0 = vpop.f32.mrb[118].mxu1 }
 0x594   : > { %v7006_v50 = vpop.f32.mrb[119].mxu1 }
 0x595   : > { %5151 = vst.msk [vmem:[%s10810_s5 + $0x48] sm:$0xff] %vm5141_vm1, %v5134_v24  ;;  %v7007_v10 = vadd.f32 %v7006_v50, %v7005_v0  ;;  %v5023_v62 = vadd.f32 %v4985_v25, %v10406_v28 }
 0x597   : > { %v4990_v42 = vadd.f32 %v7007_v10, %v10789_v11  ;;  %v5135_v16 = vadd.f32 %v5098_v7, %v5023_v62  ;;  %v7008_v21 = vpop.f32.mrb[120].mxu1 }
 0x598   : > { %v7009_v59 = vpop.f32.mrb[121].mxu1 }
 0x599   : > { %5152 = vst.msk [vmem:[%s10810_s5 + $0x50] sm:$0xff] %vm5141_vm1, %v5135_v16  ;;  %v7010_v61 = vadd.f32 %v7009_v59, %v7008_v21  ;;  %v5024_v46 = vadd.f32 %v4990_v42, %v10412_v32 }
 0x59b   : > { %v4995_v2 = vadd.f32 %v7010_v61, %v10792_v55  ;;  %v5136_v44 = vadd.f32 %v5103_v13, %v5024_v46  ;;  %v7011_v40 = vpop.f32.mrb[122].mxu1 }
 0x59c   : > { %v7012_v56 = vpop.f32.mrb[123].mxu1 }
 0x59d   : > { %5153 = vst.msk [vmem:[%s10810_s5 + $0x58] sm:$0xff] %vm5141_vm1, %v5136_v44  ;;  %v7013_v28 = vadd.f32 %v7012_v56, %v7011_v40  ;;  %v5025_v11 = vadd.f32 %v4995_v2, %v10418_v26 }
 0x59f   : > { %v5000_v17 = vadd.f32 %v7013_v28, %v10795_v29  ;;  %v5137_v20 = vadd.f32 %v5108_v19, %v5025_v11  ;;  %v7014_v14 = vpop.f32.mrb[124].mxu1 }
 0x5a0   : > { %v7015_v30 = vpop.f32.mrb[125].mxu1 }
 0x5a1   : > { %5154 = vst.msk [vmem:[%s10810_s5 + $0x60] sm:$0xff] %vm5141_vm1, %v5137_v20  ;;  %v7016_v32 = vadd.f32 %v7015_v30, %v7014_v14  ;;  %v5026_v55 = vadd.f32 %v5000_v17, %v10424_v27 }
 0x5a3   : > { %v5005_v5 = vadd.f32 %v7016_v32, %v10798_v6  ;;  %v5138_v41 = vadd.f32 %v5113_v33, %v5026_v55  ;;  %v7017_v36 = vpop.f32.mrb[126].mxu1 }
 0x5a4   : > { %v7018_v22 = vpop.f32.mrb[127].mxu1 }
 0x5a5   : > { %5155 = vst.msk [vmem:[%s10810_s5 + $0x68] sm:$0xff] %vm5141_vm1, %v5138_v41  ;;  %v7019_v26 = vadd.f32 %v7018_v22, %v7017_v36  ;;  %v5027_v29 = vadd.f32 %v5005_v5, %v10430_v49 }
 0x5a7   : > { %v5010_v58 = vadd.f32 %v7019_v26, %v10802_v35  ;;  %v5139_v23 = vadd.f32 %v5118_v60, %v5027_v29 }
 0x5a9   : > { %5156 = vst.msk [vmem:[%s10810_s5 + $0x70] sm:$0xff] %vm5141_vm1, %v5139_v23  ;;  %v5028_v27 = vadd.f32 %v5010_v58, %v10436_v4 }
 0x5ab   : > { %v5140_v39 = vadd.f32 %v5123_v1, %v5028_v27 }
 0x5ad   : > { %5158 = vst.msk [vmem:[%s10810_s5 + $0x78] sm:$0xf] %vm5157_vm2, %v5140_v39 }
 0x5ae PF: > { %p15_p8 = scmp.ge.s32.totalorder %s8435_s25, 4   ;;  %s11115_s15 = smov %s8349_s16 }
 0x5af   : > { %s11116_s16 = smov %s8353_s17  ;;  %s11117_s17 = smov %s8461_s14 }
 0x5b0   : > { %s11118_s18 = smov %s8435_s25  ;;  %17 = sbr.rel (!%p15_p8) target bundleno = 4 (0x4), region = 84 }
 0x5b7   :  { %5180 = vsyncpa [#allocation3], 1 }
 0x5b8   :  { %5182 = vsyncpa [#allocation3 + $0x1], 1 }
 0x5b9   :  { %5183 = vsyncpa [#allocation5], 1 }

</bundles_post_ra>
